<compile_context>
chip_gen: v5e
topology: v5e:2x2
jax: 0.10.0
libtpu: 0.0.40
codegen_flags: <defaults>
</compile_context>

<pallas_src>
import math
import functools

import jax
import jax.numpy as jnp
from jax.experimental import pallas as pl
from jax.experimental.pallas import tpu as pltpu

LN_EPS = 1e-5
NEG_INF = -1e30


# ----------------------------- in-kernel helpers -----------------------------

def _layernorm(x, w, b):
    # x: (M, D) f32, w/b: (1, D) f32.  PyTorch LayerNorm (biased variance).
    mean = jnp.mean(x, axis=-1, keepdims=True)
    cen = x - mean
    var = jnp.mean(cen * cen, axis=-1, keepdims=True)
    return cen * jax.lax.rsqrt(var + LN_EPS) * w + b


def _gelu(x):
    # TODO(synk): tanh-GELU approximation (tanh runs on the EUP slot); PyTorch
    # nn.GELU() default is exact erf (max abs diff ~1e-3).
    c = math.sqrt(2.0 / math.pi)
    return 0.5 * x * (1.0 + jnp.tanh(c * (x + 0.044715 * x * x * x)))


def _softmax_lastdim(s):
    # s: f32. exp on EUP; approx reciprocal also on the EUP slot.
    m = jnp.max(s, axis=-1, keepdims=True)
    e = jnp.exp(s - m)
    return e * pl.reciprocal(jnp.sum(e, axis=-1, keepdims=True), approx=True)


# ------------------------------ fused ViT kernel ------------------------------
# grid = (batch_blocks, depth); the (Bt*N, D) activation is carried in a VMEM
# scratch across the depth axis.  l == 0: tokenizer; every l: one transformer
# layer; l == depth-1: cls head.

def vit_kernel(feat_ref, wa_ref, wv_ref, base_ref,
               ln1w_ref, ln1b_ref, wqkv_ref, bqkv_ref, wo_ref, bo_ref,
               ln2w_ref, ln2b_ref, w1_ref, b1_ref, w2_ref, b2_ref,
               whead_ref, bhead_ref,
               out_ref,
               x_scratch,
               *, heads):
    l = pl.program_id(1)
    depth = pl.num_programs(1)

    Bt = feat_ref.shape[0]
    L = wa_ref.shape[1]                 # num_tokens
    n_real = L + 1                      # tokens + cls
    D = wv_ref.shape[2]
    M, _ = x_scratch.shape              # M = Bt * N_pad
    N = M // Bt                         # padded sequence length
    dh = D // heads

    # ------------------------- tokenizer (l == 0 only) -------------------------
    @pl.when(l == 0)
    def _tokenize():
        xin = feat_ref[...].astype(jnp.bfloat16)                     # (Bt, P, C)
        wa = wa_ref[...]                                             # (Bt, L, C) bf16
        wv = wv_ref[...]                                             # (Bt, C, D) bf16
        P = xin.shape[1]
        # A[b, l, p] = sum_c token_wA[b, l, c] * x[b, p, c]
        a = jnp.einsum('blc,bpc->blp', wa, xin,
                       preferred_element_type=jnp.float32)           # (Bt, L, P)
        a = _softmax_lastdim(a).astype(jnp.bfloat16)
        # Pad A with a zero row for the cls slot and zero rows up to N so the
        # pooled tokens land directly in rows 1..L of the padded sequence.
        pieces = [jnp.zeros((Bt, 1, P), jnp.bfloat16), a]
        if N - 1 - L > 0:
            pieces.append(jnp.zeros((Bt, N - 1 - L, P), jnp.bfloat16))
        a_pad = jnp.concatenate(pieces, axis=1)                      # (Bt, N, P)
        vv = jnp.einsum('bpc,bcd->bpd', xin, wv,
                        preferred_element_type=jnp.float32)          # (Bt, P, D)
        t = jnp.einsum('bnp,bpd->bnd', a_pad, vv.astype(jnp.bfloat16),
                       preferred_element_type=jnp.float32)           # (Bt, N, D)
        # base = cls token (row 0) + positional embedding, zero-padded rows.
        x_scratch[...] = (t + base_ref[...]).reshape(M, D)

    # --------------------- transformer layer (every l) -------------------------
    x = x_scratch[...]                                               # (M, D) f32

    # Residual(LN1 -> MultiHeadAttention)
    xn = _layernorm(x, ln1w_ref[0], ln1b_ref[0]).astype(jnp.bfloat16)
    qkv = (jnp.dot(xn, wqkv_ref[0], preferred_element_type=jnp.float32)
           + bqkv_ref[0])                                            # (M, 3D) f32
    qkv3 = qkv.astype(jnp.bfloat16).reshape(Bt, N, 3 * D)

    def split_heads(base):
        # lane slices of the (qkv, head, dh) column layout -> (H*Bt, N, dh)
        parts = [qkv3[:, :, base + h * dh: base + (h + 1) * dh]
                 for h in range(heads)]
        return jnp.stack(parts, axis=0).reshape(heads * Bt, N, dh)

    q = split_heads(0)
    k = split_heads(D)
    v = split_heads(2 * D)

    # scale (dim**-0.5) is folded into the Q columns of w_qkv / b_qkv host-side.
    dots = jnp.einsum('xid,xjd->xij', q, k,
                      preferred_element_type=jnp.float32)            # (H*Bt, N, N)
    # Mask padded key columns so real rows match the unpadded reference.
    col = jax.lax.broadcasted_iota(jnp.int32, (N, N), 1)
    dots = jnp.where(col < n_real, dots, NEG_INF)
    attn = _softmax_lastdim(dots).astype(jnp.bfloat16)
    ctx = jnp.einsum('xij,xjd->xid', attn, v,
                     preferred_element_type=jnp.float32)             # (H*Bt, N, dh)
    ctx = ctx.reshape(heads, Bt, N, dh)
    ctx2d = jnp.concatenate([ctx[h] for h in range(heads)], axis=-1)  # (Bt, N, D)
    ctx2d = ctx2d.reshape(M, D).astype(jnp.bfloat16)
    proj = (jnp.dot(ctx2d, wo_ref[0], preferred_element_type=jnp.float32)
            + bo_ref[0])
    y = x + proj                                                     # residual 1

    # Residual(LN2 -> MLP)
    yn = _layernorm(y, ln2w_ref[0], ln2b_ref[0]).astype(jnp.bfloat16)
    h1 = jnp.dot(yn, w1_ref[0], preferred_element_type=jnp.float32) + b1_ref[0]
    g = _gelu(h1).astype(jnp.bfloat16)
    y2 = jnp.dot(g, w2_ref[0], preferred_element_type=jnp.float32) + b2_ref[0]

    new_x = y + y2                                                   # residual 2
    x_scratch[...] = new_x

    # ----------------------- cls head (last layer only) ------------------------
    @pl.when(l == depth - 1)
    def _head():
        x3 = new_x.reshape(Bt, N, D)
        n_idx = jax.lax.broadcasted_iota(jnp.int32, (1, N, 1), 1)
        cls = jnp.sum(jnp.where(n_idx == 0, x3, 0.0), axis=1)        # (Bt, D)
        out_ref[...] = (jnp.dot(cls.astype(jnp.bfloat16), whead_ref[...],
                                preferred_element_type=jnp.float32)
                        + bhead_ref[...])                            # (Bt, NCpad)


# --------------------------------- wrapper -------------------------------------

def vit_forward(feat, params, heads, num_classes, block_batch=8):
    # feat: (B, h*w, 64) ResNet backbone output (already 'b c h w -> b (h w) c').
    B, P, C = feat.shape
    depth, D, _ = params["w_qkv"].shape
    L = params["token_wA"].shape[1]
    n_pad = params["base"].shape[1]
    nc_pad = params["w_head"].shape[1]
    mlp = params["w1"].shape[2]

    Bt = min(block_batch, B)            # on v6e/v7x use 16-32 if batch allows
    assert B % Bt == 0 and D % heads == 0

    layer_keys = ("ln1_w", "ln1_b", "w_qkv", "b_qkv", "w_o", "b_o",
                  "ln2_w", "ln2_b", "w1", "b1", "w2", "b2")
    layer_args = [params[k] for k in layer_keys]

    in_specs = [
        pl.BlockSpec((Bt, P, C), lambda b, l: (b, 0, 0)),            # feat
        pl.BlockSpec((Bt, L, C), lambda b, l: (b, 0, 0)),            # token_wA
        pl.BlockSpec((Bt, C, D), lambda b, l: (b, 0, 0)),            # token_wV
        pl.BlockSpec((1, n_pad, D), lambda b, l: (0, 0, 0)),         # cls+pos base
    ]
    for w in layer_args:                                             # depth-streamed
        in_specs.append(pl.BlockSpec((1,) + w.shape[1:], lambda b, l: (l, 0, 0)))
    in_specs += [
        pl.BlockSpec(params["w_head"].shape, lambda b, l: (0, 0)),
        pl.BlockSpec(params["b_head"].shape, lambda b, l: (0, 0)),
    ]

    kernel = functools.partial(vit_kernel, heads=heads)
    out = pl.pallas_call(
        kernel,
        out_shape=jax.ShapeDtypeStruct((B, nc_pad), jnp.float32),
        grid=(B // Bt, depth),
        in_specs=in_specs,
        out_specs=pl.BlockSpec((Bt, nc_pad), lambda b, l: (b, 0)),
        scratch_shapes=[pltpu.VMEM((Bt * n_pad, D), jnp.float32)],
        compiler_params=pltpu.CompilerParams(
            dimension_semantics=("parallel", "arbitrary")),
    )(feat, params["token_wA"], params["token_wV"], params["base"],
      *layer_args, params["w_head"], params["b_head"])
    return out[:, :num_classes]


# ---------------------------- parameter construction ---------------------------

def _xavier(key, shape, fan_in, fan_out, dtype=jnp.float32):
    bound = math.sqrt(6.0 / (fan_in + fan_out))
    return jax.random.uniform(key, shape, jnp.float32, -bound, bound).astype(dtype)


def init_params(key, batch, feat_ch, dim, depth, heads, mlp_dim, num_tokens,
                num_classes, n_pad=16, nc_pad=128):
    assert n_pad >= num_tokens + 1
    p = {}
    key, ka, kv, kp = jax.random.split(key, 4)
    p["token_wA"] = _xavier(ka, (batch, num_tokens, feat_ch), feat_ch, num_tokens,
                            jnp.bfloat16)
    p["token_wV"] = _xavier(kv, (batch, feat_ch, dim), feat_ch, dim, jnp.bfloat16)
    pos = 0.02 * jax.random.normal(kp, (1, num_tokens + 1, dim), jnp.float32)
    cls = jnp.zeros((1, 1, dim), jnp.float32)
    # base = cls token (row 0) + positional embedding, zero-padded to n_pad rows.
    base = jnp.zeros((1, n_pad, dim), jnp.float32)
    base = base.at[:, :num_tokens + 1].set(pos)
    base = base.at[:, 0:1].add(cls)
    p["base"] = base

    scale = float(dim) ** (-0.5)        # reference Attention uses dim ** -0.5
    acc = {k: [] for k in ("ln1_w", "ln1_b", "w_qkv", "b_qkv", "w_o", "b_o",
                           "ln2_w", "ln2_b", "w1", "b1", "w2", "b2")}
    for _ in range(depth):
        key, kq, ko, k1, k2, kb1, kb2 = jax.random.split(key, 7)
        # Linear weights stored transposed to [in, out]; attention scale folded
        # into the Q columns of the qkv weight (and bias, zero here).
        wq = _xavier(kq, (dim, 3 * dim), dim, 3 * dim)
        wq = wq.at[:, :dim].multiply(scale)
        bq = jnp.zeros((1, 3 * dim), jnp.float32)          # Q part would be scaled too
        acc["ln1_w"].append(jnp.ones((1, dim), jnp.float32))
        acc["ln1_b"].append(jnp.zeros((1, dim), jnp.float32))
        acc["w_qkv"].append(wq.astype(jnp.bfloat16))
        acc["b_qkv"].append(bq)
        acc["w_o"].append(_xavier(ko, (dim, dim), dim, dim, jnp.bfloat16))
        acc["b_o"].append(jnp.zeros((1, dim), jnp.float32))
        acc["ln2_w"].append(jnp.ones((1, dim), jnp.float32))
        acc["ln2_b"].append(jnp.zeros((1, dim), jnp.float32))
        acc["w1"].append(_xavier(k1, (dim, mlp_dim), dim, mlp_dim, jnp.bfloat16))
        acc["b1"].append(1e-6 * jax.random.normal(kb1, (1, mlp_dim), jnp.float32))
        acc["w2"].append(_xavier(k2, (mlp_dim, dim), mlp_dim, dim, jnp.bfloat16))
        acc["b2"].append(1e-6 * jax.random.normal(kb2, (1, dim), jnp.float32))
    for k, lst in acc.items():
        p[k] = jnp.stack(lst, axis=0)                      # (depth, ...)

    key, kh, kb = jax.random.split(key, 3)
    wh = jnp.zeros((dim, nc_pad), jnp.float32)
    wh = wh.at[:, :num_classes].set(
        _xavier(kh, (dim, num_classes), dim, num_classes))
    p["w_head"] = wh.astype(jnp.bfloat16)                  # lane-padded head
    bh = jnp.zeros((1, nc_pad), jnp.float32)
    bh = bh.at[:, :num_classes].set(
        1e-6 * jax.random.normal(kb, (1, num_classes), jnp.float32))
    p["b_head"] = bh
    return p


# ------------------------------------ main -------------------------------------

if __name__ == "__main__":
    # Shapes consistent with ViTResNet: backbone output = 64 channels over a 4x4
    # spatial grid; dim=128, heads=8, mlp_dim=256, num_tokens=8 (seq 9 -> pad 16).
    # batch=16 with Bt=8 gives two batch blocks (both v7x TCs busy) and 128 MXU
    # rows per projection / MLP matmul.
    batch, spatial, feat_ch = 16, 4, 64
    dim, depth, heads, mlp_dim = 128, 2, 8, 256
    num_tokens, num_classes = 8, 10

    key = jax.random.PRNGKey(0)
    key, kf = jax.random.split(key)
    feat = jax.random.normal(kf, (batch, spatial * spatial, feat_ch), jnp.float32)
    params = init_params(key, batch, feat_ch, dim, depth, heads, mlp_dim,
                         num_tokens, num_classes)

    logits = vit_forward(feat, params, heads, num_classes, block_batch=8)
    logits = jax.block_until_ready(logits)
    assert logits.shape == (batch, num_classes)
    assert bool(jnp.all(jnp.isfinite(logits)))
    print("KERNEL_OK")
</pallas_src>

<mosaic_0001>
module attributes {stable_mosaic.version = 11 : i64} {
  func.func @vit_kernel(%arg0: i32, %arg1: i32, %arg2: memref<8x16x64xf32, #tpu.memory_space<vmem>>, %arg3: memref<8x8x64xbf16, #tpu.memory_space<vmem>>, %arg4: memref<8x64x128xbf16, #tpu.memory_space<vmem>>, %arg5: memref<1x16x128xf32, #tpu.memory_space<vmem>>, %arg6: memref<1x1x128xf32, #tpu.memory_space<vmem>>, %arg7: memref<1x1x128xf32, #tpu.memory_space<vmem>>, %arg8: memref<1x128x384xbf16, #tpu.memory_space<vmem>>, %arg9: memref<1x1x384xf32, #tpu.memory_space<vmem>>, %arg10: memref<1x128x128xbf16, #tpu.memory_space<vmem>>, %arg11: memref<1x1x128xf32, #tpu.memory_space<vmem>>, %arg12: memref<1x1x128xf32, #tpu.memory_space<vmem>>, %arg13: memref<1x1x128xf32, #tpu.memory_space<vmem>>, %arg14: memref<1x128x256xbf16, #tpu.memory_space<vmem>>, %arg15: memref<1x1x256xf32, #tpu.memory_space<vmem>>, %arg16: memref<1x256x128xbf16, #tpu.memory_space<vmem>>, %arg17: memref<1x1x128xf32, #tpu.memory_space<vmem>>, %arg18: memref<128x128xbf16, #tpu.memory_space<vmem>>, %arg19: memref<1x128xf32, #tpu.memory_space<vmem>>, %arg20: memref<8x128xf32, #tpu.memory_space<vmem>>, %arg21: memref<128x128xf32, #tpu.memory_space<vmem>>) attributes {dimension_semantics = [#tpu.dimension_semantics<parallel>, #tpu.dimension_semantics<arbitrary>], iteration_bounds = array<i64: 2, 2>, scalar_prefetch = 0 : i64, scratch_operands = 1 : i64, tpu.core_type = #tpu.core_type<tc>, window_params = [{transform_indices = @transform_0, window_bounds = array<i64: 8, 16, 64>}, {transform_indices = @transform_1, window_bounds = array<i64: 8, 8, 64>}, {transform_indices = @transform_2, window_bounds = array<i64: 8, 64, 128>}, {pipeline_mode = #tpu.pipeline_mode<synchronous>, transform_indices = @transform_3, window_bounds = array<i64: 1, 16, 128>}, {transform_indices = @transform_4, window_bounds = array<i64: 1, 1, 128>}, {transform_indices = @transform_5, window_bounds = array<i64: 1, 1, 128>}, {transform_indices = @transform_6, window_bounds = array<i64: 1, 128, 384>}, {transform_indices = @transform_7, window_bounds = array<i64: 1, 1, 384>}, {transform_indices = @transform_8, window_bounds = array<i64: 1, 128, 128>}, {transform_indices = @transform_9, window_bounds = array<i64: 1, 1, 128>}, {transform_indices = @transform_10, window_bounds = array<i64: 1, 1, 128>}, {transform_indices = @transform_11, window_bounds = array<i64: 1, 1, 128>}, {transform_indices = @transform_12, window_bounds = array<i64: 1, 128, 256>}, {transform_indices = @transform_13, window_bounds = array<i64: 1, 1, 256>}, {transform_indices = @transform_14, window_bounds = array<i64: 1, 256, 128>}, {transform_indices = @transform_15, window_bounds = array<i64: 1, 1, 128>}, {pipeline_mode = #tpu.pipeline_mode<synchronous>, transform_indices = @transform_16, window_bounds = array<i64: 128, 128>}, {pipeline_mode = #tpu.pipeline_mode<synchronous>, transform_indices = @transform_17, window_bounds = array<i64: 1, 128>}, {transform_indices = @transform_18, window_bounds = array<i64: 8, 128>}]} {
    %c0_i32 = arith.constant 0 : i32
    %0 = arith.cmpi eq, %arg1, %c0_i32 : i32
    %1 = arith.extui %0 : i1 to i32
    %c0_i32_0 = arith.constant 0 : i32
    %2 = arith.cmpi ne, %1, %c0_i32_0 : i32
    scf.if %2 {
      %c0_63 = arith.constant 0 : index
      %c0_64 = arith.constant 0 : index
      %c0_65 = arith.constant 0 : index
      %198 = vector.load %arg2[%c0_63, %c0_64, %c0_65] : memref<8x16x64xf32, #tpu.memory_space<vmem>>, vector<8x16x64xf32>
      %199 = arith.truncf %198 : vector<8x16x64xf32> to vector<8x16x64xbf16>
      %c0_66 = arith.constant 0 : index
      %c0_67 = arith.constant 0 : index
      %c0_68 = arith.constant 0 : index
      %200 = vector.load %arg3[%c0_66, %c0_67, %c0_68] : memref<8x8x64xbf16, #tpu.memory_space<vmem>>, vector<8x8x64xbf16>
      %c0_69 = arith.constant 0 : index
      %c0_70 = arith.constant 0 : index
      %c0_71 = arith.constant 0 : index
      %201 = vector.load %arg4[%c0_69, %c0_70, %c0_71] : memref<8x64x128xbf16, #tpu.memory_space<vmem>>, vector<8x64x128xbf16>
      "tpu.trace_start"() <{level = 10 : i32, message = "blc,bpc->blp"}> : () -> ()
      %cst_72 = arith.constant dense<0.000000e+00> : vector<8x8x16xf32>
      %202 = tpu.matmul %200, %199, %cst_72 {dimension_numbers = #tpu.dot_dimension_numbers<[2], [2], [1], [1], [0, 0, 0, 1, 1, 1], [0], [0]>} : vector<8x8x64xbf16>, vector<8x16x64xbf16>, vector<8x8x16xf32> -> vector<8x8x16xf32>
      "tpu.trace_stop"() : () -> ()
      %cst_73 = arith.constant dense<0xFF800000> : vector<8x8xf32>
      %203 = vector.multi_reduction <maximumf>, %202, %cst_73 [2] : vector<8x8x16xf32> to vector<8x8xf32>
      %204 = vector.shape_cast %203 : vector<8x8xf32> to vector<8x8x1xf32>
      %205 = vector.broadcast %204 : vector<8x8x1xf32> to vector<8x8x16xf32>
      %206 = arith.subf %202, %205 : vector<8x8x16xf32>
      %207 = math.exp %206 : vector<8x8x16xf32>
      %cst_74 = arith.constant dense<0.000000e+00> : vector<8x8xf32>
      %208 = vector.multi_reduction <add>, %207, %cst_74 [2] : vector<8x8x16xf32> to vector<8x8xf32>
      %209 = vector.shape_cast %208 : vector<8x8xf32> to vector<8x8x1xf32>
      %210 = tpu.reciprocal %209 {approx = true} : vector<8x8x1xf32> -> vector<8x8x1xf32>
      %211 = vector.broadcast %210 : vector<8x8x1xf32> to vector<8x8x16xf32>
      %212 = arith.mulf %207, %211 : vector<8x8x16xf32>
      %213 = arith.truncf %212 : vector<8x8x16xf32> to vector<8x8x16xbf16>
      %cst_75 = arith.constant 0.000000e+00 : bf16
      %214 = vector.broadcast %cst_75 : bf16 to vector<8x1x16xbf16>
      %cst_76 = arith.constant 0.000000e+00 : bf16
      %215 = vector.broadcast %cst_76 : bf16 to vector<8x7x16xbf16>
      %216 = tpu.concatenate %214, %213, %215 in 1 : vector<8x1x16xbf16>, vector<8x8x16xbf16>, vector<8x7x16xbf16> -> vector<8x16x16xbf16>
      "tpu.trace_start"() <{level = 10 : i32, message = "bpc,bcd->bpd"}> : () -> ()
      %cst_77 = arith.constant dense<0.000000e+00> : vector<8x16x128xf32>
      %217 = tpu.matmul %199, %201, %cst_77 {dimension_numbers = #tpu.dot_dimension_numbers<[2], [1], [1], [2], [0, 0, 0, 1, 1, 2], [0], [0]>} : vector<8x16x64xbf16>, vector<8x64x128xbf16>, vector<8x16x128xf32> -> vector<8x16x128xf32>
      "tpu.trace_stop"() : () -> ()
      %218 = arith.truncf %217 : vector<8x16x128xf32> to vector<8x16x128xbf16>
      "tpu.trace_start"() <{level = 10 : i32, message = "bnp,bpd->bnd"}> : () -> ()
      %cst_78 = arith.constant dense<0.000000e+00> : vector<8x16x128xf32>
      %219 = tpu.matmul %216, %218, %cst_78 {dimension_numbers = #tpu.dot_dimension_numbers<[2], [1], [1], [2], [0, 0, 0, 1, 1, 2], [0], [0]>} : vector<8x16x16xbf16>, vector<8x16x128xbf16>, vector<8x16x128xf32> -> vector<8x16x128xf32>
      "tpu.trace_stop"() : () -> ()
      %c0_79 = arith.constant 0 : index
      %c0_80 = arith.constant 0 : index
      %c0_81 = arith.constant 0 : index
      %220 = vector.load %arg5[%c0_79, %c0_80, %c0_81] : memref<1x16x128xf32, #tpu.memory_space<vmem>>, vector<1x16x128xf32>
      %221 = vector.broadcast %220 : vector<1x16x128xf32> to vector<8x16x128xf32>
      %222 = arith.addf %219, %221 : vector<8x16x128xf32>
      %223 = vector.shape_cast %222 : vector<8x16x128xf32> to vector<128x128xf32>
      %c0_82 = arith.constant 0 : index
      %c0_83 = arith.constant 0 : index
      %224 = vector.load %arg21[%c0_82, %c0_83] : memref<128x128xf32, #tpu.memory_space<vmem>>, vector<128x128xf32>
      tpu.vector_store %arg21[%c0_82, %c0_83], %223 {strides = array<i32>} : memref<128x128xf32, #tpu.memory_space<vmem>>, vector<128x128xf32>,
    } else {
    }
    %c0 = arith.constant 0 : index
    %c0_1 = arith.constant 0 : index
    %3 = vector.load %arg21[%c0, %c0_1] : memref<128x128xf32, #tpu.memory_space<vmem>>, vector<128x128xf32>
    %c0_2 = arith.constant 0 : index
    %c0_3 = arith.constant 0 : index
    %c0_4 = arith.constant 0 : index
    %4 = vector.load %arg6[%c0_2, %c0_3, %c0_4] : memref<1x1x128xf32, #tpu.memory_space<vmem>>, vector<1x1x128xf32>
    %5 = vector.shape_cast %4 : vector<1x1x128xf32> to vector<1x128xf32>
    %c0_5 = arith.constant 0 : index
    %c0_6 = arith.constant 0 : index
    %c0_7 = arith.constant 0 : index
    %6 = vector.load %arg7[%c0_5, %c0_6, %c0_7] : memref<1x1x128xf32, #tpu.memory_space<vmem>>, vector<1x1x128xf32>
    %7 = vector.shape_cast %6 : vector<1x1x128xf32> to vector<1x128xf32>
    %cst = arith.constant dense<0.000000e+00> : vector<128xf32>
    %8 = vector.multi_reduction <add>, %3, %cst [1] : vector<128x128xf32> to vector<128xf32>
    %9 = vector.shape_cast %8 : vector<128xf32> to vector<128x1xf32>
    %cst_8 = arith.constant 1.280000e+02 : f32
    %10 = vector.broadcast %cst_8 : f32 to vector<128x1xf32>
    %11 = arith.divf %9, %10 : vector<128x1xf32>
    %12 = vector.broadcast %11 : vector<128x1xf32> to vector<128x128xf32>
    %13 = arith.subf %3, %12 : vector<128x128xf32>
    %14 = arith.mulf %13, %13 : vector<128x128xf32>
    %cst_9 = arith.constant dense<0.000000e+00> : vector<128xf32>
    %15 = vector.multi_reduction <add>, %14, %cst_9 [1] : vector<128x128xf32> to vector<128xf32>
    %16 = vector.shape_cast %15 : vector<128xf32> to vector<128x1xf32>
    %cst_10 = arith.constant 1.280000e+02 : f32
    %17 = vector.broadcast %cst_10 : f32 to vector<128x1xf32>
    %18 = arith.divf %16, %17 : vector<128x1xf32>
    %cst_11 = arith.constant 9.99999974E-6 : f32
    %19 = vector.broadcast %cst_11 : f32 to vector<128x1xf32>
    %20 = arith.addf %18, %19 : vector<128x1xf32>
    %21 = math.rsqrt %20 : vector<128x1xf32>
    %22 = vector.broadcast %21 : vector<128x1xf32> to vector<128x128xf32>
    %23 = arith.mulf %13, %22 : vector<128x128xf32>
    %24 = vector.broadcast %5 : vector<1x128xf32> to vector<128x128xf32>
    %25 = arith.mulf %23, %24 : vector<128x128xf32>
    %26 = vector.broadcast %7 : vector<1x128xf32> to vector<128x128xf32>
    %27 = arith.addf %25, %26 : vector<128x128xf32>
    %28 = arith.truncf %27 : vector<128x128xf32> to vector<128x128xbf16>
    %c0_12 = arith.constant 0 : index
    %c0_13 = arith.constant 0 : index
    %c0_14 = arith.constant 0 : index
    %29 = vector.load %arg8[%c0_12, %c0_13, %c0_14] : memref<1x128x384xbf16, #tpu.memory_space<vmem>>, vector<1x128x384xbf16>
    %30 = vector.shape_cast %29 : vector<1x128x384xbf16> to vector<128x384xbf16>
    %cst_15 = arith.constant dense<0.000000e+00> : vector<128x384xf32>
    %31 = tpu.matmul %28, %30, %cst_15 {dimension_numbers = #tpu.dot_dimension_numbers<[1], [0], [0], [1], [0, 0, 1, 1], [], []>} : vector<128x128xbf16>, vector<128x384xbf16>, vector<128x384xf32> -> vector<128x384xf32>
    %c0_16 = arith.constant 0 : index
    %c0_17 = arith.constant 0 : index
    %c0_18 = arith.constant 0 : index
    %32 = vector.load %arg9[%c0_16, %c0_17, %c0_18] : memref<1x1x384xf32, #tpu.memory_space<vmem>>, vector<1x1x384xf32>
    %33 = vector.shape_cast %32 : vector<1x1x384xf32> to vector<1x384xf32>
    %34 = vector.broadcast %33 : vector<1x384xf32> to vector<128x384xf32>
    %35 = arith.addf %31, %34 : vector<128x384xf32>
    %36 = arith.truncf %35 : vector<128x384xf32> to vector<128x384xbf16>
    %37 = vector.shape_cast %36 : vector<128x384xbf16> to vector<8x16x384xbf16>
    %38 = vector.extract_strided_slice %37 {offsets = [0, 0, 0], sizes = [8, 16, 16], strides = [1, 1, 1]} : vector<8x16x384xbf16> to vector<8x16x16xbf16>
    %39 = vector.extract_strided_slice %37 {offsets = [0, 0, 16], sizes = [8, 16, 16], strides = [1, 1, 1]} : vector<8x16x384xbf16> to vector<8x16x16xbf16>
    %40 = vector.extract_strided_slice %37 {offsets = [0, 0, 32], sizes = [8, 16, 16], strides = [1, 1, 1]} : vector<8x16x384xbf16> to vector<8x16x16xbf16>
    %41 = vector.extract_strided_slice %37 {offsets = [0, 0, 48], sizes = [8, 16, 16], strides = [1, 1, 1]} : vector<8x16x384xbf16> to vector<8x16x16xbf16>
    %42 = vector.extract_strided_slice %37 {offsets = [0, 0, 64], sizes = [8, 16, 16], strides = [1, 1, 1]} : vector<8x16x384xbf16> to vector<8x16x16xbf16>
    %43 = vector.extract_strided_slice %37 {offsets = [0, 0, 80], sizes = [8, 16, 16], strides = [1, 1, 1]} : vector<8x16x384xbf16> to vector<8x16x16xbf16>
    %44 = vector.extract_strided_slice %37 {offsets = [0, 0, 96], sizes = [8, 16, 16], strides = [1, 1, 1]} : vector<8x16x384xbf16> to vector<8x16x16xbf16>
    %45 = vector.extract_strided_slice %37 {offsets = [0, 0, 112], sizes = [8, 16, 16], strides = [1, 1, 1]} : vector<8x16x384xbf16> to vector<8x16x16xbf16>
    %46 = vector.shape_cast %38 : vector<8x16x16xbf16> to vector<1x8x16x16xbf16>
    %47 = vector.shape_cast %39 : vector<8x16x16xbf16> to vector<1x8x16x16xbf16>
    %48 = vector.shape_cast %40 : vector<8x16x16xbf16> to vector<1x8x16x16xbf16>
    %49 = vector.shape_cast %41 : vector<8x16x16xbf16> to vector<1x8x16x16xbf16>
    %50 = vector.shape_cast %42 : vector<8x16x16xbf16> to vector<1x8x16x16xbf16>
    %51 = vector.shape_cast %43 : vector<8x16x16xbf16> to vector<1x8x16x16xbf16>
    %52 = vector.shape_cast %44 : vector<8x16x16xbf16> to vector<1x8x16x16xbf16>
    %53 = vector.shape_cast %45 : vector<8x16x16xbf16> to vector<1x8x16x16xbf16>
    %54 = tpu.concatenate %46, %47, %48, %49, %50, %51, %52, %53 in 0 : vector<1x8x16x16xbf16>, vector<1x8x16x16xbf16>, vector<1x8x16x16xbf16>, vector<1x8x16x16xbf16>, vector<1x8x16x16xbf16>, vector<1x8x16x16xbf16>, vector<1x8x16x16xbf16>, vector<1x8x16x16xbf16> -> vector<8x8x16x16xbf16>
    %55 = vector.shape_cast %54 : vector<8x8x16x16xbf16> to vector<64x16x16xbf16>
    %56 = vector.extract_strided_slice %37 {offsets = [0, 0, 128], sizes = [8, 16, 16], strides = [1, 1, 1]} : vector<8x16x384xbf16> to vector<8x16x16xbf16>
    %57 = vector.extract_strided_slice %37 {offsets = [0, 0, 144], sizes = [8, 16, 16], strides = [1, 1, 1]} : vector<8x16x384xbf16> to vector<8x16x16xbf16>
    %58 = vector.extract_strided_slice %37 {offsets = [0, 0, 160], sizes = [8, 16, 16], strides = [1, 1, 1]} : vector<8x16x384xbf16> to vector<8x16x16xbf16>
    %59 = vector.extract_strided_slice %37 {offsets = [0, 0, 176], sizes = [8, 16, 16], strides = [1, 1, 1]} : vector<8x16x384xbf16> to vector<8x16x16xbf16>
    %60 = vector.extract_strided_slice %37 {offsets = [0, 0, 192], sizes = [8, 16, 16], strides = [1, 1, 1]} : vector<8x16x384xbf16> to vector<8x16x16xbf16>
    %61 = vector.extract_strided_slice %37 {offsets = [0, 0, 208], sizes = [8, 16, 16], strides = [1, 1, 1]} : vector<8x16x384xbf16> to vector<8x16x16xbf16>
    %62 = vector.extract_strided_slice %37 {offsets = [0, 0, 224], sizes = [8, 16, 16], strides = [1, 1, 1]} : vector<8x16x384xbf16> to vector<8x16x16xbf16>
    %63 = vector.extract_strided_slice %37 {offsets = [0, 0, 240], sizes = [8, 16, 16], strides = [1, 1, 1]} : vector<8x16x384xbf16> to vector<8x16x16xbf16>
    %64 = vector.shape_cast %56 : vector<8x16x16xbf16> to vector<1x8x16x16xbf16>
    %65 = vector.shape_cast %57 : vector<8x16x16xbf16> to vector<1x8x16x16xbf16>
    %66 = vector.shape_cast %58 : vector<8x16x16xbf16> to vector<1x8x16x16xbf16>
    %67 = vector.shape_cast %59 : vector<8x16x16xbf16> to vector<1x8x16x16xbf16>
    %68 = vector.shape_cast %60 : vector<8x16x16xbf16> to vector<1x8x16x16xbf16>
    %69 = vector.shape_cast %61 : vector<8x16x16xbf16> to vector<1x8x16x16xbf16>
    %70 = vector.shape_cast %62 : vector<8x16x16xbf16> to vector<1x8x16x16xbf16>
    %71 = vector.shape_cast %63 : vector<8x16x16xbf16> to vector<1x8x16x16xbf16>
    %72 = tpu.concatenate %64, %65, %66, %67, %68, %69, %70, %71 in 0 : vector<1x8x16x16xbf16>, vector<1x8x16x16xbf16>, vector<1x8x16x16xbf16>, vector<1x8x16x16xbf16>, vector<1x8x16x16xbf16>, vector<1x8x16x16xbf16>, vector<1x8x16x16xbf16>, vector<1x8x16x16xbf16> -> vector<8x8x16x16xbf16>
    %73 = vector.shape_cast %72 : vector<8x8x16x16xbf16> to vector<64x16x16xbf16>
    %74 = vector.extract_strided_slice %37 {offsets = [0, 0, 256], sizes = [8, 16, 16], strides = [1, 1, 1]} : vector<8x16x384xbf16> to vector<8x16x16xbf16>
    %75 = vector.extract_strided_slice %37 {offsets = [0, 0, 272], sizes = [8, 16, 16], strides = [1, 1, 1]} : vector<8x16x384xbf16> to vector<8x16x16xbf16>
    %76 = vector.extract_strided_slice %37 {offsets = [0, 0, 288], sizes = [8, 16, 16], strides = [1, 1, 1]} : vector<8x16x384xbf16> to vector<8x16x16xbf16>
    %77 = vector.extract_strided_slice %37 {offsets = [0, 0, 304], sizes = [8, 16, 16], strides = [1, 1, 1]} : vector<8x16x384xbf16> to vector<8x16x16xbf16>
    %78 = vector.extract_strided_slice %37 {offsets = [0, 0, 320], sizes = [8, 16, 16], strides = [1, 1, 1]} : vector<8x16x384xbf16> to vector<8x16x16xbf16>
    %79 = vector.extract_strided_slice %37 {offsets = [0, 0, 336], sizes = [8, 16, 16], strides = [1, 1, 1]} : vector<8x16x384xbf16> to vector<8x16x16xbf16>
    %80 = vector.extract_strided_slice %37 {offsets = [0, 0, 352], sizes = [8, 16, 16], strides = [1, 1, 1]} : vector<8x16x384xbf16> to vector<8x16x16xbf16>
    %81 = vector.extract_strided_slice %37 {offsets = [0, 0, 368], sizes = [8, 16, 16], strides = [1, 1, 1]} : vector<8x16x384xbf16> to vector<8x16x16xbf16>
    %82 = vector.shape_cast %74 : vector<8x16x16xbf16> to vector<1x8x16x16xbf16>
    %83 = vector.shape_cast %75 : vector<8x16x16xbf16> to vector<1x8x16x16xbf16>
    %84 = vector.shape_cast %76 : vector<8x16x16xbf16> to vector<1x8x16x16xbf16>
    %85 = vector.shape_cast %77 : vector<8x16x16xbf16> to vector<1x8x16x16xbf16>
    %86 = vector.shape_cast %78 : vector<8x16x16xbf16> to vector<1x8x16x16xbf16>
    %87 = vector.shape_cast %79 : vector<8x16x16xbf16> to vector<1x8x16x16xbf16>
    %88 = vector.shape_cast %80 : vector<8x16x16xbf16> to vector<1x8x16x16xbf16>
    %89 = vector.shape_cast %81 : vector<8x16x16xbf16> to vector<1x8x16x16xbf16>
    %90 = tpu.concatenate %82, %83, %84, %85, %86, %87, %88, %89 in 0 : vector<1x8x16x16xbf16>, vector<1x8x16x16xbf16>, vector<1x8x16x16xbf16>, vector<1x8x16x16xbf16>, vector<1x8x16x16xbf16>, vector<1x8x16x16xbf16>, vector<1x8x16x16xbf16>, vector<1x8x16x16xbf16> -> vector<8x8x16x16xbf16>
    %91 = vector.shape_cast %90 : vector<8x8x16x16xbf16> to vector<64x16x16xbf16>
    "tpu.trace_start"() <{level = 10 : i32, message = "xid,xjd->xij"}> : () -> ()
    %cst_19 = arith.constant dense<0.000000e+00> : vector<64x16x16xf32>
    %92 = tpu.matmul %55, %73, %cst_19 {dimension_numbers = #tpu.dot_dimension_numbers<[2], [2], [1], [1], [0, 0, 0, 1, 1, 1], [0], [0]>} : vector<64x16x16xbf16>, vector<64x16x16xbf16>, vector<64x16x16xf32> -> vector<64x16x16xf32>
    "tpu.trace_stop"() : () -> ()
    %93 = tpu.iota {dimensions = array<i32: 1>} : vector<16x16xi32>
    %c9_i32 = arith.constant 9 : i32
    %94 = vector.broadcast %c9_i32 : i32 to vector<16x16xi32>
    %95 = arith.cmpi slt, %93, %94 : vector<16x16xi32>
    %cst_20 = arith.constant -1.000000e+30 : f32
    %96 = vector.shape_cast %95 : vector<16x16xi1> to vector<1x16x16xi1>
    %97 = vector.broadcast %96 : vector<1x16x16xi1> to vector<64x16x16xi1>
    %98 = vector.broadcast %cst_20 : f32 to vector<64x16x16xf32>
    %99 = arith.select %97, %92, %98 : vector<64x16x16xi1>, vector<64x16x16xf32>
    %cst_21 = arith.constant dense<0xFF800000> : vector<64x16xf32>
    %100 = vector.multi_reduction <maximumf>, %99, %cst_21 [2] : vector<64x16x16xf32> to vector<64x16xf32>
    %101 = vector.shape_cast %100 : vector<64x16xf32> to vector<64x16x1xf32>
    %102 = vector.broadcast %101 : vector<64x16x1xf32> to vector<64x16x16xf32>
    %103 = arith.subf %99, %102 : vector<64x16x16xf32>
    %104 = math.exp %103 : vector<64x16x16xf32>
    %cst_22 = arith.constant dense<0.000000e+00> : vector<64x16xf32>
    %105 = vector.multi_reduction <add>, %104, %cst_22 [2] : vector<64x16x16xf32> to vector<64x16xf32>
    %106 = vector.shape_cast %105 : vector<64x16xf32> to vector<64x16x1xf32>
    %107 = tpu.reciprocal %106 {approx = true} : vector<64x16x1xf32> -> vector<64x16x1xf32>
    %108 = vector.broadcast %107 : vector<64x16x1xf32> to vector<64x16x16xf32>
    %109 = arith.mulf %104, %108 : vector<64x16x16xf32>
    %110 = arith.truncf %109 : vector<64x16x16xf32> to vector<64x16x16xbf16>
    "tpu.trace_start"() <{level = 10 : i32, message = "xij,xjd->xid"}> : () -> ()
    %cst_23 = arith.constant dense<0.000000e+00> : vector<64x16x16xf32>
    %111 = tpu.matmul %110, %91, %cst_23 {dimension_numbers = #tpu.dot_dimension_numbers<[2], [1], [1], [2], [0, 0, 0, 1, 1, 2], [0], [0]>} : vector<64x16x16xbf16>, vector<64x16x16xbf16>, vector<64x16x16xf32> -> vector<64x16x16xf32>
    "tpu.trace_stop"() : () -> ()
    %112 = vector.shape_cast %111 : vector<64x16x16xf32> to vector<8x8x16x16xf32>
    %113 = vector.extract_strided_slice %112 {offsets = [0, 0, 0, 0], sizes = [1, 8, 16, 16], strides = [1, 1, 1, 1]} : vector<8x8x16x16xf32> to vector<1x8x16x16xf32>
    %114 = vector.shape_cast %113 : vector<1x8x16x16xf32> to vector<8x16x16xf32>
    %115 = vector.extract_strided_slice %112 {offsets = [1, 0, 0, 0], sizes = [1, 8, 16, 16], strides = [1, 1, 1, 1]} : vector<8x8x16x16xf32> to vector<1x8x16x16xf32>
    %116 = vector.shape_cast %115 : vector<1x8x16x16xf32> to vector<8x16x16xf32>
    %117 = vector.extract_strided_slice %112 {offsets = [2, 0, 0, 0], sizes = [1, 8, 16, 16], strides = [1, 1, 1, 1]} : vector<8x8x16x16xf32> to vector<1x8x16x16xf32>
    %118 = vector.shape_cast %117 : vector<1x8x16x16xf32> to vector<8x16x16xf32>
    %119 = vector.extract_strided_slice %112 {offsets = [3, 0, 0, 0], sizes = [1, 8, 16, 16], strides = [1, 1, 1, 1]} : vector<8x8x16x16xf32> to vector<1x8x16x16xf32>
    %120 = vector.shape_cast %119 : vector<1x8x16x16xf32> to vector<8x16x16xf32>
    %121 = vector.extract_strided_slice %112 {offsets = [4, 0, 0, 0], sizes = [1, 8, 16, 16], strides = [1, 1, 1, 1]} : vector<8x8x16x16xf32> to vector<1x8x16x16xf32>
    %122 = vector.shape_cast %121 : vector<1x8x16x16xf32> to vector<8x16x16xf32>
    %123 = vector.extract_strided_slice %112 {offsets = [5, 0, 0, 0], sizes = [1, 8, 16, 16], strides = [1, 1, 1, 1]} : vector<8x8x16x16xf32> to vector<1x8x16x16xf32>
    %124 = vector.shape_cast %123 : vector<1x8x16x16xf32> to vector<8x16x16xf32>
    %125 = vector.extract_strided_slice %112 {offsets = [6, 0, 0, 0], sizes = [1, 8, 16, 16], strides = [1, 1, 1, 1]} : vector<8x8x16x16xf32> to vector<1x8x16x16xf32>
    %126 = vector.shape_cast %125 : vector<1x8x16x16xf32> to vector<8x16x16xf32>
    %127 = vector.extract_strided_slice %112 {offsets = [7, 0, 0, 0], sizes = [1, 8, 16, 16], strides = [1, 1, 1, 1]} : vector<8x8x16x16xf32> to vector<1x8x16x16xf32>
    %128 = vector.shape_cast %127 : vector<1x8x16x16xf32> to vector<8x16x16xf32>
    %129 = tpu.concatenate %114, %116, %118, %120, %122, %124, %126, %128 in 2 : vector<8x16x16xf32>, vector<8x16x16xf32>, vector<8x16x16xf32>, vector<8x16x16xf32>, vector<8x16x16xf32>, vector<8x16x16xf32>, vector<8x16x16xf32>, vector<8x16x16xf32> -> vector<8x16x128xf32>
    %130 = vector.shape_cast %129 : vector<8x16x128xf32> to vector<128x128xf32>
    %131 = arith.truncf %130 : vector<128x128xf32> to vector<128x128xbf16>
    %c0_24 = arith.constant 0 : index
    %c0_25 = arith.constant 0 : index
    %c0_26 = arith.constant 0 : index
    %132 = vector.load %arg10[%c0_24, %c0_25, %c0_26] : memref<1x128x128xbf16, #tpu.memory_space<vmem>>, vector<1x128x128xbf16>
    %133 = vector.shape_cast %132 : vector<1x128x128xbf16> to vector<128x128xbf16>
    %cst_27 = arith.constant dense<0.000000e+00> : vector<128x128xf32>
    %134 = tpu.matmul %131, %133, %cst_27 {dimension_numbers = #tpu.dot_dimension_numbers<[1], [0], [0], [1], [0, 0, 1, 1], [], []>} : vector<128x128xbf16>, vector<128x128xbf16>, vector<128x128xf32> -> vector<128x128xf32>
    %c0_28 = arith.constant 0 : index
    %c0_29 = arith.constant 0 : index
    %c0_30 = arith.constant 0 : index
    %135 = vector.load %arg11[%c0_28, %c0_29, %c0_30] : memref<1x1x128xf32, #tpu.memory_space<vmem>>, vector<1x1x128xf32>
    %136 = vector.shape_cast %135 : vector<1x1x128xf32> to vector<1x128xf32>
    %137 = vector.broadcast %136 : vector<1x128xf32> to vector<128x128xf32>
    %138 = arith.addf %134, %137 : vector<128x128xf32>
    %139 = arith.addf %3, %138 : vector<128x128xf32>
    %c0_31 = arith.constant 0 : index
    %c0_32 = arith.constant 0 : index
    %c0_33 = arith.constant 0 : index
    %140 = vector.load %arg12[%c0_31, %c0_32, %c0_33] : memref<1x1x128xf32, #tpu.memory_space<vmem>>, vector<1x1x128xf32>
    %141 = vector.shape_cast %140 : vector<1x1x128xf32> to vector<1x128xf32>
    %c0_34 = arith.constant 0 : index
    %c0_35 = arith.constant 0 : index
    %c0_36 = arith.constant 0 : index
    %142 = vector.load %arg13[%c0_34, %c0_35, %c0_36] : memref<1x1x128xf32, #tpu.memory_space<vmem>>, vector<1x1x128xf32>
    %143 = vector.shape_cast %142 : vector<1x1x128xf32> to vector<1x128xf32>
    %cst_37 = arith.constant dense<0.000000e+00> : vector<128xf32>
    %144 = vector.multi_reduction <add>, %139, %cst_37 [1] : vector<128x128xf32> to vector<128xf32>
    %145 = vector.shape_cast %144 : vector<128xf32> to vector<128x1xf32>
    %cst_38 = arith.constant 1.280000e+02 : f32
    %146 = vector.broadcast %cst_38 : f32 to vector<128x1xf32>
    %147 = arith.divf %145, %146 : vector<128x1xf32>
    %148 = vector.broadcast %147 : vector<128x1xf32> to vector<128x128xf32>
    %149 = arith.subf %139, %148 : vector<128x128xf32>
    %150 = arith.mulf %149, %149 : vector<128x128xf32>
    %cst_39 = arith.constant dense<0.000000e+00> : vector<128xf32>
    %151 = vector.multi_reduction <add>, %150, %cst_39 [1] : vector<128x128xf32> to vector<128xf32>
    %152 = vector.shape_cast %151 : vector<128xf32> to vector<128x1xf32>
    %cst_40 = arith.constant 1.280000e+02 : f32
    %153 = vector.broadcast %cst_40 : f32 to vector<128x1xf32>
    %154 = arith.divf %152, %153 : vector<128x1xf32>
    %cst_41 = arith.constant 9.99999974E-6 : f32
    %155 = vector.broadcast %cst_41 : f32 to vector<128x1xf32>
    %156 = arith.addf %154, %155 : vector<128x1xf32>
    %157 = math.rsqrt %156 : vector<128x1xf32>
    %158 = vector.broadcast %157 : vector<128x1xf32> to vector<128x128xf32>
    %159 = arith.mulf %149, %158 : vector<128x128xf32>
    %160 = vector.broadcast %141 : vector<1x128xf32> to vector<128x128xf32>
    %161 = arith.mulf %159, %160 : vector<128x128xf32>
    %162 = vector.broadcast %143 : vector<1x128xf32> to vector<128x128xf32>
    %163 = arith.addf %161, %162 : vector<128x128xf32>
    %164 = arith.truncf %163 : vector<128x128xf32> to vector<128x128xbf16>
    %c0_42 = arith.constant 0 : index
    %c0_43 = arith.constant 0 : index
    %c0_44 = arith.constant 0 : index
    %165 = vector.load %arg14[%c0_42, %c0_43, %c0_44] : memref<1x128x256xbf16, #tpu.memory_space<vmem>>, vector<1x128x256xbf16>
    %166 = vector.shape_cast %165 : vector<1x128x256xbf16> to vector<128x256xbf16>
    %cst_45 = arith.constant dense<0.000000e+00> : vector<128x256xf32>
    %167 = tpu.matmul %164, %166, %cst_45 {dimension_numbers = #tpu.dot_dimension_numbers<[1], [0], [0], [1], [0, 0, 1, 1], [], []>} : vector<128x128xbf16>, vector<128x256xbf16>, vector<128x256xf32> -> vector<128x256xf32>
    %c0_46 = arith.constant 0 : index
    %c0_47 = arith.constant 0 : index
    %c0_48 = arith.constant 0 : index
    %168 = vector.load %arg15[%c0_46, %c0_47, %c0_48] : memref<1x1x256xf32, #tpu.memory_space<vmem>>, vector<1x1x256xf32>
    %169 = vector.shape_cast %168 : vector<1x1x256xf32> to vector<1x256xf32>
    %170 = vector.broadcast %169 : vector<1x256xf32> to vector<128x256xf32>
    %171 = arith.addf %167, %170 : vector<128x256xf32>
    %cst_49 = arith.constant 5.000000e-01 : f32
    %172 = vector.broadcast %cst_49 : f32 to vector<128x256xf32>
    %173 = arith.mulf %172, %171 : vector<128x256xf32>
    %cst_50 = arith.constant 4.471500e-02 : f32
    %174 = vector.broadcast %cst_50 : f32 to vector<128x256xf32>
    %175 = arith.mulf %174, %171 : vector<128x256xf32>
    %176 = arith.mulf %175, %171 : vector<128x256xf32>
    %177 = arith.mulf %176, %171 : vector<128x256xf32>
    %178 = arith.addf %171, %177 : vector<128x256xf32>
    %cst_51 = arith.constant 0.797884583 : f32
    %179 = vector.broadcast %cst_51 : f32 to vector<128x256xf32>
    %180 = arith.mulf %179, %178 : vector<128x256xf32>
    %181 = math.tanh %180 : vector<128x256xf32>
    %cst_52 = arith.constant 1.000000e+00 : f32
    %182 = vector.broadcast %cst_52 : f32 to vector<128x256xf32>
    %183 = arith.addf %182, %181 : vector<128x256xf32>
    %184 = arith.mulf %173, %183 : vector<128x256xf32>
    %185 = arith.truncf %184 : vector<128x256xf32> to vector<128x256xbf16>
    %c0_53 = arith.constant 0 : index
    %c0_54 = arith.constant 0 : index
    %c0_55 = arith.constant 0 : index
    %186 = vector.load %arg16[%c0_53, %c0_54, %c0_55] : memref<1x256x128xbf16, #tpu.memory_space<vmem>>, vector<1x256x128xbf16>
    %187 = vector.shape_cast %186 : vector<1x256x128xbf16> to vector<256x128xbf16>
    %cst_56 = arith.constant dense<0.000000e+00> : vector<128x128xf32>
    %188 = tpu.matmul %185, %187, %cst_56 {dimension_numbers = #tpu.dot_dimension_numbers<[1], [0], [0], [1], [0, 0, 1, 1], [], []>} : vector<128x256xbf16>, vector<256x128xbf16>, vector<128x128xf32> -> vector<128x128xf32>
    %c0_57 = arith.constant 0 : index
    %c0_58 = arith.constant 0 : index
    %c0_59 = arith.constant 0 : index
    %189 = vector.load %arg17[%c0_57, %c0_58, %c0_59] : memref<1x1x128xf32, #tpu.memory_space<vmem>>, vector<1x1x128xf32>
    %190 = vector.shape_cast %189 : vector<1x1x128xf32> to vector<1x128xf32>
    %191 = vector.broadcast %190 : vector<1x128xf32> to vector<128x128xf32>
    %192 = arith.addf %188, %191 : vector<128x128xf32>
    %193 = arith.addf %139, %192 : vector<128x128xf32>
    %c0_60 = arith.constant 0 : index
    %c0_61 = arith.constant 0 : index
    %194 = vector.load %arg21[%c0_60, %c0_61] : memref<128x128xf32, #tpu.memory_space<vmem>>, vector<128x128xf32>
    tpu.vector_store %arg21[%c0_60, %c0_61], %193 {strides = array<i32>} : memref<128x128xf32, #tpu.memory_space<vmem>>, vector<128x128xf32>,
    %c1_i32 = arith.constant 1 : i32
    %195 = arith.cmpi eq, %arg1, %c1_i32 : i32
    %196 = arith.extui %195 : i1 to i32
    %c0_i32_62 = arith.constant 0 : i32
    %197 = arith.cmpi ne, %196, %c0_i32_62 : i32
    scf.if %197 {
      %198 = vector.shape_cast %193 : vector<128x128xf32> to vector<8x16x128xf32>
      %199 = tpu.iota {dimensions = array<i32: 1>} : vector<1x16x1xi32>
      %c0_i32_63 = arith.constant 0 : i32
      %200 = vector.broadcast %c0_i32_63 : i32 to vector<1x16x1xi32>
      %201 = arith.cmpi eq, %199, %200 : vector<1x16x1xi32>
      %cst_64 = arith.constant 0.000000e+00 : f32
      %202 = vector.shape_cast %201 : vector<1x16x1xi1> to vector<1x16x1xi1>
      %203 = vector.broadcast %202 : vector<1x16x1xi1> to vector<8x16x128xi1>
      %204 = vector.broadcast %cst_64 : f32 to vector<8x16x128xf32>
      %205 = arith.select %203, %198, %204 : vector<8x16x128xi1>, vector<8x16x128xf32>
      %cst_65 = arith.constant dense<0.000000e+00> : vector<8x128xf32>
      %206 = vector.multi_reduction <add>, %205, %cst_65 [1] : vector<8x16x128xf32> to vector<8x128xf32>
      %207 = arith.truncf %206 : vector<8x128xf32> to vector<8x128xbf16>
      %c0_66 = arith.constant 0 : index
      %c0_67 = arith.constant 0 : index
      %208 = vector.load %arg18[%c0_66, %c0_67] : memref<128x128xbf16, #tpu.memory_space<vmem>>, vector<128x128xbf16>
      %cst_68 = arith.constant dense<0.000000e+00> : vector<8x128xf32>
      %209 = tpu.matmul %207, %208, %cst_68 {dimension_numbers = #tpu.dot_dimension_numbers<[1], [0], [0], [1], [0, 0, 1, 1], [], []>} : vector<8x128xbf16>, vector<128x128xbf16>, vector<8x128xf32> -> vector<8x128xf32>
      %c0_69 = arith.constant 0 : index
      %c0_70 = arith.constant 0 : index
      %210 = vector.load %arg19[%c0_69, %c0_70] : memref<1x128xf32, #tpu.memory_space<vmem>>, vector<1x128xf32>
      %211 = vector.broadcast %210 : vector<1x128xf32> to vector<8x128xf32>
      %212 = arith.addf %209, %211 : vector<8x128xf32>
      %c0_71 = arith.constant 0 : index
      %c0_72 = arith.constant 0 : index
      %213 = vector.load %arg20[%c0_71, %c0_72] : memref<8x128xf32, #tpu.memory_space<vmem>>, vector<8x128xf32>
      tpu.vector_store %arg20[%c0_71, %c0_72], %212 {strides = array<i32>} : memref<8x128xf32, #tpu.memory_space<vmem>>, vector<8x128xf32>,
    } else {
    }
    return
  }
  func.func @transform_0(%arg0: i32, %arg1: i32) -> (i32, i32, i32) {
    %c0_i32 = arith.constant 0 : i32
    %c0_i32_0 = arith.constant 0 : i32
    %c0_i32_1 = arith.constant 0 : i32
    return %arg0, %c0_i32, %c0_i32_0 : i32, i32, i32
  }
  func.func @transform_1(%arg0: i32, %arg1: i32) -> (i32, i32, i32) {
    %c0_i32 = arith.constant 0 : i32
    %c0_i32_0 = arith.constant 0 : i32
    %c0_i32_1 = arith.constant 0 : i32
    return %arg0, %c0_i32, %c0_i32_0 : i32, i32, i32
  }
  func.func @transform_2(%arg0: i32, %arg1: i32) -> (i32, i32, i32) {
    %c0_i32 = arith.constant 0 : i32
    %c0_i32_0 = arith.constant 0 : i32
    %c0_i32_1 = arith.constant 0 : i32
    return %arg0, %c0_i32, %c0_i32_0 : i32, i32, i32
  }
  func.func @transform_3(%arg0: i32, %arg1: i32) -> (i32, i32, i32) {
    %c0_i32 = arith.constant 0 : i32
    %c0_i32_0 = arith.constant 0 : i32
    %c0_i32_1 = arith.constant 0 : i32
    %c0_i32_2 = arith.constant 0 : i32
    return %c0_i32, %c0_i32_0, %c0_i32_1 : i32, i32, i32
  }
  func.func @transform_4(%arg0: i32, %arg1: i32) -> (i32, i32, i32) {
    %c0_i32 = arith.constant 0 : i32
    %c0_i32_0 = arith.constant 0 : i32
    %c0_i32_1 = arith.constant 0 : i32
    return %arg1, %c0_i32, %c0_i32_0 : i32, i32, i32
  }
  func.func @transform_5(%arg0: i32, %arg1: i32) -> (i32, i32, i32) {
    %c0_i32 = arith.constant 0 : i32
    %c0_i32_0 = arith.constant 0 : i32
    %c0_i32_1 = arith.constant 0 : i32
    return %arg1, %c0_i32, %c0_i32_0 : i32, i32, i32
  }
  func.func @transform_6(%arg0: i32, %arg1: i32) -> (i32, i32, i32) {
    %c0_i32 = arith.constant 0 : i32
    %c0_i32_0 = arith.constant 0 : i32
    %c0_i32_1 = arith.constant 0 : i32
    return %arg1, %c0_i32, %c0_i32_0 : i32, i32, i32
  }
  func.func @transform_7(%arg0: i32, %arg1: i32) -> (i32, i32, i32) {
    %c0_i32 = arith.constant 0 : i32
    %c0_i32_0 = arith.constant 0 : i32
    %c0_i32_1 = arith.constant 0 : i32
    return %arg1, %c0_i32, %c0_i32_0 : i32, i32, i32
  }
  func.func @transform_8(%arg0: i32, %arg1: i32) -> (i32, i32, i32) {
    %c0_i32 = arith.constant 0 : i32
    %c0_i32_0 = arith.constant 0 : i32
    %c0_i32_1 = arith.constant 0 : i32
    return %arg1, %c0_i32, %c0_i32_0 : i32, i32, i32
  }
  func.func @transform_9(%arg0: i32, %arg1: i32) -> (i32, i32, i32) {
    %c0_i32 = arith.constant 0 : i32
    %c0_i32_0 = arith.constant 0 : i32
    %c0_i32_1 = arith.constant 0 : i32
    return %arg1, %c0_i32, %c0_i32_0 : i32, i32, i32
  }
  func.func @transform_10(%arg0: i32, %arg1: i32) -> (i32, i32, i32) {
    %c0_i32 = arith.constant 0 : i32
    %c0_i32_0 = arith.constant 0 : i32
    %c0_i32_1 = arith.constant 0 : i32
    return %arg1, %c0_i32, %c0_i32_0 : i32, i32, i32
  }
  func.func @transform_11(%arg0: i32, %arg1: i32) -> (i32, i32, i32) {
    %c0_i32 = arith.constant 0 : i32
    %c0_i32_0 = arith.constant 0 : i32
    %c0_i32_1 = arith.constant 0 : i32
    return %arg1, %c0_i32, %c0_i32_0 : i32, i32, i32
  }
  func.func @transform_12(%arg0: i32, %arg1: i32) -> (i32, i32, i32) {
    %c0_i32 = arith.constant 0 : i32
    %c0_i32_0 = arith.constant 0 : i32
    %c0_i32_1 = arith.constant 0 : i32
    return %arg1, %c0_i32, %c0_i32_0 : i32, i32, i32
  }
  func.func @transform_13(%arg0: i32, %arg1: i32) -> (i32, i32, i32) {
    %c0_i32 = arith.constant 0 : i32
    %c0_i32_0 = arith.constant 0 : i32
    %c0_i32_1 = arith.constant 0 : i32
    return %arg1, %c0_i32, %c0_i32_0 : i32, i32, i32
  }
  func.func @transform_14(%arg0: i32, %arg1: i32) -> (i32, i32, i32) {
    %c0_i32 = arith.constant 0 : i32
    %c0_i32_0 = arith.constant 0 : i32
    %c0_i32_1 = arith.constant 0 : i32
    return %arg1, %c0_i32, %c0_i32_0 : i32, i32, i32
  }
  func.func @transform_15(%arg0: i32, %arg1: i32) -> (i32, i32, i32) {
    %c0_i32 = arith.constant 0 : i32
    %c0_i32_0 = arith.constant 0 : i32
    %c0_i32_1 = arith.constant 0 : i32
    return %arg1, %c0_i32, %c0_i32_0 : i32, i32, i32
  }
  func.func @transform_16(%arg0: i32, %arg1: i32) -> (i32, i32) {
    %c0_i32 = arith.constant 0 : i32
    %c0_i32_0 = arith.constant 0 : i32
    %c0_i32_1 = arith.constant 0 : i32
    return %c0_i32, %c0_i32_0 : i32, i32
  }
  func.func @transform_17(%arg0: i32, %arg1: i32) -> (i32, i32) {
    %c0_i32 = arith.constant 0 : i32
    %c0_i32_0 = arith.constant 0 : i32
    %c0_i32_1 = arith.constant 0 : i32
    return %c0_i32, %c0_i32_0 : i32, i32
  }
  func.func @transform_18(%arg0: i32, %arg1: i32) -> (i32, i32) {
    %c0_i32 = arith.constant 0 : i32
    %c0_i32_0 = arith.constant 0 : i32
    return %arg0, %c0_i32 : i32, i32
  }
}

</mosaic_0001>

<bundles_post_ra>
// kernel: tpu_custom_call.1
= control target key start
LH: loop header
LB: loop body
LE: loop exit
PB: predicated region body
PF: predicated region fallthrough
CT: control target
= control target key end

     0   :  { %s19007_s0 = inlined_call_operand.hbm [shape: f32[16,16,64], index: 0, kind: input, shape index: {}]   ;;  %s19008_s1 = inlined_call_operand.hbm [shape: bf16[16,8,64], index: 1, kind: input, shape index: {}]   ;;  %s19009_s2 = inlined_call_operand.hbm [shape: bf16[16,64,128], index: 2, kind: input, shape index: {}]   ;;  %s19010_s3 = inlined_call_operand.hbm [shape: f32[1,16,128], index: 3, kind: input, shape index: {}]   ;;  %s19011_s4 = inlined_call_operand.hbm [shape: f32[2,1,128], index: 4, kind: input, shape index: {}]   ;;  %s19012_s5 = inlined_call_operand.hbm [shape: f32[2,1,128], index: 5, kind: input, shape index: {}]   ;;  %s19013_s6 = inlined_call_operand.hbm [shape: bf16[2,128,384], index: 6, kind: input, shape index: {}]   ;;  %s19014_s7 = inlined_call_operand.vmem [shape: f32[2,1,384], index: 7, kind: input, shape index: {}]   ;;  %s19015_s8 = inlined_call_operand.hbm [shape: bf16[2,128,128], index: 8, kind: input, shape index: {}]   ;;  %s19016_s9 = inlined_call_operand.hbm [shape: f32[2,1,128], index: 9, kind: input, shape index: {}]   ;;  %s19017_s10 = inlined_call_operand.hbm [shape: f32[2,1,128], index: 10, kind: input, shape index: {}]   ;;  %s19018_s11 = inlined_call_operand.hbm [shape: f32[2,1,128], index: 11, kind: input, shape index: {}]   ;;  %s19019_s12 = inlined_call_operand.hbm [shape: bf16[2,128,256], index: 12, kind: input, shape index: {}]   ;;  %s19020_s13 = inlined_call_operand.vmem [shape: f32[2,1,256], index: 13, kind: input, shape index: {}]   ;;  %s19021_s14 = inlined_call_operand.hbm [shape: bf16[2,256,128], index: 14, kind: input, shape index: {}]   ;;  %s19022_s15 = inlined_call_operand.vmem [shape: f32[2,1,128], index: 15, kind: input, shape index: {}]   ;;  %s19023_s16 = inlined_call_operand.hbm [shape: bf16[128,128], index: 16, kind: input, shape index: {}]   ;;  %s19024_s17 = inlined_call_operand.vmem [shape: f32[1,128], index: 17, kind: input, shape index: {}]   ;;  %s19025_s18 = inlined_call_operand.hbm [shape: f32[16,128], index: 18, kind: output, shape index: {}]  }
   0x1   :  { %19146 = sst [smem:[#allocation176_spill]] %s19007_s0 }
   0x2   :  { %19147 = sst [smem:[#allocation177_spill]] %s19008_s1 }
   0x3   :  { %19148 = sst [smem:[#allocation178_spill]] %s19009_s2 }
   0x4   :  { %19149 = sst [smem:[#allocation179_spill]] %s19010_s3 }
   0x5   :  { %19150 = sst [smem:[#allocation180_spill]] %s19011_s4 }
   0x6   :  { %19151 = sst [smem:[#allocation181_spill]] %s19012_s5 }
   0x7   :  { %19152 = sst [smem:[#allocation182_spill]] %s19013_s6 }
   0x8   :  { %19153 = sst [smem:[#allocation183_spill]] %s19014_s7 }
   0x9   :  { %19154 = sst [smem:[#allocation184_spill]] %s19015_s8 }
   0xa   :  { %19155 = sst [smem:[#allocation185_spill]] %s19016_s9 }
   0xb   :  { %19156 = sst [smem:[#allocation186_spill]] %s19017_s10 }
   0xc   :  { %19157 = sst [smem:[#allocation187_spill]] %s19019_s12 }
   0xd   :  { %19158 = sst [smem:[#allocation188_spill]] %s19020_s13 }
   0xe   :  { %19159 = sst [smem:[#allocation189_spill]] %s19021_s14 }
   0xf   :  { %19160 = sst [smem:[#allocation190_spill]] %s19022_s15 }
  0x10   :  { %19161 = sst [smem:[#allocation191_spill]] %s19023_s16 }
  0x11   :  { %19162 = sst [smem:[#allocation192_spill]] %s19024_s17 }
  0x12   :  { %19163 = sst [smem:[#allocation193_spill]] %s19025_s18 }
  0x13   :  { %23 = vsyncpa [#allocation4], 0 }
  0x14   :  { %25 = vsyncpa [#allocation4 + $0x1], 0 }
  0x15   :  { %26 = vsyncpa [#allocation7], 0 }
  0x16   :  { %28 = vsyncpa [#allocation7 + $0x1], 0 }
  0x17   :  { %29 = vsyncpa [#allocation10], 0 }
  0x18   :  { %30 = vsyncpa [#allocation5], 0 }
  0x19   :  { %32 = vsyncpa [#allocation5 + $0x1], 0  ;;  %s13428_s27 = smov 0   ;;  %s13430_s28 = smov 0  }
  0x1a   :  { %s13432_s29 = smov 0   ;;  %s13434_s30 = smov 0  }
  0x1b   :  { %s13436_s0 = smov 0   ;;  %s13438_s19 = smov 0  }
  0x1c   :  { %s13440_s1 = smov 0   ;;  %s13442_s20 = smov 0  }
  0x1d   :  { %s13444_s21 = smov 0   ;;  %s13446_s22 = smov 0  }
  0x1e   :  { %s13448_s2 = smov 0  }
  0x1f LB: > { %19164 = sst [smem:[#allocation36_spill]] %s13275_s28  ;;  %s13484_s23 = sadd.s32 4294967295, %s13311_s2   ;;  %s13311_s2 = sphi %s13448_s2, %s38_s2   ;;  %s13307_s22 = sphi %s13446_s22, %s19785_s22   ;;  %s13303_s21 = sphi %s13444_s21, %s19784_s21   ;;  %s13299_s20 = sphi %s13442_s20, %s19783_s20   ;;  %s13295_s1 = sphi %s13440_s1, %s19782_s1   ;;  %s13291_s19 = sphi %s13438_s19, %s19777_s19   ;;  %s13287_s0 = sphi %s13436_s0, %s19776_s0   ;;  %s13283_s30 = sphi %s13434_s30, %s19775_s30   ;;  %s13279_s29 = sphi %s13432_s29, %s19781_s29   ;;  %s13275_s28 = sphi %s13430_s28, %s19780_s28   ;;  %s13271_s27 = sphi %s13428_s27, %s19773_s27  }
  0x20   : > { %19165 = sst [smem:[#allocation37_spill]] %s13283_s30  ;;  %s10867_s24 = sadd.s32 4294967294, %s13311_s2  }
  0x21   : > { %19166 = sst [smem:[#allocation38_spill]] %s13287_s0  ;;  %s47_s25 = sadd.s32 1, %s13303_s21 }
  0x22   : > { %19167 = sst [smem:[#allocation39_spill]] %s13291_s19  ;;  %s50_s26 = sadd.s32 1, %s13307_s22 }
  0x23   : > { %19168 = sst [smem:[#allocation40_spill]] %s13295_s1  ;;  %p48_p0 = scmp.ge.s32.totalorder %s47_s25, 2 }
  0x24   : > { %19169 = sst [smem:[#allocation41_spill]] %s13299_s20  ;;  %s57_s18 = sadd.s32 1, %s13291_s19 }
  0x25   : > { %19170 = sst [smem:[#allocation42_spill]] %s13311_s2  ;;  %p19030_p1 = scmp.ne.s32.totalorder %s13291_s19, %s13287_s0 }
  0x26   : > { %19171 = sst [smem:[#allocation43_spill]] %s13484_s23  ;;  %p65_p2 = scmp.eq.s32.totalorder %s13311_s2, 0 }
  0x27   : > { %s19787_s25 = smov (%p48_p0, %s47_s25), 0  ;;  %s19789_s26 = smov (!%p48_p0, %s50_s26), %s13307_s22 }
  0x28   : > { %19172 = sst [smem:[#allocation44_spill]] %s19787_s25  ;;  %p13501_p3 = por %p65_p2, %p19030_p1 }
  0x29   : > { %p19029_p4 = scmp.ne.s32.totalorder %s13287_s0, %s13283_s30  ;;  %p52_p5 = scmp.ge.s32.totalorder %s19789_s26, 2 }
  0x2a   : > { %s19173_s20 = scalar_select %p13501_p3, 1, 0 }
  0x2b   : > { %p71_p6 = scmp.eq.s32.totalorder %s13484_s23, 0  ;;  %s153_s17 = ssub.s32 %s13303_s21, %s19787_s25 }
  0x2c   : > { %s156_s7 = sadd.s32 1, %s13279_s29  ;;  %s19791_s26 = smov (%p52_p5, %s19789_s26), 0 }
  0x2d   : > { %19174 = sst [smem:[#allocation45_spill]] %s19791_s26  ;;  %p13518_p7 = por %p71_p6, %p19029_p4 }
  0x2e   : > { %p154_p8 = scmp.eq.s32.totalorder %s153_s17, 0  ;;  %s54_s13 = ssub.s32 %s13307_s22, %s19791_s26 }
  0x2f   : > { %s19175_s15 = scalar_select %p13518_p7, 1, 0 }
  0x30   : > { %p163_p9 = scmp.ne.s32.totalorder %s13279_s29, %s13275_s28  ;;  %p55_p10 = scmp.eq.s32.totalorder %s54_s13, 0 }
  0x31   : > { %19176 = sst [smem:[#allocation46_spill]] %s19175_s15  ;;  %p169_p11 = scmp.ne.s32.totalorder %s13275_s28, %s13271_s27 }
  0x32   : > { %s13529_s25 = scalar_select %p154_p8, %s13279_s29, %s156_s7  }
  0x33   : > { %s13532_s1 = scalar_select %p55_p10, %s13291_s19, %s57_s18  }
  0x34   : > { %19177 = sst [smem:[#allocation47_spill]] %s13529_s25  ;;  %p13536_p12 = por %p163_p9, %p65_p2 }
  0x35   : > { %19178 = sst [smem:[#allocation48_spill]] %s13532_s1  ;;  %p13542_p13 = por %p169_p11, %p71_p6 }
  0x36   : > { %p521_p0 = scmp.eq.s32.totalorder %s13484_s23, 3  ;;  %p527_p5 = scmp.eq.s32.totalorder %s10867_s24, 3 }
  0x37   : > { %s19180_s12 = scalar_select %p13542_p13, 1, 0 }
  0x38   : > { %p10868_p4 = scmp.ge.s32.totalorder %s13311_s2, 1  ;;  %p534_p1 = scmp.lt.s32.totalorder %s13311_s2, 5 }
  0x39   : > { %19181 = sst [smem:[#allocation49_spill]] %s19180_s12  ;;  %p19182_p7 = scmp.ne.s32.totalorder %s13291_s19, %s13287_s0 }
  0x3a   : > { %p19185_p10 = scmp.ne.s32.totalorder %s13287_s0, %s13283_s30  ;;  %p13563_p2 = pnand %p10868_p4, %p534_p1 }
  0x3b   : > { %p13552_p8 = por %p521_p0, %p19182_p7  ;;  %s19189_s3 = sld [smem:[#allocation179_spill]] }
  0x3c   : > { %p13559_p3 = por %p527_p5, %p19185_p10  ;;  %p11644_p9 = pneg %p13563_p2 }
  0x3d   : > { %s19183_s7 = scalar_select %p13552_p8, 1, 0 }
  0x3e   : > { %s19186_s13 = scalar_select %p13559_p3, 1, 0 }
  0x3f   : > { %19184 = sst [smem:[#allocation50_spill]] %s19183_s7  ;;  %s13313_s26 = smov [#allocation9]  }
  0x40   : > { %19187 = sst [smem:[#allocation51_spill]] %s19186_s13  ;;  %s547_s1 = sshll.u32 %s13313_s26, 4  ;;  %s548_s1 = int_to_ptr.vmem [resolvable:$true] %s547_s1 }
  0x41   : > { %s545_s24 = sshll.u32 %s19189_s3, 4  ;;  %p11645_p7 = pnand %p11644_p9, %p71_p6  ;;  %s546_s24 = int_to_ptr.hbm [resolvable:$true] %s545_s24 }
  0x42   : > { %s19190_s16 = sld [smem:[#allocation191_spill]]  ;;  %s13314_s7 = smov 128  }
  0x43   : > { %s13315_s12 = smov 8   ;;  %s13316_s28 = smov [#allocation20]  }
  0x44   : > { %11647 = dma.hbm_to_vmem [thread:$0]  (!%p11645_p7), %s546_s24, 256, %s548_s1, [#allocation10], %s13314_s7, %s13314_s7, %s13315_s12  }
  0x45   : > { %s561_s18 = sshll.u32 %s13316_s28, 4  ;;  %s13317_s27 = smov 64   ;;  %s562_s18 = int_to_ptr.vmem [resolvable:$true] %s561_s18 }
  0x46   : > { %s13318_s3 = smov 4   ;;  %p10871_p1 = scmp.ge.s32.totalorder %s13311_s2, 4 }
  0x47   : > { %s578_s30 = sand.u32 (!%p10871_p1), 1, %s13311_s2   ;;  %s13580_s25 = sand.u32 (!%p10871_p1), 1, %s13291_s19  }
  0x48   : > { %s559_s13 = sshll.u32 %s19190_s16, 4  ;;  %574 = sbr.rel (%p10871_p1) target bundleno = 134 (0x86), region = 28  ;;  %s560_s13 = int_to_ptr.hbm [resolvable:$true] %s559_s13 }
  0x49   : > { %11650 = dma.hbm_to_vmem [thread:$0]  (!%p11645_p7), %s560_s13, 1024, %s562_s18, [#allocation7], %s13317_s27, %s13317_s27, %s13318_s3  }
  0x4a   : > { %s10872_s12 = sshll.u32 (!%p10871_p1), %s13580_s25, 7  ;;  %s11479_s1 = sshll.u32 (!%p10871_p1), %s13307_s22, 7 }
  0x4b   : > { %s19191_s7 = sld [smem:[#allocation176_spill]] (!%p10871_p1)  ;;  %s582_s3 = scalar_lea.vmem (!%p10871_p1), [#allocation3], %s10872_s12 }
  0x4c   : > { %s591_s13 = sshll.u32 (!%p10871_p1), %s582_s3, 4  ;;  %s13587_s27 = scalar_lea.sflag (!%p10871_p1), [#allocation4], %s578_s30  ;;  %s592_s13 = int_to_ptr.vmem [resolvable:$true] %s591_s13 }
  0x4d   : > { %s19049_s16 = smov 128   ;;  %s13320_s19 = smov 8  }
  0x4e   : > { %p19192_p4 = scmp.ne.s32.totalorder %s19173_s20, 0  ;;  %s10876_s28 = sshll.u32 %s13580_s25, 5 }
  0x4f   : > { %s605_s2 = scalar_lea.vmem [#allocation6], %s10876_s28  ;;  %s13600_s0 = scalar_lea.sflag [#allocation7], %s578_s30 }
  0x50   : > { %s613_s15 = sshll.u32 %s605_s2, 4  ;;  %s19050_s23 = smov 64   ;;  %s614_s15 = int_to_ptr.vmem [resolvable:$true] %s613_s15 }
  0x51   : > { %s588_s24 = scalar_lea.hbm %s19191_s7, %s11479_s1  ;;  %s11480_s1 = sshll.u32 %s13307_s22, 5 }
  0x52   : > { %s589_s18 = sshll.u32 %s588_s24, 4  ;;  %s19193_s7 = sld [smem:[#allocation177_spill]]  ;;  %s590_s18 = int_to_ptr.hbm [resolvable:$true] %s589_s18 }
  0x53   : > { %11614 = dma.hbm_to_vmem [thread:$0]  (%p19192_p4), %s590_s18, 2048, %s592_s13, %s13587_s27, %s19049_s16, %s19049_s16, %s13320_s19  }
  0x54   : > { %s19051_s13 = smov 4   ;;  %s10879_s18 = sshll.u32 %s13580_s25, 8 }
  0x55   : > { %s11482_s28 = sshll.u32 %s13307_s22, 8  ;;  %s19194_s12 = sld [smem:[#allocation178_spill]] }
  0x56   : > { %s19195_s4 = sld [smem:[#allocation180_spill]]  ;;  %s13324_s16 = smov 12  }
  0x57   : > { %s19196_s5 = sld [smem:[#allocation181_spill]] }
  0x58   : > { %s610_s24 = scalar_lea.hbm %s19193_s7, %s11480_s1  ;;  %s627_s7 = scalar_lea.vmem [#allocation8], %s10879_s18 }
  0x59   : > { %s611_s3 = sshll.u32 %s610_s24, 4  ;;  %s636_s24 = sshll.u32 %s627_s7, 4  ;;  %s612_s3 = int_to_ptr.hbm [resolvable:$true] %s611_s3  ;;  %s637_s24 = int_to_ptr.vmem [resolvable:$true] %s636_s24 }
  0x5a   : > { %11615 = dma.hbm_to_vmem [thread:$0]  (%p19192_p4), %s612_s3, 512, %s614_s15, %s13600_s0, %s19050_s23, %s19050_s23, %s19051_s13  }
  0x5b   : > { %s633_s26 = scalar_lea.hbm %s19194_s12, %s11482_s28  ;;  %s13620_s15 = sand.u32 1, %s13279_s29  }
  0x5c   : > { %s634_s30 = sshll.u32 %s633_s26, 4  ;;  %s652_s18 = scalar_lea.hbm %s19195_s4, %s13303_s21  ;;  %s635_s30 = int_to_ptr.hbm [resolvable:$true] %s634_s30 }
  0x5d   : > { %11616 = dma.hbm_to_vmem [thread:$0]  (%p19192_p4), %s635_s30, 4096, %s637_s24, %s13600_s0, %s19050_s23, %s19050_s23, %s19051_s13  }
  0x5e   : > { %s654_s28 = sshll.u32 %s652_s18, 4  ;;  %s649_s2 = scalar_lea.vmem [#allocation11], %s13620_s15  ;;  %s655_s28 = int_to_ptr.hbm [resolvable:$true] %s654_s28 }
  0x5f   : > { %s656_s20 = sshll.u32 %s649_s2, 4  ;;  %s669_s26 = scalar_lea.hbm %s19196_s5, %s13303_s21  ;;  %s657_s20 = int_to_ptr.vmem [resolvable:$true] %s656_s20 }
  0x60   : > { %11617 = dma.hbm_to_vmem [thread:$0]  (%p13536_p12), %s655_s28, 16, %s657_s20, %s13587_s27  }
  0x61   : > { %s666_s30 = scalar_lea.vmem [#allocation12], %s13620_s15  ;;  %s671_s24 = sshll.u32 %s669_s26, 4  ;;  %s672_s24 = int_to_ptr.hbm [resolvable:$true] %s671_s24 }
  0x62   : > { %s673_s7 = sshll.u32 %s666_s30, 4  ;;  %s11606_s25 = smul.u32 192, %s13620_s15  ;;  %s674_s7 = int_to_ptr.vmem [resolvable:$true] %s673_s7 }
  0x63   : > { %11618 = dma.hbm_to_vmem [thread:$0]  (%p13536_p12), %s672_s24, 16, %s674_s7, %s13600_s0  }
  0x64   : > { %s11607_s3 = smul.u32 192, %s13303_s21  ;;  %s684_s18 = scalar_lea.vmem [#allocation13], %s11606_s25 }
  0x65   : > { %s692_s2 = sshll.u32 %s684_s18, 4  ;;  %s19197_s6 = sld [smem:[#allocation182_spill]]  ;;  %s693_s2 = int_to_ptr.vmem [resolvable:$true] %s692_s2 }
  0x66   : > { %s10884_s26 = sshll.u32 %s13620_s15, 6  ;;  %s13323_s30 = smov 192  }
  0x67   : > { %s11483_s7 = sshll.u32 %s13303_s21, 6  ;;  %s19198_s8 = sld [smem:[#allocation184_spill]] }
  0x68   : > { %s19199_s9 = sld [smem:[#allocation185_spill]]  ;;  %s19204_s24 = smov 4  }
  0x69   : > { %s19200_s10 = sld [smem:[#allocation186_spill]] }
  0x6b   : > { %s689_s1 = scalar_lea.hbm %s19197_s6, %s11607_s3  ;;  %s713_s3 = scalar_lea.vmem [#allocation14], %s10884_s26 }
  0x6c   : > { %s690_s12 = sshll.u32 %s689_s1, 4  ;;  %s721_s28 = sshll.u32 %s713_s3, 4  ;;  %s691_s12 = int_to_ptr.hbm [resolvable:$true] %s690_s12  ;;  %s722_s28 = int_to_ptr.vmem [resolvable:$true] %s721_s28 }
  0x6d   : > { %11619 = dma.hbm_to_vmem [thread:$0]  (%p13536_p12), %s691_s12, 3072, %s693_s2, %s13587_s27, %s13323_s30, %s13323_s30, %s13324_s16  }
  0x6e   : > { %s718_s18 = scalar_lea.hbm %s19198_s8, %s11483_s7  ;;  %s737_s1 = scalar_lea.hbm %s19199_s9, %s13303_s21 }
  0x6f   : > { %s719_s20 = sshll.u32 %s718_s18, 4  ;;  %s734_s12 = scalar_lea.vmem [#allocation15], %s13620_s15  ;;  %s720_s20 = int_to_ptr.hbm [resolvable:$true] %s719_s20 }
  0x70   : > { %11620 = dma.hbm_to_vmem [thread:$0]  (%p13536_p12), %s720_s20, 1024, %s722_s28, %s13600_s0, %s19050_s23, %s19050_s23, %s19051_s13  }
  0x71   : > { %s741_s30 = sshll.u32 %s734_s12, 4  ;;  %s739_s26 = sshll.u32 %s737_s1, 4  ;;  %s742_s30 = int_to_ptr.vmem [resolvable:$true] %s741_s30  ;;  %s740_s26 = int_to_ptr.hbm [resolvable:$true] %s739_s26 }
  0x72   : > { %11621 = dma.hbm_to_vmem [thread:$0]  (%p13536_p12), %s740_s26, 16, %s742_s30, %s13587_s27  }
  0x73   : > { %s754_s25 = scalar_lea.hbm %s19200_s10, %s13303_s21  ;;  %s751_s18 = scalar_lea.vmem [#allocation16], %s13620_s15 }
  0x74   : > { %s758_s3 = sshll.u32 %s751_s18, 4  ;;  %s756_s28 = sshll.u32 %s754_s25, 4  ;;  %s759_s3 = int_to_ptr.vmem [resolvable:$true] %s758_s3  ;;  %s757_s28 = int_to_ptr.hbm [resolvable:$true] %s756_s28 }
  0x75   : > { %11622 = dma.hbm_to_vmem [thread:$0]  (%p13536_p12), %s757_s28, 16, %s759_s3, %s13600_s0  }
  0x76   : > { %s771_s2 = scalar_lea.hbm %s19018_s11, %s13303_s21  ;;  %s768_s1 = scalar_lea.vmem [#allocation17], %s13620_s15 }
  0x77   : > { %s775_s12 = sshll.u32 %s768_s1, 4  ;;  %s773_s30 = sshll.u32 %s771_s2, 4  ;;  %s776_s12 = int_to_ptr.vmem [resolvable:$true] %s775_s12  ;;  %s774_s30 = int_to_ptr.hbm [resolvable:$true] %s773_s30 }
  0x78   : > { %s10887_s26 = sshll.u32 %s13620_s15, 7  ;;  %s11484_s7 = sshll.u32 %s13303_s21, 7 }
  0x79   : > { %11623 = dma.hbm_to_vmem [thread:$0]  (%p13536_p12), %s774_s30, 16, %s776_s12, %s13587_s27  }
  0x7a   : > { %s19201_s18 = sld [smem:[#allocation187_spill]]  ;;  %s786_s28 = scalar_lea.vmem [#allocation18], %s10887_s26 }
  0x7b   : > { %s794_s20 = sshll.u32 %s786_s28, 4  ;;  %s19202_s2 = smov 128   ;;  %s795_s20 = int_to_ptr.vmem [resolvable:$true] %s794_s20 }
  0x7c   : > { %s19203_s23 = sld [smem:[#allocation189_spill]]  ;;  %s815_s12 = scalar_lea.vmem [#allocation19], %s10887_s26 }
  0x7d   : > { %s823_s30 = sshll.u32 %s815_s12, 4  ;;  %s19205_s25 = smov 64   ;;  %s824_s30 = int_to_ptr.vmem [resolvable:$true] %s823_s30 }
  0x80   : > { %s791_s3 = scalar_lea.hbm %s19201_s18, %s11484_s7 }
  0x81   : > { %s792_s16 = sshll.u32 %s791_s3, 4  ;;  %s793_s16 = int_to_ptr.hbm [resolvable:$true] %s792_s16 }
  0x82   : > { %11624 = dma.hbm_to_vmem [thread:$0]  (%p13536_p12), %s793_s16, 2048, %s795_s20, %s13600_s0, %s19202_s2, %s19202_s2, %s13320_s19  }
  0x83   : > { %s820_s13 = scalar_lea.hbm %s19203_s23, %s11484_s7 }
  0x84   : > { %s821_s4 = sshll.u32 %s820_s13, 4  ;;  %s822_s4 = int_to_ptr.hbm [resolvable:$true] %s821_s4 }
  0x85   : > { %11625 = dma.hbm_to_vmem [thread:$0]  (%p13536_p12), %s822_s4, 2048, %s824_s30, %s13587_s27, %s19205_s25, %s19205_s25, %s19204_s24  }
  0x86 PF: > { %841 = sbr.rel (%p13563_p2) target bundleno = 4060 (0xfdc), region = 92 }
  0x8b   : > { %s19206_s18 = sld [smem:[#allocation43_spill]] }
  0x8c   : > { %s19207_s0 = sld [smem:[#allocation38_spill]] }
  0x8d   : > { %s19208_s19 = sld [smem:[#allocation46_spill]] }
  0x91   : > { %s843_s3 = sand.u32 1, %s19206_s18  }
  0x92   : > { %s13705_s28 = sand.u32 1, %s19207_s0   ;;  %s13708_s13 = scalar_lea.sflag [#allocation4], %s843_s3 }
  0x93   : > { %s10894_s23 = sshll.u32 %s13705_s28, 7  ;;  %p19209_p11 = scmp.ne.s32.totalorder %s19208_s19, 0 }
  0x94   : > { %s13710_s14 = scalar_lea.vmem [#allocation3], %s10894_s23 }
  0x95   : > { %13214 = dma.done.wait (%p19209_p11), %s13708_s13, 2048  }
  0x96   : > { %13216 = vsyncadd (%p19209_p11), %s13708_s13, 4294965248  ;;  %s10895_s4 = sshll.u32 %s13705_s28, 5  ;;  %s13719_s17 = scalar_lea.sflag [#allocation7], %s843_s3 }
  0x97   : > { %s13721_s27 = scalar_lea.vmem [#allocation6], %s10895_s4 }
  0x98   : > { %13218 = dma.done.wait (%p19209_p11), %s13719_s17, 4608  }
  0x99   : > { %13220 = vsyncadd (%p19209_p11), %s13719_s17, 4294962688  ;;  %s10896_s26 = sshll.u32 %s13705_s28, 8 }
  0x9a   : > { %s13730_s7 = scalar_lea.vmem [#allocation8], %s10896_s26 }
  0x9b   : > { %13222 = dma.done.wait (%p71_p6), [#allocation10], 256  }
  0x9c   : > { %13224 = vsyncadd (%p71_p6), [#allocation10], 4294967040  ;;  %s19210_s20 = sld [smem:[#allocation36_spill]] }
  0xa2   : > { %s13737_s2 = sand.u32 1, %s19210_s20  }
  0xa3   : > { %13226 = dma.done.wait (%p13542_p13), %s13708_s13, 16  }
  0xa4   : > { %13228 = vsyncadd (%p13542_p13), %s13708_s13, 4294967280 }
  0xa5   : > { %13230 = dma.done.wait (%p13542_p13), %s13719_s17, 16  }
  0xa6   : > { %13232 = vsyncadd (%p13542_p13), %s13719_s17, 4294967280  ;;  %s11608_s12 = smul.u32 192, %s13737_s2 }
  0xa8   : > { %s13754_s30 = scalar_lea.vmem [#allocation13], %s11608_s12 }
  0xa9   : > { %13234 = dma.done.wait (%p13542_p13), %s13708_s13, 3072  }
  0xaa   : > { %13236 = vsyncadd (%p13542_p13), %s13708_s13, 4294964224  ;;  %s10898_s24 = sshll.u32 %s13737_s2, 6 }
  0xab   : > { %s13763_s25 = scalar_lea.vmem [#allocation14], %s10898_s24 }
  0xac   : > { %13238 = dma.done.wait (%p13542_p13), %s13719_s17, 1024  }
  0xad   : > { %13240 = vsyncadd (%p13542_p13), %s13719_s17, 4294966272 }
  0xae   : > { %13242 = dma.done.wait (%p13542_p13), %s13708_s13, 16  }
  0xaf   : > { %13244 = vsyncadd (%p13542_p13), %s13708_s13, 4294967280 }
  0xb0   : > { %13246 = dma.done.wait (%p13542_p13), %s13719_s17, 16  }
  0xb1   : > { %13248 = vsyncadd (%p13542_p13), %s13719_s17, 4294967280 }
  0xb2   : > { %13250 = dma.done.wait (%p13542_p13), %s13708_s13, 16  }
  0xb3   : > { %13252 = vsyncadd (%p13542_p13), %s13708_s13, 4294967280  ;;  %s10899_s23 = sshll.u32 %s13737_s2, 7 }
  0xb4   : > { %s13793_s4 = scalar_lea.vmem [#allocation18], %s10899_s23 }
  0xb5   : > { %13254 = dma.done.wait (%p13542_p13), %s13719_s17, 2048  }
  0xb6   : > { %13256 = vsyncadd (%p13542_p13), %s13719_s17, 4294965248  ;;  %s13801_s26 = scalar_lea.vmem [#allocation19], %s10899_s23 }
  0xb7   : > { %13258 = dma.done.wait (%p13542_p13), %s13708_s13, 2048  }
  0xb8   : > { %13260 = vsyncadd (%p13542_p13), %s13708_s13, 4294965248 }
  0xb9   : > { %13262 = dma.done.wait (%p71_p6), [#allocation7], 1024  }
  0xba   : > { %13264 = vsyncadd (%p71_p6), [#allocation7], 4294966272  ;;  %s19212_s20 = sld [smem:[#allocation40_spill]]  ;;  %s10902_s17 = sshll.u32 %s13705_s28, 3 }
  0xbb   : > { %s19213_s3 = sld [smem:[#allocation188_spill]]  ;;  %s13834_s10 = scalar_lea.vmem [#allocation21], %s10902_s17 }
  0xbc   : > { %s19214_s1 = sld [smem:[#allocation190_spill]] }
  0xbd   : > { %s19215_s8 = sld [smem:[#allocation183_spill]] }
  0xc0   : > { %p1080_p12 = scmp.lt.s32.totalorder %s19212_s20, 1  ;;  %p10904_p6 = scmp.ne.s32.totalorder %s19212_s20, 0 }
  0xc2   : > { %s13816_s12 = scalar_select %p1080_p12, %s19212_s20, 1 }
  0xc3   : > { %1095 = sbr.rel (%p10904_p6) target bundleno = 784 (0x310), region = 152 }
  0xc4   : > { %s11609_s24 = smul.u32 3, %s13816_s12  ;;  %s10903_s16 = sshll.u32 %s13816_s12, 1 }
  0xc5   : > { %s13823_s19 = scalar_lea.vmem %s19213_s3, %s10903_s16  ;;  %s1090_s15 = scalar_lea.vmem %s19214_s1, %s13816_s12 }
  0xc6   : > { %s13832_s9 = scalar_lea.vmem %s19215_s8, %s11609_s24 }
  0xc8   : > { %v1096_v0 = vld [vmem:[%s13710_s14] sm:$0xff]  ;;  %v1097_v1 = vld [vmem:[%s13710_s14 + $0x8] sm:$0xff]  ;;  %v1098_v2 = vld [vmem:[%s13710_s14 + $0x10] sm:$0xff]  ;;  %vm1205_vm0 = vcmask 523264   ;;  %vm1393_vm1 = vcmask 130048   ;;  %vm1578_vm2 = vcmask 1040384  }
  0xc9   : > { %v1112_v3 = vpack.c.bf16 %v1096_v0, %v1096_v0  ;;  %v1113_v4 = vpack.c.bf16 %v1097_v1, %v1097_v1  ;;  %v1099_v5 = vld [vmem:[%s13710_s14 + $0x18] sm:$0xff]  ;;  %v1114_v6 = vpack.c.bf16 %v1098_v2, %v1098_v2  ;;  %v1100_v7 = vld [vmem:[%s13710_s14 + $0x20] sm:$0xff]  ;;  %v1101_v8 = vld [vmem:[%s13710_s14 + $0x28] sm:$0xff]  ;;  %vm1579_vm3 = vsmask.f32 256 }
  0xca   : > { %v1115_v9 = vpack.c.bf16 %v1099_v5, %v1099_v5  ;;  %v1116_v10 = vpack.c.bf16 %v1100_v7, %v1100_v7  ;;  %v1117_v11 = vpack.c.bf16 %v1101_v8, %v1101_v8  ;;  %v1102_v12 = vld [vmem:[%s13710_s14 + $0x30] sm:$0xff]  ;;  %v1103_v13 = vld [vmem:[%s13710_s14 + $0x38] sm:$0xff]  ;;  %v1108_v22 = vld [vmem:[%s13710_s14 + $0x60] sm:$0xff]  ;;  %vm1589_vm4 = vcmask 1044480  }
  0xcb   : > { %v1202_v14 = vunpack.c.l.b16 %v1112_v3  ;;  %v1203_v15 = vunpack.c.l.b16 %v1113_v4  ;;  %v1227_v16 = vunpack.c.l.b16 %v1114_v6  ;;  %v1118_v17 = vpack.c.bf16 %v1102_v12, %v1102_v12  ;;  %v1109_v23 = vld [vmem:[%s13710_s14 + $0x68] sm:$0xff]  ;;  %v1110_v24 = vld [vmem:[%s13710_s14 + $0x70] sm:$0xff]  ;;  %v1111_v29 = vld [vmem:[%s13710_s14 + $0x78] sm:$0xff] }
  0xcc   : > { %v1228_v18 = vunpack.c.l.b16 %v1115_v9  ;;  %v1251_v19 = vunpack.c.l.b16 %v1116_v10  ;;  %v1252_v20 = vunpack.c.l.b16 %v1117_v11  ;;  %v1119_v21 = vpack.c.bf16 %v1103_v13, %v1103_v13  ;;  %v1106_v34 = vld [vmem:[%s13710_s14 + $0x50] sm:$0xff]  ;;  %v1107_v35 = vld [vmem:[%s13710_s14 + $0x58] sm:$0xff]  ;;  %v1104_v40 = vld [vmem:[%s13710_s14 + $0x40] sm:$0xff] }
  0xcd   : > { %v13848_v25 = vpack.c.b16 %v1203_v15, %v1202_v14  ;;  %v1275_v26 = vunpack.c.l.b16 %v1118_v17  ;;  %v1124_v27 = vpack.c.bf16 %v1108_v22, %v1108_v22  ;;  %v1125_v28 = vpack.c.bf16 %v1109_v23, %v1109_v23  ;;  %v1105_v41 = vld [vmem:[%s13710_s14 + $0x48] sm:$0xff]  ;;  %v1128_v57 = vld [vmem:[%s13721_s27] sm:$0xf]  ;;  %v1129_v60 = vld [vmem:[%s13721_s27 + $0x4] sm:$0xf] }
  0xce   : > { %v13851_v30 = vpack.c.b16 %v1228_v18, %v1227_v16  ;;  %v13853_v31 = vpack.c.b16 %v1252_v20, %v1251_v19  ;;  %v1276_v32 = vunpack.c.l.b16 %v1119_v21  ;;  %v1126_v33 = vpack.c.bf16 %v1110_v24, %v1110_v24  ;;  %v1130_v61 = vld [vmem:[%s13721_s27 + $0x8] sm:$0xf]  ;;  %v1131_v1 = vld [vmem:[%s13721_s27 + $0xc] sm:$0xf]  ;;  %v1132_v4 = vld [vmem:[%s13721_s27 + $0x10] sm:$0xf] }
  0xcf   : > { %v1210_v36 = vsel %vm1205_vm0, %v13848_v25, 0  ;;  %v1347_v37 = vunpack.c.l.b16 %v1124_v27  ;;  %v1348_v38 = vunpack.c.l.b16 %v1125_v28  ;;  %v1127_v39 = vpack.c.bf16 %v1111_v29, %v1111_v29  ;;  %v1133_v5 = vld [vmem:[%s13721_s27 + $0x14] sm:$0xf]  ;;  %v1134_v6 = vld [vmem:[%s13721_s27 + $0x18] sm:$0xf]  ;;  %v11495_v21 = vld [vmem:[%s13730_s7 + $0x48] sm:$0xff] }
  0xd0   : > { %1219 = vmatpush.bf16.xpose.msra.mxu0 %v1210_v36  ;;  %v1234_v42 = vsel %vm1205_vm0, %v13851_v30, 0  ;;  %v1258_v43 = vsel %vm1205_vm0, %v13853_v31, 0  ;;  %v13865_v44 = vpack.c.b16 %v1276_v32, %v1275_v26  ;;  %v1371_v45 = vunpack.c.l.b16 %v1126_v33  ;;  %v1135_v7 = vld [vmem:[%s13721_s27 + $0x1c] sm:$0xf]  ;;  %v11496_v13 = vld [vmem:[%s13730_s7 + $0x50] sm:$0xff]  ;;  %v11499_v22 = vld [vmem:[%s13730_s7 + $0x68] sm:$0xff] }
  0xd1   : > { %1243 = vmatpush.bf16.xpose.msra.mxu1 %v1234_v42  ;;  %1267 = vmatpush.bf16.xpose.msra.mxu2 %v1258_v43  ;;  %v13867_v46 = vpack.c.b16 %v1348_v38, %v1347_v37  ;;  %v1372_v47 = vunpack.c.l.b16 %v1127_v39  ;;  %v1122_v48 = vpack.c.bf16 %v1106_v34, %v1106_v34  ;;  %v1123_v49 = vpack.c.bf16 %v1107_v35, %v1107_v35  ;;  %v11497_v11 = vld [vmem:[%s13730_s7 + $0x58] sm:$0xff]  ;;  %v11500_v14 = vld [vmem:[%s13730_s7 + $0x70] sm:$0xff]  ;;  %v11494_v28 = vld [vmem:[%s13730_s7 + $0x40] sm:$0xff] }
  0xd2   : > { %v1282_v50 = vsel %vm1205_vm0, %v13865_v44, 0  ;;  %v1120_v51 = vpack.c.bf16 %v1104_v40, %v1104_v40  ;;  %v1121_v52 = vpack.c.bf16 %v1105_v41, %v1105_v41  ;;  %v11501_v12 = vld [vmem:[%s13730_s7 + $0x78] sm:$0xff]  ;;  %v11488_v17 = vld [vmem:[%s13730_s7 + $0x10] sm:$0xff]  ;;  %v11498_v29 = vld [vmem:[%s13730_s7 + $0x60] sm:$0xff]  ;;  %vm1590_vm5 = vsmask.f32 4352 }
  0xd3   : > { %1291 = vmatpush.bf16.xpose.msra.mxu3 %v1282_v50  ;;  %v1354_v53 = vsel %vm1205_vm0, %v13867_v46, 0  ;;  %v13873_v54 = vpack.c.b16 %v1372_v47, %v1371_v45  ;;  %v1323_v55 = vunpack.c.l.b16 %v1122_v48  ;;  %v1324_v56 = vunpack.c.l.b16 %v1123_v49  ;;  %v11489_v15 = vld [vmem:[%s13730_s7 + $0x18] sm:$0xff]  ;;  %v11492_v18 = vld [vmem:[%s13730_s7 + $0x30] sm:$0xff]  ;;  %v11487_v49 = vld [vmem:[%s13730_s7 + $0x8] sm:$0xff] }
  0xd4   : > { %v1299_v58 = vunpack.c.l.b16 %v1120_v51  ;;  %v1300_v59 = vunpack.c.l.b16 %v1121_v52  ;;  %v11493_v16 = vld [vmem:[%s13730_s7 + $0x38] sm:$0xff]  ;;  %v11491_v50 = vld [vmem:[%s13730_s7 + $0x28] sm:$0xff]  ;;  %v11512_v51 = vld [vmem:[%s13730_s7 + $0xd0] sm:$0xff] }
  0xd5   : > { %v1378_v62 = vsel %vm1205_vm0, %v13873_v54, 0  ;;  %v13880_v63 = vpack.c.b16 %v1324_v56, %v1323_v55  ;;  %v11513_v32 = vld [vmem:[%s13730_s7 + $0xd8] sm:$0xff]  ;;  %v11516_v52 = vld [vmem:[%s13730_s7 + $0xf0] sm:$0xff]  ;;  %v11490_v55 = vld [vmem:[%s13730_s7 + $0x20] sm:$0xff] }
  0xd6   : > { %v13882_v0 = vpack.c.b16 %v1300_v59, %v1299_v58  ;;  %v11517_v33 = vld [vmem:[%s13730_s7 + $0xf8] sm:$0xff]  ;;  %v11511_v56 = vld [vmem:[%s13730_s7 + $0xc8] sm:$0xff]  ;;  %vm14023_vm6 = vmand %vm1578_vm2, %vm1579_vm3 }
  0xd7   : > { %10905 = vmatmul.msk.bf16.vlgmr.msra.gmra.mxu0 %vm1205_vm0, %v1128_v57  ;;  %v1330_v2 = vsel %vm1205_vm0, %v13880_v63, 0  ;;  %v11515_v57 = vld [vmem:[%s13730_s7 + $0xe8] sm:$0xff]  ;;  %v11505_v58 = vld [vmem:[%s13730_s7 + $0x98] sm:$0xff]  ;;  %vm14027_vm7 = vmand %vm1589_vm4, %vm1590_vm5 }
  0xd8   : > { %10906 = vmatmul.msk.bf16.vlgmr.msra.gmra.mxu1 %vm1205_vm0, %v1129_v60  ;;  %10907 = vmatmul.msk.bf16.vlgmr.msra.gmra.mxu2 %vm1205_vm0, %v1130_v61  ;;  %v1306_v3 = vsel %vm1205_vm0, %v13882_v0, 0  ;;  %v11509_v59 = vld [vmem:[%s13730_s7 + $0xb8] sm:$0xff]  ;;  %v11510_v60 = vld [vmem:[%s13730_s7 + $0xc0] sm:$0xff] }
  0xd9   : > { %1363 = vmatpush.bf16.xpose.msrb.mxu2 %v1354_v53  ;;  %1339 = vmatpush.bf16.xpose.msrb.mxu1 %v1330_v2  ;;  %v11486_v53 = vld [vmem:[%s13730_s7] sm:$0xff]  ;;  %v11507_v2 = vld [vmem:[%s13730_s7 + $0xa8] sm:$0xff] }
  0xda   : > { %1315 = vmatpush.bf16.xpose.msrb.mxu0 %v1306_v3  ;;  %10908 = vmatmul.msk.bf16.vlgmr.msra.gmra.mxu3 %vm1205_vm0, %v1131_v1  ;;  %v11514_v61 = vld [vmem:[%s13730_s7 + $0xe0] sm:$0xff]  ;;  %v11508_v1 = vld [vmem:[%s13730_s7 + $0xb0] sm:$0xff] }
  0xdb   : > { %1387 = vmatpush.bf16.xpose.msrb.mxu3 %v1378_v62  ;;  %v11504_v62 = vld [vmem:[%s13730_s7 + $0x90] sm:$0xff]  ;;  %v11506_v3 = vld [vmem:[%s13730_s7 + $0xa0] sm:$0xff] }
  0xe1   : > { %1704 = vmatpush.bf16.msra.mxu2 %v11497_v11  ;;  %1666 = vmatpush.bf16.msra.mxu1 %v11493_v16 }
  0xe2   : > { %1628 = vmatpush.bf16.msra.mxu0 %v11489_v15 }
  0xe3   : > { %1742 = vmatpush.bf16.msra.mxu3 %v11501_v12 }
  0xe5   : > { %1705 = vmatpush.bf16.msra.mxu2 %v11496_v13  ;;  %1667 = vmatpush.bf16.msra.mxu1 %v11492_v18 }
  0xe6   : > { %1629 = vmatpush.bf16.msra.mxu0 %v11488_v17 }
  0xe7   : > { %10909 = vmatmul.msk.bf16.vlgmr.msrb.gmra.mxu0 %vm1205_vm0, %v1132_v4  ;;  %1743 = vmatpush.bf16.msra.mxu3 %v11500_v14 }
  0xe8   : > { %10910 = vmatmul.msk.bf16.vlgmr.msrb.gmra.mxu1 %vm1205_vm0, %v1133_v5  ;;  %10911 = vmatmul.msk.bf16.vlgmr.msrb.gmra.mxu2 %vm1205_vm0, %v1134_v6 }
  0xe9   : > { %1706 = vmatpush.bf16.msra.mxu2 %v11495_v21  ;;  %1668 = vmatpush.bf16.msra.mxu1 %v11491_v50 }
  0xea   : > { %10912 = vmatmul.msk.bf16.vlgmr.msrb.gmra.mxu3 %vm1205_vm0, %v1135_v7  ;;  %1630 = vmatpush.bf16.msra.mxu0 %v11487_v49 }
  0xeb   : > { %1744 = vmatpush.bf16.msra.mxu3 %v11499_v22 }
  0xed   : > { %1707 = vmatpush.bf16.msra.mxu2 %v11494_v28  ;;  %1669 = vmatpush.bf16.msra.mxu1 %v11490_v55 }
  0xee   : > { %1631 = vmatpush.bf16.msra.mxu0 %v11486_v53 }
  0xef   : > { %1745 = vmatpush.bf16.msra.mxu3 %v11498_v29 }
  0xf1   : > { %1856 = vmatpush.bf16.msrb.mxu2 %v11513_v32  ;;  %1818 = vmatpush.bf16.msrb.mxu1 %v11509_v59 }
  0xf2   : > { %1780 = vmatpush.bf16.msrb.mxu0 %v11505_v58 }
  0xf3   : > { %1894 = vmatpush.bf16.msrb.mxu3 %v11517_v33 }
  0xf5   : > { %1857 = vmatpush.bf16.msrb.mxu2 %v11512_v51  ;;  %1819 = vmatpush.bf16.msrb.mxu1 %v11508_v1 }
  0xf6   : > { %1781 = vmatpush.bf16.msrb.mxu0 %v11504_v62 }
  0xf7   : > { %1895 = vmatpush.bf16.msrb.mxu3 %v11516_v52  ;;  %10929 = vmatmul.msk.bf16.vlgmr.msra.gmra.mxu0 %vm1205_vm0, %v13848_v25  ;;  %v11503_v25 = vld [vmem:[%s13730_s7 + $0x88] sm:$0xff] }
  0xf8   : > { %10963 = vmatmul.msk.bf16.vlgmr.msra.gmra.mxu2 %vm1205_vm0, %v13853_v31  ;;  %10946 = vmatmul.msk.bf16.vlgmr.msra.gmra.mxu1 %vm1205_vm0, %v13851_v30  ;;  %v11502_v30 = vld [vmem:[%s13730_s7 + $0x80] sm:$0xff] }
  0xf9   : > { %1858 = vmatpush.bf16.msrb.mxu2 %v11511_v56  ;;  %1820 = vmatpush.bf16.msrb.mxu1 %v11507_v2 }
  0xfa   : > { %10980 = vmatmul.msk.bf16.vlgmr.msra.gmra.mxu3 %vm1205_vm0, %v13865_v44  ;;  %1782 = vmatpush.bf16.msrb.mxu0 %v11503_v25 }
  0xfb   : > { %1896 = vmatpush.bf16.msrb.mxu3 %v11515_v57 }
  0xfd   : > { %1859 = vmatpush.bf16.msrb.mxu2 %v11510_v60  ;;  %1821 = vmatpush.bf16.msrb.mxu1 %v11506_v3 }
  0xfe   : > { %1783 = vmatpush.bf16.msrb.mxu0 %v11502_v30 }
  0xff   : > { %1897 = vmatpush.bf16.msrb.mxu3 %v11514_v61 }
 0x107   : > { %10997 = vmatmul.msk.bf16.vlgmr.msrb.gmra.mxu0 %vm1205_vm0, %v13882_v0 }
 0x108   : > { %11031 = vmatmul.msk.bf16.vlgmr.msrb.gmra.mxu2 %vm1205_vm0, %v13867_v46  ;;  %11014 = vmatmul.msk.bf16.vlgmr.msrb.gmra.mxu1 %vm1205_vm0, %v13880_v63 }
 0x10a   : > { %11048 = vmatmul.msk.bf16.vlgmr.msrb.gmra.mxu3 %vm1205_vm0, %v13873_v54 }
 0x154   : > { %v13901_v8 = vpop.f32.mrf.mxu0 }
 0x155   : > { %v13903_v9 = vpop.f32.mrf.mxu1  ;;  %v1394_v10 = vsel %vm1393_vm1, %v13901_v8, -inf }
 0x156   : > { %1395 = vmax.xlane.f32.xlu1 %v1394_v10  ;;  %v1397_v20 = vsel %vm1393_vm1, %v13903_v9, -inf }
 0x15b   : > { %v13915_v19 = vpop.f32.mrf.mxu2 }
 0x15c   : > { %v1400_v23 = vsel %vm1393_vm1, %v13915_v19, -inf  ;;  %v1223_v24 = vpop.f32.mrf.mxu0 }
 0x15d   : > { %v13923_v26 = vpop.f32.mrf.mxu3  ;;  %1401 = vmax.xlane.f32.xlu0 %v1400_v23  ;;  %v1247_v27 = vpop.f32.mrf.mxu1 }
 0x15e   : > { %1398 = vmax.xlane.f32.xlu1 %v1397_v20  ;;  %v1403_v34 = vsel %vm1393_vm1, %v13923_v26, -inf }
 0x163   : > { %v1271_v35 = vpop.f32.mrf.mxu2 }
 0x164   : > { %v13931_v36 = vpop.f32.mrf.mxu0 }
 0x165   : > { %v1295_v37 = vpop.f32.mrf.mxu3  ;;  %1404 = vmax.xlane.f32.xlu0 %v1403_v34  ;;  %v13933_v38 = vpop.f32.mrf.mxu1  ;;  %v1406_v40 = vsel %vm1393_vm1, %v13931_v36, -inf }
 0x166   : > { %v1409_v39 = vsel %vm1393_vm1, %v13933_v38, -inf }
 0x167   : > { %1410 = vmax.xlane.f32.xlu1 %v1409_v39 }
 0x16b   : > { %v13943_v41 = vpop.f32.mrf.mxu2 }
 0x16c   : > { %v1412_v42 = vsel %vm1393_vm1, %v13943_v41, -inf  ;;  %v1319_v43 = vpop.f32.mrf.mxu0 }
 0x16d   : > { %v13947_v45 = vpop.f32.mrf.mxu3  ;;  %1413 = vmax.xlane.f32.xlu2 %v1412_v42  ;;  %1407 = vmax.xlane.f32.xlu0 %v1406_v40  ;;  %v1343_v31 = vpop.f32.mrf.mxu1 }
 0x16e   : > { %v1415_v44 = vsel %vm1393_vm1, %v13947_v45, -inf }
 0x173   : > { %v1367_v47 = vpop.f32.mrf.mxu2 }
 0x174   : > { %v1633_v43 = vpop.f32.mrf.mxu0 }
 0x175   : > { %v1391_v48 = vpop.f32.mrf.mxu3  ;;  %1416 = vmax.xlane.f32.xlu2 %v1415_v44  ;;  %v1904_v44 = vpack.c.bf16 %v1633_v43, %v1633_v43  ;;  %v1671_v47 = vpop.f32.mrf.mxu1 }
 0x176   : > { %v1906_v55 = vpack.c.bf16 %v1671_v47, %v1671_v47 }
 0x177   : > { %v1924_v49 = vunpack.c.l.b16 %v1904_v44 }
 0x178   : > { %v1947_v25 = vunpack.c.l.b16 %v1906_v55 }
 0x17c   : > { %v1635_v48 = vpop.f32.mrf.mxu0 }
 0x17d   : > { %v1747_v31 = vpop.f32.mrf.mxu3  ;;  %v1905_v50 = vpack.c.bf16 %v1635_v48, %v1635_v48  ;;  %v1673_v1 = vpop.f32.mrf.mxu1 }
 0x17e   : > { %v1910_v52 = vpack.c.bf16 %v1747_v31, %v1747_v31  ;;  %v1907_v2 = vpack.c.bf16 %v1673_v1, %v1673_v1 }
 0x17f   : > { %v1925_v53 = vunpack.c.l.b16 %v1905_v50 }
 0x180   : > { %v1993_v60 = vunpack.c.l.b16 %v1910_v52 }
 0x181   : > { %v1926_v56 = vpack.c.b16 %v1925_v53, %v1924_v49 }
 0x183   : > { %1938 = vmatpush.bf16.msra.mxu0 %v1926_v56 }
 0x185   : > { %v1749_v58 = vpop.f32.mrf.mxu3 }
 0x186   : > { %v1911_v62 = vpack.c.bf16 %v1749_v58, %v1749_v58 }
 0x188   : > { %v1994_v3 = vunpack.c.l.b16 %v1911_v62 }
 0x1c9   : > { %v1396_v46 = vpop.xlane.xlu1 %1395 }
 0x1ca   : > { %v1418_v4 = vsub.f32 %v13901_v8, %v1396_v46  ;;  %v1948_v46 = vunpack.c.l.b16 %v1907_v2 }
 0x1cc   : > { %v1426_v54 = vmul.f32 1.442695, %v1418_v4 }
 0x1ce   : > { %11768 = vpow2.f32 %v1426_v54  ;;  %v1995_v54 = vpack.c.b16 %v1994_v3, %v1993_v60 }
 0x1d0   : > { %v1402_v5 = vpop.xlane.xlu0 %1401  ;;  %2007 = vmatpush.bf16.msra.mxu3 %v1995_v54 }
 0x1d1   : > { %v1420_v6 = vsub.f32 %v13915_v19, %v1402_v5  ;;  %v1399_v7 = vpop.xlane.xlu1 %1398  ;;  %v1949_v5 = vpack.c.b16 %v1948_v46, %v1947_v25 }
 0x1d2   : > { %v1419_v11 = vsub.f32 %v13903_v9, %v1399_v7  ;;  %v1899_v7 = vpop.f32.mrf.mxu3 }
 0x1d3   : > { %v1430_v10 = vmul.f32 1.442695, %v1420_v6  ;;  %1961 = vmatpush.bf16.msra.mxu1 %v1949_v5 }
 0x1d4   : > { %v13984_v12 = vpop.eup %11768  ;;  %v1428_v63 = vmul.f32 1.442695, %v1419_v11  ;;  %v1785_v11 = vpop.f32.mrf.mxu0 }
 0x1d5   : > { %11770 = vpow2.f32 %v1430_v10  ;;  %v1442_v0 = vsel %vm1393_vm1, %v13984_v12, 0.0 }
 0x1d6   : > { %1443 = vadd.xlane.f32.xlu1 %v1442_v0  ;;  %11772 = vpow2.f32 %v1428_v63  ;;  %v1823_v0 = vpop.f32.mrf.mxu1 }
 0x1d8   : > { %v1405_v13 = vpop.xlane.xlu0 %1404 }
 0x1d9   : > { %v1421_v8 = vsub.f32 %v13923_v26, %v1405_v13  ;;  %v1918_v13 = vpack.c.bf16 %v1899_v7, %v1899_v7 }
 0x1da   : > { %v1411_v9 = vpop.xlane.xlu1 %1410 }
 0x1db   : > { %v13989_v14 = vpop.eup %11770  ;;  %v1432_v15 = vmul.f32 1.442695, %v1421_v8  ;;  %v1423_v23 = vsub.f32 %v13933_v38, %v1411_v9  ;;  %v1912_v8 = vpack.c.bf16 %v1785_v11, %v1785_v11 }
 0x1dc   : > { %v1448_v16 = vsel %vm1393_vm1, %v13989_v14, 0.0  ;;  %v13993_v19 = vpop.eup %11772 }
 0x1dd   : > { %11774 = vpow2.f32 %v1432_v15  ;;  %1449 = vadd.xlane.f32.xlu2 %v1448_v16  ;;  %v1445_v27 = vsel %vm1393_vm1, %v13993_v19, 0.0  ;;  %v1436_v29 = vmul.f32 1.442695, %v1423_v23  ;;  %v1914_v15 = vpack.c.bf16 %v1823_v0, %v1823_v0  ;;  %v1901_v23 = vpop.f32.mrf.mxu3 }
 0x1e0   : > { %v1414_v17 = vpop.xlane.xlu2 %1413  ;;  %v1408_v18 = vpop.xlane.xlu0 %1407 }
 0x1e1   : > { %v1424_v20 = vsub.f32 %v13943_v41, %v1414_v17  ;;  %v1422_v21 = vsub.f32 %v13931_v36, %v1408_v18 }
 0x1e3   : > { %v13997_v22 = vpop.eup %11774  ;;  %v1438_v24 = vmul.f32 1.442695, %v1424_v20  ;;  %v1434_v26 = vmul.f32 1.442695, %v1422_v21 }
 0x1e4   : > { %v1451_v28 = vsel %vm1393_vm1, %v13997_v22, 0.0 }
 0x1e5   : > { %11776 = vpow2.f32 %v1438_v24  ;;  %1446 = vadd.xlane.f32.xlu2 %v1445_v27  ;;  %1452 = vadd.xlane.f32.xlu0 %v1451_v28  ;;  %v1787_v24 = vpop.f32.mrf.mxu0  ;;  %v2016_v27 = vunpack.c.l.b16 %v1912_v8  ;;  %v1919_v28 = vpack.c.bf16 %v1901_v23, %v1901_v23 }
 0x1e6   : > { %11778 = vpow2.f32 %v1434_v26  ;;  %v2085_v26 = vunpack.c.l.b16 %v1918_v13 }
 0x1e7   : > { %11780 = vpow2.f32 %v1436_v29  ;;  %v1913_v29 = vpack.c.bf16 %v1787_v24, %v1787_v24 }
 0x1e8   : > { %v1417_v32 = vpop.xlane.xlu2 %1416 }
 0x1e9   : > { %v1425_v33 = vsub.f32 %v13947_v45, %v1417_v32  ;;  %v1709_v45 = vpop.f32.mrf.mxu2  ;;  %v1825_v32 = vpop.f32.mrf.mxu1 }
 0x1ea   : > { %v1908_v51 = vpack.c.bf16 %v1709_v45, %v1709_v45 }
 0x1eb   : > { %v14005_v34 = vpop.eup %11776  ;;  %v1440_v35 = vmul.f32 1.442695, %v1425_v33 }
 0x1ec   : > { %v14007_v36 = vpop.eup %11778  ;;  %v1460_v37 = vsel %vm1393_vm1, %v14005_v34, 0.0  ;;  %v1970_v59 = vunpack.c.l.b16 %v1908_v51 }
 0x1ed   : > { %11782 = vpow2.f32 %v1440_v35  ;;  %1461 = vadd.xlane.f32.xlu0 %v1460_v37  ;;  %v1454_v38 = vsel %vm1393_vm1, %v14007_v36, 0.0  ;;  %v14013_v39 = vpop.eup %11780  ;;  %v2039_v35 = vunpack.c.l.b16 %v1914_v15 }
 0x1ee   : > { %1455 = vadd.xlane.f32.xlu2 %v1454_v38  ;;  %v1457_v42 = vsel %vm1393_vm1, %v14013_v39, 0.0  ;;  %v1915_v38 = vpack.c.bf16 %v1825_v32, %v1825_v32 }
 0x1f0   : > { %v2040_v31 = vunpack.c.l.b16 %v1915_v38 }
 0x1f1   : > { %v1711_v57 = vpop.f32.mrf.mxu2 }
 0x1f2   : > { %v1909_v61 = vpack.c.bf16 %v1711_v57, %v1711_v57  ;;  %v2041_v49 = vpack.c.b16 %v2040_v31, %v2039_v35 }
 0x1f3   : > { %v14015_v40 = vpop.eup %11782 }
 0x1f4   : > { %v1463_v41 = vsel %vm1393_vm1, %v14015_v40, 0.0  ;;  %v1971_v30 = vunpack.c.l.b16 %v1909_v61  ;;  %2053 = vmatpush.bf16.msrb.mxu1 %v2041_v49 }
 0x1f5   : > { %1464 = vadd.xlane.f32.xlu1 %v1463_v41  ;;  %1458 = vadd.xlane.f32.xlu0 %v1457_v42  ;;  %v2086_v41 = vunpack.c.l.b16 %v1919_v28  ;;  %v2017_v42 = vunpack.c.l.b16 %v1913_v29 }
 0x1f6   : > { %v1972_v4 = vpack.c.b16 %v1971_v30, %v1970_v59 }
 0x1f7   : > { %v2018_v44 = vpack.c.b16 %v2017_v42, %v2016_v27 }
 0x1f8   : > { %1984 = vmatpush.bf16.msra.mxu2 %v1972_v4 }
 0x1f9   : > { %v1861_v6 = vpop.f32.mrf.mxu2  ;;  %2030 = vmatpush.bf16.msrb.mxu0 %v2018_v44 }
 0x1fa   : > { %v1916_v63 = vpack.c.bf16 %v1861_v6, %v1861_v6 }
 0x1fc   : > { %v2062_v20 = vunpack.c.l.b16 %v1916_v63 }
 0x201   : > { %v1863_v17 = vpop.f32.mrf.mxu2 }
 0x202   : > { %v1917_v21 = vpack.c.bf16 %v1863_v17, %v1863_v17 }
 0x204   : > { %v2063_v37 = vunpack.c.l.b16 %v1917_v21 }
 0x206   : > { %v2064_v45 = vpack.c.b16 %v2063_v37, %v2062_v20 }
 0x208   : > { %2076 = vmatpush.bf16.msrb.mxu2 %v2064_v45 }
 0x249   : > { %v1444_v10 = vpop.xlane.xlu1 %1443 }
 0x24a   : > { %11784 = vrcp.f32 %v1444_v10 }
 0x250   : > { %v11785_v16 = vpop.eup %11784  ;;  %v1450_v9 = vpop.xlane.xlu2 %1449 }
 0x251   : > { %v1474_v18 = vmul.f32 %v11785_v16, %v13984_v12  ;;  %11786 = vrcp.f32 %v1450_v9  ;;  %v2087_v12 = vpack.c.b16 %v2086_v41, %v2085_v26 }
 0x253   : > { %v1482_v33 = vpack.c.bf16 %v1474_v18, %v1474_v18  ;;  %2099 = vmatpush.bf16.msrb.mxu3 %v2087_v12 }
 0x255   : > { %v1498_v43 = vunpack.c.l.b16 %v1482_v33 }
 0x257   : > { %v11787_v47 = vpop.eup %11786  ;;  %v1506_v48 = vpack.c.b16 %v1498_v43, %v1498_v43 }
 0x258   : > { %v1476_v50 = vmul.f32 %v11787_v47, %v13989_v14  ;;  %v1447_v51 = vpop.xlane.xlu2 %1446  ;;  %v1453_v52 = vpop.xlane.xlu0 %1452 }
 0x259   : > { %v1515_v53 = vshrl.u32 %v1506_v48, 16  ;;  %11788 = vrcp.f32 %v1447_v51  ;;  %v1518_v57 = vshll.u32 %v1506_v48, 16 }
 0x25a   : > { %v1484_v55 = vpack.c.bf16 %v1476_v50, %v1476_v50  ;;  %11790 = vrcp.f32 %v1453_v52 }
 0x25b   : > { %v1517_v56 = vrot.slane %v1515_v53, 7 }
 0x25c   : > { %v1500_v58 = vunpack.c.l.b16 %v1484_v55 }
 0x25d   : > { %v1520_v14 = vor.u32 %v1518_v57, %v1517_v56 }
 0x25e   : > { %v1508_v61 = vpack.c.b16 %v1500_v58, %v1500_v58 }
 0x25f   : > { %v11789_v62 = vpop.eup %11788  ;;  %v1581_v1 = vsel %vm14023_vm6, 0, %v1520_v14 }
 0x260   : > { %v11791_v25 = vpop.eup %11790  ;;  %v1529_v2 = vshrl.u32 %v1508_v61, 16  ;;  %v1475_v30 = vmul.f32 %v11789_v62, %v13993_v19  ;;  %v1462_v3 = vpop.xlane.xlu0 %1461  ;;  %v1592_v46 = vsel %vm14027_vm7, %v1581_v1, 0  ;;  %v1532_v7 = vshll.u32 %v1508_v61, 16 }
 0x261   : > { %v1477_v4 = vmul.f32 %v11791_v25, %v13997_v22  ;;  %v1456_v54 = vpop.xlane.xlu2 %1455  ;;  %11792 = vrcp.f32 %v1462_v3  ;;  %11049 = vmatmul.msk.bf16.vlgmr.msra.gmra.mxu0 %vm1393_vm1, %v1592_v46 }
 0x262   : > { %v1483_v5 = vpack.c.bf16 %v1475_v30, %v1475_v30  ;;  %11794 = vrcp.f32 %v1456_v54  ;;  %v1531_v6 = vrot.slane %v1529_v2, 7 }
 0x263   : > { %v1485_v10 = vpack.c.bf16 %v1477_v4, %v1477_v4 }
 0x264   : > { %v1499_v11 = vunpack.c.l.b16 %v1483_v5  ;;  %v1534_v0 = vor.u32 %v1532_v7, %v1531_v6 }
 0x265   : > { %v1501_v63 = vunpack.c.l.b16 %v1485_v10 }
 0x266   : > { %v1507_v13 = vpack.c.b16 %v1499_v11, %v1499_v11  ;;  %v1583_v19 = vsel %vm14023_vm6, 0, %v1534_v0 }
 0x267   : > { %v11793_v8 = vpop.eup %11792  ;;  %v1509_v15 = vpack.c.b16 %v1501_v63, %v1501_v63  ;;  %v1594_v22 = vsel %vm14027_vm7, %v1583_v19, 0 }
 0x268   : > { %v11795_v16 = vpop.eup %11794  ;;  %v1522_v9 = vshrl.u32 %v1507_v13, 16  ;;  %v1480_v17 = vmul.f32 %v11793_v8, %v14005_v34  ;;  %11051 = vmatmul.msk.bf16.vlgmr.msra.gmra.mxu2 %vm1393_vm1, %v1594_v22  ;;  %v1465_v18 = vpop.xlane.xlu1 %1464  ;;  %v1525_v27 = vshll.u32 %v1507_v13, 16  ;;  %v1920_v13 = vld [vmem:[#allocation9] sm:$0xff] }
 0x269   : > { %v1459_v20 = vpop.xlane.xlu0 %1458  ;;  %v1536_v21 = vshrl.u32 %v1509_v15, 16  ;;  %v1478_v23 = vmul.f32 %v11795_v16, %v14007_v36  ;;  %11796 = vrcp.f32 %v1465_v18  ;;  %v1539_v32 = vshll.u32 %v1509_v15, 16  ;;  %v1921_v15 = vld [vmem:[#allocation9 + $0x8] sm:$0xff] }
 0x26a   : > { %v1488_v24 = vpack.c.bf16 %v1480_v17, %v1480_v17  ;;  %11798 = vrcp.f32 %v1459_v20  ;;  %v1524_v26 = vrot.slane %v1522_v9, 7 }
 0x26b   : > { %v1486_v28 = vpack.c.bf16 %v1478_v23, %v1478_v23  ;;  %v1538_v29 = vrot.slane %v1536_v21, 7 }
 0x26c   : > { %v1504_v33 = vunpack.c.l.b16 %v1488_v24  ;;  %v1527_v35 = vor.u32 %v1525_v27, %v1524_v26 }
 0x26d   : > { %v1502_v37 = vunpack.c.l.b16 %v1486_v28  ;;  %v1541_v38 = vor.u32 %v1539_v32, %v1538_v29 }
 0x26e   : > { %v1512_v34 = vpack.c.b16 %v1504_v33, %v1504_v33  ;;  %v1582_v41 = vsel %vm14023_vm6, 0, %v1527_v35 }
 0x26f   : > { %v11797_v42 = vpop.eup %11796  ;;  %v1510_v43 = vpack.c.b16 %v1502_v37, %v1502_v37  ;;  %v1593_v36 = vsel %vm14027_vm7, %v1582_v41, 0  ;;  %v1584_v45 = vsel %vm14023_vm6, 0, %v1541_v38 }
 0x270   : > { %v11799_v31 = vpop.eup %11798  ;;  %v1557_v12 = vshrl.u32 %v1512_v34, 16  ;;  %v1481_v44 = vmul.f32 %v11797_v42, %v14015_v40  ;;  %11050 = vmatmul.msk.bf16.vlgmr.msra.gmra.mxu1 %vm1393_vm1, %v1593_v36  ;;  %v1595_v47 = vsel %vm14027_vm7, %v1584_v45, 0  ;;  %v1560_v52 = vshll.u32 %v1512_v34, 16 }
 0x271   : > { %v1543_v48 = vshrl.u32 %v1510_v43, 16  ;;  %v1479_v49 = vmul.f32 %v11799_v31, %v14013_v39  ;;  %11052 = vmatmul.msk.bf16.vlgmr.msra.gmra.mxu3 %vm1393_vm1, %v1595_v47  ;;  %v1546_v53 = vshll.u32 %v1510_v43, 16 }
 0x272   : > { %v1489_v50 = vpack.c.bf16 %v1481_v44, %v1481_v44  ;;  %v1559_v51 = vrot.slane %v1557_v12, 7 }
 0x273   : > { %v1487_v55 = vpack.c.bf16 %v1479_v49, %v1479_v49  ;;  %v1545_v56 = vrot.slane %v1543_v48, 7 }
 0x274   : > { %v1505_v57 = vunpack.c.l.b16 %v1489_v50  ;;  %v1562_v58 = vor.u32 %v1560_v52, %v1559_v51 }
 0x275   : > { %v1503_v14 = vunpack.c.l.b16 %v1487_v55  ;;  %v1548_v40 = vor.u32 %v1546_v53, %v1545_v56 }
 0x276   : > { %v1513_v61 = vpack.c.b16 %v1505_v57, %v1505_v57  ;;  %v1587_v62 = vsel %vm14023_vm6, 0, %v1562_v58 }
 0x277   : > { %v1511_v1 = vpack.c.b16 %v1503_v14, %v1503_v14  ;;  %v1585_v39 = vsel %vm14023_vm6, 0, %v1548_v40  ;;  %v1598_v25 = vsel %vm14027_vm7, %v1587_v62, 0 }
 0x278   : > { %v1564_v2 = vshrl.u32 %v1513_v61, 16  ;;  %v1596_v30 = vsel %vm14027_vm7, %v1585_v39, 0  ;;  %11055 = vmatmul.msk.bf16.vlgmr.msrb.gmra.mxu2 %vm1393_vm1, %v1598_v25  ;;  %v1567_v46 = vshll.u32 %v1513_v61, 16 }
 0x279   : > { %v1550_v3 = vshrl.u32 %v1511_v1, 16  ;;  %11053 = vmatmul.msk.bf16.vlgmr.msrb.gmra.mxu0 %vm1393_vm1, %v1596_v30  ;;  %v1553_v54 = vshll.u32 %v1511_v1, 16 }
 0x27a   : > { %v1566_v4 = vrot.slane %v1564_v2, 7 }
 0x27b   : > { %v1552_v5 = vrot.slane %v1550_v3, 7 }
 0x27c   : > { %v1569_v6 = vor.u32 %v1567_v46, %v1566_v4 }
 0x27d   : > { %v1555_v7 = vor.u32 %v1553_v54, %v1552_v5 }
 0x27e   : > { %v1588_v10 = vsel %vm14023_vm6, 0, %v1569_v6 }
 0x27f   : > { %v1586_v11 = vsel %vm14023_vm6, 0, %v1555_v7  ;;  %v1599_v0 = vsel %vm14027_vm7, %v1588_v10, 0 }
 0x280   : > { %v1597_v63 = vsel %vm14027_vm7, %v1586_v11, 0 }
 0x281   : > { %11054 = vmatmul.msk.bf16.vlgmr.msrb.gmra.mxu1 %vm1393_vm1, %v1597_v63  ;;  %11056 = vmatmul.msk.bf16.vlgmr.msrb.gmra.mxu3 %vm1393_vm1, %v1599_v0 }
 0x2de   : > { %v1940_v19 = vpop.f32.mrf.mxu0 }
 0x2df   : > { %v1941_v8 = vadd.f32 %v1940_v19, %v1920_v13 }
 0x2e1   : > { %2106 = vst [vmem:[#allocation2 + $0x30] sm:$0xff] %v1941_v8 }
 0x2e6   : > { %v1942_v22 = vpop.f32.mrf.mxu0 }
 0x2e7   : > { %v1943_v16 = vadd.f32 %v1942_v22, %v1921_v15 }
 0x2e9   : > { %2107 = vst [vmem:[#allocation2] sm:$0xff] %v1943_v16 }
 0x2eb   : > { %v1986_v59 = vpop.f32.mrf.mxu2 }
 0x2ec   : > { %v1987_v9 = vadd.f32 %v1986_v59, %v1920_v13 }
 0x2ed   : > { %v1963_v17 = vpop.f32.mrf.mxu1 }
 0x2ee   : > { %2110 = vst [vmem:[#allocation2 + $0x50] sm:$0xff] %v1987_v9  ;;  %v1964_v18 = vadd.f32 %v1963_v17, %v1920_v13 }
 0x2f0   : > { %2108 = vst [vmem:[#allocation2 + $0x58] sm:$0xff] %v1964_v18 }
 0x2f3   : > { %v1988_v60 = vpop.f32.mrf.mxu2 }
 0x2f4   : > { %v1989_v20 = vadd.f32 %v1988_v60, %v1921_v15  ;;  %v2009_v21 = vpop.f32.mrf.mxu3 }
 0x2f5   : > { %v2010_v23 = vadd.f32 %v2009_v21, %v1920_v13  ;;  %v1965_v24 = vpop.f32.mrf.mxu1 }
 0x2f6   : > { %2111 = vst [vmem:[#allocation2 + $0x68] sm:$0xff] %v1989_v20  ;;  %v1966_v26 = vadd.f32 %v1965_v24, %v1921_v15  ;;  %v2032_v27 = vpop.f32.mrf.mxu0 }
 0x2f7   : > { %2112 = vst [vmem:[#allocation2 + $0x8] sm:$0xff] %v2010_v23  ;;  %v2033_v28 = vadd.f32 %v2032_v27, %v1920_v13 }
 0x2f8   : > { %2109 = vst [vmem:[#allocation2 + $0x18] sm:$0xff] %v1966_v26 }
 0x2f9   : > { %2114 = vst [vmem:[#allocation2 + $0x40] sm:$0xff] %v2033_v28 }
 0x2fb   : > { %v2078_v29 = vpop.f32.mrf.mxu2 }
 0x2fc   : > { %v2011_v32 = vpop.f32.mrf.mxu3  ;;  %v2079_v33 = vadd.f32 %v2078_v29, %v1920_v13 }
 0x2fd   : > { %v2012_v35 = vadd.f32 %v2011_v32, %v1921_v15 }
 0x2fe   : > { %2118 = vst [vmem:[#allocation2 + $0x60] sm:$0xff] %v2079_v33  ;;  %v2034_v37 = vpop.f32.mrf.mxu0  ;;  %v2055_v38 = vpop.f32.mrf.mxu1 }
 0x2ff   : > { %2113 = vst [vmem:[#allocation2 + $0x48] sm:$0xff] %v2012_v35  ;;  %v2035_v34 = vadd.f32 %v2034_v37, %v1921_v15  ;;  %v2056_v41 = vadd.f32 %v2055_v38, %v1920_v13 }
 0x301   : > { %2115 = vst [vmem:[#allocation2 + $0x20] sm:$0xff] %v2035_v34 }
 0x302   : > { %2116 = vst [vmem:[#allocation2 + $0x10] sm:$0xff] %v2056_v41 }
 0x303   : > { %v2080_v42 = vpop.f32.mrf.mxu2 }
 0x304   : > { %v2081_v43 = vadd.f32 %v2080_v42, %v1921_v15  ;;  %v2101_v36 = vpop.f32.mrf.mxu3 }
 0x305   : > { %v2102_v45 = vadd.f32 %v2101_v36, %v1920_v13 }
 0x306   : > { %2119 = vst [vmem:[#allocation2 + $0x70] sm:$0xff] %v2081_v43  ;;  %v2057_v31 = vpop.f32.mrf.mxu1 }
 0x307   : > { %2120 = vst [vmem:[#allocation2 + $0x78] sm:$0xff] %v2102_v45  ;;  %v2058_v12 = vadd.f32 %v2057_v31, %v1921_v15 }
 0x309   : > { %2117 = vst [vmem:[#allocation2 + $0x38] sm:$0xff] %v2058_v12 }
 0x30c   : > { %v2103_v44 = vpop.f32.mrf.mxu3 }
 0x30d   : > { %v2104_v47 = vadd.f32 %v2103_v44, %v1921_v15 }
 0x30f   : > { %2121 = vst [vmem:[#allocation2 + $0x28] sm:$0xff] %v2104_v47 }
 0x310 PF: > { %v14077_v48 = vld [vmem:[#allocation2 + $0x50] sm:$0xff]  ;;  %v2124_v49 = vld [vmem:[#allocation2 + $0x58] sm:$0xff]  ;;  %v2127_v51 = vld [vmem:[#allocation2 + $0x68] sm:$0xff]  ;;  %v13325_v25 = vmov 128.0   ;;  %s19227_s5 = scalar_lea.vmem [#allocation11], %s13737_s2  ;;  %s19230_s6 = scalar_lea.vmem [#allocation12], %s13737_s2 }
 0x311   : > { %v2122_v50 = vld [vmem:[#allocation2 + $0x30] sm:$0xff]  ;;  %2148 = vadd.xlane.f32.xlu2 %v14077_v48  ;;  %2144 = vadd.xlane.f32.xlu1 %v2124_v49  ;;  %v2125_v52 = vld [vmem:[#allocation2 + $0x18] sm:$0xff]  ;;  %v2123_v53 = vld [vmem:[#allocation2] sm:$0xff]  ;;  %12086 = vrcp.f32 %v13325_v25  ;;  %s13326_s8 = smov 96   ;;  %s13327_s14 = smov 112  }
 0x312   : > { %2140 = vadd.xlane.f32.xlu0 %v2122_v50  ;;  %v2130_v55 = vld [vmem:[#allocation2 + $0x40] sm:$0xff]  ;;  %v14080_v56 = vld [vmem:[#allocation2 + $0x48] sm:$0xff]  ;;  %v14083_v58 = vld [vmem:[#allocation2 + $0x38] sm:$0xff]  ;;  %s13328_s27 = smov 64   ;;  %s13330_s7 = smov 80  }
 0x313   : > { %v2128_v57 = vld [vmem:[#allocation2 + $0x8] sm:$0xff]  ;;  %v14085_v14 = vld [vmem:[#allocation2 + $0x10] sm:$0xff]  ;;  %v14087_v40 = vld [vmem:[#allocation2 + $0x20] sm:$0xff]  ;;  %s13331_s1 = smov 16   ;;  %s19757_s0 = scalar_lea.vmem [#allocation16], %s13737_s2 }
 0x314   : > { %v14092_v61 = vld [vmem:[#allocation2 + $0x78] sm:$0xff]  ;;  %v14094_v62 = vld [vmem:[#allocation2 + $0x70] sm:$0xff]  ;;  %v14096_v1 = vld [vmem:[#allocation2 + $0x60] sm:$0xff]  ;;  %s19758_s3 = scalar_lea.vmem [#allocation17], %s13737_s2 }
 0x316   : > { %v14101_v39 = vld [vmem:[#allocation2 + $0x28] sm:$0xff] }
 0x317   : > { %v12087_v2 = vpop.eup %12086 }
 0x318   : > { %v2173_v30 = vmul.f32 128.0, %v12087_v2  ;;  %vm2177_vm8 = vweird.f32 %v12087_v2 }
 0x319   : > { %2150 = vadd.xlane.f32.xlu2 %v2127_v51  ;;  %2146 = vadd.xlane.f32.xlu1 %v2125_v52 }
 0x31a   : > { %2142 = vadd.xlane.f32.xlu0 %v2123_v53  ;;  %v2174_v3 = vsub.f32 1.0, %v2173_v30 }
 0x31c   : > { %v2175_v46 = vmul.f32 %v12087_v2, %v2174_v3 }
 0x31e   : > { %v2176_v4 = vadd.f32 %v12087_v2, %v2175_v46 }
 0x320   : > { %v14104_v54 = vsel %vm2177_vm8, %v12087_v2, %v2176_v4 }
 0x321   : > { %2156 = vadd.xlane.f32.xlu2 %v2130_v55  ;;  %2154 = vadd.xlane.f32.xlu1 %v14080_v56  ;;  %19220 = vst [vmem:[#allocation52_spill] sm:$0xff] %v14104_v54 }
 0x322   : > { %2152 = vadd.xlane.f32.xlu0 %v2128_v57 }
 0x329   : > { %2162 = vadd.xlane.f32.xlu2 %v14083_v58  ;;  %2160 = vadd.xlane.f32.xlu1 %v14085_v14 }
 0x32a   : > { %2158 = vadd.xlane.f32.xlu0 %v14087_v40 }
 0x331   : > { %2168 = vadd.xlane.f32.xlu2 %v14092_v61  ;;  %2166 = vadd.xlane.f32.xlu1 %v14094_v62 }
 0x332   : > { %2164 = vadd.xlane.f32.xlu0 %v14096_v1 }
 0x33a   : > { %2170 = vadd.xlane.f32.xlu0 %v14101_v39 }
 0x384   : > { %v2149_v5 = vpop.xlane.xlu2 %2148  ;;  %v2145_v6 = vpop.xlane.xlu1 %2144 }
 0x385   : > { %v2181_v7 = vmul.f32 %v14104_v54, %v2145_v6  ;;  %v2141_v10 = vpop.xlane.xlu0 %2140  ;;  %v2183_v60 = vmul.f32 %v14104_v54, %v2149_v5 }
 0x386   : > { %v2179_v11 = vmul.f32 %v14104_v54, %v2141_v10  ;;  %v11143_v10 = vld [vmem:[%s13754_s30 + $0xa8] sm:$0xf] }
 0x387   : > { %v14108_v0 = vsub.f32 %v2124_v49, %v2181_v7  ;;  %v14133_v27 = vsub.f32 %v14077_v48, %v2183_v60 }
 0x388   : > { %v14110_v63 = vsub.f32 %v2122_v50, %v2179_v11  ;;  %v11539_v11 = vld [vmem:[%s13754_s30 + $0xac] sm:$0xf] }
 0x389   : > { %v2213_v13 = vmul.f32 %v14108_v0, %v14108_v0  ;;  %v2215_v37 = vmul.f32 %v14133_v27, %v14133_v27 }
 0x38a   : > { %v2211_v19 = vmul.f32 %v14110_v63, %v14110_v63 }
 0x38b   : > { %2231 = vadd.xlane.f32.xlu0 %v2213_v13 }
 0x38c   : > { %2227 = vadd.xlane.f32.xlu1 %v2211_v19  ;;  %v2151_v8 = vpop.xlane.xlu2 %2150  ;;  %v2147_v15 = vpop.xlane.xlu1 %2146  ;;  %v11145_v19 = vld [vmem:[%s13754_s30 + $0xb4] sm:$0xf0] }
 0x38d   : > { %v2184_v22 = vmul.f32 %v14104_v54, %v2151_v8  ;;  %v2182_v16 = vmul.f32 %v14104_v54, %v2147_v15  ;;  %v2143_v59 = vpop.xlane.xlu0 %2142  ;;  %v11151_v8 = vld [vmem:[%s13754_s30 + $0xb0] sm:$0xf]  ;;  %v11541_v15 = vld [vmem:[%s13754_s30 + $0xb8] sm:$0xf0] }
 0x38e   : > { %v2180_v9 = vmul.f32 %v14104_v54, %v2143_v59  ;;  %v11537_v59 = vld [vmem:[%s13754_s30 + $0x98] sm:$0xf0] }
 0x38f   : > { %v14119_v17 = vsub.f32 %v2127_v51, %v2184_v22  ;;  %v14121_v18 = vsub.f32 %v2125_v52, %v2182_v16  ;;  %v11152_v22 = vor.u32 %v11541_v15, %v11151_v8  ;;  %v11131_v16 = vld [vmem:[%s13754_s30 + $0x90] sm:$0xf] }
 0x390   : > { %v14124_v20 = vsub.f32 %v2123_v53, %v2180_v9  ;;  %v11536_v9 = vld [vmem:[%s13754_s30 + $0x94] sm:$0xf]  ;;  %v11132_v60 = vor.u32 %v11537_v59, %v11131_v16  ;;  %v11071_v59 = vld [vmem:[%s13754_s30 + $0x18] sm:$0xf] }
 0x391   : > { %v2216_v21 = vmul.f32 %v14119_v17, %v14119_v17  ;;  %v2214_v23 = vmul.f32 %v14121_v18, %v14121_v18  ;;  %2779 = vmatpush.bf16.msra.mxu2 %v11152_v22 }
 0x392   : > { %v2212_v24 = vmul.f32 %v14124_v20, %v14124_v20 }
 0x393   : > { %2237 = vadd.xlane.f32.xlu0 %v2216_v21  ;;  %v11133_v21 = vld [vmem:[%s13754_s30 + $0x9c] sm:$0xf0] }
 0x394   : > { %2233 = vadd.xlane.f32.xlu1 %v2214_v23  ;;  %2229 = vadd.xlane.f32.xlu2 %v2212_v24  ;;  %v2157_v26 = vpop.xlane.xlu2 %2156  ;;  %v2155_v28 = vpop.xlane.xlu1 %2154  ;;  %v11139_v23 = vld [vmem:[%s13754_s30 + $0x98] sm:$0xf]  ;;  %v11538_v24 = vld [vmem:[%s13754_s30 + $0xa0] sm:$0xf0] }
 0x395   : > { %v2187_v29 = vmul.f32 %v14104_v54, %v2157_v26  ;;  %v2153_v32 = vpop.xlane.xlu0 %2152  ;;  %v2186_v34 = vmul.f32 %v14104_v54, %v2155_v28  ;;  %v11136_v26 = vor.u32 %v11536_v9, %v11133_v21  ;;  %v11140_v28 = vor.u32 %v11538_v24, %v11139_v23  ;;  %v11522_v9 = vld [vmem:[%s13754_s30 + $0x20] sm:$0xf0]  ;;  %v11073_v24 = vld [vmem:[%s13754_s30 + $0x24] sm:$0xf0] }
 0x396   : > { %v2185_v33 = vmul.f32 %v14104_v54, %v2153_v32  ;;  %v11534_v32 = vld [vmem:[%s13754_s30 + $0x80] sm:$0xf0]  ;;  %v11072_v23 = vor.u32 %v11522_v9, %v11071_v59 }
 0x397   : > { %v14137_v35 = vsub.f32 %v2130_v55, %v2187_v29  ;;  %v14149_v36 = vsub.f32 %v14080_v56, %v2186_v34  ;;  %2780 = vmatpush.bf16.msra.mxu2 %v11140_v28  ;;  %v11119_v29 = vld [vmem:[%s13754_s30 + $0x78] sm:$0xf]  ;;  %v11121_v34 = vld [vmem:[%s13754_s30 + $0x84] sm:$0xf0]  ;;  %v11523_v28 = vld [vmem:[%s13754_s30 + $0x28] sm:$0xf0] }
 0x398   : > { %v14141_v38 = vsub.f32 %v2128_v57, %v2185_v33  ;;  %v11533_v33 = vld [vmem:[%s13754_s30 + $0x7c] sm:$0xf] }
 0x399   : > { %v2219_v41 = vmul.f32 %v14137_v35, %v14137_v35  ;;  %v2218_v48 = vmul.f32 %v14149_v36, %v14149_v36 }
 0x39a   : > { %v2217_v42 = vmul.f32 %v14141_v38, %v14141_v38 }
 0x39b   : > { %2243 = vadd.xlane.f32.xlu0 %v2219_v41  ;;  %v11127_v41 = vld [vmem:[%s13754_s30 + $0x80] sm:$0xf] }
 0x39c   : > { %2235 = vadd.xlane.f32.xlu2 %v2215_v37  ;;  %2239 = vadd.xlane.f32.xlu1 %v2217_v42  ;;  %v2163_v43 = vpop.xlane.xlu2 %2162  ;;  %v2161_v45 = vpop.xlane.xlu1 %2160  ;;  %v11120_v37 = vor.u32 %v11534_v32, %v11119_v29  ;;  %v11535_v42 = vld [vmem:[%s13754_s30 + $0x88] sm:$0xf0] }
 0x39d   : > { %v2190_v31 = vmul.f32 %v14104_v54, %v2163_v43  ;;  %v2159_v12 = vpop.xlane.xlu0 %2158  ;;  %v2189_v50 = vmul.f32 %v14104_v54, %v2161_v45  ;;  %v11124_v43 = vor.u32 %v11533_v33, %v11121_v34  ;;  %v11128_v45 = vor.u32 %v11535_v42, %v11127_v41 }
 0x39e   : > { %v2188_v44 = vmul.f32 %v14104_v54, %v2159_v12  ;;  %v11531_v12 = vld [vmem:[%s13754_s30 + $0x68] sm:$0xf0] }
 0x39f   : > { %v14154_v47 = vsub.f32 %v14083_v58, %v2190_v31  ;;  %v14167_v55 = vsub.f32 %v14085_v14, %v2189_v50  ;;  %2781 = vmatpush.bf16.msra.mxu2 %v11128_v45  ;;  %v11107_v31 = vld [vmem:[%s13754_s30 + $0x60] sm:$0xf]  ;;  %v11109_v50 = vld [vmem:[%s13754_s30 + $0x6c] sm:$0xf0] }
 0x3a0   : > { %v14159_v49 = vsub.f32 %v14087_v40, %v2188_v44  ;;  %v11530_v44 = vld [vmem:[%s13754_s30 + $0x64] sm:$0xf]  ;;  %v11059_v45 = vld [vmem:[%s13754_s30] sm:$0xf] }
 0x3a1   : > { %v2222_v51 = vmul.f32 %v14154_v47, %v14154_v47  ;;  %v2221_v2 = vmul.f32 %v14167_v55, %v14167_v55 }
 0x3a2   : > { %v2220_v52 = vmul.f32 %v14159_v49, %v14159_v49 }
 0x3a3   : > { %2249 = vadd.xlane.f32.xlu0 %v2222_v51  ;;  %v11115_v51 = vld [vmem:[%s13754_s30 + $0x68] sm:$0xf] }
 0x3a4   : > { %2241 = vadd.xlane.f32.xlu2 %v2218_v48  ;;  %2245 = vadd.xlane.f32.xlu1 %v2220_v52  ;;  %v2169_v53 = vpop.xlane.xlu2 %2168  ;;  %v2167_v58 = vpop.xlane.xlu1 %2166  ;;  %v11108_v48 = vor.u32 %v11531_v12, %v11107_v31  ;;  %v11532_v52 = vld [vmem:[%s13754_s30 + $0x70] sm:$0xf0]  ;;  %v11519_v31 = vld [vmem:[%s13754_s30 + $0x8] sm:$0xf0]  ;;  %v11518_v12 = vld [vmem:[%s13754_s30 + $0x4] sm:$0xf] }
 0x3a5   : > { %v2193_v56 = vmul.f32 %v14104_v54, %v2169_v53  ;;  %v2165_v57 = vpop.xlane.xlu0 %2164  ;;  %v2192_v14 = vmul.f32 %v14104_v54, %v2167_v58  ;;  %v11112_v53 = vor.u32 %v11530_v44, %v11109_v50  ;;  %v11528_v58 = vld [vmem:[%s13754_s30 + $0x50] sm:$0xf0]  ;;  %v11060_v50 = vor.u32 %v11519_v31, %v11059_v45 }
 0x3a6   : > { %v2191_v40 = vmul.f32 %v14104_v54, %v2165_v57  ;;  %v11095_v57 = vld [vmem:[%s13754_s30 + $0x48] sm:$0xf] }
 0x3a7   : > { %v14172_v25 = vsub.f32 %v14092_v61, %v2193_v56  ;;  %v14185_v61 = vsub.f32 %v14094_v62, %v2192_v14  ;;  %v11540_v62 = vld [vmem:[%s13754_s30 + $0xb0] sm:$0xf0]  ;;  %v11116_v56 = vor.u32 %v11532_v52, %v11115_v51  ;;  %v11097_v14 = vld [vmem:[%s13754_s30 + $0x54] sm:$0xf0]  ;;  %v11061_v51 = vld [vmem:[%s13754_s30 + $0xc] sm:$0xf0] }
 0x3a8   : > { %v14177_v30 = vsub.f32 %v14096_v1, %v2191_v40  ;;  %v11144_v13 = vor.u32 %v11540_v62, %v11143_v10  ;;  %v11527_v40 = vld [vmem:[%s13754_s30 + $0x4c] sm:$0xf]  ;;  %v11524_v10 = vld [vmem:[%s13754_s30 + $0x34] sm:$0xf]  ;;  %v11067_v52 = vld [vmem:[%s13754_s30 + $0x8] sm:$0xf] }
 0x3a9   : > { %v2225_v3 = vmul.f32 %v14172_v25, %v14172_v25  ;;  %v2224_v5 = vmul.f32 %v14185_v61, %v14185_v61  ;;  %2782 = vmatpush.bf16.msra.mxu2 %v11116_v56 }
 0x3aa   : > { %v2223_v46 = vmul.f32 %v14177_v30, %v14177_v30  ;;  %2681 = vmatpush.bf16.msra.mxu0 %v11144_v13  ;;  %v11091_v13 = vld [vmem:[%s13754_s30 + $0x38] sm:$0xf] }
 0x3ab   : > { %2255 = vadd.xlane.f32.xlu0 %v2225_v3  ;;  %v11103_v3 = vld [vmem:[%s13754_s30 + $0x50] sm:$0xf] }
 0x3ac   : > { %2247 = vadd.xlane.f32.xlu2 %v2221_v2  ;;  %2251 = vadd.xlane.f32.xlu1 %v2223_v46  ;;  %v11096_v2 = vor.u32 %v11528_v58, %v11095_v57  ;;  %v11529_v46 = vld [vmem:[%s13754_s30 + $0x58] sm:$0xf0]  ;;  %v11064_v58 = vor.u32 %v11518_v12, %v11061_v51 }
 0x3ad   : > { %v2171_v1 = vpop.xlane.xlu0 %2170 }
 0x3ae   : > { %v2194_v4 = vmul.f32 %v14104_v54, %v2171_v1  ;;  %2682 = vmatpush.bf16.msra.mxu0 %v11132_v60  ;;  %v11100_v1 = vor.u32 %v11527_v40, %v11097_v14  ;;  %v11521_v60 = vld [vmem:[%s13754_s30 + $0x1c] sm:$0xf] }
 0x3af   : > { %v11076_v32 = vor.u32 %v11521_v60, %v11073_v24 }
 0x3b0   : > { %v14191_v6 = vsub.f32 %v14101_v39, %v2194_v4  ;;  %v11148_v39 = vor.u32 %v11539_v11, %v11145_v19  ;;  %v11104_v4 = vor.u32 %v11529_v46, %v11103_v3  ;;  %v11085_v11 = vld [vmem:[%s13754_s30 + $0x3c] sm:$0xf0]  ;;  %v11526_v19 = vld [vmem:[%s13754_s30 + $0x40] sm:$0xf0] }
 0x3b1   : > { %v11088_v8 = vor.u32 %v11524_v10, %v11085_v11  ;;  %v11092_v15 = vor.u32 %v11526_v19, %v11091_v13 }
 0x3b2   : > { %v2226_v7 = vmul.f32 %v14191_v6, %v14191_v6  ;;  %2730 = vmatpush.bf16.msra.mxu1 %v11148_v39  ;;  %2683 = vmatpush.bf16.msra.mxu0 %v11120_v37 }
 0x3b3   : > { %2783 = vmatpush.bf16.msra.mxu2 %v11104_v4 }
 0x3b4   : > { %2253 = vadd.xlane.f32.xlu2 %v2224_v5  ;;  %2257 = vadd.xlane.f32.xlu1 %v2226_v7  ;;  %v11083_v5 = vld [vmem:[%s13754_s30 + $0x30] sm:$0xf]  ;;  %v11525_v7 = vld [vmem:[%s13754_s30 + $0x38] sm:$0xf0] }
 0x3b5   : > { %v11084_v62 = vor.u32 %v11525_v7, %v11083_v5 }
 0x3b6   : > { %2731 = vmatpush.bf16.msra.mxu1 %v11136_v26  ;;  %2684 = vmatpush.bf16.msra.mxu0 %v11108_v48  ;;  %v11079_v26 = vld [vmem:[%s13754_s30 + $0x20] sm:$0xf] }
 0x3b7   : > { %2784 = vmatpush.bf16.msra.mxu2 %v11092_v15  ;;  %v11080_v33 = vor.u32 %v11523_v28, %v11079_v26 }
 0x3ba   : > { %2732 = vmatpush.bf16.msra.mxu1 %v11124_v43  ;;  %2685 = vmatpush.bf16.msra.mxu0 %v11096_v2 }
 0x3bb   : > { %2785 = vmatpush.bf16.msra.mxu2 %v11080_v33 }
 0x3be   : > { %2733 = vmatpush.bf16.msra.mxu1 %v11112_v53  ;;  %2686 = vmatpush.bf16.msra.mxu0 %v11084_v62  ;;  %v11520_v53 = vld [vmem:[%s13754_s30 + $0x10] sm:$0xf0]  ;;  %s13332_s30 = smov 32  }
 0x3bf   : > { %v11068_v40 = vor.u32 %v11520_v53, %v11067_v52 }
 0x3c1   : > { %2786 = vmatpush.bf16.msra.mxu2 %v11068_v40 }
 0x3c2   : > { %2734 = vmatpush.bf16.msra.mxu1 %v11100_v1  ;;  %2687 = vmatpush.bf16.msra.mxu0 %v11072_v23 }
 0x3c6   : > { %2735 = vmatpush.bf16.msra.mxu1 %v11088_v8  ;;  %2688 = vmatpush.bf16.msra.mxu0 %v11060_v50 }
 0x3ca   : > { %2736 = vmatpush.bf16.msra.mxu1 %v11076_v32 }
 0x3ce   : > { %2737 = vmatpush.bf16.msra.mxu1 %v11064_v58 }
 0x3fe   : > { %v2232_v39 = vpop.xlane.xlu0 %2231 }
 0x3ff   : > { %v2228_v22 = vpop.xlane.xlu1 %2227  ;;  %v2261_v16 = vmul.f32 %v2232_v39, %v14104_v54 }
 0x400   : > { %v2259_v21 = vmul.f32 %v2228_v22, %v14104_v54 }
 0x401   : > { %v14239_v29 = vadd.f32 1e-05, %v2261_v16 }
 0x402   : > { %v14241_v37 = vadd.f32 1e-05, %v2259_v21 }
 0x403   : > { %12088 = vrsqrt.f32 %v14239_v29  ;;  %vm2317_vm10 = vweird.f32 %v14239_v29 }
 0x404   : > { %12090 = vrsqrt.f32 %v14241_v37  ;;  %vm2297_vm9 = vweird.f32 %v14241_v37 }
 0x406   : > { %v2238_v34 = vpop.xlane.xlu0 %2237 }
 0x407   : > { %v2234_v41 = vpop.xlane.xlu1 %2233  ;;  %v2230_v42 = vpop.xlane.xlu2 %2229  ;;  %v2264_v43 = vmul.f32 %v2238_v34, %v14104_v54 }
 0x408   : > { %v2262_v44 = vmul.f32 %v2234_v41, %v14104_v54  ;;  %v2260_v48 = vmul.f32 %v2230_v42, %v14104_v54 }
 0x409   : > { %v14254_v56 = vpop.eup %12088  ;;  %v14256_v57 = vadd.f32 1e-05, %v2264_v43 }
 0x40a   : > { %v14258_v2 = vpop.eup %12090  ;;  %v14260_v14 = vadd.f32 1e-05, %v2262_v44  ;;  %v2276_v3 = vadd.f32 1e-05, %v2260_v48  ;;  %v2312_v4 = vmul.f32 %v14254_v56, %v14239_v29  ;;  %vm2318_vm13 = vweird.f32 %v14254_v56 }
 0x40b   : > { %v2292_v46 = vmul.f32 %v14258_v2, %v14241_v37  ;;  %12092 = vrsqrt.f32 %v14256_v57  ;;  %vm2298_vm11 = vweird.f32 %v14258_v2  ;;  %vm14323_vm1 = vmor %vm2317_vm10, %vm2318_vm13  ;;  %vm2347_vm2 = vweird.f32 %v14256_v57 }
 0x40c   : > { %12094 = vrsqrt.f32 %v14260_v14  ;;  %v2313_v8 = vmul.f32 %v14254_v56, %v2312_v4  ;;  %vm14307_vm14 = vmor %vm2297_vm9, %vm2298_vm11  ;;  %vm2307_vm15 = vweird.f32 %v2276_v3  ;;  %vm2327_vm3 = vweird.f32 %v14260_v14 }
 0x40d   : > { %v2293_v1 = vmul.f32 %v14258_v2, %v2292_v46  ;;  %12096 = vrsqrt.f32 %v2276_v3 }
 0x40e   : > { %v2244_v5 = vpop.xlane.xlu0 %2243  ;;  %v2314_v21 = vmul.f32 0.5, %v2313_v8 }
 0x40f   : > { %v2236_v7 = vpop.xlane.xlu2 %2235  ;;  %v2240_v10 = vpop.xlane.xlu1 %2239  ;;  %v2267_v62 = vmul.f32 %v2244_v5, %v14104_v54  ;;  %v2294_v19 = vmul.f32 0.5, %v2293_v1 }
 0x410   : > { %v2263_v11 = vmul.f32 %v2236_v7, %v14104_v54  ;;  %v2265_v26 = vmul.f32 %v2240_v10, %v14104_v54  ;;  %v2315_v31 = vsub.f32 1.5, %v2314_v21 }
 0x411   : > { %v14271_v13 = vpop.eup %12092  ;;  %v14280_v59 = vadd.f32 1e-05, %v2267_v62  ;;  %v2295_v60 = vsub.f32 1.5, %v2294_v19 }
 0x412   : > { %v14274_v15 = vpop.eup %12094  ;;  %v14276_v39 = vadd.f32 1e-05, %v2263_v11  ;;  %v2342_v16 = vmul.f32 %v14271_v13, %v14256_v57  ;;  %v14297_v50 = vadd.f32 1e-05, %v2265_v26  ;;  %v2316_v4 = vmul.f32 %v14254_v56, %v2315_v31 }
 0x413   : > { %v12097_v22 = vpop.eup %12096  ;;  %v2322_v23 = vmul.f32 %v14274_v15, %v14260_v14  ;;  %v2296_v45 = vmul.f32 %v14258_v2, %v2295_v60  ;;  %vm2348_vm4 = vweird.f32 %v14271_v13  ;;  %vm2328_vm5 = vweird.f32 %v14274_v15 }
 0x414   : > { %v2302_v9 = vmul.f32 %v12097_v22, %v2276_v3  ;;  %12098 = vrsqrt.f32 %v14276_v39  ;;  %v2343_v32 = vmul.f32 %v14271_v13, %v2342_v16  ;;  %vm2308_vm12 = vweird.f32 %v12097_v22  ;;  %vm14368_vm6 = vmor %vm2347_vm2, %vm2348_vm4 }
 0x415   : > { %12100 = vrsqrt.f32 %v14280_v59  ;;  %v2323_v44 = vmul.f32 %v14274_v15, %v2322_v23  ;;  %v2300_v1 = vsel %vm14307_vm14, %v14258_v2, %v2296_v45  ;;  %vm14317_vm0 = vmor %vm2307_vm15, %vm2308_vm12  ;;  %v2320_v21 = vsel %vm14323_vm1, %v14254_v56, %v2316_v4 }
 0x416   : > { %v2303_v24 = vmul.f32 %v12097_v22, %v2302_v9  ;;  %v2250_v28 = vpop.xlane.xlu0 %2249  ;;  %v2344_v52 = vmul.f32 0.5, %v2343_v32  ;;  %v2451_v16 = vmul.f32 %v2300_v1, %v14110_v63  ;;  %v14342_v9 = vld [vmem:[%s19227_s5] ss:$0 sm:$0xff]  ;;  %vm2337_vm7 = vweird.f32 %v14276_v39  ;;  %vm14398_vm10 = vmor %vm2327_vm3, %vm2328_vm5 }
 0x417   : > { %v2242_v33 = vpop.xlane.xlu2 %2241  ;;  %v2246_v34 = vpop.xlane.xlu1 %2245  ;;  %v2270_v41 = vmul.f32 %v2250_v28, %v14104_v54  ;;  %v2324_v3 = vmul.f32 0.5, %v2323_v44  ;;  %v14377_v45 = vmul.f32 %v2320_v21, %v14108_v0  ;;  %vm2377_vm8 = vweird.f32 %v14280_v59 }
 0x418   : > { %v2304_v42 = vmul.f32 0.5, %v2303_v24  ;;  %v2268_v43 = vmul.f32 %v2246_v34, %v14104_v54  ;;  %v2345_v10 = vsub.f32 1.5, %v2344_v52  ;;  %v2266_v19 = vmul.f32 %v2242_v33, %v14104_v54  ;;  %v14388_v52 = vld [vmem:[%s19230_s6] ss:$0 sm:$0xff] }
 0x419   : > { %v14294_v12 = vadd.f32 1e-05, %v2270_v41  ;;  %v2325_v24 = vsub.f32 1.5, %v2324_v3 }
 0x41a   : > { %v2305_v48 = vsub.f32 1.5, %v2304_v42  ;;  %v14299_v51 = vpop.eup %12098  ;;  %v14302_v53 = vadd.f32 1e-05, %v2268_v43  ;;  %v14357_v32 = vmul.f32 %v14271_v13, %v2345_v10  ;;  %v14373_v42 = vadd.f32 1e-05, %v2266_v19 }
 0x41b   : > { %12102 = vrsqrt.f32 %v14294_v12  ;;  %v14311_v46 = vpop.eup %12100  ;;  %v2332_v2 = vmul.f32 %v14299_v51, %v14276_v39  ;;  %v2470_v43 = vmul.f32 %v14342_v9, %v2451_v16  ;;  %v2326_v58 = vmul.f32 %v14274_v15, %v2325_v24 }
 0x41c   : > { %v2306_v40 = vmul.f32 %v12097_v22, %v2305_v48  ;;  %12104 = vrsqrt.f32 %v14297_v50  ;;  %v2372_v29 = vmul.f32 %v14311_v46, %v14280_v59  ;;  %vm2407_vm9 = vweird.f32 %v14294_v12 }
 0x41d   : > { %12106 = vrsqrt.f32 %v14302_v53  ;;  %v2333_v63 = vmul.f32 %v14299_v51, %v2332_v2  ;;  %v2350_v4 = vsel %vm14368_vm6, %v14271_v13, %v14357_v32  ;;  %vm2338_vm11 = vweird.f32 %v14299_v51 }
 0x41e   : > { %v2310_v7 = vsel %vm14317_vm0, %v12097_v22, %v2306_v40  ;;  %v2256_v28 = vpop.xlane.xlu0 %2255  ;;  %v2373_v56 = vmul.f32 %v14311_v46, %v2372_v29  ;;  %v2489_v29 = vadd.f32 %v14388_v52, %v2470_v43  ;;  %v2330_v19 = vsel %vm14398_vm10, %v14274_v15, %v2326_v58  ;;  %vm14451_vm15 = vmor %vm2337_vm7, %vm2338_vm11 }
 0x41f   : > { %v2248_v62 = vpop.xlane.xlu2 %2247  ;;  %v2252_v11 = vpop.xlane.xlu1 %2251  ;;  %v2452_v23 = vmul.f32 %v2310_v7, %v14124_v20  ;;  %v2273_v57 = vmul.f32 %v2256_v28, %v14104_v54  ;;  %v2334_v40 = vmul.f32 0.5, %v2333_v63  ;;  %vm2378_vm12 = vweird.f32 %v14311_v46 }
 0x420   : > { %v2269_v8 = vmul.f32 %v2248_v62, %v14104_v54  ;;  %v2271_v22 = vmul.f32 %v2252_v11, %v14104_v54  ;;  %v2374_v5 = vmul.f32 0.5, %v2373_v56  ;;  %vm2387_vm13 = vweird.f32 %v14302_v53  ;;  %vm14463_vm2 = vmor %vm2377_vm8, %vm2378_vm12 }
 0x421   : > { %v14344_v60 = vpop.eup %12102  ;;  %v2471_v48 = vmul.f32 %v14342_v9, %v2452_v23  ;;  %v14412_v10 = vadd.f32 1e-05, %v2273_v57  ;;  %v2454_v57 = vmul.f32 %v2330_v19, %v14121_v18  ;;  %vm2367_vm6 = vweird.f32 %v14373_v42 }
 0x422   : > { %v2402_v26 = vmul.f32 %v14344_v60, %v14294_v12  ;;  %v14360_v33 = vadd.f32 1e-05, %v2269_v8  ;;  %v14362_v34 = vadd.f32 1e-05, %v2271_v22  ;;  %v14364_v20 = vpop.eup %12104  ;;  %v2335_v8 = vsub.f32 1.5, %v2334_v40 }
 0x423   : > { %v14379_v31 = vpop.eup %12106  ;;  %v2352_v7 = vmul.f32 %v14364_v20, %v14297_v50  ;;  %v2490_v62 = vadd.f32 %v14388_v52, %v2471_v48  ;;  %v2375_v23 = vsub.f32 1.5, %v2374_v5  ;;  %vm2408_vm14 = vweird.f32 %v14344_v60 }
 0x424   : > { %v2403_v44 = vmul.f32 %v14344_v60, %v2402_v26  ;;  %12108 = vrsqrt.f32 %v14360_v33  ;;  %v2382_v0 = vmul.f32 %v14379_v31, %v14302_v53  ;;  %v14441_v58 = vmul.f32 %v14299_v51, %v2335_v8  ;;  %vm14477_vm3 = vmor %vm2407_vm9, %vm2408_vm14 }
 0x425   : > { %12110 = vrsqrt.f32 %v14362_v34  ;;  %v2505_v24 = vpack.c.bf16 %v2490_v62, %v2489_v29  ;;  %v14426_v63 = vmul.f32 %v14364_v20, %v2352_v7  ;;  %v2376_v18 = vmul.f32 %v14311_v46, %v2375_v23 }
 0x426   : > { %12112 = vrsqrt.f32 %v14373_v42  ;;  %v2383_v14 = vmul.f32 %v14379_v31, %v2382_v0  ;;  %v2404_v2 = vmul.f32 0.5, %v2403_v44  ;;  %vm2388_vm0 = vweird.f32 %v14379_v31 }
 0x427   : > { %v2254_v37 = vpop.xlane.xlu2 %2253  ;;  %v2258_v3 = vpop.xlane.xlu1 %2257  ;;  %12114 = vrsqrt.f32 %v14412_v10  ;;  %2689 = vmatmul.bf16.vlgmr.msra.gmra.mxu0 %v2505_v24  ;;  %2738 = vmatmul.bf16.vlgmr.msra.gmra.mxu1 %v2505_v24  ;;  %vm2397_vm1 = vweird.f32 %v14360_v33  ;;  %v2473_v29 = vmul.f32 %v14342_v9, %v2454_v57  ;;  %vm14491_vm5 = vmor %vm2387_vm13, %vm2388_vm0  ;;  %vm2417_vm7 = vweird.f32 %v14362_v34 }
 0x428   : > { %v2272_v11 = vmul.f32 %v2254_v37, %v14104_v54  ;;  %v2384_v22 = vmul.f32 0.5, %v2383_v14  ;;  %v2274_v16 = vmul.f32 %v2258_v3, %v14104_v54  ;;  %v2405_v26 = vsub.f32 1.5, %v2404_v2  ;;  %2787 = vmatmul.bf16.vlgmr.msra.gmra.mxu2 %v2505_v24 }
 0x429   : > { %v2472_v2 = vmul.f32 %v14342_v9, %v14377_v45  ;;  %v2340_v45 = vsel %vm14451_vm15, %v14299_v51, %v14441_v58  ;;  %v2492_v51 = vadd.f32 %v14388_v52, %v2473_v29  ;;  %vm2437_vm10 = vweird.f32 %v14412_v10 }
 0x42a   : > { %v14421_v21 = vpop.eup %12108  ;;  %v2385_v56 = vsub.f32 1.5, %v2384_v22  ;;  %v14433_v43 = vadd.f32 1e-05, %v2272_v11  ;;  %v14435_v44 = vadd.f32 1e-05, %v2274_v16  ;;  %v2406_v39 = vmul.f32 %v14344_v60, %v2405_v26 }
 0x42b   : > { %v2392_v15 = vmul.f32 %v14421_v21, %v14360_v33  ;;  %v14431_v28 = vpop.eup %12110  ;;  %vm2398_vm4 = vweird.f32 %v14421_v21  ;;  %v2380_v22 = vsel %vm14463_vm2, %v14311_v46, %v2376_v18  ;;  %v2491_v33 = vadd.f32 %v14388_v52, %v2472_v2 }
 0x42c   : > { %v14438_v48 = vpop.eup %12112  ;;  %v2412_v0 = vmul.f32 %v14431_v28, %v14362_v34  ;;  %12116 = vrsqrt.f32 %v14433_v43  ;;  %v2386_v14 = vmul.f32 %v14379_v31, %v2385_v56  ;;  %vm2418_vm8 = vweird.f32 %v14431_v28  ;;  %vm14509_vm9 = vmor %vm2397_vm1, %vm2398_vm4 }
 0x42d   : > { %v2393_v40 = vmul.f32 %v14421_v21, %v2392_v15  ;;  %12118 = vrsqrt.f32 %v14435_v44  ;;  %v14470_v7 = vpop.eup %12114  ;;  %v2362_v62 = vmul.f32 %v14438_v48, %v14373_v42  ;;  %v2410_v15 = vsel %vm14477_vm3, %v14344_v60, %v2406_v39  ;;  %vm14533_vm12 = vmor %vm2417_vm7, %vm2418_vm8 }
 0x42e   : > { %v2413_v3 = vmul.f32 %v14431_v28, %v2412_v0  ;;  %v2432_v8 = vmul.f32 %v14470_v7, %v14412_v10  ;;  %v2390_v46 = vsel %vm14491_vm5, %v14379_v31, %v2386_v14  ;;  %vm2438_vm11 = vweird.f32 %v14470_v7 }
 0x42f   : > { %v2394_v37 = vmul.f32 0.5, %v2393_v40  ;;  %vm2427_vm13 = vweird.f32 %v14433_v43  ;;  %vm2447_vm14 = vweird.f32 %v14435_v44  ;;  %v2506_v5 = vpack.c.bf16 %v2492_v51, %v2491_v33  ;;  %vm14542_vm0 = vmor %vm2437_vm10, %vm2438_vm11 }
 0x430   : > { %v2414_v19 = vmul.f32 0.5, %v2413_v3  ;;  %v2433_v24 = vmul.f32 %v14470_v7, %v2432_v8  ;;  %v2459_v39 = vmul.f32 %v2380_v22, %v14137_v35  ;;  %v2363_v35 = vmul.f32 %v14438_v48, %v2362_v62 }
 0x431   : > { %v2395_v11 = vsub.f32 1.5, %v2394_v37  ;;  %v2460_v37 = vmul.f32 %v2390_v46, %v14159_v49  ;;  %v2455_v51 = vmul.f32 %v2340_v45, %v14133_v27  ;;  %v2456_v27 = vmul.f32 %v2350_v4, %v14119_v17 }
 0x432   : > { %v2415_v23 = vsub.f32 1.5, %v2414_v19  ;;  %v12117_v26 = vpop.eup %12116  ;;  %v2434_v58 = vmul.f32 0.5, %v2433_v24  ;;  %v2478_v29 = vmul.f32 %v14342_v9, %v2459_v39  ;;  %v2364_v33 = vmul.f32 0.5, %v2363_v35 }
 0x433   : > { %v2396_v53 = vmul.f32 %v14421_v21, %v2395_v11  ;;  %v12119_v56 = vpop.eup %12118  ;;  %v2422_v40 = vmul.f32 %v12117_v26, %v14433_v43  ;;  %vm2428_vm15 = vweird.f32 %v12117_v26  ;;  %v2479_v12 = vmul.f32 %v14342_v9, %v2460_v37 }
 0x434   : > { %v2416_v57 = vmul.f32 %v14431_v28, %v2415_v23  ;;  %v2442_v0 = vmul.f32 %v12119_v56, %v14435_v44  ;;  %v2435_v1 = vsub.f32 1.5, %v2434_v58  ;;  %vm2448_vm1 = vweird.f32 %v12119_v56  ;;  %vm14564_vm2 = vmor %vm2427_vm13, %vm2428_vm15 }
 0x435   : > { %v2400_v31 = vsel %vm14509_vm9, %v14421_v21, %v2396_v53  ;;  %v2423_v18 = vmul.f32 %v12117_v26, %v2422_v40  ;;  %v2462_v11 = vmul.f32 %v2410_v15, %v14154_v47  ;;  %v2497_v47 = vadd.f32 %v14388_v52, %v2478_v29  ;;  %vm14574_vm3 = vmor %vm2447_vm14, %vm2448_vm1 }
 0x436   : > { %v2443_v34 = vmul.f32 %v12119_v56, %v2442_v0  ;;  %v2420_v3 = vsel %vm14533_vm12, %v14431_v28, %v2416_v57  ;;  %v2436_v14 = vmul.f32 %v14470_v7, %v2435_v1  ;;  %v2461_v2 = vmul.f32 %v2400_v31, %v14167_v55 }
 0x437   : > { %v2424_v59 = vmul.f32 0.5, %v2423_v18  ;;  %2694 = vmatmul.bf16.gmra.mxu0 %v2506_v5  ;;  %2743 = vmatmul.bf16.gmra.mxu1 %v2506_v5  ;;  %v2498_v62 = vadd.f32 %v14388_v52, %v2479_v12  ;;  %v2481_v22 = vmul.f32 %v14342_v9, %v2462_v11  ;;  %v2463_v16 = vmul.f32 %v2420_v3, %v14177_v30 }
 0x438   : > { %v2444_v10 = vmul.f32 0.5, %v2443_v34  ;;  %v2440_v49 = vsel %vm14542_vm0, %v14470_v7, %v2436_v14  ;;  %v2480_v28 = vmul.f32 %v14342_v9, %v2461_v2  ;;  %2792 = vmatmul.bf16.gmra.mxu2 %v2506_v5  ;;  %v2354_v45 = vmul.f32 0.5, %v14426_v63 }
 0x439   : > { %v2425_v19 = vsub.f32 1.5, %v2424_v59  ;;  %v2465_v23 = vmul.f32 %v2440_v49, %v14172_v25  ;;  %v2509_v46 = vpack.c.bf16 %v2498_v62, %v2497_v47  ;;  %v2500_v15 = vadd.f32 %v14388_v52, %v2481_v22 }
 0x43a   : > { %v2445_v8 = vsub.f32 1.5, %v2444_v10  ;;  %v2499_v43 = vadd.f32 %v14388_v52, %v2480_v28  ;;  %v2482_v57 = vmul.f32 %v14342_v9, %v2463_v16  ;;  %v2365_v41 = vsub.f32 1.5, %v2364_v33 }
 0x43b   : > { %v2426_v7 = vmul.f32 %v12117_v26, %v2425_v19  ;;  %v2484_v58 = vmul.f32 %v14342_v9, %v2465_v23  ;;  %v2475_v17 = vmul.f32 %v14342_v9, %v2456_v27  ;;  %vm2368_vm4 = vweird.f32 %v14438_v48 }
 0x43c   : > { %v2446_v24 = vmul.f32 %v12119_v56, %v2445_v8  ;;  %v2510_v25 = vpack.c.bf16 %v2500_v15, %v2499_v43  ;;  %vm2357_vm5 = vweird.f32 %v14297_v50  ;;  %vm2358_vm7 = vweird.f32 %v14364_v20  ;;  %vm2369_vm8 = vmor %vm2367_vm6, %vm2368_vm4 }
 0x43d   : > { %v2430_v44 = vsel %vm14564_vm2, %v12117_v26, %v2426_v7  ;;  %v2501_v26 = vadd.f32 %v14388_v52, %v2482_v57  ;;  %v2503_v60 = vadd.f32 %v14388_v52, %v2484_v58  ;;  %v2366_v63 = vmul.f32 %v14438_v48, %v2365_v41  ;;  %vm2359_vm9 = vmor %vm2357_vm5, %vm2358_vm7 }
 0x43e   : > { %v2450_v40 = vsel %vm14574_vm3, %v12119_v56, %v2446_v24  ;;  %v2464_v30 = vmul.f32 %v2430_v44, %v14185_v61  ;;  %v2474_v56 = vmul.f32 %v14342_v9, %v2455_v51  ;;  %v2355_v61 = vsub.f32 1.5, %v2354_v45 }
 0x43f   : > { %v2466_v31 = vmul.f32 %v2450_v40, %v14191_v6  ;;  %v2494_v5 = vadd.f32 %v14388_v52, %v2475_v17  ;;  %v2370_v34 = vsel %vm2369_vm8, %v14438_v48, %v2366_v63  ;;  %vm3474_vm10 = vcmask 130048  }
 0x440   : > { %v2483_v0 = vmul.f32 %v14342_v9, %v2464_v30  ;;  %v2493_v32 = vadd.f32 %v14388_v52, %v2474_v56  ;;  %v2356_v21 = vmul.f32 %v14364_v20, %v2355_v61  ;;  %v2458_v50 = vmul.f32 %v2370_v34, %v14149_v36 }
 0x441   : > { %v2485_v1 = vmul.f32 %v14342_v9, %v2466_v31  ;;  %vm8930_vm12 = vcmask 261120   ;;  %vm8947_vm13 = vcmask 392192   ;;  %vm8964_vm14 = vcmask 523264  }
 0x442   : > { %v2502_v13 = vadd.f32 %v14388_v52, %v2483_v0  ;;  %v2507_v42 = vpack.c.bf16 %v2494_v5, %v2493_v32  ;;  %v2360_v39 = vsel %vm2359_vm9, %v14364_v20, %v2356_v21  ;;  %v2477_v3 = vmul.f32 %v14342_v9, %v2458_v50 }
 0x443   : > { %v2504_v6 = vadd.f32 %v14388_v52, %v2485_v1  ;;  %v2457_v37 = vmul.f32 %v2360_v39, %v14141_v38  ;;  %v2545_v38 = vld [vmem:[%s13832_s9] sm:$0x7]  ;;  %s13329_s9 = smov 48   ;;  %vm8981_vm15 = vcmask 654336   ;;  %vm8998_vm0 = vcmask 785408  }
 0x444   : > { %v2511_v4 = vpack.c.bf16 %v2502_v13, %v2501_v26  ;;  %v2496_v59 = vadd.f32 %v14388_v52, %v2477_v3  ;;  %v14623_v36 = vperm.slane %v2545_v38, 0  ;;  %v14634_v28 = vperm.slane %v2545_v38, 2 }
 0x445   : > { %v2512_v18 = vpack.c.bf16 %v2504_v6, %v2503_v60  ;;  %v2476_v14 = vmul.f32 %v14342_v9, %v2457_v37  ;;  %v14625_v9 = vperm.slane %v2545_v38, 1  ;;  %vm9015_vm1 = vcmask 916480  }
 0x447   : > { %2699 = vmatmul.bf16.gmra.mxu0 %v2507_v42  ;;  %2748 = vmatmul.bf16.gmra.mxu1 %v2507_v42  ;;  %v2495_v2 = vadd.f32 %v14388_v52, %v2476_v14 }
 0x448   : > { %2797 = vmatmul.bf16.gmra.mxu2 %v2507_v42 }
 0x449   : > { %v2508_v10 = vpack.c.bf16 %v2496_v59, %v2495_v2 }
 0x457   : > { %2704 = vmatmul.bf16.gmra.mxu0 %v2508_v10  ;;  %2753 = vmatmul.bf16.gmra.mxu1 %v2508_v10 }
 0x458   : > { %2802 = vmatmul.bf16.gmra.mxu2 %v2508_v10 }
 0x467   : > { %2709 = vmatmul.bf16.gmra.mxu0 %v2509_v46  ;;  %2758 = vmatmul.bf16.gmra.mxu1 %v2509_v46 }
 0x468   : > { %2807 = vmatmul.bf16.gmra.mxu2 %v2509_v46 }
 0x477   : > { %2714 = vmatmul.bf16.gmra.mxu0 %v2510_v25  ;;  %2763 = vmatmul.bf16.gmra.mxu1 %v2510_v25 }
 0x478   : > { %2812 = vmatmul.bf16.gmra.mxu2 %v2510_v25 }
 0x487   : > { %2719 = vmatmul.bf16.gmra.mxu0 %v2511_v4  ;;  %2768 = vmatmul.bf16.gmra.mxu1 %v2511_v4 }
 0x488   : > { %2817 = vmatmul.bf16.gmra.mxu2 %v2511_v4 }
 0x497   : > { %2724 = vmatmul.bf16.gmra.mxu0 %v2512_v18  ;;  %2773 = vmatmul.bf16.gmra.mxu1 %v2512_v18 }
 0x498   : > { %2822 = vmatmul.bf16.gmra.mxu2 %v2512_v18 }
 0x4a4   : > { %v2690_v20 = vpop.f32.mrf.mxu0  ;;  %v2739_v52 = vpop.f32.mrf.mxu1 }
 0x4a5   : > { %v2691_v48 = vadd.f32 %v2690_v20, %v14623_v36  ;;  %v2740_v29 = vadd.f32 %v2739_v52, %v14625_v9 }
 0x4a7   : > { %v2828_v12 = vpack.c.bf16 %v2740_v29, %v2691_v48 }
 0x4a9   : > { %2908 = vrot.lane.b32.xlu0 %v2828_v12, %s13326_s8  ;;  %2876 = vrot.lane.b32.xlu2 %v2828_v12, %s13327_s14  ;;  %v3100_v8 = vrot.slane %v2828_v12, 4  ;;  %v3468_v57 = vunpack.c.l.b16 %v2828_v12 }
 0x4aa   : > { %2972 = vrot.lane.b32.xlu1 %v2828_v12, %s13328_s27 }
 0x4ab   : > { %v2788_v47 = vpop.f32.mrf.mxu2  ;;  %v3471_v7 = vunpack.c.l.b16 %v3100_v8 }
 0x4ac   : > { %v2692_v11 = vpop.f32.mrf.mxu0  ;;  %v2741_v35 = vpop.f32.mrf.mxu1  ;;  %v2789_v22 = vadd.f32 %v2788_v47, %v14634_v28 }
 0x4ad   : > { %v2693_v49 = vadd.f32 %v2692_v11, %v14623_v36  ;;  %v2742_v19 = vadd.f32 %v2741_v35, %v14625_v9 }
 0x4ae   : > { %v14643_v24 = vpack.c.bf16 %v2789_v22, %v2789_v22 }
 0x4af   : > { %v14636_v55 = vpack.c.bf16 %v2742_v19, %v2693_v49 }
 0x4b0   : > { %19251 = vst [vmem:[#allocation53_spill] sm:$0xff] %v14643_v24 }
 0x4b1   : > { %3004 = vrot.lane.b32.xlu0 %v2828_v12, %s13329_s9  ;;  %2940 = vrot.lane.b32.xlu2 %v2828_v12, %s13330_s7  ;;  %v3101_v62 = vrot.slane %v14636_v55, 4  ;;  %v3469_v33 = vunpack.c.l.b16 %v14636_v55 }
 0x4b2   : > { %3068 = vrot.lane.b32.xlu1 %v2828_v12, %s13331_s1 }
 0x4b3   : > { %v3472_v53 = vunpack.c.l.b16 %v3101_v62  ;;  %v3470_v30 = vpack.c.b16 %v3469_v33, %v3468_v57  ;;  %v2790_v6 = vpop.f32.mrf.mxu2 }
 0x4b4   : > { %v2695_v43 = vpop.f32.mrf.mxu0  ;;  %v2744_v16 = vpop.f32.mrf.mxu1  ;;  %v2791_v18 = vadd.f32 %v2790_v6, %v14634_v28 }
 0x4b5   : > { %v3473_v23 = vpack.c.b16 %v3472_v53, %v3471_v7  ;;  %v2696_v51 = vadd.f32 %v2695_v43, %v14623_v36  ;;  %v2745_v46 = vadd.f32 %v2744_v16, %v14625_v9 }
 0x4b6   : > { %v14689_v3 = vpack.c.bf16 %v2791_v18, %v2791_v18 }
 0x4b7   : > { %v3479_v15 = vsel %vm3474_vm10, %v3473_v23, 0  ;;  %v14654_v44 = vpack.c.bf16 %v2745_v46, %v2696_v51 }
 0x4b8   : > { %3488 = vmatpush.bf16.xpose.msrb.mxu1 %v3479_v15 }
 0x4b9   : > { %3244 = vrot.lane.b32.xlu0 %v14643_v24, %s13327_s14  ;;  %3036 = vrot.lane.b32.xlu2 %v2828_v12, %s13332_s30  ;;  %v3102_v26 = vrot.slane %v14654_v44, 4  ;;  %v3495_v63 = vunpack.c.l.b16 %v14654_v44 }
 0x4ba   : > { %3308 = vrot.lane.b32.xlu1 %v14643_v24, %s13330_s7 }
 0x4bb   : > { %v3498_v60 = vunpack.c.l.b16 %v3102_v26  ;;  %v2793_v57 = vpop.f32.mrf.mxu2 }
 0x4bc   : > { %v2697_v58 = vpop.f32.mrf.mxu0  ;;  %v2746_v40 = vpop.f32.mrf.mxu1 }
 0x4bd   : > { %v2698_v27 = vadd.f32 %v2697_v58, %v14623_v36  ;;  %v2747_v25 = vadd.f32 %v2746_v40, %v14625_v9  ;;  %v2794_v40 = vadd.f32 %v2793_v57, %v14634_v28 }
 0x4bf   : > { %v14658_v45 = vpack.c.bf16 %v2747_v25, %v2698_v27  ;;  %11153 = vmatmul.msk.bf16.vlgmr.msrb.gmra.mxu1 %vm3474_vm10, %v3470_v30 }
 0x4c1   : > { %3340 = vrot.lane.b32.xlu0 %v14643_v24, %s13328_s27  ;;  %3276 = vrot.lane.b32.xlu2 %v14643_v24, %s13326_s8  ;;  %v3103_v31 = vrot.slane %v14658_v45, 4  ;;  %v3496_v32 = vunpack.c.l.b16 %v14658_v45 }
 0x4c2   : > { %2942 = vrot.lane.b32.xlu1 %v14636_v55, %s13330_s7 }
 0x4c3   : > { %v3499_v56 = vunpack.c.l.b16 %v3103_v31  ;;  %v3497_v39 = vpack.c.b16 %v3496_v32, %v3495_v63 }
 0x4c4   : > { %v2700_v0 = vpop.f32.mrf.mxu0  ;;  %v2749_v41 = vpop.f32.mrf.mxu1 }
 0x4c5   : > { %v3500_v1 = vpack.c.b16 %v3499_v56, %v3498_v60  ;;  %v2701_v17 = vadd.f32 %v2700_v0, %v14623_v36  ;;  %v2750_v13 = vadd.f32 %v2749_v41, %v14625_v9  ;;  %v14740_v0 = vpack.c.bf16 %v2794_v40, %v2794_v40 }
 0x4c7   : > { %v3505_v61 = vsel %vm3474_vm10, %v3500_v1, 0  ;;  %v14679_v4 = vpack.c.bf16 %v2750_v13, %v2701_v17 }
 0x4c8   : > { %3514 = vmatpush.bf16.xpose.msra.mxu3 %v3505_v61 }
 0x4c9   : > { %2878 = vrot.lane.b32.xlu0 %v14636_v55, %s13327_s14  ;;  %2910 = vrot.lane.b32.xlu2 %v14636_v55, %s13326_s8  ;;  %v3104_v37 = vrot.slane %v14679_v4, 4  ;;  %v3521_v35 = vunpack.c.l.b16 %v14679_v4 }
 0x4ca   : > { %3038 = vrot.lane.b32.xlu1 %v14636_v55, %s13332_s30 }
 0x4cb   : > { %v3524_v59 = vunpack.c.l.b16 %v3104_v37 }
 0x4cc   : > { %v2702_v5 = vpop.f32.mrf.mxu0  ;;  %v2751_v21 = vpop.f32.mrf.mxu1 }
 0x4cd   : > { %v2703_v42 = vadd.f32 %v2702_v5, %v14623_v36  ;;  %v2752_v34 = vadd.f32 %v2751_v21, %v14625_v9 }
 0x4cf   : > { %v14685_v50 = vpack.c.bf16 %v2752_v34, %v2703_v42  ;;  %11154 = vmatmul.msk.bf16.vlgmr.msra.gmra.mxu3 %vm3474_vm10, %v3497_v39 }
 0x4d1   : > { %2974 = vrot.lane.b32.xlu0 %v14636_v55, %s13328_s27  ;;  %3006 = vrot.lane.b32.xlu2 %v14636_v55, %s13329_s9  ;;  %v3105_v14 = vrot.slane %v14685_v50, 4  ;;  %v3522_v12 = vunpack.c.l.b16 %v14685_v50 }
 0x4d2   : > { %3278 = vrot.lane.b32.xlu1 %v14689_v3, %s13326_s8 }
 0x4d3   : > { %v3525_v2 = vunpack.c.l.b16 %v3105_v14  ;;  %v3523_v62 = vpack.c.b16 %v3522_v12, %v3521_v35 }
 0x4d4   : > { %v2705_v10 = vpop.f32.mrf.mxu0  ;;  %v2754_v38 = vpop.f32.mrf.mxu1 }
 0x4d5   : > { %v3526_v20 = vpack.c.b16 %v3525_v2, %v3524_v59  ;;  %v2706_v52 = vadd.f32 %v2705_v10, %v14623_v36  ;;  %v2755_v48 = vadd.f32 %v2754_v38, %v14625_v9 }
 0x4d7   : > { %v3531_v29 = vsel %vm3474_vm10, %v3526_v20, 0  ;;  %v14708_v11 = vpack.c.bf16 %v2755_v48, %v2706_v52  ;;  %v2795_v20 = vpop.f32.mrf.mxu2 }
 0x4d8   : > { %3540 = vmatpush.bf16.xpose.msrb.mxu3 %v3531_v29  ;;  %v2796_v35 = vadd.f32 %v2795_v20, %v14634_v28 }
 0x4d9   : > { %3070 = vrot.lane.b32.xlu0 %v14636_v55, %s13331_s1  ;;  %3246 = vrot.lane.b32.xlu2 %v14689_v3, %s13327_s14  ;;  %v3106_v22 = vrot.slane %v14708_v11, 4  ;;  %v3547_v25 = vunpack.c.l.b16 %v14708_v11 }
 0x4da   : > { %2880 = vrot.lane.b32.xlu1 %v14654_v44, %s13327_s14 }
 0x4db   : > { %v3550_v53 = vunpack.c.l.b16 %v3106_v22 }
 0x4dc   : > { %v2707_v49 = vpop.f32.mrf.mxu0  ;;  %v2756_v19 = vpop.f32.mrf.mxu1 }
 0x4dd   : > { %v2708_v8 = vadd.f32 %v2707_v49, %v14623_v36  ;;  %v2757_v47 = vadd.f32 %v2756_v19, %v14625_v9 }
 0x4df   : > { %v14713_v55 = vpack.c.bf16 %v2757_v47, %v2708_v8  ;;  %11155 = vmatmul.msk.bf16.vlgmr.msrb.gmra.mxu3 %vm3474_vm10, %v3523_v62 }
 0x4e1   : > { %3310 = vrot.lane.b32.xlu0 %v14689_v3, %s13330_s7  ;;  %2976 = vrot.lane.b32.xlu2 %v14654_v44, %s13328_s27  ;;  %v3107_v7 = vrot.slane %v14713_v55, 4  ;;  %v3548_v58 = vunpack.c.l.b16 %v14713_v55 }
 0x4e2   : > { %2912 = vrot.lane.b32.xlu1 %v14654_v44, %s13326_s8 }
 0x4e3   : > { %v3551_v43 = vunpack.c.l.b16 %v3107_v7  ;;  %v3549_v56 = vpack.c.b16 %v3548_v58, %v3547_v25  ;;  %v14785_v7 = vpack.c.bf16 %v2796_v35, %v2796_v35 }
 0x4e4   : > { %v2710_v16 = vpop.f32.mrf.mxu0  ;;  %v2759_v23 = vpop.f32.mrf.mxu1 }
 0x4e5   : > { %v3552_v51 = vpack.c.b16 %v3551_v43, %v3550_v53  ;;  %v2711_v46 = vadd.f32 %v2710_v16, %v14623_v36  ;;  %v2760_v15 = vadd.f32 %v2759_v23, %v14625_v9 }
 0x4e7   : > { %v3557_v33 = vsel %vm3474_vm10, %v3552_v51, 0  ;;  %v14735_v27 = vpack.c.bf16 %v2760_v15, %v2711_v46 }
 0x4e8   : > { %3566 = vmatpush.bf16.xpose.msra.mxu3 %v3557_v33 }
 0x4e9   : > { %3072 = vrot.lane.b32.xlu2 %v14654_v44, %s13331_s1  ;;  %2944 = vrot.lane.b32.xlu0 %v14654_v44, %s13330_s7  ;;  %v3108_v1 = vrot.slane %v14735_v27, 4  ;;  %v3573_v34 = vunpack.c.l.b16 %v14735_v27 }
 0x4ea   : > { %3008 = vrot.lane.b32.xlu1 %v14654_v44, %s13329_s9 }
 0x4eb   : > { %v3576_v13 = vunpack.c.l.b16 %v3108_v1 }
 0x4ec   : > { %v2712_v30 = vpop.f32.mrf.mxu0  ;;  %v2761_v26 = vpop.f32.mrf.mxu1 }
 0x4ed   : > { %v2713_v31 = vadd.f32 %v2712_v30, %v14623_v36  ;;  %v2762_v60 = vadd.f32 %v2761_v26, %v14625_v9 }
 0x4ef   : > { %v14742_v41 = vpack.c.bf16 %v2762_v60, %v2713_v31  ;;  %11156 = vmatmul.msk.bf16.vlgmr.msra.gmra.mxu3 %vm3474_vm10, %v3549_v56 }
 0x4f1   : > { %3312 = vrot.lane.b32.xlu2 %v14740_v0, %s13330_s7  ;;  %3040 = vrot.lane.b32.xlu0 %v14654_v44, %s13332_s30  ;;  %v3109_v17 = vrot.slane %v14742_v41, 4  ;;  %v3574_v44 = vunpack.c.l.b16 %v14742_v41 }
 0x4f2   : > { %3248 = vrot.lane.b32.xlu1 %v14740_v0, %s13327_s14 }
 0x4f3   : > { %v3577_v61 = vunpack.c.l.b16 %v3109_v17  ;;  %v3575_v2 = vpack.c.b16 %v3574_v44, %v3573_v34 }
 0x4f4   : > { %v2715_v6 = vpop.f32.mrf.mxu0  ;;  %v2764_v32 = vpop.f32.mrf.mxu1 }
 0x4f5   : > { %v3578_v63 = vpack.c.b16 %v3577_v61, %v3576_v13  ;;  %v2716_v18 = vadd.f32 %v2715_v6, %v14623_v36  ;;  %v2765_v5 = vadd.f32 %v2764_v32, %v14625_v9  ;;  %v2798_v61 = vpop.f32.mrf.mxu2 }
 0x4f7   : > { %v3583_v21 = vsel %vm3474_vm10, %v3578_v63, 0  ;;  %v14763_v42 = vpack.c.bf16 %v2765_v5, %v2716_v18  ;;  %v2799_v18 = vadd.f32 %v2798_v61, %v14634_v28 }
 0x4f8   : > { %3592 = vmatpush.bf16.xpose.msrb.mxu3 %v3583_v21 }
 0x4f9   : > { %2882 = vrot.lane.b32.xlu2 %v14658_v45, %s13327_s14  ;;  %3280 = vrot.lane.b32.xlu0 %v14740_v0, %s13326_s8  ;;  %v3110_v38 = vrot.slane %v14763_v42, 4  ;;  %v3599_v23 = vunpack.c.l.b16 %v14763_v42 }
 0x4fa   : > { %2978 = vrot.lane.b32.xlu1 %v14658_v45, %s13328_s27 }
 0x4fb   : > { %v3602_v29 = vunpack.c.l.b16 %v3110_v38 }
 0x4fc   : > { %v2717_v39 = vpop.f32.mrf.mxu0  ;;  %v2766_v37 = vpop.f32.mrf.mxu1 }
 0x4fd   : > { %v2718_v14 = vadd.f32 %v2717_v39, %v14623_v36  ;;  %v2767_v59 = vadd.f32 %v2766_v37, %v14625_v9 }
 0x4ff   : > { %v14768_v10 = vpack.c.bf16 %v2767_v59, %v2718_v14  ;;  %11157 = vmatmul.msk.bf16.vlgmr.msrb.gmra.mxu3 %vm3474_vm10, %v3575_v2  ;;  %v14837_v2 = vpack.c.bf16 %v2799_v18, %v2799_v18 }
 0x501   : > { %2946 = vrot.lane.b32.xlu2 %v14658_v45, %s13330_s7  ;;  %2914 = vrot.lane.b32.xlu0 %v14658_v45, %s13326_s8  ;;  %v3111_v52 = vrot.slane %v14768_v10, 4  ;;  %v3600_v53 = vunpack.c.l.b16 %v14768_v10 }
 0x502   : > { %3074 = vrot.lane.b32.xlu1 %v14658_v45, %s13331_s1 }
 0x503   : > { %v14779_v48 = vpop.permute.xlu2 %2876  ;;  %v3603_v12 = vunpack.c.l.b16 %v3111_v52  ;;  %v3601_v57 = vpack.c.b16 %v3600_v53, %v3599_v23 }
 0x504   : > { %v2720_v49 = vpop.f32.mrf.mxu0  ;;  %v2769_v19 = vpop.f32.mrf.mxu1  ;;  %v3677_v18 = vunpack.c.l.b16 %v14779_v48 }
 0x505   : > { %v3604_v8 = vpack.c.b16 %v3603_v12, %v3602_v29  ;;  %v2721_v47 = vadd.f32 %v2720_v49, %v14623_v36  ;;  %v2770_v62 = vadd.f32 %v2769_v19, %v14625_v9 }
 0x507   : > { %v3609_v22 = vsel %vm3474_vm10, %v3604_v8, 0  ;;  %v14794_v43 = vpack.c.bf16 %v2770_v62, %v2721_v47 }
 0x508   : > { %3618 = vmatpush.bf16.xpose.msra.mxu3 %v3609_v22 }
 0x509   : > { %3042 = vrot.lane.b32.xlu2 %v14658_v45, %s13332_s30  ;;  %3010 = vrot.lane.b32.xlu0 %v14658_v45, %s13329_s9  ;;  %v3112_v45 = vrot.slane %v14794_v43, 4  ;;  %v3625_v63 = vunpack.c.l.b16 %v14794_v43 }
 0x50a   : > { %3314 = vrot.lane.b32.xlu1 %v14785_v7, %s13330_s7 }
 0x50b   : > { %v14796_v16 = vpop.permute.xlu2 %2940  ;;  %v3628_v30 = vunpack.c.l.b16 %v3112_v45  ;;  %v3116_v45 = vrot.slane %v14779_v48, 4 }
 0x50c   : > { %v2722_v51 = vpop.f32.mrf.mxu0  ;;  %v2771_v46 = vpop.f32.mrf.mxu1 }
 0x50d   : > { %v2723_v15 = vadd.f32 %v2722_v51, %v14623_v36  ;;  %v2772_v33 = vadd.f32 %v2771_v46, %v14625_v9  ;;  %v2800_v51 = vpop.f32.mrf.mxu2 }
 0x50e   : > { %v2801_v46 = vadd.f32 %v2800_v51, %v14634_v28 }
 0x50f   : > { %v14801_v58 = vpack.c.bf16 %v2772_v33, %v2723_v15  ;;  %11158 = vmatmul.msk.bf16.vlgmr.msra.gmra.mxu3 %vm3474_vm10, %v3601_v57 }
 0x510   : > { %v14884_v57 = vpack.c.bf16 %v2801_v46, %v2801_v46 }
 0x511   : > { %3282 = vrot.lane.b32.xlu2 %v14785_v7, %s13326_s8  ;;  %3250 = vrot.lane.b32.xlu0 %v14785_v7, %s13327_s14  ;;  %v3113_v40 = vrot.slane %v14801_v58, 4  ;;  %v3626_v6 = vunpack.c.l.b16 %v14801_v58 }
 0x512   : > { %2948 = vrot.lane.b32.xlu1 %v14679_v4, %s13330_s7 }
 0x513   : > { %v14812_v25 = vpop.permute.xlu2 %3036  ;;  %v3629_v26 = vunpack.c.l.b16 %v3113_v40  ;;  %v3627_v37 = vpack.c.b16 %v3626_v6, %v3625_v63 }
 0x514   : > { %v2725_v31 = vpop.f32.mrf.mxu0  ;;  %v2774_v60 = vpop.f32.mrf.mxu1 }
 0x515   : > { %v3630_v56 = vpack.c.b16 %v3629_v26, %v3628_v30  ;;  %v2726_v17 = vadd.f32 %v2725_v31, %v14623_v36  ;;  %v2775_v13 = vadd.f32 %v2774_v60, %v14625_v9  ;;  %v3680_v60 = vunpack.c.l.b16 %v3116_v45 }
 0x517   : > { %v3635_v1 = vsel %vm3474_vm10, %v3630_v56, 0  ;;  %v14828_v5 = vpack.c.bf16 %v2775_v13, %v2726_v17 }
 0x518   : > { %3644 = vmatpush.bf16.xpose.msrb.mxu3 %v3635_v1 }
 0x519   : > { %2916 = vrot.lane.b32.xlu2 %v14679_v4, %s13326_s8  ;;  %2884 = vrot.lane.b32.xlu0 %v14679_v4, %s13327_s14  ;;  %v3114_v20 = vrot.slane %v14828_v5, 4  ;;  %v3651_v53 = vunpack.c.l.b16 %v14828_v5 }
 0x51a   : > { %3044 = vrot.lane.b32.xlu1 %v14679_v4, %s13332_s30 }
 0x51b   : > { %v14824_v32 = vpop.permute.xlu2 %3276  ;;  %v14832_v44 = vpop.permute.xlu0 %2908  ;;  %v3654_v12 = vunpack.c.l.b16 %v3114_v20 }
 0x51c   : > { %19252 = vst [vmem:[#allocation54_spill] sm:$0xff] %v14824_v32  ;;  %v14830_v21 = vpop.permute.xlu1 %2972  ;;  %v2727_v34 = vpop.f32.mrf.mxu0 }
 0x51d   : > { %v2776_v39 = vpop.f32.mrf.mxu1  ;;  %v2728_v14 = vadd.f32 %v2727_v34, %v14623_v36 }
 0x51e   : > { %v2777_v59 = vadd.f32 %v2776_v39, %v14625_v9 }
 0x51f   : > { %11159 = vmatmul.msk.bf16.vlgmr.msrb.gmra.mxu3 %vm3474_vm10, %v3627_v37 }
 0x520   : > { %v14839_v38 = vpack.c.bf16 %v2777_v59, %v2728_v14  ;;  %v2803_v14 = vpop.f32.mrf.mxu2 }
 0x521   : > { %3012 = vrot.lane.b32.xlu2 %v14679_v4, %s13329_s9  ;;  %2980 = vrot.lane.b32.xlu0 %v14679_v4, %s13328_s27  ;;  %v2804_v20 = vadd.f32 %v2803_v14, %v14634_v28 }
 0x522   : > { %3284 = vrot.lane.b32.xlu1 %v14837_v2, %s13326_s8  ;;  %v3115_v36 = vrot.slane %v14839_v38, 4  ;;  %v3652_v8 = vunpack.c.l.b16 %v14839_v38 }
 0x523   : > { %v14849_v9 = vpop.permute.xlu2 %2910  ;;  %v14853_v29 = vpop.permute.xlu0 %3004 }
 0x524   : > { %v14851_v52 = vpop.permute.xlu1 %3068  ;;  %v3655_v35 = vunpack.c.l.b16 %v3115_v36  ;;  %v3653_v23 = vpack.c.b16 %v3652_v8, %v3651_v53  ;;  %v14933_v8 = vpack.c.bf16 %v2804_v20, %v2804_v20 }
 0x525   : > { %19253 = vst [vmem:[#allocation55_spill] sm:$0xff] %v14851_v52 }
 0x526   : > { %v3656_v49 = vpack.c.b16 %v3655_v35, %v3654_v12 }
 0x528   : > { %v3661_v19 = vsel %vm3474_vm10, %v3656_v49, 0 }
 0x529   : > { %3670 = vmatpush.bf16.xpose.msra.mxu3 %v3661_v19  ;;  %3252 = vrot.lane.b32.xlu2 %v14837_v2, %s13327_s14 }
 0x52a   : > { %2918 = vrot.lane.b32.xlu1 %v14685_v50, %s13326_s8  ;;  %3076 = vrot.lane.b32.xlu0 %v14679_v4, %s13331_s1 }
 0x52b   : > { %v14863_v47 = vpop.permute.xlu2 %3006  ;;  %v14867_v22 = vpop.permute.xlu0 %3244 }
 0x52c   : > { %v14865_v62 = vpop.permute.xlu1 %3308  ;;  %19255 = vst [vmem:[#allocation57_spill] sm:$0xff] %v14867_v22 }
 0x52d   : > { %19254 = vst [vmem:[#allocation56_spill] sm:$0xff] %v14865_v62 }
 0x530   : > { %11160 = vmatmul.msk.bf16.vlgmr.msra.gmra.mxu3 %vm3474_vm10, %v3653_v23 }
 0x531   : > { %2886 = vrot.lane.b32.xlu2 %v14685_v50, %s13327_s14 }
 0x532   : > { %3014 = vrot.lane.b32.xlu1 %v14685_v50, %s13329_s9  ;;  %3316 = vrot.lane.b32.xlu0 %v14837_v2, %s13330_s7 }
 0x533   : > { %v14877_v4 = vpop.permute.xlu2 %3246  ;;  %v14882_v33 = vpop.permute.xlu0 %3340 }
 0x534   : > { %19256 = vst [vmem:[#allocation58_spill] sm:$0xff] %v14877_v4  ;;  %v14880_v15 = vpop.permute.xlu1 %2942 }
 0x535   : > { %19257 = vst [vmem:[#allocation59_spill] sm:$0xff] %v14882_v33 }
 0x539   : > { %2982 = vrot.lane.b32.xlu2 %v14685_v50, %s13328_s27 }
 0x53a   : > { %3254 = vrot.lane.b32.xlu1 %v14884_v57, %s13327_s14  ;;  %2950 = vrot.lane.b32.xlu0 %v14685_v50, %s13330_s7 }
 0x53b   : > { %v14893_v40 = vpop.permute.xlu2 %2976  ;;  %v2879_v26 = vpop.permute.xlu0 %2878 }
 0x53c   : > { %v14895_v30 = vpop.permute.xlu1 %3038  ;;  %v3117_v31 = vrot.slane %v2879_v26, 4  ;;  %v3678_v63 = vunpack.c.l.b16 %v2879_v26 }
 0x53e   : > { %v3681_v56 = vunpack.c.l.b16 %v3117_v31  ;;  %v3679_v34 = vpack.c.b16 %v3678_v63, %v3677_v18 }
 0x540   : > { %v3682_v1 = vpack.c.b16 %v3681_v56, %v3680_v60 }
 0x541   : > { %3078 = vrot.lane.b32.xlu2 %v14685_v50, %s13331_s1 }
 0x542   : > { %2888 = vrot.lane.b32.xlu1 %v14708_v11, %s13327_s14  ;;  %3046 = vrot.lane.b32.xlu0 %v14685_v50, %s13332_s30  ;;  %v3687_v13 = vsel %vm3474_vm10, %v3682_v1, 0 }
 0x543   : > { %v14903_v17 = vpop.permute.xlu2 %3072  ;;  %3696 = vmatpush.bf16.xpose.msrb.mxu3 %v3687_v13  ;;  %v14908_v6 = vpop.permute.xlu0 %2974 }
 0x544   : > { %19258 = vst [vmem:[#allocation60_spill] sm:$0xff] %v14903_v17  ;;  %v14906_v61 = vpop.permute.xlu1 %3278  ;;  %v2805_v13 = vpop.f32.mrf.mxu2 }
 0x545   : > { %19259 = vst [vmem:[#allocation61_spill] sm:$0xff] %v14906_v61  ;;  %v2806_v18 = vadd.f32 %v2805_v13, %v14634_v28 }
 0x547   : > { %v14974_v14 = vpack.c.bf16 %v2806_v18, %v2806_v18 }
 0x549   : > { %3318 = vrot.lane.b32.xlu2 %v14884_v57, %s13330_s7 }
 0x54a   : > { %2984 = vrot.lane.b32.xlu1 %v14708_v11, %s13328_s27  ;;  %3286 = vrot.lane.b32.xlu0 %v14884_v57, %s13326_s8 }
 0x54b   : > { %11161 = vmatmul.msk.bf16.vlgmr.msrb.gmra.mxu3 %vm3474_vm10, %v3679_v34  ;;  %v14918_v50 = vpop.permute.xlu2 %3312  ;;  %v14920_v37 = vpop.permute.xlu0 %3070 }
 0x54c   : > { %19260 = vst [vmem:[#allocation62_spill] sm:$0xff] %v14918_v50  ;;  %v2881_v39 = vpop.permute.xlu1 %2880 }
 0x54d   : > { %19261 = vst [vmem:[#allocation63_spill] sm:$0xff] %v14920_v37  ;;  %v3118_v48 = vrot.slane %v2881_v39, 4  ;;  %v3703_v31 = vunpack.c.l.b16 %v2881_v39 }
 0x54f   : > { %v3706_v49 = vunpack.c.l.b16 %v3118_v48 }
 0x551   : > { %2952 = vrot.lane.b32.xlu2 %v14708_v11, %s13330_s7 }
 0x552   : > { %3080 = vrot.lane.b32.xlu1 %v14708_v11, %s13331_s1  ;;  %2920 = vrot.lane.b32.xlu0 %v14708_v11, %s13326_s8 }
 0x553   : > { %v2883_v59 = vpop.permute.xlu2 %2882  ;;  %v14931_v35 = vpop.permute.xlu0 %3310 }
 0x554   : > { %v3119_v36 = vrot.slane %v2883_v59, 4  ;;  %v14929_v12 = vpop.permute.xlu1 %2912  ;;  %19262 = vst [vmem:[#allocation64_spill] sm:$0xff] %v14931_v35  ;;  %v3704_v26 = vunpack.c.l.b16 %v2883_v59 }
 0x556   : > { %v3707_v19 = vunpack.c.l.b16 %v3119_v36  ;;  %v3705_v60 = vpack.c.b16 %v3704_v26, %v3703_v31 }
 0x558   : > { %v3708_v53 = vpack.c.b16 %v3707_v19, %v3706_v49 }
 0x559   : > { %3048 = vrot.lane.b32.xlu2 %v14708_v11, %s13332_s30 }
 0x55a   : > { %3320 = vrot.lane.b32.xlu1 %v14933_v8, %s13330_s7  ;;  %3016 = vrot.lane.b32.xlu0 %v14708_v11, %s13329_s9  ;;  %v3713_v23 = vsel %vm3474_vm10, %v3708_v53, 0  ;;  %v2808_v53 = vpop.f32.mrf.mxu2 }
 0x55b   : > { %v14942_v51 = vpop.permute.xlu2 %2946  ;;  %3722 = vmatpush.bf16.xpose.msra.mxu3 %v3713_v23  ;;  %v14946_v45 = vpop.permute.xlu0 %2944  ;;  %v2809_v23 = vadd.f32 %v2808_v53, %v14634_v28 }
 0x55c   : > { %v14944_v46 = vpop.permute.xlu1 %3008 }
 0x55d   : > { %19263 = vst [vmem:[#allocation65_spill] sm:$0xff] %v14944_v46 }
 0x561   : > { %3288 = vrot.lane.b32.xlu2 %v14933_v8, %s13326_s8 }
 0x562   : > { %2954 = vrot.lane.b32.xlu1 %v14713_v55, %s13330_s7  ;;  %3256 = vrot.lane.b32.xlu0 %v14933_v8, %s13327_s14 }
 0x563   : > { %11162 = vmatmul.msk.bf16.vlgmr.msra.gmra.mxu3 %vm3474_vm10, %v3705_v60  ;;  %v14955_v11 = vpop.permute.xlu2 %3042  ;;  %v14959_v1 = vpop.permute.xlu0 %3040  ;;  %v15013_v60 = vpack.c.bf16 %v2809_v23, %v2809_v23 }
 0x564   : > { %19264 = vst [vmem:[#allocation66_spill] sm:$0xff] %v14955_v11  ;;  %v14957_v56 = vpop.permute.xlu1 %3248  ;;  %v3886_v11 = vunpack.c.l.b16 %v14849_v9 }
 0x565   : > { %19265 = vst [vmem:[#allocation67_spill] sm:$0xff] %v14957_v56 }
 0x566   : > { %19266 = vst [vmem:[#allocation68_spill] sm:$0xff] %v14959_v1 }
 0x569   : > { %2922 = vrot.lane.b32.xlu2 %v14713_v55, %s13326_s8 }
 0x56a   : > { %3050 = vrot.lane.b32.xlu1 %v14713_v55, %s13332_s30  ;;  %2890 = vrot.lane.b32.xlu0 %v14713_v55, %s13327_s14 }
 0x56b   : > { %v14967_v63 = vpop.permute.xlu2 %3282  ;;  %v14972_v39 = vpop.permute.xlu0 %3280 }
 0x56c   : > { %19267 = vst [vmem:[#allocation69_spill] sm:$0xff] %v14967_v63  ;;  %v14970_v34 = vpop.permute.xlu1 %2978 }
 0x56d   : > { %19268 = vst [vmem:[#allocation70_spill] sm:$0xff] %v14972_v39 }
 0x571   : > { %3018 = vrot.lane.b32.xlu2 %v14713_v55, %s13329_s9 }
 0x572   : > { %3290 = vrot.lane.b32.xlu1 %v14974_v14, %s13326_s8  ;;  %2986 = vrot.lane.b32.xlu0 %v14713_v55, %s13328_s27 }
 0x573   : > { %v14982_v48 = vpop.permute.xlu2 %2916  ;;  %v14986_v20 = vpop.permute.xlu0 %2914 }
 0x574   : > { %v14984_v59 = vpop.permute.xlu1 %3074 }
 0x575   : > { %19269 = vst [vmem:[#allocation71_spill] sm:$0xff] %v14984_v59 }
 0x579   : > { %3258 = vrot.lane.b32.xlu2 %v14974_v14, %s13327_s14 }
 0x57a   : > { %3082 = vrot.lane.b32.xlu0 %v14713_v55, %s13331_s1  ;;  %2924 = vrot.lane.b32.xlu1 %v14735_v27, %s13326_s8 }
 0x57b   : > { %v14994_v36 = vpop.permute.xlu2 %3012  ;;  %v14998_v19 = vpop.permute.xlu0 %3010 }
 0x57c   : > { %19270 = vst [vmem:[#allocation72_spill] sm:$0xff] %v14994_v36  ;;  %v14996_v49 = vpop.permute.xlu1 %3314 }
 0x57d   : > { %19271 = vst [vmem:[#allocation73_spill] sm:$0xff] %v14996_v49 }
 0x581   : > { %2892 = vrot.lane.b32.xlu2 %v14735_v27, %s13327_s14 }
 0x582   : > { %3322 = vrot.lane.b32.xlu0 %v14974_v14, %s13330_s7  ;;  %3020 = vrot.lane.b32.xlu1 %v14735_v27, %s13329_s9 }
 0x583   : > { %v15006_v55 = vpop.permute.xlu2 %3252  ;;  %v15011_v31 = vpop.permute.xlu0 %3250 }
 0x584   : > { %19272 = vst [vmem:[#allocation74_spill] sm:$0xff] %v15006_v55  ;;  %v15009_v26 = vpop.permute.xlu1 %2948 }
 0x585   : > { %19273 = vst [vmem:[#allocation75_spill] sm:$0xff] %v15009_v26 }
 0x586   : > { %19274 = vst [vmem:[#allocation76_spill] sm:$0xff] %v15011_v31 }
 0x589   : > { %2988 = vrot.lane.b32.xlu2 %v14735_v27, %s13328_s27 }
 0x58a   : > { %2956 = vrot.lane.b32.xlu0 %v14735_v27, %s13330_s7  ;;  %3260 = vrot.lane.b32.xlu1 %v15013_v60, %s13327_s14 }
 0x58b   : > { %v2887_v13 = vpop.permute.xlu2 %2886  ;;  %v2885_v53 = vpop.permute.xlu0 %2884 }
 0x58c   : > { %v15021_v18 = vpop.permute.xlu1 %3044  ;;  %v3121_v54 = vrot.slane %v2887_v13, 4  ;;  %v3120_v33 = vrot.slane %v2885_v53, 4 }
 0x58d   : > { %19275 = vst [vmem:[#allocation77_spill] sm:$0xff] %v15021_v18 }
 0x58e   : > { %v3733_v50 = vunpack.c.l.b16 %v3121_v54  ;;  %v3732_v49 = vunpack.c.l.b16 %v3120_v33  ;;  %v3730_v54 = vunpack.c.l.b16 %v2887_v13  ;;  %v3729_v33 = vunpack.c.l.b16 %v2885_v53 }
 0x590   : > { %v3734_v23 = vpack.c.b16 %v3733_v50, %v3732_v49  ;;  %v3731_v32 = vpack.c.b16 %v3730_v54, %v3729_v33  ;;  %v2810_v49 = vpop.f32.mrf.mxu2 }
 0x591   : > { %3084 = vrot.lane.b32.xlu2 %v14735_v27, %s13331_s1 }
 0x592   : > { %3052 = vrot.lane.b32.xlu0 %v14735_v27, %s13332_s30  ;;  %2894 = vrot.lane.b32.xlu1 %v14742_v41, %s13327_s14  ;;  %v3739_v35 = vsel %vm3474_vm10, %v3734_v23, 0 }
 0x593   : > { %v15029_v62 = vpop.permute.xlu2 %2982  ;;  %3748 = vmatpush.bf16.xpose.msrb.mxu0 %v3739_v35  ;;  %v15034_v63 = vpop.permute.xlu0 %2980 }
 0x594   : > { %19276 = vst [vmem:[#allocation78_spill] sm:$0xff] %v15029_v62  ;;  %v15032_v39 = vpop.permute.xlu1 %3284 }
 0x595   : > { %19277 = vst [vmem:[#allocation79_spill] sm:$0xff] %v15032_v39 }
 0x596   : > { %19278 = vst [vmem:[#allocation80_spill] sm:$0xff] %v15034_v63 }
 0x598   : > { %v2813_v39 = vpop.f32.mrf.mxu2 }
 0x599   : > { %3324 = vrot.lane.b32.xlu2 %v15013_v60, %s13330_s7  ;;  %v2814_v55 = vadd.f32 %v2813_v39, %v14634_v28 }
 0x59a   : > { %3292 = vrot.lane.b32.xlu0 %v15013_v60, %s13326_s8  ;;  %2990 = vrot.lane.b32.xlu1 %v14742_v41, %s13328_s27 }
 0x59b   : > { %11163 = vmatmul.msk.bf16.vlgmr.msrb.gmra.mxu0 %vm3474_vm10, %v3731_v32  ;;  %v15043_v27 = vpop.permute.xlu2 %3078  ;;  %v2811_v32 = vadd.f32 %v2810_v49, %v14634_v28  ;;  %v15099_v31 = vpack.c.bf16 %v2814_v55, %v2814_v55 }
 0x59c   : > { %19279 = vst [vmem:[#allocation81_spill] sm:$0xff] %v15043_v27  ;;  %v15045_v50 = vpop.permute.xlu1 %2918  ;;  %v15047_v35 = vpop.permute.xlu0 %3076 }
 0x59d   : > { %19280 = vst [vmem:[#allocation82_spill] sm:$0xff] %v15047_v35  ;;  %v15062_v54 = vpack.c.bf16 %v2811_v32, %v2811_v32 }
 0x5a1   : > { %2958 = vrot.lane.b32.xlu2 %v14742_v41, %s13330_s7 }
 0x5a2   : > { %2926 = vrot.lane.b32.xlu0 %v14742_v41, %s13326_s8  ;;  %3086 = vrot.lane.b32.xlu1 %v14742_v41, %s13331_s1 }
 0x5a3   : > { %v15055_v13 = vpop.permute.xlu2 %3318 }
 0x5a4   : > { %19281 = vst [vmem:[#allocation83_spill] sm:$0xff] %v15055_v13  ;;  %v15058_v53 = vpop.permute.xlu1 %3014  ;;  %v15060_v23 = vpop.permute.xlu0 %3316 }
 0x5a5   : > { %19282 = vst [vmem:[#allocation84_spill] sm:$0xff] %v15058_v53 }
 0x5a6   : > { %19283 = vst [vmem:[#allocation85_spill] sm:$0xff] %v15060_v23 }
 0x5a9   : > { %3054 = vrot.lane.b32.xlu2 %v14742_v41, %s13332_s30 }
 0x5aa   : > { %3022 = vrot.lane.b32.xlu0 %v14742_v41, %s13329_s9  ;;  %3326 = vrot.lane.b32.xlu1 %v15062_v54, %s13330_s7 }
 0x5ab   : > { %v15070_v33 = vpop.permute.xlu2 %2952 }
 0x5ac   : > { %19284 = vst [vmem:[#allocation86_spill] sm:$0xff] %v15070_v33  ;;  %v15072_v13 = vpop.permute.xlu1 %3254  ;;  %v15074_v49 = vpop.permute.xlu0 %2950 }
 0x5ad   : > { %19285 = vst [vmem:[#allocation87_spill] sm:$0xff] %v15072_v13 }
 0x5ae   : > { %19286 = vst [vmem:[#allocation88_spill] sm:$0xff] %v15074_v49 }
 0x5b1   : > { %3294 = vrot.lane.b32.xlu2 %v15062_v54, %s13326_s8 }
 0x5b2   : > { %3262 = vrot.lane.b32.xlu0 %v15062_v54, %s13327_s14  ;;  %2960 = vrot.lane.b32.xlu1 %v14763_v42, %s13330_s7 }
 0x5b3   : > { %v15082_v32 = vpop.permute.xlu2 %3048 }
 0x5b4   : > { %19287 = vst [vmem:[#allocation89_spill] sm:$0xff] %v15082_v32  ;;  %v2889_v41 = vpop.permute.xlu1 %2888  ;;  %v15084_v23 = vpop.permute.xlu0 %3046 }
 0x5b5   : > { %19288 = vst [vmem:[#allocation90_spill] sm:$0xff] %v15084_v23  ;;  %v2815_v32 = vpop.f32.mrf.mxu2 }
 0x5b9   : > { %2928 = vrot.lane.b32.xlu2 %v14763_v42, %s13326_s8 }
 0x5ba   : > { %3056 = vrot.lane.b32.xlu1 %v14763_v42, %s13332_s30  ;;  %2896 = vrot.lane.b32.xlu0 %v14763_v42, %s13327_s14 }
 0x5bb   : > { %v15092_v61 = vpop.permute.xlu2 %3288 }
 0x5bc   : > { %19289 = vst [vmem:[#allocation91_spill] sm:$0xff] %v15092_v61  ;;  %v15095_v13 = vpop.permute.xlu1 %2984  ;;  %v15097_v56 = vpop.permute.xlu0 %3286 }
 0x5bd   : > { %19290 = vst [vmem:[#allocation92_spill] sm:$0xff] %v15095_v13 }
 0x5be   : > { %19291 = vst [vmem:[#allocation93_spill] sm:$0xff] %v15097_v56 }
 0x5c1   : > { %3024 = vrot.lane.b32.xlu2 %v14763_v42, %s13329_s9 }
 0x5c2   : > { %3296 = vrot.lane.b32.xlu1 %v15099_v31, %s13326_s8  ;;  %2992 = vrot.lane.b32.xlu0 %v14763_v42, %s13328_s27 }
 0x5c3   : > { %v15107_v22 = vpop.permute.xlu2 %2922 }
 0x5c4   : > { %19292 = vst [vmem:[#allocation94_spill] sm:$0xff] %v15107_v22  ;;  %v15109_v61 = vpop.permute.xlu1 %3080  ;;  %v15111_v39 = vpop.permute.xlu0 %2920 }
 0x5c5   : > { %19293 = vst [vmem:[#allocation95_spill] sm:$0xff] %v15109_v61 }
 0x5c6   : > { %19294 = vst [vmem:[#allocation96_spill] sm:$0xff] %v15111_v39 }
 0x5c9   : > { %3264 = vrot.lane.b32.xlu2 %v15099_v31, %s13327_s14 }
 0x5ca   : > { %2930 = vrot.lane.b32.xlu1 %v14768_v10, %s13326_s8  ;;  %3088 = vrot.lane.b32.xlu0 %v14763_v42, %s13331_s1  ;;  %v2816_v42 = vadd.f32 %v2815_v32, %v14634_v28 }
 0x5cb   : > { %v15119_v55 = vpop.permute.xlu2 %3018 }
 0x5cc   : > { %19295 = vst [vmem:[#allocation97_spill] sm:$0xff] %v15119_v55  ;;  %v15121_v56 = vpop.permute.xlu1 %3320  ;;  %v15123_v4 = vpop.permute.xlu0 %3016 }
 0x5cd   : > { %19296 = vst [vmem:[#allocation98_spill] sm:$0xff] %v15121_v56  ;;  %v15138_v56 = vpack.c.bf16 %v2816_v42, %v2816_v42 }
 0x5ce   : > { %19297 = vst [vmem:[#allocation99_spill] sm:$0xff] %v15123_v4  ;;  %v3122_v4 = vrot.slane %v2889_v41, 4 }
 0x5d0   : > { %v3758_v23 = vunpack.c.l.b16 %v3122_v4 }
 0x5d1   : > { %2898 = vrot.lane.b32.xlu2 %v14768_v10, %s13327_s14 }
 0x5d2   : > { %3026 = vrot.lane.b32.xlu1 %v14768_v10, %s13329_s9  ;;  %3328 = vrot.lane.b32.xlu0 %v15099_v31, %s13330_s7 }
 0x5d3   : > { %v15131_v61 = vpop.permute.xlu2 %3258 }
 0x5d4   : > { %19298 = vst [vmem:[#allocation100_spill] sm:$0xff] %v15131_v61  ;;  %v15134_v35 = vpop.permute.xlu1 %2954  ;;  %v15136_v27 = vpop.permute.xlu0 %3256 }
 0x5d5   : > { %19299 = vst [vmem:[#allocation101_spill] sm:$0xff] %v15134_v35 }
 0x5d6   : > { %19300 = vst [vmem:[#allocation102_spill] sm:$0xff] %v15136_v27 }
 0x5d9   : > { %2994 = vrot.lane.b32.xlu2 %v14768_v10, %s13328_s27 }
 0x5da   : > { %3266 = vrot.lane.b32.xlu1 %v15138_v56, %s13327_s14  ;;  %2962 = vrot.lane.b32.xlu0 %v14768_v10, %s13330_s7 }
 0x5db   : > { %v15146_v55 = vpop.permute.xlu2 %2892 }
 0x5dc   : > { %v15148_v61 = vpop.permute.xlu1 %3050  ;;  %v2891_v32 = vpop.permute.xlu0 %2890 }
 0x5dd   : > { %19301 = vst [vmem:[#allocation103_spill] sm:$0xff] %v15148_v61  ;;  %v3123_v18 = vrot.slane %v2891_v32, 4  ;;  %v3756_v4 = vunpack.c.l.b16 %v2891_v32 }
 0x5df   : > { %v3759_v27 = vunpack.c.l.b16 %v3123_v18  ;;  %v3755_v18 = vunpack.c.l.b16 %v2889_v41 }
 0x5e1   : > { %3090 = vrot.lane.b32.xlu2 %v14768_v10, %s13331_s1  ;;  %v3760_v42 = vpack.c.b16 %v3759_v27, %v3758_v23  ;;  %v3757_v17 = vpack.c.b16 %v3756_v4, %v3755_v18  ;;  %v2818_v23 = vpop.f32.mrf.mxu2 }
 0x5e2   : > { %2900 = vrot.lane.b32.xlu1 %v14794_v43, %s13327_s14  ;;  %3058 = vrot.lane.b32.xlu0 %v14768_v10, %s13332_s30 }
 0x5e3   : > { %v15156_v13 = vpop.permute.xlu2 %2988  ;;  %v3765_v36 = vsel %vm3474_vm10, %v3760_v42, 0 }
 0x5e4   : > { %v15159_v53 = vpop.permute.xlu1 %3290  ;;  %3774 = vmatpush.bf16.xpose.msra.mxu1 %v3765_v36  ;;  %v15161_v61 = vpop.permute.xlu0 %2986 }
 0x5e5   : > { %19302 = vst [vmem:[#allocation104_spill] sm:$0xff] %v15159_v53  ;;  %v3133_v53 = vrot.slane %v14849_v9, 4 }
 0x5e6   : > { %19303 = vst [vmem:[#allocation105_spill] sm:$0xff] %v15161_v61 }
 0x5e9   : > { %3330 = vrot.lane.b32.xlu2 %v15138_v56, %s13330_s7 }
 0x5ea   : > { %2996 = vrot.lane.b32.xlu1 %v14794_v43, %s13328_s27  ;;  %3298 = vrot.lane.b32.xlu0 %v15138_v56, %s13326_s8 }
 0x5eb   : > { %11164 = vmatmul.msk.bf16.vlgmr.msra.gmra.mxu1 %vm3474_vm10, %v3757_v17  ;;  %v15170_v10 = vpop.permute.xlu2 %3084  ;;  %v2819_v17 = vadd.f32 %v2818_v23, %v14634_v28 }
 0x5ec   : > { %19304 = vst [vmem:[#allocation106_spill] sm:$0xff] %v15170_v10  ;;  %v15172_v27 = vpop.permute.xlu1 %2924  ;;  %v15174_v36 = vpop.permute.xlu0 %3082 }
 0x5ed   : > { %19305 = vst [vmem:[#allocation107_spill] sm:$0xff] %v15174_v36  ;;  %v15189_v4 = vpack.c.bf16 %v2819_v17, %v2819_v17  ;;  %v3132_v17 = vrot.slane %v14832_v44, 4  ;;  %v2820_v10 = vpop.f32.mrf.mxu2  ;;  %v3989_v49 = vunpack.c.l.b16 %v15172_v27 }
 0x5ef   : > { %v3888_v33 = vunpack.c.l.b16 %v3132_v17  ;;  %v2821_v17 = vadd.f32 %v2820_v10, %v14634_v28 }
 0x5f1   : > { %2964 = vrot.lane.b32.xlu2 %v14794_v43, %s13330_s7 }
 0x5f2   : > { %3092 = vrot.lane.b32.xlu1 %v14794_v43, %s13331_s1  ;;  %2932 = vrot.lane.b32.xlu0 %v14794_v43, %s13326_s8 }
 0x5f3   : > { %v15182_v41 = vpop.permute.xlu2 %3324 }
 0x5f4   : > { %19306 = vst [vmem:[#allocation108_spill] sm:$0xff] %v15182_v41  ;;  %v15185_v32 = vpop.permute.xlu1 %3020  ;;  %v15187_v42 = vpop.permute.xlu0 %3322 }
 0x5f5   : > { %19307 = vst [vmem:[#allocation109_spill] sm:$0xff] %v15187_v42 }
 0x5f9   : > { %3060 = vrot.lane.b32.xlu2 %v14794_v43, %s13332_s30 }
 0x5fa   : > { %3332 = vrot.lane.b32.xlu1 %v15189_v4, %s13330_s7  ;;  %3028 = vrot.lane.b32.xlu0 %v14794_v43, %s13329_s9  ;;  %v3124_v43 = vrot.slane %v15146_v55, 4 }
 0x5fb   : > { %v15197_v18 = vpop.permute.xlu2 %2958 }
 0x5fc   : > { %v15199_v41 = vpop.permute.xlu1 %3260  ;;  %v15201_v23 = vpop.permute.xlu0 %2956  ;;  %v3784_v35 = vunpack.c.l.b16 %v3124_v43 }
 0x5fd   : > { %19308 = vst [vmem:[#allocation110_spill] sm:$0xff] %v15199_v41  ;;  %v3889_v41 = vunpack.c.l.b16 %v3133_v53 }
 0x5ff   : > { %v3890_v62 = vpack.c.b16 %v3889_v41, %v3888_v33  ;;  %v15232_v41 = vpack.c.bf16 %v2821_v17, %v2821_v17 }
 0x601   : > { %3300 = vrot.lane.b32.xlu2 %v15189_v4, %s13326_s8  ;;  %v3895_v33 = vsel %vm3474_vm10, %v3890_v62, 0 }
 0x602   : > { %2966 = vrot.lane.b32.xlu1 %v14801_v58, %s13330_s7  ;;  %3268 = vrot.lane.b32.xlu0 %v15189_v4, %s13327_s14 }
 0x603   : > { %v15212_v42 = vpop.permute.xlu2 %3054 }
 0x604   : > { %19309 = vst [vmem:[#allocation111_spill] sm:$0xff] %v15212_v42  ;;  %v2895_v36 = vpop.permute.xlu1 %2894  ;;  %v15214_v61 = vpop.permute.xlu0 %3052 }
 0x605   : > { %19310 = vst [vmem:[#allocation112_spill] sm:$0xff] %v15214_v61  ;;  %v3125_v59 = vrot.slane %v2895_v36, 4 }
 0x607   : > { %v3785_v63 = vunpack.c.l.b16 %v3125_v59 }
 0x609   : > { %2934 = vrot.lane.b32.xlu2 %v14801_v58, %s13326_s8  ;;  %v3786_v39 = vpack.c.b16 %v3785_v63, %v3784_v35  ;;  %v3782_v63 = vunpack.c.l.b16 %v2895_v36  ;;  %v3781_v35 = vunpack.c.l.b16 %v15146_v55 }
 0x60a   : > { %3062 = vrot.lane.b32.xlu1 %v14801_v58, %s13332_s30  ;;  %2902 = vrot.lane.b32.xlu0 %v14801_v58, %s13327_s14 }
 0x60b   : > { %v3791_v53 = vsel %vm3474_vm10, %v3786_v39, 0  ;;  %v15223_v22 = vpop.permute.xlu2 %3294  ;;  %v3783_v1 = vpack.c.b16 %v3782_v63, %v3781_v35  ;;  %v3140_v39 = vrot.slane %v15172_v27, 4  ;;  %v3148_v63 = vrot.slane %v14796_v16, 4 }
 0x60c   : > { %19311 = vst [vmem:[#allocation113_spill] sm:$0xff] %v15223_v22  ;;  %v15226_v43 = vpop.permute.xlu1 %2990  ;;  %3800 = vmatpush.bf16.xpose.msrb.mxu2 %v3791_v53  ;;  %v15228_v59 = vpop.permute.xlu0 %3292  ;;  %v3149_v53 = vrot.slane %v14880_v15, 4 }
 0x60d   : > { %19312 = vst [vmem:[#allocation114_spill] sm:$0xff] %v15228_v59  ;;  %v3992_v17 = vunpack.c.l.b16 %v3140_v39 }
 0x611   : > { %3030 = vrot.lane.b32.xlu2 %v14801_v58, %s13329_s9 }
 0x612   : > { %3302 = vrot.lane.b32.xlu1 %v15232_v41, %s13326_s8  ;;  %2998 = vrot.lane.b32.xlu0 %v14801_v58, %s13328_s27 }
 0x613   : > { %11165 = vmatmul.msk.bf16.vlgmr.msrb.gmra.mxu2 %vm3474_vm10, %v3783_v1  ;;  %v15242_v62 = vpop.permute.xlu2 %2928  ;;  %v4097_v1 = vunpack.c.l.b16 %v3149_v53 }
 0x614   : > { %3904 = vmatpush.bf16.xpose.msra.mxu2 %v3895_v33  ;;  %v15244_v10 = vpop.permute.xlu1 %3086  ;;  %v2927_v55 = vpop.permute.xlu0 %2926 }
 0x615   : > { %19313 = vst [vmem:[#allocation115_spill] sm:$0xff] %v15244_v10  ;;  %v3141_v36 = vrot.slane %v2927_v55, 4 }
 0x617   : > { %v3993_v33 = vunpack.c.l.b16 %v3141_v36  ;;  %v4096_v36 = vunpack.c.l.b16 %v3148_v63  ;;  %v3157_v63 = vrot.slane %v15197_v18, 4 }
 0x619   : > { %3270 = vrot.lane.b32.xlu2 %v15232_v41, %s13327_s14  ;;  %v3994_v35 = vpack.c.b16 %v3993_v33, %v3992_v17  ;;  %v3885_v17 = vunpack.c.l.b16 %v14832_v44  ;;  %v4098_v33 = vpack.c.b16 %v4097_v1, %v4096_v36  ;;  %v3135_v36 = vrot.slane %v14986_v20, 4 }
 0x61a   : > { %3094 = vrot.lane.b32.xlu0 %v14801_v58, %s13331_s1  ;;  %2936 = vrot.lane.b32.xlu1 %v14828_v5, %s13326_s8  ;;  %v2823_v58 = vpop.f32.mrf.mxu2 }
 0x61b   : > { %v15254_v59 = vpop.permute.xlu2 %3024  ;;  %v3999_v22 = vsel %vm3474_vm10, %v3994_v35, 0  ;;  %v3887_v52 = vpack.c.b16 %v3886_v11, %v3885_v17  ;;  %v2824_v44 = vadd.f32 %v2823_v58, %v14634_v28  ;;  %v3156_v35 = vrot.slane %v15201_v23, 4 }
 0x61c   : > { %19314 = vst [vmem:[#allocation116_spill] sm:$0xff] %v15254_v59  ;;  %v15257_v10 = vpop.permute.xlu1 %3326  ;;  %4008 = vmatpush.bf16.xpose.msrb.mxu2 %v3999_v22  ;;  %v15259_v39 = vpop.permute.xlu0 %3022  ;;  %v4103_v22 = vsel %vm3474_vm10, %v4098_v33, 0  ;;  %v4201_v17 = vunpack.c.l.b16 %v3157_v63 }
 0x61d   : > { %19315 = vst [vmem:[#allocation117_spill] sm:$0xff] %v15257_v10  ;;  %v15280_v1 = vpack.c.bf16 %v2824_v44, %v2824_v44  ;;  %v4200_v33 = vunpack.c.l.b16 %v3156_v35 }
 0x61f   : > { %19318 = vst [vmem:[#allocation120_spill] sm:$0xff] %v15280_v1  ;;  %v4202_v42 = vpack.c.b16 %v4201_v17, %v4200_v33  ;;  %v4094_v33 = vunpack.c.l.b16 %v14880_v15 }
 0x621   : > { %2904 = vrot.lane.b32.xlu2 %v14828_v5, %s13327_s14 }
 0x622   : > { %3334 = vrot.lane.b32.xlu0 %v15232_v41, %s13330_s7  ;;  %3032 = vrot.lane.b32.xlu1 %v14828_v5, %s13329_s9 }
 0x623   : > { %11169 = vmatmul.msk.bf16.vlgmr.msra.gmra.mxu2 %vm3474_vm10, %v3887_v52  ;;  %v15271_v53 = vpop.permute.xlu2 %3264  ;;  %v3134_v52 = vrot.slane %v14929_v12, 4 }
 0x624   : > { %19316 = vst [vmem:[#allocation118_spill] sm:$0xff] %v15271_v53  ;;  %4112 = vmatpush.bf16.xpose.msra.mxu2 %v4103_v22  ;;  %v15274_v9 = vpop.permute.xlu1 %2960  ;;  %v15276_v11 = vpop.permute.xlu0 %3262  ;;  %v3915_v22 = vunpack.c.l.b16 %v3135_v36 }
 0x625   : > { %19317 = vst [vmem:[#allocation119_spill] sm:$0xff] %v15276_v11  ;;  %v3990_v11 = vunpack.c.l.b16 %v2927_v55  ;;  %v3914_v59 = vunpack.c.l.b16 %v3134_v52  ;;  %v4207_v55 = vsel %vm3474_vm10, %v4202_v42, 0 }
 0x627   : > { %v3916_v24 = vpack.c.b16 %v3915_v22, %v3914_v59  ;;  %v3991_v46 = vpack.c.b16 %v3990_v11, %v3989_v49  ;;  %v4093_v22 = vunpack.c.l.b16 %v14796_v16  ;;  %v15336_v16 = vpop.f32.mrf.mxu3 }
 0x628   : > { %19322 = vst [vmem:[#allocation124_spill] sm:$0xff] %v15336_v16 }
 0x629   : > { %3000 = vrot.lane.b32.xlu2 %v14828_v5, %s13328_s27 }
 0x62a   : > { %2968 = vrot.lane.b32.xlu0 %v14828_v5, %s13330_s7  ;;  %3272 = vrot.lane.b32.xlu1 %v15280_v1, %s13327_s14 }
 0x62b   : > { %v2899_v58 = vpop.permute.xlu2 %2898 }
 0x62c   : > { %v15290_v10 = vpop.permute.xlu1 %3056  ;;  %v3127_v44 = vrot.slane %v2899_v58, 4  ;;  %v2897_v53 = vpop.permute.xlu0 %2896 }
 0x62d   : > { %v3126_v37 = vrot.slane %v2897_v53, 4  ;;  %v3807_v59 = vunpack.c.l.b16 %v2897_v53 }
 0x62e   : > { %v3811_v26 = vunpack.c.l.b16 %v3127_v44 }
 0x62f   : > { %v3810_v61 = vunpack.c.l.b16 %v3126_v37 }
 0x631   : > { %3096 = vrot.lane.b32.xlu2 %v14828_v5, %s13331_s1  ;;  %v3812_v63 = vpack.c.b16 %v3811_v26, %v3810_v61  ;;  %v3921_v61 = vsel %vm3474_vm10, %v3916_v24, 0  ;;  %v3808_v26 = vunpack.c.l.b16 %v2899_v58  ;;  %v3142_v24 = vrot.slane %v15242_v62, 4 }
 0x632   : > { %2906 = vrot.lane.b32.xlu1 %v14839_v38, %s13327_s14  ;;  %3064 = vrot.lane.b32.xlu0 %v14828_v5, %s13332_s30  ;;  %v3165_v5 = vrot.slane %v14908_v6, 4 }
 0x633   : > { %11173 = vmatmul.msk.bf16.vlgmr.msrb.gmra.mxu2 %vm3474_vm10, %v3991_v46  ;;  %v15301_v35 = vpop.permute.xlu2 %2994  ;;  %v3817_v37 = vsel %vm3474_vm10, %v3812_v63, 0  ;;  %v3164_v46 = vrot.slane %v14830_v21, 4  ;;  %v3809_v42 = vpack.c.b16 %v3808_v26, %v3807_v59  ;;  %v3151_v63 = vrot.slane %v14942_v51, 4  ;;  %v2825_v26 = vpop.f32.mrf.mxu2 }
 0x634   : > { %4216 = vmatpush.bf16.xpose.msrb.mxu2 %v4207_v55  ;;  %v15304_v49 = vpop.permute.xlu1 %3296  ;;  %3826 = vmatpush.bf16.xpose.msrb.mxu3 %v3817_v37  ;;  %v15306_v27 = vpop.permute.xlu0 %2992  ;;  %v4305_v11 = vunpack.c.l.b16 %v3165_v5  ;;  %v3150_v55 = vrot.slane %v14946_v45, 4  ;;  %v4018_v37 = vunpack.c.l.b16 %v3142_v24  ;;  %v4095_v59 = vpack.c.b16 %v4094_v33, %v4093_v22 }
 0x635   : > { %19319 = vst [vmem:[#allocation121_spill] sm:$0xff] %v15304_v49  ;;  %v4304_v36 = vunpack.c.l.b16 %v3164_v46  ;;  %v4123_v15 = vunpack.c.l.b16 %v3151_v63  ;;  %v3912_v22 = vunpack.c.l.b16 %v14986_v20  ;;  %v3911_v63 = vunpack.c.l.b16 %v14929_v12 }
 0x636   : > { %v4122_v46 = vunpack.c.l.b16 %v3150_v55  ;;  %v3173_v55 = vrot.slane %v15226_v43, 4  ;;  %v3175_v49 = vrot.slane %v15301_v35, 4 }
 0x637   : > { %v4306_v44 = vpack.c.b16 %v4305_v11, %v4304_v36  ;;  %v2826_v36 = vadd.f32 %v2825_v26, %v14634_v28 }
 0x638   : > { %v4409_v28 = vunpack.c.l.b16 %v3173_v55 }
 0x639   : > { %3336 = vrot.lane.b32.xlu2 %v15280_v1, %s13330_s7 }
 0x63a   : > { %3002 = vrot.lane.b32.xlu1 %v14839_v38, %s13328_s27  ;;  %3304 = vrot.lane.b32.xlu0 %v15280_v1, %s13326_s8 }
 0x63b   : > { %11166 = vmatmul.msk.bf16.vlgmr.msrb.gmra.mxu3 %vm3474_vm10, %v3809_v42  ;;  %v15319_v53 = vpop.permute.xlu2 %3090  ;;  %v4311_v42 = vsel %vm3474_vm10, %v4306_v44, 0  ;;  %v15351_v44 = vpack.c.bf16 %v2826_v36, %v2826_v36 }
 0x63c   : > { %3930 = vmatpush.bf16.xpose.msra.mxu3 %v3921_v61  ;;  %19320 = vst [vmem:[#allocation122_spill] sm:$0xff] %v15319_v53  ;;  %v15321_v52 = vpop.permute.xlu1 %2930  ;;  %v15323_v17 = vpop.permute.xlu0 %3088 }
 0x63d   : > { %19321 = vst [vmem:[#allocation123_spill] sm:$0xff] %v15323_v17  ;;  %v3143_v58 = vrot.slane %v15321_v52, 4 }
 0x63f   : > { %v4019_v61 = vunpack.c.l.b16 %v3143_v58 }
 0x641   : > { %2970 = vrot.lane.b32.xlu2 %v14839_v38, %s13330_s7  ;;  %v4020_v5 = vpack.c.b16 %v4019_v61, %v4018_v37  ;;  %v4124_v37 = vpack.c.b16 %v4123_v15, %v4122_v46  ;;  %v3913_v61 = vpack.c.b16 %v3912_v22, %v3911_v63  ;;  %v15368_v15 = vpop.f32.mrf.mxu3  ;;  %v3158_v63 = vrot.slane %v15274_v9, 4 }
 0x642   : > { %3098 = vrot.lane.b32.xlu1 %v14839_v38, %s13331_s1  ;;  %2938 = vrot.lane.b32.xlu0 %v14839_v38, %s13326_s8  ;;  %19326 = vst [vmem:[#allocation128_spill] sm:$0xff] %v15368_v15 }
 0x643   : > { %11177 = vmatmul.msk.bf16.vlgmr.msra.gmra.mxu2 %vm3474_vm10, %v4095_v59  ;;  %v15340_v11 = vpop.permute.xlu2 %3330  ;;  %v4025_v24 = vsel %vm3474_vm10, %v4020_v5, 0  ;;  %v3172_v59 = vrot.slane %v15156_v13, 4  ;;  %v4129_v12 = vsel %vm3474_vm10, %v4124_v37, 0 }
 0x644   : > { %19323 = vst [vmem:[#allocation125_spill] sm:$0xff] %v15340_v11  ;;  %4320 = vmatpush.bf16.xpose.msra.mxu2 %v4311_v42  ;;  %v15344_v33 = vpop.permute.xlu1 %3026  ;;  %4034 = vmatpush.bf16.xpose.msrb.mxu3 %v4025_v24  ;;  %v15346_v58 = vpop.permute.xlu0 %3328  ;;  %v4198_v42 = vunpack.c.l.b16 %v15197_v18  ;;  %v4197_v24 = vunpack.c.l.b16 %v15201_v23 }
 0x645   : > { %19324 = vst [vmem:[#allocation126_spill] sm:$0xff] %v15346_v58  ;;  %v4408_v46 = vunpack.c.l.b16 %v3172_v59  ;;  %v4226_v59 = vunpack.c.l.b16 %v3158_v63 }
 0x646   : > { %v4199_v22 = vpack.c.b16 %v4198_v42, %v4197_v24  ;;  %v4015_v42 = vunpack.c.l.b16 %v15242_v62 }
 0x647   : > { %v4410_v36 = vpack.c.b16 %v4409_v28, %v4408_v46  ;;  %v4016_v28 = vunpack.c.l.b16 %v15321_v52 }
 0x649   : > { %3066 = vrot.lane.b32.xlu2 %v14839_v38, %s13332_s30  ;;  %v4415_v18 = vsel %vm3474_vm10, %v4410_v36, 0  ;;  %v15390_v46 = vpop.f32.mrf.mxu3  ;;  %v4017_v36 = vpack.c.b16 %v4016_v28, %v4015_v42  ;;  %v4301_v28 = vunpack.c.l.b16 %v14830_v21  ;;  %v3167_v42 = vrot.slane %v14970_v34, 4 }
 0x64a   : > { %3338 = vrot.lane.b32.xlu1 %v15351_v44, %s13330_s7  ;;  %3034 = vrot.lane.b32.xlu0 %v14839_v38, %s13329_s9  ;;  %19328 = vst [vmem:[#allocation130_spill] sm:$0xff] %v15390_v46 }
 0x64b   : > { %11170 = vmatmul.msk.bf16.vlgmr.msra.gmra.mxu3 %vm3474_vm10, %v3913_v61  ;;  %v15362_v20 = vpop.permute.xlu2 %2964 }
 0x64c   : > { %4138 = vmatpush.bf16.xpose.msra.mxu3 %v4129_v12  ;;  %v15364_v26 = vpop.permute.xlu1 %3266  ;;  %v15366_v5 = vpop.permute.xlu0 %2962  ;;  %v3181_v12 = vrot.slane %v14863_v47, 4 }
 0x64d   : > { %19325 = vst [vmem:[#allocation127_spill] sm:$0xff] %v15364_v26  ;;  %v3159_v38 = vrot.slane %v15366_v5, 4  ;;  %v4509_v26 = vunpack.c.l.b16 %v14853_v29 }
 0x64e   : > { %v4513_v52 = vunpack.c.l.b16 %v3181_v12  ;;  %v3166_v12 = vrot.slane %v14893_v40, 4 }
 0x64f   : > { %v4227_v55 = vunpack.c.l.b16 %v3159_v38  ;;  %v3180_v38 = vrot.slane %v14853_v29, 4  ;;  %v19343_v29 = vld [vmem:[#allocation53_spill] sm:$0xff] }
 0x651   : > { %3306 = vrot.lane.b32.xlu2 %v15351_v44, %s13326_s8  ;;  %v4228_v24 = vpack.c.b16 %v4227_v55, %v4226_v59  ;;  %v4302_v59 = vunpack.c.l.b16 %v14908_v6  ;;  %v15412_v11 = vpop.f32.mrf.mxu3  ;;  %v4331_v6 = vunpack.c.l.b16 %v3167_v42 }
 0x652   : > { %3344 = vrot.lane.b32.xlu1 %v14740_v0, %s13328_s27  ;;  %3274 = vrot.lane.b32.xlu0 %v15351_v44, %s13327_s14  ;;  %19331 = vst [vmem:[#allocation133_spill] sm:$0xff] %v15412_v11  ;;  %v3183_v11 = vrot.slane %v14998_v19, 4 }
 0x653   : > { %11181 = vmatmul.msk.bf16.vlgmr.msrb.gmra.mxu2 %vm3474_vm10, %v4199_v22  ;;  %v15382_v23 = vpop.permute.xlu2 %3060  ;;  %v4233_v22 = vsel %vm3474_vm10, %v4228_v24, 0 }
 0x654   : > { %19327 = vst [vmem:[#allocation129_spill] sm:$0xff] %v15382_v23  ;;  %4424 = vmatpush.bf16.xpose.msrb.mxu2 %v4415_v18  ;;  %v15384_v37 = vpop.permute.xlu1 %2900  ;;  %v15386_v61 = vpop.permute.xlu0 %3058  ;;  %v4512_v18 = vunpack.c.l.b16 %v3180_v38  ;;  %v4539_v23 = vunpack.c.l.b16 %v3183_v11 }
 0x656   : > { %v4514_v58 = vpack.c.b16 %v4513_v52, %v4512_v18  ;;  %v4120_v18 = vunpack.c.l.b16 %v14942_v51 }
 0x658   : > { %v4519_v21 = vsel %vm3474_vm10, %v4514_v58, 0 }
 0x659   : > { %3342 = vrot.lane.b32.xlu2 %v14689_v3, %s13328_s27  ;;  %v15438_v58 = vpop.f32.mrf.mxu3 }
 0x65a   : > { %3350 = vrot.lane.b32.xlu1 %v14884_v57, %s13328_s27  ;;  %3346 = vrot.lane.b32.xlu0 %v14785_v7, %s13328_s27  ;;  %19333 = vst [vmem:[#allocation135_spill] sm:$0xff] %v15438_v58 }
 0x65b   : > { %11174 = vmatmul.msk.bf16.vlgmr.msrb.gmra.mxu3 %vm3474_vm10, %v4017_v36  ;;  %v15402_v63 = vpop.permute.xlu2 %3300  ;;  %v4303_v36 = vpack.c.b16 %v4302_v59, %v4301_v28  ;;  %v4119_v59 = vunpack.c.l.b16 %v14946_v45  ;;  %v3189_v28 = vrot.slane %v15259_v39, 4 }
 0x65c   : > { %19329 = vst [vmem:[#allocation131_spill] sm:$0xff] %v15402_v63  ;;  %4242 = vmatpush.bf16.xpose.msrb.mxu3 %v4233_v22  ;;  %v15404_v62 = vpop.permute.xlu1 %2996  ;;  %v15406_v55 = vpop.permute.xlu0 %3298  ;;  %v4330_v22 = vunpack.c.l.b16 %v3166_v12 }
 0x65d   : > { %19330 = vst [vmem:[#allocation132_spill] sm:$0xff] %v15406_v55  ;;  %v4121_v42 = vpack.c.b16 %v4120_v18, %v4119_v59  ;;  %v4617_v51 = vunpack.c.l.b16 %v3189_v28  ;;  %v4406_v18 = vunpack.c.l.b16 %v15226_v43  ;;  %v4405_v59 = vunpack.c.l.b16 %v15156_v13 }
 0x65e   : > { %v4332_v63 = vpack.c.b16 %v4331_v6, %v4330_v22  ;;  %v3174_v28 = vrot.slane %v15306_v27, 4 }
 0x660   : > { %v4337_v45 = vsel %vm3474_vm10, %v4332_v63, 0  ;;  %v4435_v63 = vunpack.c.l.b16 %v3175_v49  ;;  %v4223_v49 = vunpack.c.l.b16 %v15274_v9  ;;  %v3128_v9 = vrot.slane %v15384_v37, 4 }
 0x661   : > { %3348 = vrot.lane.b32.xlu2 %v14837_v2, %s13328_s27 }
 0x662   : > { %3356 = vrot.lane.b32.xlu1 %v15013_v60, %s13328_s27  ;;  %3352 = vrot.lane.b32.xlu0 %v14933_v8, %s13328_s27 }
 0x663   : > { %11185 = vmatmul.msk.bf16.vlgmr.msra.gmra.mxu2 %vm3474_vm10, %v4303_v36  ;;  %v15422_v24 = vpop.permute.xlu2 %2934  ;;  %v3188_v36 = vrot.slane %v15185_v32, 4 }
 0x664   : > { %4528 = vmatpush.bf16.xpose.msra.mxu2 %v4519_v21  ;;  %v15424_v38 = vpop.permute.xlu1 %3092  ;;  %v15426_v52 = vpop.permute.xlu0 %2932 }
 0x665   : > { %19332 = vst [vmem:[#allocation134_spill] sm:$0xff] %v15424_v38  ;;  %v4616_v22 = vunpack.c.l.b16 %v3188_v36  ;;  %v4434_v36 = vunpack.c.l.b16 %v3174_v28  ;;  %v19342_v38 = vld [vmem:[#allocation65_spill] sm:$0xff] }
 0x666   : > { %v3182_v16 = vrot.slane %v19342_v38, 4 }
 0x667   : > { %v4618_v55 = vpack.c.b16 %v4617_v51, %v4616_v22  ;;  %v4224_v22 = vunpack.c.l.b16 %v15366_v5  ;;  %v4436_v28 = vpack.c.b16 %v4435_v63, %v4434_v36 }
 0x669   : > { %3354 = vrot.lane.b32.xlu2 %v14974_v14, %s13328_s27  ;;  %v4623_v13 = vsel %vm3474_vm10, %v4618_v55, 0  ;;  %v3137_v55 = vrot.slane %v15045_v50, 4  ;;  %v4441_v5 = vsel %vm3474_vm10, %v4436_v28, 0  ;;  %v3145_v28 = vrot.slane %v15422_v24, 4 }
 0x66a   : > { %3362 = vrot.lane.b32.xlu1 %v15138_v56, %s13328_s27  ;;  %3358 = vrot.lane.b32.xlu0 %v15062_v54, %s13328_s27 }
 0x66b   : > { %11178 = vmatmul.msk.bf16.vlgmr.msra.gmra.mxu3 %vm3474_vm10, %v4121_v42  ;;  %v15442_v12 = vpop.permute.xlu2 %3030  ;;  %v4407_v42 = vpack.c.b16 %v4406_v18, %v4405_v59  ;;  %v3197_v59 = vrot.slane %v14895_v30, 4  ;;  %v3941_v36 = vunpack.c.l.b16 %v3137_v55 }
 0x66c   : > { %19334 = vst [vmem:[#allocation136_spill] sm:$0xff] %v15442_v12  ;;  %4346 = vmatpush.bf16.xpose.msra.mxu3 %v4337_v45  ;;  %v15444_v6 = vpop.permute.xlu1 %3332  ;;  %v15446_v21 = vpop.permute.xlu0 %3028 }
 0x66d   : > { %19335 = vst [vmem:[#allocation137_spill] sm:$0xff] %v15444_v6  ;;  %v15464_v45 = vpop.f32.mrf.mxu3  ;;  %v4721_v6 = vunpack.c.l.b16 %v3197_v59 }
 0x66e   : > { %19336 = vst [vmem:[#allocation138_spill] sm:$0xff] %v15446_v21  ;;  %v4535_v21 = vunpack.c.l.b16 %v19342_v38 }
 0x66f   : > { %19338 = vst [vmem:[#allocation140_spill] sm:$0xff] %v15464_v45 }
 0x671   : > { %3360 = vrot.lane.b32.xlu2 %v15099_v31, %s13328_s27 }
 0x672   : > { %3368 = vrot.lane.b32.xlu1 %v15280_v1, %s13328_s27  ;;  %3364 = vrot.lane.b32.xlu0 %v15189_v4, %s13328_s27 }
 0x673   : > { %11189 = vmatmul.msk.bf16.vlgmr.msrb.gmra.mxu2 %vm3474_vm10, %v4407_v42  ;;  %v15467_v18 = vpop.permute.xlu2 %3270  ;;  %v3196_v42 = vrot.slane %v14812_v25, 4 }
 0x674   : > { %4632 = vmatpush.bf16.xpose.msrb.mxu2 %v4623_v13  ;;  %v15460_v43 = vpop.permute.xlu1 %2966  ;;  %v15462_v51 = vpop.permute.xlu0 %3268  ;;  %19339 = vst [vmem:[#allocation141_spill] sm:$0xff] %v15467_v18  ;;  %v4225_v13 = vpack.c.b16 %v4224_v22, %v4223_v49  ;;  %v4510_v49 = vunpack.c.l.b16 %v14863_v47 }
 0x675   : > { %19337 = vst [vmem:[#allocation139_spill] sm:$0xff] %v15462_v51  ;;  %v3136_v51 = vrot.slane %v14982_v48, 4  ;;  %v4720_v63 = vunpack.c.l.b16 %v3196_v42  ;;  %v15488_v15 = vpop.f32.mrf.mxu3  ;;  %v3144_v42 = vrot.slane %v15426_v52, 4 }
 0x676   : > { %19341 = vst [vmem:[#allocation143_spill] sm:$0xff] %v15488_v15  ;;  %v4511_v46 = vpack.c.b16 %v4510_v49, %v4509_v26  ;;  %v4538_v26 = vunpack.c.l.b16 %v3182_v16  ;;  %v4328_v49 = vunpack.c.l.b16 %v14970_v34  ;;  %v3833_v16 = vunpack.c.l.b16 %v15384_v37 }
 0x677   : > { %v3940_v58 = vunpack.c.l.b16 %v3136_v51  ;;  %v4722_v45 = vpack.c.b16 %v4721_v6, %v4720_v63  ;;  %v4045_v6 = vunpack.c.l.b16 %v3145_v28  ;;  %v4327_v28 = vunpack.c.l.b16 %v14893_v40 }
 0x679   : > { %3366 = vrot.lane.b32.xlu2 %v15232_v41, %s13328_s27  ;;  %v3942_v47 = vpack.c.b16 %v3941_v36, %v3940_v58 }
 0x67a   : > { %3374 = vrot.lane.b32.xlu1 %v14689_v3, %s13329_s9  ;;  %3370 = vrot.lane.b32.xlu0 %v15351_v44, %s13328_s27 }
 0x67b   : > { %11182 = vmatmul.msk.bf16.vlgmr.msrb.gmra.mxu3 %vm3474_vm10, %v4225_v13  ;;  %v3836_v13 = vunpack.c.l.b16 %v3128_v9  ;;  %v15492_v55 = vpop.permute.xlu2 %2904  ;;  %v4044_v9 = vunpack.c.l.b16 %v3144_v42  ;;  %v3947_v36 = vsel %vm3474_vm10, %v3942_v47, 0  ;;  %v19345_v42 = vld [vmem:[#allocation111_spill] sm:$0xff] }
 0x67c   : > { %4450 = vmatpush.bf16.xpose.msrb.mxu3 %v4441_v5  ;;  %v15483_v22 = vpop.permute.xlu1 %3062  ;;  %v2903_v59 = vpop.permute.xlu0 %2902 }
 0x67d   : > { %19340 = vst [vmem:[#allocation142_spill] sm:$0xff] %v15483_v22  ;;  %v3129_v18 = vrot.slane %v2903_v59, 4 }
 0x67f   : > { %v3837_v5 = vunpack.c.l.b16 %v3129_v18  ;;  %v4727_v18 = vsel %vm3474_vm10, %v4722_v45, 0  ;;  %v3205_v45 = vrot.slane %v19345_v42, 4 }
 0x681   : > { %3372 = vrot.lane.b32.xlu2 %v19343_v29, %s13329_s9  ;;  %v3838_v51 = vpack.c.b16 %v3837_v5, %v3836_v13  ;;  %v3834_v13 = vunpack.c.l.b16 %v2903_v59  ;;  %v19346_v5 = vld [vmem:[#allocation112_spill] sm:$0xff]  ;;  %v4825_v40 = vunpack.c.l.b16 %v3205_v45 }
 0x682   : > { %3380 = vrot.lane.b32.xlu1 %v14837_v2, %s13329_s9  ;;  %3376 = vrot.lane.b32.xlu0 %v14740_v0, %s13329_s9 }
 0x683   : > { %11193 = vmatmul.msk.bf16.vlgmr.msra.gmra.mxu2 %vm3474_vm10, %v4511_v46  ;;  %v3843_v58 = vsel %vm3474_vm10, %v3838_v51, 0  ;;  %v4540_v46 = vpack.c.b16 %v4539_v23, %v4538_v26  ;;  %v3204_v51 = vrot.slane %v19346_v5, 4  ;;  %v3835_v15 = vpack.c.b16 %v3834_v13, %v3833_v16  ;;  %v15516_v22 = vpop.permute.xlu2 %3000 }
 0x684   : > { %4736 = vmatpush.bf16.xpose.msra.mxu2 %v4727_v18  ;;  %v15504_v63 = vpop.permute.xlu1 %3302  ;;  %3852 = vmatpush.bf16.xpose.msra.mxu0 %v3843_v58  ;;  %v15506_v11 = vpop.permute.xlu0 %2998  ;;  %v4046_v18 = vpack.c.b16 %v4045_v6, %v4044_v9  ;;  %19348 = vst [vmem:[#allocation111_spill] sm:$0xff] %v15516_v22  ;;  %v4614_v6 = vunpack.c.l.b16 %v15259_v39  ;;  %v19350_v9 = vld [vmem:[#allocation88_spill] sm:$0xff]  ;;  %v4041_v22 = vunpack.c.l.b16 %v15426_v52 }
 0x685   : > { %19344 = vst [vmem:[#allocation65_spill] sm:$0xff] %v15504_v63  ;;  %v4329_v63 = vpack.c.b16 %v4328_v49, %v4327_v28  ;;  %v15514_v58 = vpop.f32.mrf.mxu3  ;;  %v4824_v34 = vunpack.c.l.b16 %v3204_v51  ;;  %v4545_v23 = vsel %vm3474_vm10, %v4540_v46, 0  ;;  %v3153_v26 = vrot.slane %v19350_v9, 4  ;;  %v19352_v28 = vld [vmem:[#allocation116_spill] sm:$0xff] }
 0x686   : > { %19347 = vst [vmem:[#allocation53_spill] sm:$0xff] %v15514_v58  ;;  %v4051_v37 = vsel %vm3474_vm10, %v4046_v18, 0  ;;  %v3190_v46 = vrot.slane %v19352_v28, 4 }
 0x687   : > { %v4826_v49 = vpack.c.b16 %v4825_v40, %v4824_v34 }
 0x689   : > { %3378 = vrot.lane.b32.xlu2 %v14785_v7, %s13329_s9  ;;  %v4831_v18 = vsel %vm3474_vm10, %v4826_v49, 0  ;;  %v19358_v49 = vld [vmem:[#allocation55_spill] sm:$0xff] }
 0x68a   : > { %3386 = vrot.lane.b32.xlu1 %v14974_v14, %s13329_s9  ;;  %3382 = vrot.lane.b32.xlu0 %v14884_v57, %s13329_s9 }
 0x68b   : > { %11167 = vmatmul.msk.bf16.vlgmr.msra.gmra.mxu0 %vm3474_vm10, %v3835_v15  ;;  %11186 = vmatmul.msk.bf16.vlgmr.msra.gmra.mxu3 %vm3474_vm10, %v4329_v63  ;;  %v3191_v15 = vrot.slane %v15344_v33, 4  ;;  %v19351_v63 = vld [vmem:[#allocation75_spill] sm:$0xff]  ;;  %v15546_v16 = vpop.permute.xlu2 %3096 }
 0x68c   : > { %3956 = vmatpush.bf16.xpose.msrb.mxu0 %v3947_v36  ;;  %4554 = vmatpush.bf16.xpose.msra.mxu3 %v4545_v23  ;;  %v15528_v59 = vpop.permute.xlu1 %2936  ;;  %v15530_v47 = vpop.permute.xlu0 %3094  ;;  %v4613_v36 = vunpack.c.l.b16 %v15185_v32  ;;  %v3152_v13 = vrot.slane %v19351_v63, 4  ;;  %v4149_v32 = vunpack.c.l.b16 %v3153_v26  ;;  %19354 = vst [vmem:[#allocation75_spill] sm:$0xff] %v15546_v16  ;;  %v4431_v26 = vunpack.c.l.b16 %v15306_v27 }
 0x68d   : > { %19349 = vst [vmem:[#allocation112_spill] sm:$0xff] %v15530_v47  ;;  %v15544_v39 = vpop.f32.mrf.mxu3  ;;  %v4643_v51 = vunpack.c.l.b16 %v3191_v15  ;;  %v19357_v15 = vld [vmem:[#allocation63_spill] sm:$0xff]  ;;  %v3937_v16 = vunpack.c.l.b16 %v14982_v48 }
 0x68e   : > { %v4615_v45 = vpack.c.b16 %v4614_v6, %v4613_v36  ;;  %19353 = vst [vmem:[#allocation88_spill] sm:$0xff] %v15544_v39  ;;  %v4148_v40 = vunpack.c.l.b16 %v3152_v13  ;;  %v4642_v6 = vunpack.c.l.b16 %v3190_v46  ;;  %v4432_v36 = vunpack.c.l.b16 %v15301_v35 }
 0x68f   : > { %v3213_v58 = vrot.slane %v19357_v15, 4  ;;  %v3212_v13 = vrot.slane %v19358_v49, 4 }
 0x690   : > { %v4644_v39 = vpack.c.b16 %v4643_v51, %v4642_v6  ;;  %v4433_v47 = vpack.c.b16 %v4432_v36, %v4431_v26  ;;  %v4718_v51 = vunpack.c.l.b16 %v14895_v30  ;;  %v19363_v6 = vld [vmem:[#allocation68_spill] sm:$0xff]  ;;  %v3160_v30 = vrot.slane %v15362_v20, 4 }
 0x691   : > { %3384 = vrot.lane.b32.xlu2 %v14933_v8, %s13329_s9  ;;  %v3198_v36 = vrot.slane %v19363_v6, 4 }
 0x692   : > { %3392 = vrot.lane.b32.xlu1 %v15099_v31, %s13329_s9  ;;  %3388 = vrot.lane.b32.xlu0 %v15013_v60, %s13329_s9  ;;  %v4649_v35 = vsel %vm3474_vm10, %v4644_v39, 0  ;;  %v3161_v39 = vrot.slane %v15460_v43, 4 }
 0x693   : > { %11197 = vmatmul.msk.bf16.vlgmr.msrb.gmra.mxu2 %vm3474_vm10, %v4615_v45  ;;  %v4150_v45 = vpack.c.b16 %v4149_v32, %v4148_v40  ;;  %v4928_v32 = vunpack.c.l.b16 %v3212_v13  ;;  %v19362_v40 = vld [vmem:[#allocation66_spill] sm:$0xff] }
 0x694   : > { %4060 = vmatpush.bf16.xpose.msra.mxu0 %v4051_v37  ;;  %4840 = vmatpush.bf16.xpose.msrb.mxu2 %v4831_v18  ;;  %v15550_v34 = vpop.permute.xlu1 %3032  ;;  %v15552_v23 = vpop.permute.xlu0 %3334  ;;  %v3938_v37 = vunpack.c.l.b16 %v15045_v50  ;;  %v4929_v50 = vunpack.c.l.b16 %v3213_v58 }
 0x695   : > { %19355 = vst [vmem:[#allocation116_spill] sm:$0xff] %v15550_v34  ;;  %v4155_v48 = vsel %vm3474_vm10, %v4150_v45, 0  ;;  %v15577_v58 = vpop.permute.xlu2 %3336  ;;  %v19364_v45 = vld [vmem:[#allocation94_spill] sm:$0xff]  ;;  %v4042_v34 = vunpack.c.l.b16 %v15422_v24 }
 0x696   : > { %19356 = vst [vmem:[#allocation144_spill] sm:$0xff] %v15552_v23  ;;  %v3939_v18 = vpack.c.b16 %v3938_v37, %v3937_v16  ;;  %v15575_v16 = vpop.f32.mrf.mxu3  ;;  %v3199_v37 = vrot.slane %v19362_v40, 4  ;;  %v4930_v26 = vpack.c.b16 %v4929_v50, %v4928_v32  ;;  %v4746_v23 = vunpack.c.l.b16 %v3198_v36 }
 0x697   : > { %19360 = vst [vmem:[#allocation55_spill] sm:$0xff] %v15575_v16  ;;  %v3130_v50 = vrot.slane %v15492_v55, 4  ;;  %v4252_v16 = vunpack.c.l.b16 %v3160_v30  ;;  %v4043_v53 = vpack.c.b16 %v4042_v34, %v4041_v22 }
 0x698   : > { %19361 = vst [vmem:[#allocation145_spill] sm:$0xff] %v15577_v58  ;;  %v4747_v58 = vunpack.c.l.b16 %v3199_v37  ;;  %v4935_v32 = vsel %vm3474_vm10, %v4930_v26, 0  ;;  %v19367_v26 = vld [vmem:[#allocation115_spill] sm:$0xff] }
 0x699   : > { %3390 = vrot.lane.b32.xlu2 %v15062_v54, %s13329_s9 }
 0x69a   : > { %3398 = vrot.lane.b32.xlu1 %v15232_v41, %s13329_s9  ;;  %3394 = vrot.lane.b32.xlu0 %v15138_v56, %s13329_s9  ;;  %v4748_v12 = vpack.c.b16 %v4747_v58, %v4746_v23  ;;  %v4822_v58 = vunpack.c.l.b16 %v19345_v42  ;;  %v3206_v42 = vrot.slane %v15290_v10, 4 }
 0x69b   : > { %11171 = vmatmul.msk.bf16.vlgmr.msrb.gmra.mxu0 %vm3474_vm10, %v3939_v18  ;;  %11190 = vmatmul.msk.bf16.vlgmr.msrb.gmra.mxu3 %vm3474_vm10, %v4433_v47  ;;  %v4717_v47 = vunpack.c.l.b16 %v14812_v25  ;;  %v3139_v18 = vrot.slane %v19364_v45, 4  ;;  %v4253_v25 = vunpack.c.l.b16 %v3161_v39 }
 0x69c   : > { %4164 = vmatpush.bf16.xpose.msrb.mxu0 %v4155_v48  ;;  %4658 = vmatpush.bf16.xpose.msrb.mxu3 %v4649_v35  ;;  %v15570_v27 = vpop.permute.xlu1 %3272  ;;  %v15572_v46 = vpop.permute.xlu0 %2968  ;;  %v19365_v48 = vld [vmem:[#allocation96_spill] sm:$0xff] }
 0x69d   : > { %19359 = vst [vmem:[#allocation63_spill] sm:$0xff] %v15570_v27  ;;  %v3138_v35 = vrot.slane %v19365_v48, 4  ;;  %v4719_v13 = vpack.c.b16 %v4718_v51, %v4717_v47  ;;  %v4536_v51 = vunpack.c.l.b16 %v14998_v19  ;;  %v3967_v47 = vunpack.c.l.b16 %v3139_v18  ;;  %v15604_v18 = vpop.permute.xlu2 %2970 }
 0x69e   : > { %v3862_v19 = vunpack.c.l.b16 %v3130_v50  ;;  %v19371_v50 = vld [vmem:[#allocation80_spill] sm:$0xff] }
 0x69f   : > { %v3966_v27 = vunpack.c.l.b16 %v3138_v35  ;;  %v4537_v17 = vpack.c.b16 %v4536_v51, %v4535_v21  ;;  %v4753_v21 = vsel %vm3474_vm10, %v4748_v12, 0  ;;  %v3168_v12 = vrot.slane %v19371_v50, 4 }
 0x6a1   : > { %3396 = vrot.lane.b32.xlu2 %v15189_v4, %s13329_s9  ;;  %v3968_v52 = vpack.c.b16 %v3967_v47, %v3966_v27  ;;  %v3207_v47 = vrot.slane %v15386_v61, 4 }
 0x6a2   : > { %3404 = vrot.lane.b32.xlu1 %v19343_v29, %s13332_s30  ;;  %3400 = vrot.lane.b32.xlu0 %v15280_v1, %s13329_s9  ;;  %v3221_v1 = vrot.slane %v19367_v26, 4 }
 0x6a3   : > { %11201 = vmatmul.msk.bf16.vlgmr.msra.gmra.mxu2 %vm3474_vm10, %v4719_v13  ;;  %v15601_v13 = vpop.f32.mrf.mxu3 }
 0x6a4   : > { %4944 = vmatpush.bf16.xpose.msra.mxu2 %v4935_v32  ;;  %v2907_v37 = vpop.permute.xlu1 %2906  ;;  %v15596_v36 = vpop.permute.xlu0 %3064  ;;  %v4254_v32 = vpack.c.b16 %v4253_v25, %v4252_v16  ;;  %v5033_v38 = vunpack.c.l.b16 %v3221_v1  ;;  %v4821_v1 = vunpack.c.l.b16 %v19346_v5  ;;  %v19370_v25 = vld [vmem:[#allocation78_spill] sm:$0xff] }
 0x6a5   : > { %19366 = vst [vmem:[#allocation66_spill] sm:$0xff] %v15596_v36  ;;  %v3131_v39 = vrot.slane %v2907_v37, 4  ;;  %v19368_v36 = vld [vmem:[#allocation106_spill] sm:$0xff]  ;;  %v3860_v51 = vunpack.c.l.b16 %v2907_v37  ;;  %v15632_v5 = vpop.permute.xlu2 %3066  ;;  %v3146_v37 = vrot.slane %v15528_v59, 4 }
 0x6a6   : > { %v3220_v30 = vrot.slane %v19368_v36, 4  ;;  %v4259_v23 = vsel %vm3474_vm10, %v4254_v32, 0  ;;  %v4823_v32 = vpack.c.b16 %v4822_v58, %v4821_v1  ;;  %v4640_v58 = vunpack.c.l.b16 %v15344_v33 }
 0x6a7   : > { %v3863_v35 = vunpack.c.l.b16 %v3131_v39 }
 0x6a8   : > { %v5032_v16 = vunpack.c.l.b16 %v3220_v30 }
 0x6a9   : > { %3402 = vrot.lane.b32.xlu2 %v15351_v44, %s13329_s9  ;;  %v3864_v24 = vpack.c.b16 %v3863_v35, %v3862_v19  ;;  %v3859_v19 = vunpack.c.l.b16 %v15492_v55  ;;  %v4851_v55 = vunpack.c.l.b16 %v3207_v47 }
 0x6aa   : > { %3410 = vrot.lane.b32.xlu1 %v14785_v7, %s13332_s30  ;;  %3406 = vrot.lane.b32.xlu0 %v14689_v3, %s13332_s30  ;;  %v5034_v39 = vpack.c.b16 %v5033_v38, %v5032_v16  ;;  %v4850_v16 = vunpack.c.l.b16 %v3206_v42  ;;  %v19373_v42 = vld [vmem:[#allocation86_spill] sm:$0xff] }
 0x6ab   : > { %11175 = vmatmul.msk.bf16.vlgmr.msra.gmra.mxu0 %vm3474_vm10, %v4043_v53  ;;  %11194 = vmatmul.msk.bf16.vlgmr.msra.gmra.mxu3 %vm3474_vm10, %v4537_v17  ;;  %v3869_v22 = vsel %vm3474_vm10, %v3864_v24, 0  ;;  %v3973_v53 = vsel %vm3474_vm10, %v3968_v52, 0  ;;  %v3169_v17 = vrot.slane %v19370_v25, 4  ;;  %v15629_v35 = vpop.f32.mrf.mxu3  ;;  %v4356_v24 = vunpack.c.l.b16 %v3168_v12 }
 0x6ac   : > { %4268 = vmatpush.bf16.xpose.msra.mxu0 %v4259_v23  ;;  %4762 = vmatpush.bf16.xpose.msra.mxu3 %v4753_v21  ;;  %v15618_v34 = vpop.permute.xlu1 %3002  ;;  %v15620_v27 = vpop.permute.xlu0 %3304  ;;  %v3861_v52 = vpack.c.b16 %v3860_v51, %v3859_v19  ;;  %v5039_v38 = vsel %vm3474_vm10, %v5034_v39, 0  ;;  %v4639_v12 = vunpack.c.l.b16 %v19352_v28  ;;  %v4070_v51 = vunpack.c.l.b16 %v3146_v37  ;;  %v19372_v19 = vld [vmem:[#allocation101_spill] sm:$0xff] }
 0x6ad   : > { %19369 = vst [vmem:[#allocation68_spill] sm:$0xff] %v15620_v27  ;;  %3878 = vmatpush.bf16.xpose.msrb.mxu1 %v3869_v22  ;;  %v4357_v30 = vunpack.c.l.b16 %v3169_v17  ;;  %v4146_v22 = vunpack.c.l.b16 %v19350_v9  ;;  %v4852_v39 = vpack.c.b16 %v4851_v55, %v4850_v16  ;;  %v3154_v33 = vrot.slane %v19373_v42, 4  ;;  %v15663_v28 = vpop.permute.xlu2 %3306 }
 0x6ae   : > { %19374 = vst [vmem:[#allocation94_spill] sm:$0xff] %v15663_v28 }
 0x6af   : > { %v4358_v17 = vpack.c.b16 %v4357_v30, %v4356_v24  ;;  %v4857_v24 = vsel %vm3474_vm10, %v4852_v39, 0 }
 0x6b1   : > { %3408 = vrot.lane.b32.xlu2 %v14740_v0, %s13332_s30  ;;  %v4363_v30 = vsel %vm3474_vm10, %v4358_v17, 0  ;;  %v3963_v17 = vunpack.c.l.b16 %v19365_v48 }
 0x6b2   : > { %3416 = vrot.lane.b32.xlu1 %v14933_v8, %s13332_s30  ;;  %3412 = vrot.lane.b32.xlu0 %v14837_v2, %s13332_s30 }
 0x6b3   : > { %11205 = vmatmul.msk.bf16.vlgmr.msrb.gmra.mxu2 %vm3474_vm10, %v4823_v32  ;;  %v3155_v32 = vrot.slane %v19372_v19, 4 }
 0x6b4   : > { %11168 = vmatmul.msk.bf16.vlgmr.msrb.gmra.mxu1 %vm3474_vm10, %v3861_v52  ;;  %5048 = vmatpush.bf16.xpose.msrb.mxu2 %v5039_v38  ;;  %v15644_v23 = vpop.permute.xlu1 %3098  ;;  %v15646_v21 = vpop.permute.xlu0 %2938  ;;  %v4641_v38 = vpack.c.b16 %v4640_v58, %v4639_v12  ;;  %v4926_v58 = vunpack.c.l.b16 %v19357_v15  ;;  %v6808_v12 = vunpack.c.l.b16 %v14689_v3 }
 0x6b5   : > { %3982 = vmatpush.bf16.xpose.msra.mxu1 %v3973_v53  ;;  %v3147_v1 = vrot.slane %v15646_v21, 4  ;;  %v4145_v53 = vunpack.c.l.b16 %v19351_v63  ;;  %v15661_v63 = vpop.f32.mrf.mxu3  ;;  %v4175_v37 = vunpack.c.l.b16 %v3155_v32  ;;  %v3177_v32 = vrot.slane %v15506_v11, 4 }
 0x6b7   : > { %v4071_v47 = vunpack.c.l.b16 %v3147_v1  ;;  %v4147_v52 = vpack.c.b16 %v4146_v22, %v4145_v53  ;;  %v4174_v1 = vunpack.c.l.b16 %v3154_v33  ;;  %v3964_v53 = vunpack.c.l.b16 %v19364_v45 }
 0x6b8   : > { %v3176_v33 = vrot.slane %v15404_v62, 4 }
 0x6b9   : > { %3414 = vrot.lane.b32.xlu2 %v14884_v57, %s13332_s30  ;;  %v4072_v9 = vpack.c.b16 %v4071_v47, %v4070_v51  ;;  %v4925_v51 = vunpack.c.l.b16 %v19358_v49  ;;  %v19376_v47 = vld [vmem:[#allocation71_spill] sm:$0xff]  ;;  %v3965_v45 = vpack.c.b16 %v3964_v53, %v3963_v17  ;;  %v4744_v53 = vunpack.c.l.b16 %v19362_v40 }
 0x6ba   : > { %3422 = vrot.lane.b32.xlu1 %v15062_v54, %s13332_s30  ;;  %3418 = vrot.lane.b32.xlu0 %v14974_v14, %s13332_s30  ;;  %v3215_v39 = vrot.slane %v19376_v47, 4  ;;  %v4743_v17 = vunpack.c.l.b16 %v19363_v6 }
 0x6bb   : > { %11179 = vmatmul.msk.bf16.vlgmr.msrb.gmra.mxu0 %vm3474_vm10, %v4147_v52  ;;  %11198 = vmatmul.msk.bf16.vlgmr.msrb.gmra.mxu3 %vm3474_vm10, %v4641_v38  ;;  %v4077_v55 = vsel %vm3474_vm10, %v4072_v9, 0  ;;  %v19377_v52 = vld [vmem:[#allocation60_spill] sm:$0xff]  ;;  %v4176_v9 = vpack.c.b16 %v4175_v37, %v4174_v1  ;;  %v4927_v15 = vpack.c.b16 %v4926_v58, %v4925_v51 }
 0x6bc   : > { %4372 = vmatpush.bf16.xpose.msrb.mxu0 %v4363_v30  ;;  %4866 = vmatpush.bf16.xpose.msrb.mxu3 %v4857_v24  ;;  %v15670_v22 = vpop.permute.xlu1 %3338  ;;  %v15672_v16 = vpop.permute.xlu0 %3034  ;;  %v3214_v38 = vrot.slane %v19377_v52, 4  ;;  %v6807_v30 = vunpack.c.l.b16 %v19343_v29  ;;  %v4955_v48 = vunpack.c.l.b16 %v3215_v39  ;;  %v4461_v24 = vunpack.c.l.b16 %v3177_v32 }
 0x6bd   : > { %19375 = vst [vmem:[#allocation96_spill] sm:$0xff] %v15670_v22  ;;  %4086 = vmatpush.bf16.xpose.msrb.mxu1 %v4077_v55  ;;  %v4181_v37 = vsel %vm3474_vm10, %v4176_v9, 0  ;;  %v15699_v51 = vpop.f32.mrf.mxu3  ;;  %v4250_v39 = vunpack.c.l.b16 %v15460_v43  ;;  %v15702_v32 = vpop.permute.xlu2 %3342 }
 0x6be   : > { %v6809_v49 = vpack.c.b16 %v6808_v12, %v6807_v30  ;;  %v4954_v55 = vunpack.c.l.b16 %v3214_v38  ;;  %v4460_v12 = vunpack.c.l.b16 %v3176_v33  ;;  %19380 = vst [vmem:[#allocation78_spill] sm:$0xff] %v15702_v32  ;;  %v4249_v38 = vunpack.c.l.b16 %v15362_v20  ;;  %v15707_v22 = vpop.f32.mrf.mxu2 }
 0x6c0   : > { %v4462_v9 = vpack.c.b16 %v4461_v24, %v4460_v12  ;;  %v4956_v30 = vpack.c.b16 %v4955_v48, %v4954_v55  ;;  %v4251_v40 = vpack.c.b16 %v4250_v39, %v4249_v38  ;;  %v19383_v12 = vld [vmem:[#allocation84_spill] sm:$0xff]  ;;  %v5029_v38 = vunpack.c.l.b16 %v19368_v36 }
 0x6c1   : > { %3420 = vrot.lane.b32.xlu2 %v15013_v60, %s13332_s30  ;;  %v3185_v39 = vrot.slane %v19383_v12, 4 }
 0x6c2   : > { %3428 = vrot.lane.b32.xlu1 %v15189_v4, %s13332_s30  ;;  %3424 = vrot.lane.b32.xlu0 %v15099_v31, %s13332_s30  ;;  %v4467_v20 = vsel %vm3474_vm10, %v4462_v9, 0  ;;  %v4961_v43 = vsel %vm3474_vm10, %v4956_v30, 0  ;;  %v19384_v9 = vld [vmem:[#allocation122_spill] sm:$0xff] }
 0x6c3   : > { %11209 = vmatmul.msk.bf16.vlgmr.msra.gmra.mxu2 %vm3474_vm10, %v4927_v15  ;;  %v3163_v15 = vrot.slane %v15604_v18, 4  ;;  %v3223_v30 = vrot.slane %v19384_v9, 4 }
 0x6c4   : > { %11172 = vmatmul.msk.bf16.vlgmr.msra.gmra.mxu1 %vm3474_vm10, %v3965_v45  ;;  %6821 = vmatpush.bf16.msra.mxu2 %v6809_v49  ;;  %v15693_v58 = vpop.permute.xlu1 %3344  ;;  %v15695_v1 = vpop.permute.xlu0 %3274  ;;  %v3162_v45 = vrot.slane %v15572_v46, 4  ;;  %v4745_v49 = vpack.c.b16 %v4744_v53, %v4743_v17  ;;  %v4068_v53 = vunpack.c.l.b16 %v15646_v21  ;;  %v6912_v17 = vunpack.c.l.b16 %v15062_v54 }
 0x6c5   : > { %19378 = vst [vmem:[#allocation115_spill] sm:$0xff] %v15693_v58  ;;  %4190 = vmatpush.bf16.xpose.msra.mxu1 %v4181_v37  ;;  %v4279_v6 = vunpack.c.l.b16 %v3163_v15  ;;  %v15723_v55 = vpop.f32.mrf.mxu3  ;;  %v5030_v37 = vunpack.c.l.b16 %v19367_v26  ;;  %v19385_v15 = vld [vmem:[#allocation123_spill] sm:$0xff]  ;;  %v19387_v26 = vld [vmem:[#allocation72_spill] sm:$0xff]  ;;  %v5059_v32 = vunpack.c.l.b16 %v3223_v30 }
 0x6c6   : > { %19379 = vst [vmem:[#allocation106_spill] sm:$0xff] %v15695_v1  ;;  %v4278_v33 = vunpack.c.l.b16 %v3162_v45  ;;  %v3222_v45 = vrot.slane %v19385_v15, 4  ;;  %v19388_v58 = vld [vmem:[#allocation120_spill] sm:$0xff] }
 0x6c7   : > { %v5031_v21 = vpack.c.b16 %v5030_v37, %v5029_v38 }
 0x6c9   : > { %3426 = vrot.lane.b32.xlu2 %v15138_v56, %s13332_s30 }
 0x6ca   : > { %3434 = vrot.lane.b32.xlu1 %v15351_v44, %s13332_s30  ;;  %3430 = vrot.lane.b32.xlu0 %v15232_v41, %s13332_s30 }
 0x6cb   : > { %11183 = vmatmul.msk.bf16.vlgmr.msra.gmra.mxu0 %vm3474_vm10, %v4251_v40  ;;  %11202 = vmatmul.msk.bf16.vlgmr.msra.gmra.mxu3 %vm3474_vm10, %v4745_v49  ;;  %v15732_v49 = vpop.permute.xlu2 %3348  ;;  %v4067_v40 = vunpack.c.l.b16 %v15528_v59  ;;  %v5058_v59 = vunpack.c.l.b16 %v3222_v45  ;;  %v4847_v45 = vunpack.c.l.b16 %v15290_v10 }
 0x6cc   : > { %4476 = vmatpush.bf16.xpose.msra.mxu0 %v4467_v20  ;;  %4970 = vmatpush.bf16.xpose.msra.mxu3 %v4961_v43  ;;  %v15719_v48 = vpop.permute.xlu1 %3350  ;;  %v15721_v24 = vpop.permute.xlu0 %3346  ;;  %19386 = vst [vmem:[#allocation86_spill] sm:$0xff] %v15732_v49  ;;  %v4280_v20 = vpack.c.b16 %v4279_v6, %v4278_v33  ;;  %v6911_v43 = vunpack.c.l.b16 %v15013_v60  ;;  %v4565_v49 = vunpack.c.l.b16 %v3185_v39  ;;  %v4848_v39 = vunpack.c.l.b16 %v15386_v61 }
 0x6cd   : > { %19381 = vst [vmem:[#allocation80_spill] sm:$0xff] %v15719_v48  ;;  %v3184_v48 = vrot.slane %v19387_v26, 4  ;;  %v15743_v6 = vpop.f32.mrf.mxu2  ;;  %v15755_v30 = vpop.f32.mrf.mxu3 }
 0x6ce   : > { %19382 = vst [vmem:[#allocation101_spill] sm:$0xff] %v15721_v24  ;;  %v4069_v24 = vpack.c.b16 %v4068_v53, %v4067_v40  ;;  %v6913_v36 = vpack.c.b16 %v6912_v17, %v6911_v43  ;;  %v4285_v33 = vsel %vm3474_vm10, %v4280_v20, 0  ;;  %v4353_v17 = vunpack.c.l.b16 %v19371_v50  ;;  %v19391_v20 = vld [vmem:[#allocation105_spill] sm:$0xff] }
 0x6cf   : > { %v4564_v38 = vunpack.c.l.b16 %v3184_v48  ;;  %v5060_v40 = vpack.c.b16 %v5059_v32, %v5058_v59  ;;  %v3171_v43 = vrot.slane %v19391_v20, 4  ;;  %v4172_v59 = vunpack.c.l.b16 %v19372_v19 }
 0x6d1   : > { %3432 = vrot.lane.b32.xlu2 %v19388_v58, %s13332_s30  ;;  %v5065_v61 = vsel %vm3474_vm10, %v5060_v40, 0  ;;  %v4383_v32 = vunpack.c.l.b16 %v3171_v43 }
 0x6d2   : > { %3440 = vrot.lane.b32.xlu1 %v14740_v0, %s13331_s1  ;;  %3436 = vrot.lane.b32.xlu0 %v19343_v29, %s13331_s1  ;;  %v4354_v29 = vunpack.c.l.b16 %v19370_v25  ;;  %v19393_v25 = vld [vmem:[#allocation92_spill] sm:$0xff] }
 0x6d3   : > { %11213 = vmatmul.msk.bf16.vlgmr.msrb.gmra.mxu2 %vm3474_vm10, %v5031_v21  ;;  %v3170_v50 = vrot.slane %v19393_v25, 4 }
 0x6d4   : > { %11176 = vmatmul.msk.bf16.vlgmr.msrb.gmra.mxu1 %vm3474_vm10, %v4069_v24  ;;  %6925 = vmatpush.bf16.msrb.mxu2 %v6913_v36  ;;  %v15748_v37 = vpop.permute.xlu1 %3356  ;;  %v15750_v53 = vpop.permute.xlu0 %3352  ;;  %v4566_v24 = vpack.c.b16 %v4565_v49, %v4564_v38  ;;  %v4355_v21 = vpack.c.b16 %v4354_v29, %v4353_v17  ;;  %v4849_v36 = vpack.c.b16 %v4848_v39, %v4847_v45  ;;  %v19396_v38 = vld [vmem:[#allocation136_spill] sm:$0xff]  ;;  %v19397_v17 = vld [vmem:[#allocation138_spill] sm:$0xff]  ;;  %v4171_v45 = vunpack.c.l.b16 %v19373_v42 }
 0x6d5   : > { %19389 = vst [vmem:[#allocation71_spill] sm:$0xff] %v15748_v37  ;;  %4294 = vmatpush.bf16.xpose.msrb.mxu1 %v4285_v33  ;;  %v15759_v37 = vpop.permute.xlu2 %3354  ;;  %v4382_v49 = vunpack.c.l.b16 %v3170_v50  ;;  %v15777_v33 = vpop.f32.mrf.mxu3  ;;  %v3193_v29 = vrot.slane %v19396_v38, 4  ;;  %v3192_v39 = vrot.slane %v19397_v17, 4  ;;  %v4952_v42 = vunpack.c.l.b16 %v19376_v47 }
 0x6d6   : > { %19390 = vst [vmem:[#allocation60_spill] sm:$0xff] %v15750_v53  ;;  %v4571_v10 = vsel %vm3474_vm10, %v4566_v24, 0  ;;  %v4173_v40 = vpack.c.b16 %v4172_v59, %v4171_v45  ;;  %v4458_v50 = vunpack.c.l.b16 %v15506_v11 }
 0x6d7   : > { %19392 = vst [vmem:[#allocation84_spill] sm:$0xff] %v15759_v37  ;;  %v4384_v24 = vpack.c.b16 %v4383_v32, %v4382_v49  ;;  %v4669_v19 = vunpack.c.l.b16 %v3193_v29  ;;  %v4668_v43 = vunpack.c.l.b16 %v3192_v39  ;;  %v4457_v32 = vunpack.c.l.b16 %v15404_v62 }
 0x6d8   : > { %v3179_v29 = vrot.slane %v15618_v34, 4  ;;  %v6833_v39 = vunpack.c.l.b16 %v14740_v0 }
 0x6d9   : > { %3438 = vrot.lane.b32.xlu2 %v14689_v3, %s13331_s1  ;;  %v4670_v59 = vpack.c.b16 %v4669_v19, %v4668_v43  ;;  %v4459_v11 = vpack.c.b16 %v4458_v50, %v4457_v32  ;;  %v4276_v43 = vunpack.c.l.b16 %v15604_v18 }
 0x6da   : > { %3446 = vrot.lane.b32.xlu1 %v14884_v57, %s13331_s1  ;;  %3442 = vrot.lane.b32.xlu0 %v14785_v7, %s13331_s1 }
 0x6db   : > { %11187 = vmatmul.msk.bf16.vlgmr.msrb.gmra.mxu0 %vm3474_vm10, %v4355_v21  ;;  %11206 = vmatmul.msk.bf16.vlgmr.msrb.gmra.mxu3 %vm3474_vm10, %v4849_v36  ;;  %v4389_v36 = vsel %vm3474_vm10, %v4384_v24, 0  ;;  %v19401_v24 = vld [vmem:[#allocation111_spill] sm:$0xff]  ;;  %v4675_v0 = vsel %vm3474_vm10, %v4670_v59, 0 }
 0x6dc   : > { %4580 = vmatpush.bf16.xpose.msrb.mxu0 %v4571_v10  ;;  %5074 = vmatpush.bf16.xpose.msrb.mxu3 %v5065_v61  ;;  %v15772_v3 = vpop.permute.xlu0 %3358  ;;  %v15774_v48 = vpop.permute.xlu1 %3362  ;;  %v4951_v61 = vunpack.c.l.b16 %v19377_v52  ;;  %v4487_v52 = vunpack.c.l.b16 %v3179_v29 }
 0x6dd   : > { %19394 = vst [vmem:[#allocation122_spill] sm:$0xff] %v15772_v3  ;;  %v15788_v21 = vpop.permute.xlu2 %3360  ;;  %v15803_v47 = vpop.f32.mrf.mxu3 }
 0x6de   : > { %19395 = vst [vmem:[#allocation123_spill] sm:$0xff] %v15774_v48  ;;  %v4953_v45 = vpack.c.b16 %v4952_v42, %v4951_v61  ;;  %v19403_v42 = vld [vmem:[#allocation90_spill] sm:$0xff]  ;;  %v19405_v61 = vld [vmem:[#allocation77_spill] sm:$0xff] }
 0x6df   : > { %19398 = vst [vmem:[#allocation72_spill] sm:$0xff] %v15788_v21  ;;  %v3201_v50 = vrot.slane %v19403_v42, 4  ;;  %v3200_v32 = vrot.slane %v19405_v61, 4 }
 0x6e1   : > { %3444 = vrot.lane.b32.xlu2 %v14837_v2, %s13331_s1 }
 0x6e2   : > { %3452 = vrot.lane.b32.xlu1 %v15013_v60, %s13331_s1  ;;  %3448 = vrot.lane.b32.xlu0 %v14933_v8, %s13331_s1  ;;  %v6834_v60 = vunpack.c.l.b16 %v14785_v7  ;;  %v3178_v7 = vrot.slane %v19401_v24, 4 }
 0x6e4   : > { %11180 = vmatmul.msk.bf16.vlgmr.msra.gmra.mxu1 %vm3474_vm10, %v4173_v40  ;;  %v15794_v10 = vpop.permute.xlu0 %3364  ;;  %v15799_v49 = vpop.permute.xlu1 %3368  ;;  %v6835_v62 = vpack.c.b16 %v6834_v60, %v6833_v39  ;;  %v4486_v19 = vunpack.c.l.b16 %v3178_v7  ;;  %v5056_v7 = vunpack.c.l.b16 %v19384_v9 }
 0x6e5   : > { %4398 = vmatpush.bf16.xpose.msra.mxu1 %v4389_v36  ;;  %19399 = vst [vmem:[#allocation120_spill] sm:$0xff] %v15794_v10  ;;  %v15815_v40 = vpop.permute.xlu2 %3366  ;;  %v4275_v36 = vunpack.c.l.b16 %v15572_v46  ;;  %v15823_v59 = vpop.f32.mrf.mxu3  ;;  %v4773_v46 = vunpack.c.l.b16 %v3201_v50 }
 0x6e6   : > { %19400 = vst [vmem:[#allocation105_spill] sm:$0xff] %v15799_v49  ;;  %v4488_v60 = vpack.c.b16 %v4487_v52, %v4486_v19  ;;  %v4561_v52 = vunpack.c.l.b16 %v19387_v26 }
 0x6e7   : > { %19402 = vst [vmem:[#allocation92_spill] sm:$0xff] %v15815_v40  ;;  %v4277_v29 = vpack.c.b16 %v4276_v43, %v4275_v36  ;;  %v19408_v36 = vld [vmem:[#allocation97_spill] sm:$0xff] }
 0x6e8   : > { %v4493_v18 = vsel %vm3474_vm10, %v4488_v60, 0  ;;  %v3187_v50 = vrot.slane %v19408_v36, 4  ;;  %v6937_v60 = vunpack.c.l.b16 %v15099_v31 }
 0x6e9   : > { %3450 = vrot.lane.b32.xlu2 %v14974_v14, %s13331_s1 }
 0x6ea   : > { %3458 = vrot.lane.b32.xlu1 %v15138_v56, %s13331_s1  ;;  %3454 = vrot.lane.b32.xlu0 %v15062_v54, %s13331_s1 }
 0x6eb   : > { %11191 = vmatmul.msk.bf16.vlgmr.msra.gmra.mxu0 %vm3474_vm10, %v4459_v11  ;;  %11210 = vmatmul.msk.bf16.vlgmr.msra.gmra.mxu3 %vm3474_vm10, %v4953_v45  ;;  %v4772_v45 = vunpack.c.l.b16 %v3200_v32  ;;  %v4562_v11 = vunpack.c.l.b16 %v19383_v12 }
 0x6ec   : > { %4684 = vmatpush.bf16.xpose.msra.mxu0 %v4675_v0  ;;  %6847 = vmatpush.bf16.msra.mxu3 %v6835_v62  ;;  %v15820_v54 = vpop.permute.xlu0 %3370  ;;  %v15825_v39 = vpop.permute.xlu1 %3374  ;;  %v5055_v62 = vunpack.c.l.b16 %v19385_v15  ;;  %v6938_v0 = vunpack.c.l.b16 %v15138_v56 }
 0x6ed   : > { %19404 = vst [vmem:[#allocation136_spill] sm:$0xff] %v15820_v54  ;;  %v15840_v19 = vpop.permute.xlu2 %3372  ;;  %v4774_v43 = vpack.c.b16 %v4773_v46, %v4772_v45  ;;  %v4563_v32 = vpack.c.b16 %v4562_v11, %v4561_v52  ;;  %v15851_v15 = vpop.f32.mrf.mxu3  ;;  %v4380_v45 = vunpack.c.l.b16 %v19391_v20  ;;  %v19412_v11 = vld [vmem:[#allocation142_spill] sm:$0xff]  ;;  %v19413_v52 = vld [vmem:[#allocation129_spill] sm:$0xff]  ;;  %v4666_v20 = vunpack.c.l.b16 %v19396_v38 }
 0x6ee   : > { %19406 = vst [vmem:[#allocation138_spill] sm:$0xff] %v15825_v39  ;;  %v5057_v12 = vpack.c.b16 %v5056_v7, %v5055_v62  ;;  %v6939_v56 = vpack.c.b16 %v6938_v0, %v6937_v60  ;;  %v3209_v7 = vrot.slane %v19412_v11, 4  ;;  %v4379_v62 = vunpack.c.l.b16 %v19393_v25 }
 0x6ef   : > { %19407 = vst [vmem:[#allocation111_spill] sm:$0xff] %v15840_v19  ;;  %v4779_v46 = vsel %vm3474_vm10, %v4774_v43, 0  ;;  %v3208_v60 = vrot.slane %v19413_v52, 4 }
 0x6f0   : > { %v4877_v49 = vunpack.c.l.b16 %v3209_v7  ;;  %v3490_v7 = vpop.f32.mrf.mxu1 }
 0x6f1   : > { %3456 = vrot.lane.b32.xlu2 %v15099_v31, %s13331_s1  ;;  %v4591_v31 = vunpack.c.l.b16 %v3187_v50  ;;  %v4876_v50 = vunpack.c.l.b16 %v3208_v60 }
 0x6f2   : > { %3464 = vrot.lane.b32.xlu1 %v19388_v58, %s13331_s1  ;;  %3460 = vrot.lane.b32.xlu0 %v15189_v4, %s13331_s1 }
 0x6f3   : > { %v4878_v25 = vpack.c.b16 %v4877_v49, %v4876_v50  ;;  %v19104_v49 = vlaneseq }
 0x6f4   : > { %11184 = vmatmul.msk.bf16.vlgmr.msrb.gmra.mxu1 %vm3474_vm10, %v4277_v29  ;;  %v19409_v29 = vld [vmem:[#allocation99_spill] sm:$0xff]  ;;  %v15847_v9 = vpop.permute.xlu0 %3376  ;;  %v15853_v26 = vpop.permute.xlu1 %3380 }
 0x6f5   : > { %4502 = vmatpush.bf16.xpose.msrb.mxu1 %v4493_v18  ;;  %v3186_v54 = vrot.slane %v19409_v29, 4  ;;  %19410 = vst [vmem:[#allocation90_spill] sm:$0xff] %v15847_v9 }
 0x6f6   : > { %19411 = vst [vmem:[#allocation77_spill] sm:$0xff] %v15853_v26  ;;  %v15862_v26 = vpop.permute.xlu2 %3378 }
 0x6f7   : > { %v4590_v18 = vunpack.c.l.b16 %v3186_v54  ;;  %19414 = vst [vmem:[#allocation97_spill] sm:$0xff] %v15862_v26 }
 0x6f9   : > { %3462 = vrot.lane.b32.xlu2 %v15232_v41, %s13331_s1  ;;  %v4592_v0 = vpack.c.b16 %v4591_v31, %v4590_v18  ;;  %v19417_v18 = vld [vmem:[#allocation116_spill] sm:$0xff] }
 0x6fa   : > { %3466 = vrot.lane.b32.xlu0 %v15351_v44, %s13331_s1 }
 0x6fb   : > { %11195 = vmatmul.msk.bf16.vlgmr.msrb.gmra.mxu0 %vm3474_vm10, %v4563_v32  ;;  %11214 = vmatmul.msk.bf16.vlgmr.msrb.gmra.mxu3 %vm3474_vm10, %v5057_v12  ;;  %v4381_v32 = vpack.c.b16 %v4380_v45, %v4379_v62  ;;  %v4597_v54 = vsel %vm3474_vm10, %v4592_v0, 0  ;;  %v4665_v12 = vunpack.c.l.b16 %v19397_v17  ;;  %v3194_v45 = vrot.slane %v19417_v18, 4 }
 0x6fc   : > { %4788 = vmatpush.bf16.xpose.msrb.mxu0 %v4779_v46  ;;  %6951 = vmatpush.bf16.msrb.mxu3 %v6939_v56  ;;  %v15864_v43 = vpop.permute.xlu0 %3382  ;;  %v15870_v56 = vpop.permute.xlu1 %3386  ;;  %v3195_v46 = vrot.slane %v15672_v16, 4  ;;  %v4883_v0 = vsel %vm3474_vm10, %v4878_v25, 0  ;;  %v4484_v17 = vunpack.c.l.b16 %v15618_v34  ;;  %v15887_v25 = vand.u32 127, %v19104_v49  ;;  %v19428_v49 = vld [vmem:[#allocation112_spill] sm:$0xff] }
 0x6fd   : > { %19415 = vst [vmem:[#allocation99_spill] sm:$0xff] %v15864_v43  ;;  %v4667_v31 = vpack.c.b16 %v4666_v20, %v4665_v12  ;;  %v4694_v38 = vunpack.c.l.b16 %v3194_v45  ;;  %v19421_v20 = vld [vmem:[#allocation82_spill] sm:$0xff] }
 0x6fe   : > { %19416 = vst [vmem:[#allocation142_spill] sm:$0xff] %v15870_v56  ;;  %v15874_v62 = vpop.permute.xlu2 %3384  ;;  %v4695_v60 = vunpack.c.l.b16 %v3195_v46  ;;  %v3216_v12 = vrot.slane %v19421_v20, 4  ;;  %vm5135_vm11 = vcmp.lt.s32.totalorder %v15887_v25, 9 }
 0x6ff   : > { %19418 = vst [vmem:[#allocation129_spill] sm:$0xff] %v15874_v62  ;;  %v4483_v62 = vunpack.c.l.b16 %v19401_v24  ;;  %v4769_v24 = vunpack.c.l.b16 %v19405_v61 }
 0x700   : > { %v4696_v43 = vpack.c.b16 %v4695_v60, %v4694_v38  ;;  %v4980_v45 = vunpack.c.l.b16 %v3216_v12  ;;  %v19424_v38 = vld [vmem:[#allocation103_spill] sm:$0xff] }
 0x702   : > { %v4701_v34 = vsel %vm3474_vm10, %v4696_v43, 0 }
 0x704   : > { %11188 = vmatmul.msk.bf16.vlgmr.msra.gmra.mxu1 %vm3474_vm10, %v4381_v32  ;;  %v15879_v32 = vpop.permute.xlu0 %3388  ;;  %v15883_v56 = vpop.permute.xlu1 %3392 }
 0x705   : > { %4606 = vmatpush.bf16.xpose.msra.mxu1 %v4597_v54  ;;  %19419 = vst [vmem:[#allocation116_spill] sm:$0xff] %v15879_v32  ;;  %v19420_v54 = vld [vmem:[#allocation81_spill] sm:$0xff]  ;;  %v4770_v32 = vunpack.c.l.b16 %v19403_v42 }
 0x706   : > { %v3217_v50 = vrot.slane %v19420_v54, 4  ;;  %19422 = vst [vmem:[#allocation81_spill] sm:$0xff] %v15883_v56  ;;  %v15892_v26 = vpop.permute.xlu2 %3390  ;;  %v19427_v42 = vld [vmem:[#allocation89_spill] sm:$0xff] }
 0x707   : > { %19423 = vst [vmem:[#allocation82_spill] sm:$0xff] %v15892_v26  ;;  %v4771_v43 = vpack.c.b16 %v4770_v32, %v4769_v24  ;;  %v4588_v32 = vunpack.c.l.b16 %v19408_v36  ;;  %v4587_v24 = vunpack.c.l.b16 %v19409_v29  ;;  %v19432_v36 = vld [vmem:[#allocation134_spill] sm:$0xff] }
 0x708   : > { %v4981_v46 = vunpack.c.l.b16 %v3217_v50  ;;  %v3224_v29 = vrot.slane %v19432_v36, 4 }
 0x70b   : > { %11199 = vmatmul.msk.bf16.vlgmr.msra.gmra.mxu0 %vm3474_vm10, %v4667_v31  ;;  %v4485_v31 = vpack.c.b16 %v4484_v17, %v4483_v62  ;;  %v4982_v62 = vpack.c.b16 %v4981_v46, %v4980_v45  ;;  %v3203_v17 = vrot.slane %v19424_v38, 4  ;;  %v15912_v45 = vsel %vm5135_vm11, %v3490_v7, -1e+30  ;;  %v19431_v7 = vld [vmem:[#allocation124_spill] sm:$0xff] }
 0x70c   : > { %4892 = vmatpush.bf16.xpose.msra.mxu0 %v4883_v0  ;;  %v3492_v0 = vpop.f32.mrf.mxu1  ;;  %v15901_v50 = vpop.permute.xlu0 %3394 }
 0x70d   : > { %v15898_v60 = vsel %vm5135_vm11, %v3492_v0, -1e+30  ;;  %19425 = vst [vmem:[#allocation103_spill] sm:$0xff] %v15901_v50  ;;  %v15903_v12 = vpop.permute.xlu1 %3398  ;;  %v4799_v46 = vunpack.c.l.b16 %v3203_v17 }
 0x70e   : > { %19426 = vst [vmem:[#allocation146_spill] sm:$0xff] %v15903_v12  ;;  %v5269_v61 = vsel %vm3474_vm10, %v15898_v60, -inf  ;;  %v3225_v12 = vrot.slane %v19428_v49, 4 }
 0x714   : > { %11192 = vmatmul.msk.bf16.vlgmr.msrb.gmra.mxu1 %vm3474_vm10, %v4485_v31  ;;  %v3202_v31 = vrot.slane %v19427_v42, 4  ;;  %v15932_v50 = vpop.permute.xlu0 %3400 }
 0x715   : > { %4710 = vmatpush.bf16.xpose.msrb.mxu1 %v4701_v34  ;;  %v4987_v34 = vsel %vm3474_vm10, %v4982_v62, 0  ;;  %v19430_v62 = vld [vmem:[#allocation130_spill] sm:$0xff]  ;;  %19433 = vst [vmem:[#allocation112_spill] sm:$0xff] %v15932_v50  ;;  %v15936_v26 = vpop.permute.xlu1 %3404 }
 0x716   : > { %v4798_v0 = vunpack.c.l.b16 %v3202_v31  ;;  %v15922_v56 = vsel %vm5135_vm11, %v19430_v62, -1e+30  ;;  %v15929_v31 = vsel %vm5135_vm11, %v19431_v7, -1e+30  ;;  %v5085_v62 = vunpack.c.l.b16 %v3225_v12  ;;  %19434 = vst [vmem:[#allocation130_spill] sm:$0xff] %v15936_v26  ;;  %v19436_v26 = vld [vmem:[#allocation140_spill] sm:$0xff] }
 0x717   : > { %v5084_v7 = vunpack.c.l.b16 %v3224_v29  ;;  %v4873_v12 = vunpack.c.l.b16 %v19413_v52 }
 0x718   : > { %v4800_v17 = vpack.c.b16 %v4799_v46, %v4798_v0  ;;  %v5272_v46 = vsel %vm3474_vm10, %v15929_v31, -inf }
 0x719   : > { %v5086_v50 = vpack.c.b16 %v5085_v62, %v5084_v7 }
 0x71a   : > { %v4805_v0 = vsel %vm3474_vm10, %v4800_v17, 0  ;;  %v19437_v17 = vld [vmem:[#allocation66_spill] sm:$0xff] }
 0x71b   : > { %11203 = vmatmul.msk.bf16.vlgmr.msrb.gmra.mxu0 %vm3474_vm10, %v4771_v43  ;;  %v15917_v43 = vpop.permute.xlu2 %3396  ;;  %v3210_v29 = vrot.slane %v19437_v17, 4 }
 0x71c   : > { %4996 = vmatpush.bf16.xpose.msrb.mxu0 %v4987_v34  ;;  %5270 = vmax.xlane.f32.xlu1 %v5269_v61  ;;  %19429 = vst [vmem:[#allocation89_spill] sm:$0xff] %v15917_v43  ;;  %v5266_v34 = vsel %vm3474_vm10, %v15912_v45, -inf  ;;  %v4589_v61 = vpack.c.b16 %v4588_v32, %v4587_v24  ;;  %v5278_v43 = vsel %vm3474_vm10, %v15922_v56, -inf  ;;  %v4874_v32 = vunpack.c.l.b16 %v19412_v11  ;;  %v19435_v24 = vld [vmem:[#allocation128_spill] sm:$0xff]  ;;  %v19438_v11 = vld [vmem:[#allocation133_spill] sm:$0xff]  ;;  %v15969_v40 = vpop.permute.xlu0 %3406 }
 0x71d   : > { %v4902_v9 = vunpack.c.l.b16 %v3210_v29  ;;  %19440 = vst [vmem:[#allocation134_spill] sm:$0xff] %v15969_v40 }
 0x722   : > { %5267 = vmax.xlane.f32.xlu2 %v5266_v34  ;;  %v15946_v34 = vsel %vm5135_vm11, %v19435_v24, -1e+30 }
 0x723   : > { %v15961_v24 = vpop.permute.xlu2 %3402  ;;  %v5275_v52 = vsel %vm3474_vm10, %v15946_v34, -inf }
 0x724   : > { %11196 = vmatmul.msk.bf16.vlgmr.msra.gmra.mxu1 %vm3474_vm10, %v4589_v61  ;;  %5279 = vmax.xlane.f32.xlu1 %v5278_v43  ;;  %v15952_v61 = vsel %vm5135_vm11, %v19436_v26, -1e+30  ;;  %v3211_v43 = vrot.slane %v15632_v5, 4  ;;  %19439 = vst [vmem:[#allocation124_spill] sm:$0xff] %v15961_v24  ;;  %v5091_v26 = vsel %vm3474_vm10, %v5086_v50, 0  ;;  %v4692_v50 = vunpack.c.l.b16 %v15672_v16  ;;  %v19444_v24 = vld [vmem:[#allocation143_spill] sm:$0xff] }
 0x725   : > { %4814 = vmatpush.bf16.xpose.msra.mxu1 %v4805_v0  ;;  %5273 = vmax.xlane.f32.xlu0 %v5272_v46  ;;  %v15959_v46 = vsel %vm5135_vm11, %v19438_v11, -1e+30  ;;  %v4875_v0 = vpack.c.b16 %v4874_v32, %v4873_v12  ;;  %v5287_v62 = vsel %vm3474_vm10, %v15952_v61, -inf  ;;  %v15973_v12 = vpop.permute.xlu1 %3410  ;;  %v19442_v11 = vld [vmem:[#allocation135_spill] sm:$0xff] }
 0x726   : > { %v4903_v7 = vunpack.c.l.b16 %v3211_v43  ;;  %v5281_v32 = vsel %vm3474_vm10, %v15959_v46, -inf  ;;  %19441 = vst [vmem:[#allocation128_spill] sm:$0xff] %v15973_v12  ;;  %v19443_v43 = vld [vmem:[#allocation88_spill] sm:$0xff] }
 0x727   : > { %v15986_v29 = vsel %vm5135_vm11, %v19443_v43, -1e+30 }
 0x728   : > { %v5296_v16 = vsel %vm3474_vm10, %v15986_v29, -inf }
 0x72a   : > { %5276 = vmax.xlane.f32.xlu2 %v5275_v52  ;;  %v15981_v52 = vpop.f32.mrf.mxu0 }
 0x72b   : > { %11207 = vmatmul.msk.bf16.vlgmr.msra.gmra.mxu0 %vm3474_vm10, %v4875_v0  ;;  %v15978_v0 = vsel %vm5135_vm11, %v19442_v11, -1e+30  ;;  %v15994_v11 = vsel %vm5135_vm11, %v19444_v24, -1e+30  ;;  %v15998_v40 = vpop.permute.xlu2 %3408  ;;  %v4977_v24 = vunpack.c.l.b16 %v19421_v20 }
 0x72c   : > { %5100 = vmatpush.bf16.xpose.msra.mxu0 %v5091_v26  ;;  %5288 = vmax.xlane.f32.xlu1 %v5287_v62  ;;  %v4691_v26 = vunpack.c.l.b16 %v19417_v18  ;;  %v4904_v62 = vpack.c.b16 %v4903_v7, %v4902_v9  ;;  %19445 = vst [vmem:[#allocation140_spill] sm:$0xff] %v15998_v40  ;;  %v5290_v43 = vsel %vm3474_vm10, %v15994_v11, -inf  ;;  %v4978_v18 = vunpack.c.l.b16 %v19420_v54  ;;  %v19446_v7 = vld [vmem:[#allocation53_spill] sm:$0xff]  ;;  %v19449_v54 = vld [vmem:[#allocation107_spill] sm:$0xff] }
 0x72d   : > { %5282 = vmax.xlane.f32.xlu0 %v5281_v32  ;;  %v5284_v32 = vsel %vm3474_vm10, %v15978_v0, -inf  ;;  %v16014_v40 = vpop.permute.xlu1 %3416  ;;  %v3219_v20 = vrot.slane %v19449_v54, 4 }
 0x72e   : > { %v4693_v12 = vpack.c.b16 %v4692_v50, %v4691_v26  ;;  %v4909_v9 = vsel %vm3474_vm10, %v4904_v62, 0  ;;  %v16009_v50 = vsel %vm5135_vm11, %v19446_v7, -1e+30  ;;  %v16011_v26 = vpop.permute.xlu0 %3412  ;;  %19448 = vst [vmem:[#allocation133_spill] sm:$0xff] %v16014_v40  ;;  %v6859_v62 = vunpack.c.l.b16 %v14837_v2  ;;  %v19451_v40 = vld [vmem:[#allocation95_spill] sm:$0xff] }
 0x72f   : > { %19447 = vst [vmem:[#allocation66_spill] sm:$0xff] %v16011_v26  ;;  %v3218_v26 = vrot.slane %v19451_v40, 4  ;;  %v5007_v10 = vunpack.c.l.b16 %v3219_v20  ;;  %v16050_v20 = vsel %vm5135_vm11, %v15723_v55, -1e+30 }
 0x730   : > { %v5314_v55 = vsel %vm3474_vm10, %v16050_v20, -inf }
 0x732   : > { %5285 = vmax.xlane.f32.xlu2 %v5284_v32  ;;  %v6860_v32 = vunpack.c.l.b16 %v14884_v57  ;;  %v16028_v7 = vpop.f32.mrf.mxu0  ;;  %v5293_v57 = vsel %vm3474_vm10, %v16009_v50, -inf }
 0x734   : > { %11200 = vmatmul.msk.bf16.vlgmr.msrb.gmra.mxu1 %vm3474_vm10, %v4693_v12  ;;  %5297 = vmax.xlane.f32.xlu1 %v5296_v16  ;;  %v16019_v12 = vsel %vm5135_vm11, %v15629_v35, -1e+30  ;;  %v19450_v16 = vld [vmem:[#allocation55_spill] sm:$0xff]  ;;  %v6861_v35 = vpack.c.b16 %v6860_v32, %v6859_v62  ;;  %v5006_v32 = vunpack.c.l.b16 %v3218_v26  ;;  %v4796_v62 = vunpack.c.l.b16 %v19424_v38 }
 0x735   : > { %4918 = vmatpush.bf16.xpose.msrb.mxu1 %v4909_v9  ;;  %5291 = vmax.xlane.f32.xlu0 %v5290_v43  ;;  %v16026_v43 = vsel %vm5135_vm11, %v19450_v16, -1e+30  ;;  %v4979_v9 = vpack.c.b16 %v4978_v18, %v4977_v24  ;;  %v5305_v2 = vsel %vm3474_vm10, %v16019_v12, -inf  ;;  %v16038_v24 = vpop.permute.xlu2 %3414  ;;  %v16043_v16 = vsel %vm5135_vm11, %v15601_v13, -1e+30  ;;  %v16063_v38 = vpop.permute.xlu1 %3422 }
 0x736   : > { %v5299_v18 = vsel %vm3474_vm10, %v16026_v43, -inf  ;;  %19452 = vst [vmem:[#allocation135_spill] sm:$0xff] %v16038_v24  ;;  %v16059_v13 = vsel %vm5135_vm11, %v15661_v63, -1e+30  ;;  %v5082_v63 = vunpack.c.l.b16 %v19428_v49  ;;  %v3227_v49 = vrot.slane %v15644_v23, 4 }
 0x737   : > { %19454 = vst [vmem:[#allocation143_spill] sm:$0xff] %v16063_v38 }
 0x73a   : > { %5294 = vmax.xlane.f32.xlu2 %v5293_v57  ;;  %v16052_v57 = vpop.permute.xlu0 %3418  ;;  %v16061_v26 = vpop.f32.mrf.mxu0 }
 0x73b   : > { %11211 = vmatmul.msk.bf16.vlgmr.msrb.gmra.mxu0 %vm3474_vm10, %v4979_v9  ;;  %v4795_v9 = vunpack.c.l.b16 %v19427_v42  ;;  %19453 = vst [vmem:[#allocation88_spill] sm:$0xff] %v16052_v57 }
 0x73c   : > { %6873 = vmatpush.bf16.msrb.mxu0 %v6861_v35  ;;  %5306 = vmax.xlane.f32.xlu1 %v5305_v2  ;;  %v5008_v35 = vpack.c.b16 %v5007_v10, %v5006_v32  ;;  %v5302_v2 = vsel %vm3474_vm10, %v16043_v16, -inf  ;;  %v5308_v10 = vsel %vm3474_vm10, %v16059_v13, -inf  ;;  %v16075_v32 = vsel %vm5135_vm11, %v15699_v51, -1e+30 }
 0x73d   : > { %5300 = vmax.xlane.f32.xlu0 %v5299_v18  ;;  %v4797_v42 = vpack.c.b16 %v4796_v62, %v4795_v9  ;;  %v6964_v62 = vunpack.c.l.b16 %v15232_v41  ;;  %v5081_v9 = vunpack.c.l.b16 %v19432_v36  ;;  %v16091_v51 = vsel %vm5135_vm11, %v15755_v30, -1e+30  ;;  %v19456_v36 = vld [vmem:[#allocation75_spill] sm:$0xff]  ;;  %v16100_v24 = vpop.permute.xlu1 %3428  ;;  %v3776_v30 = vpop.f32.mrf.mxu1 }
 0x73e   : > { %v5013_v18 = vsel %vm3474_vm10, %v5008_v35, 0  ;;  %v16084_v35 = vsel %vm5135_vm11, %v15803_v47, -1e+30  ;;  %v5311_v41 = vsel %vm3474_vm10, %v16075_v32, -inf  ;;  %19458 = vst [vmem:[#allocation55_spill] sm:$0xff] %v16100_v24 }
 0x73f   : > { %v16116_v24 = vsel %vm5135_vm11, %v3776_v30, -1e+30 }
 0x742   : > { %5303 = vmax.xlane.f32.xlu2 %v5302_v2  ;;  %v16079_v2 = vpop.permute.xlu2 %3420  ;;  %v16098_v57 = vpop.f32.mrf.mxu0 }
 0x743   : > { %19455 = vst [vmem:[#allocation53_spill] sm:$0xff] %v16079_v2 }
 0x744   : > { %11204 = vmatmul.msk.bf16.vlgmr.msra.gmra.mxu1 %vm3474_vm10, %v4797_v42  ;;  %5315 = vmax.xlane.f32.xlu1 %v5314_v55  ;;  %v6963_v42 = vunpack.c.l.b16 %v15189_v4  ;;  %v5083_v55 = vpack.c.b16 %v5082_v63, %v5081_v9  ;;  %v5323_v4 = vsel %vm3474_vm10, %v16084_v35, -inf  ;;  %v5111_v63 = vunpack.c.l.b16 %v3227_v49 }
 0x745   : > { %5022 = vmatpush.bf16.xpose.msra.mxu1 %v5013_v18  ;;  %5309 = vmax.xlane.f32.xlu0 %v5308_v10  ;;  %v3226_v10 = vrot.slane %v19456_v36, 4  ;;  %v16096_v18 = vpop.permute.xlu0 %3424  ;;  %v5317_v9 = vsel %vm3474_vm10, %v16091_v51, -inf }
 0x746   : > { %19457 = vst [vmem:[#allocation107_spill] sm:$0xff] %v16096_v18  ;;  %v6965_v47 = vpack.c.b16 %v6964_v62, %v6963_v42  ;;  %v16110_v62 = vsel %vm5135_vm11, %v15777_v33, -1e+30 }
 0x747   : > { %v5110_v42 = vunpack.c.l.b16 %v3226_v10 }
 0x749   : > { %v5112_v49 = vpack.c.b16 %v5111_v63, %v5110_v42  ;;  %v3778_v42 = vpop.f32.mrf.mxu1 }
 0x74a   : > { %5312 = vmax.xlane.f32.xlu2 %v5311_v41  ;;  %v4900_v41 = vunpack.c.l.b16 %v15632_v5  ;;  %v16125_v33 = vpop.permute.xlu2 %3426  ;;  %v5332_v5 = vsel %vm3474_vm10, %v16116_v24, -inf }
 0x74b   : > { %11215 = vmatmul.msk.bf16.vlgmr.msra.gmra.mxu0 %vm3474_vm10, %v5083_v55  ;;  %v4899_v55 = vunpack.c.l.b16 %v19437_v17  ;;  %19459 = vst [vmem:[#allocation95_spill] sm:$0xff] %v16125_v33  ;;  %v5117_v63 = vsel %vm3474_vm10, %v5112_v49, 0 }
 0x74c   : > { %6977 = vmatpush.bf16.msra.mxu0 %v6965_v47  ;;  %5324 = vmax.xlane.f32.xlu1 %v5323_v4  ;;  %v5320_v47 = vsel %vm3474_vm10, %v16110_v62, -inf  ;;  %v16123_v4 = vsel %vm5135_vm11, %v15981_v52, -1e+30  ;;  %v16140_v52 = vsel %vm5135_vm11, %v16028_v7, -1e+30 }
 0x74d   : > { %5318 = vmax.xlane.f32.xlu0 %v5317_v9  ;;  %v4901_v10 = vpack.c.b16 %v4900_v41, %v4899_v55  ;;  %v5326_v17 = vsel %vm3474_vm10, %v16123_v4, -inf  ;;  %v16131_v30 = vpop.permute.xlu0 %3430  ;;  %v16135_v9 = vpop.permute.xlu1 %3434  ;;  %v16145_v41 = vsel %vm5135_vm11, %v15743_v6, -1e+30  ;;  %v16149_v55 = vsel %vm5135_vm11, %v3778_v42, -1e+30 }
 0x74e   : > { %19460 = vst [vmem:[#allocation75_spill] sm:$0xff] %v16131_v30  ;;  %v5329_v49 = vsel %vm3474_vm10, %v16140_v52, -inf  ;;  %v5341_v7 = vsel %vm3474_vm10, %v16145_v41, -inf  ;;  %v5004_v6 = vunpack.c.l.b16 %v19449_v54  ;;  %v6886_v42 = vunpack.c.l.b16 %v14974_v14 }
 0x74f   : > { %19461 = vst [vmem:[#allocation147_spill] sm:$0xff] %v16135_v9  ;;  %v16176_v54 = vsel %vm5135_vm11, %v15823_v59, -1e+30 }
 0x750   : > { %v5344_v9 = vsel %vm3474_vm10, %v16176_v54, -inf }
 0x752   : > { %5321 = vmax.xlane.f32.xlu2 %v5320_v47  ;;  %v16153_v47 = vpop.permute.xlu2 %3432 }
 0x753   : > { %19462 = vst [vmem:[#allocation148_spill] sm:$0xff] %v16153_v47 }
 0x754   : > { %11208 = vmatmul.msk.bf16.vlgmr.msrb.gmra.mxu1 %vm3474_vm10, %v4901_v10  ;;  %5333 = vmax.xlane.f32.xlu1 %v5332_v5  ;;  %v5335_v10 = vsel %vm3474_vm10, %v16149_v55, -inf  ;;  %v16163_v5 = vsel %vm5135_vm11, %v15707_v22, -1e+30 }
 0x755   : > { %5126 = vmatpush.bf16.xpose.msrb.mxu1 %v5117_v63  ;;  %5327 = vmax.xlane.f32.xlu0 %v5326_v17  ;;  %v16165_v17 = vpop.permute.xlu0 %3436  ;;  %v16167_v63 = vpop.permute.xlu1 %3440 }
 0x756   : > { %19463 = vst [vmem:[#allocation149_spill] sm:$0xff] %v16165_v17 }
 0x757   : > { %19464 = vst [vmem:[#allocation150_spill] sm:$0xff] %v16167_v63 }
 0x75a   : > { %5330 = vmax.xlane.f32.xlu2 %v5329_v49  ;;  %v5003_v49 = vunpack.c.l.b16 %v19451_v40  ;;  %v16182_v14 = vpop.permute.xlu2 %3438  ;;  %v16187_v40 = vsel %vm5135_vm11, %v15851_v15, -1e+30 }
 0x75b   : > { %19465 = vst [vmem:[#allocation151_spill] sm:$0xff] %v16182_v14 }
 0x75c   : > { %5342 = vmax.xlane.f32.xlu1 %v5341_v7  ;;  %v5338_v7 = vsel %vm3474_vm10, %v16163_v5, -inf  ;;  %v5005_v22 = vpack.c.b16 %v5004_v6, %v5003_v49  ;;  %v16195_v49 = vpop.f32.mrf.mxu1 }
 0x75d   : > { %5336 = vmax.xlane.f32.xlu0 %v5335_v10  ;;  %v6885_v10 = vunpack.c.l.b16 %v14933_v8  ;;  %v16189_v59 = vpop.permute.xlu0 %3442  ;;  %v3906_v8 = vpop.f32.mrf.mxu2 }
 0x75e   : > { %19466 = vst [vmem:[#allocation152_spill] sm:$0xff] %v16189_v59  ;;  %v16191_v6 = vpop.permute.xlu1 %3446 }
 0x75f   : > { %v6887_v47 = vpack.c.b16 %v6886_v42, %v6885_v10  ;;  %19467 = vst [vmem:[#allocation153_spill] sm:$0xff] %v16191_v6  ;;  %v5347_v42 = vsel %vm3474_vm10, %v16187_v40, -inf  ;;  %v5107_v10 = vunpack.c.l.b16 %v19456_v36  ;;  %v6989_v6 = vunpack.c.l.b16 %v19388_v58 }
 0x762   : > { %5339 = vmax.xlane.f32.xlu2 %v5338_v7  ;;  %v5108_v7 = vunpack.c.l.b16 %v15644_v23  ;;  %v16203_v15 = vpop.permute.xlu2 %3444 }
 0x763   : > { %19468 = vst [vmem:[#allocation154_spill] sm:$0xff] %v16203_v15 }
 0x764   : > { %11212 = vmatmul.msk.bf16.vlgmr.msra.gmra.mxu1 %vm3474_vm10, %v5005_v22  ;;  %v5109_v63 = vpack.c.b16 %v5108_v7, %v5107_v10  ;;  %v16214_v30 = vpop.f32.mrf.mxu1 }
 0x765   : > { %6899 = vmatpush.bf16.msra.mxu1 %v6887_v47  ;;  %5345 = vmax.xlane.f32.xlu0 %v5344_v9  ;;  %v16201_v9 = vsel %vm5135_vm11, %v16061_v26, -1e+30  ;;  %v6990_v47 = vunpack.c.l.b16 %v15351_v44  ;;  %v3908_v23 = vpop.f32.mrf.mxu2 }
 0x766   : > { %v5350_v22 = vsel %vm3474_vm10, %v16201_v9, -inf  ;;  %v16212_v59 = vpop.permute.xlu1 %3452  ;;  %v16219_v44 = vsel %vm5135_vm11, %v3908_v23, -1e+30 }
 0x767   : > { %19470 = vst [vmem:[#allocation156_spill] sm:$0xff] %v16212_v59  ;;  %v6991_v26 = vpack.c.b16 %v6990_v47, %v6989_v6  ;;  %v5365_v58 = vsel %vm3474_vm10, %v16219_v44, -inf }
 0x76a   : > { %5348 = vmax.xlane.f32.xlu2 %v5347_v42  ;;  %v16210_v42 = vpop.permute.xlu0 %3448  ;;  %v16221_v36 = vpop.permute.xlu2 %3450 }
 0x76b   : > { %19469 = vst [vmem:[#allocation155_spill] sm:$0xff] %v16210_v42 }
 0x76c   : > { %19471 = vst [vmem:[#allocation157_spill] sm:$0xff] %v16221_v36 }
 0x76e   : > { %v16227_v10 = vpop.permute.xlu1 %3458 }
 0x76f   : > { %19473 = vst [vmem:[#allocation159_spill] sm:$0xff] %v16227_v10 }
 0x772   : > { %5351 = vmax.xlane.f32.xlu2 %v5350_v22  ;;  %v16225_v7 = vpop.permute.xlu0 %3454  ;;  %v16229_v6 = vpop.permute.xlu2 %3456 }
 0x773   : > { %19472 = vst [vmem:[#allocation158_spill] sm:$0xff] %v16225_v7 }
 0x774   : > { %11216 = vmatmul.msk.bf16.vlgmr.msrb.gmra.mxu1 %vm3474_vm10, %v5109_v63  ;;  %19474 = vst [vmem:[#allocation160_spill] sm:$0xff] %v16229_v6 }
 0x775   : > { %7003 = vmatpush.bf16.msrb.mxu1 %v6991_v26 }
 0x776   : > { %v16233_v63 = vpop.permute.xlu1 %3464 }
 0x777   : > { %19476 = vst [vmem:[#allocation162_spill] sm:$0xff] %v16233_v63 }
 0x77a   : > { %5366 = vmax.xlane.f32.xlu2 %v5365_v58  ;;  %v16231_v47 = vpop.permute.xlu0 %3460  ;;  %v16235_v22 = vpop.permute.xlu2 %3462 }
 0x77b   : > { %19475 = vst [vmem:[#allocation161_spill] sm:$0xff] %v16231_v47 }
 0x77c   : > { %19477 = vst [vmem:[#allocation163_spill] sm:$0xff] %v16235_v22 }
 0x782   : > { %v16237_v26 = vpop.permute.xlu0 %3466 }
 0x783   : > { %19478 = vst [vmem:[#allocation164_spill] sm:$0xff] %v16237_v26 }
 0x78f   : > { %v5271_v23 = vpop.xlane.xlu1 %5270 }
 0x790   : > { %v5651_v36 = vsub.f32 %v15898_v60, %v5271_v23 }
 0x792   : > { %v5780_v42 = vmul.f32 1.442695, %v5651_v36 }
 0x794   : > { %12120 = vpow2.f32 %v5780_v42 }
 0x795   : > { %v5268_v58 = vpop.xlane.xlu2 %5267 }
 0x796   : > { %v5650_v15 = vsub.f32 %v15912_v45, %v5268_v58  ;;  %v16252_v45 = vsel %vm5135_vm11, %v3906_v8, -1e+30  ;;  %v16264_v8 = vsel %vm5135_vm11, %v16098_v57, -1e+30 }
 0x797   : > { %v5280_v59 = vpop.xlane.xlu1 %5279  ;;  %v5353_v58 = vsel %vm3474_vm10, %v16264_v8, -inf }
 0x798   : > { %v5778_v10 = vmul.f32 1.442695, %v5650_v15  ;;  %v5274_v7 = vpop.xlane.xlu0 %5273 }
 0x799   : > { %v5652_v15 = vsub.f32 %v15929_v31, %v5274_v7 }
 0x79a   : > { %v16241_v6 = vpop.eup %12120  ;;  %12122 = vpow2.f32 %v5778_v10 }
 0x79b   : > { %v6037_v63 = vsel %vm3474_vm10, %v16241_v6, 0.0 }
 0x79c   : > { %6038 = vadd.xlane.f32.xlu0 %v6037_v63  ;;  %v5782_v63 = vmul.f32 1.442695, %v5652_v15 }
 0x79d   : > { %v5277_v22 = vpop.xlane.xlu2 %5276 }
 0x79e   : > { %v5653_v26 = vsub.f32 %v15946_v34, %v5277_v22  ;;  %v5362_v34 = vsel %vm3474_vm10, %v16252_v45, -inf }
 0x79f   : > { %v16246_v47 = vpop.xlane.xlu1 %5288 }
 0x7a0   : > { %v16248_v60 = vpop.eup %12122  ;;  %v5784_v42 = vmul.f32 1.442695, %v5653_v26  ;;  %v5283_v36 = vpop.xlane.xlu0 %5282 }
 0x7a1   : > { %v6034_v10 = vsel %vm3474_vm10, %v16248_v60, 0.0 }
 0x7a2   : > { %12124 = vpow2.f32 %v5784_v42  ;;  %6035 = vadd.xlane.f32.xlu1 %v6034_v10  ;;  %v4010_v42 = vpop.f32.mrf.mxu2 }
 0x7a3   : > { %12126 = vpow2.f32 %v5782_v63 }
 0x7a4   : > { %5363 = vmax.xlane.f32.xlu0 %v5362_v34  ;;  %v3932_v34 = vpop.f32.mrf.mxu3 }
 0x7a5   : > { %v16259_v22 = vpop.xlane.xlu2 %5285 }
 0x7a6   : > { %v5656_v38 = vsub.f32 %v15978_v0, %v16259_v22 }
 0x7a7   : > { %v5298_v23 = vpop.xlane.xlu1 %5297 }
 0x7a8   : > { %v16266_v31 = vpop.eup %12124  ;;  %v5292_v7 = vpop.xlane.xlu0 %5291  ;;  %v5790_v19 = vmul.f32 1.442695, %v5656_v38 }
 0x7a9   : > { %v5658_v26 = vsub.f32 %v15994_v11, %v5292_v7  ;;  %v6043_v15 = vsel %vm3474_vm10, %v16266_v31, 0.0  ;;  %v16273_v14 = vpop.eup %12126  ;;  %v16278_v11 = vsel %vm5135_vm11, %v3932_v34, -1e+30 }
 0x7aa   : > { %5354 = vmax.xlane.f32.xlu1 %v5353_v58  ;;  %v6040_v33 = vsel %vm3474_vm10, %v16273_v14, 0.0  ;;  %v5660_v58 = vsub.f32 %v15986_v29, %v5298_v23 }
 0x7ab   : > { %v5794_v10 = vmul.f32 1.442695, %v5658_v26 }
 0x7ac   : > { %6044 = vadd.xlane.f32.xlu0 %v6043_v15  ;;  %v5368_v15 = vsel %vm3474_vm10, %v16278_v11, -inf  ;;  %v5798_v18 = vmul.f32 1.442695, %v5660_v58 }
 0x7ad   : > { %12128 = vpow2.f32 %v5794_v10  ;;  %v5295_v57 = vpop.xlane.xlu2 %5294 }
 0x7ae   : > { %v5659_v63 = vsub.f32 %v16009_v50, %v5295_v57  ;;  %v5654_v50 = vsub.f32 %v15922_v56, %v5280_v59  ;;  %v4012_v57 = vpop.f32.mrf.mxu2 }
 0x7af   : > { %v16288_v10 = vpop.xlane.xlu1 %5306 }
 0x7b0   : > { %v5796_v7 = vmul.f32 1.442695, %v5659_v63  ;;  %v5301_v17 = vpop.xlane.xlu0 %5300  ;;  %v3934_v63 = vpop.f32.mrf.mxu3  ;;  %v5786_v29 = vmul.f32 1.442695, %v5654_v50  ;;  %v5663_v38 = vsub.f32 %v16019_v12, %v16288_v10 }
 0x7b1   : > { %v5661_v50 = vsub.f32 %v16026_v43, %v5301_v17 }
 0x7b2   : > { %12130 = vpow2.f32 %v5796_v7  ;;  %6041 = vadd.xlane.f32.xlu1 %v6040_v33  ;;  %v16296_v33 = vsel %vm5135_vm11, %v4012_v57, -1e+30  ;;  %v5655_v7 = vsub.f32 %v15959_v46, %v5283_v36 }
 0x7b3   : > { %v16283_v26 = vpop.eup %12128  ;;  %12132 = vpow2.f32 %v5798_v18  ;;  %v5800_v2 = vmul.f32 1.442695, %v5661_v50 }
 0x7b4   : > { %5369 = vmax.xlane.f32.xlu0 %v5368_v15  ;;  %v6058_v34 = vsel %vm3474_vm10, %v16283_v26, 0.0  ;;  %v16305_v15 = vsel %vm5135_vm11, %v3934_v63, -1e+30  ;;  %12134 = vpow2.f32 %v5786_v29  ;;  %v5788_v46 = vmul.f32 1.442695, %v5655_v7 }
 0x7b5   : > { %6059 = vadd.xlane.f32.xlu2 %v6058_v34  ;;  %v16299_v56 = vpop.xlane.xlu2 %5303  ;;  %v5389_v34 = vsel %vm3474_vm10, %v16296_v33, -inf  ;;  %v5371_v36 = vsel %vm3474_vm10, %v16305_v15, -inf  ;;  %v16316_v63 = vsel %vm5135_vm11, %v4010_v42, -1e+30 }
 0x7b6   : > { %12136 = vpow2.f32 %v5788_v46  ;;  %v5386_v7 = vsel %vm3474_vm10, %v16316_v63, -inf  ;;  %v4114_v0 = vpop.f32.mrf.mxu2 }
 0x7b7   : > { %v5316_v57 = vpop.xlane.xlu1 %5315  ;;  %12138 = vpow2.f32 %v5800_v2  ;;  %v16400_v10 = vsel %vm5135_vm11, %v4114_v0, -1e+30 }
 0x7b8   : > { %v16292_v23 = vpop.eup %12130  ;;  %v16301_v59 = vpop.xlane.xlu0 %5309  ;;  %v5666_v43 = vsub.f32 %v16050_v20, %v5316_v57 }
 0x7b9   : > { %v6061_v58 = vsel %vm3474_vm10, %v16292_v23, 0.0  ;;  %v16318_v18 = vpop.eup %12132 }
 0x7ba   : > { %6062 = vadd.xlane.f32.xlu1 %v6061_v58  ;;  %v16321_v29 = vpop.eup %12134  ;;  %v6064_v50 = vsel %vm3474_vm10, %v16318_v18, 0.0 }
 0x7bb   : > { %v6046_v20 = vsel %vm3474_vm10, %v16321_v29, 0.0 }
 0x7bc   : > { %5390 = vmax.xlane.f32.xlu0 %v5389_v34  ;;  %v16332_v46 = vpop.eup %12136 }
 0x7bd   : > { %5372 = vmax.xlane.f32.xlu2 %v5371_v36  ;;  %v16326_v34 = vpop.xlane.xlu2 %5312  ;;  %v5810_v36 = vmul.f32 1.442695, %v5666_v43  ;;  %v16334_v57 = vpop.eup %12138 }
 0x7c0   : > { %v5319_v17 = vpop.xlane.xlu0 %5318 }
 0x7c1   : > { %v5667_v58 = vsub.f32 %v16091_v51, %v5319_v17  ;;  %v6049_v51 = vsel %vm3474_vm10, %v16332_v46, 0.0  ;;  %v4036_v17 = vpop.f32.mrf.mxu3 }
 0x7c2   : > { %5387 = vmax.xlane.f32.xlu1 %v5386_v7  ;;  %v3958_v7 = vpop.f32.mrf.mxu0 }
 0x7c3   : > { %v5812_v42 = vmul.f32 1.442695, %v5667_v58  ;;  %v6067_v58 = vsel %vm3474_vm10, %v16334_v57, 0.0 }
 0x7c4   : > { %6065 = vadd.xlane.f32.xlu0 %v6064_v50 }
 0x7c5   : > { %12140 = vpow2.f32 %v5812_v42  ;;  %6047 = vadd.xlane.f32.xlu2 %v6046_v20  ;;  %v5322_v43 = vpop.xlane.xlu2 %5321  ;;  %v16353_v20 = vsel %vm5135_vm11, %v16195_v49, -1e+30  ;;  %v16366_v49 = vsel %vm5135_vm11, %v16214_v30, -1e+30 }
 0x7c6   : > { %12142 = vpow2.f32 %v5810_v36  ;;  %v16348_v36 = vsel %vm5135_vm11, %v3958_v7, -1e+30  ;;  %v5325_v7 = vpop.xlane.xlu1 %5324 }
 0x7c7   : > { %12144 = vpow2.f32 %v5790_v19  ;;  %v5662_v19 = vsub.f32 %v16043_v16, %v16299_v56  ;;  %v5410_v16 = vsel %vm3474_vm10, %v16400_v10, -inf }
 0x7c9   : > { %v4038_v37 = vpop.f32.mrf.mxu3  ;;  %v5802_v56 = vmul.f32 1.442695, %v5662_v19 }
 0x7ca   : > { %6050 = vadd.xlane.f32.xlu1 %v6049_v51  ;;  %v3960_v53 = vpop.f32.mrf.mxu0  ;;  %v16372_v22 = vsel %vm5135_vm11, %v4038_v37, -1e+30 }
 0x7cb   : > { %v16338_v2 = vpop.eup %12140  ;;  %v16376_v39 = vsel %vm5135_vm11, %v3960_v53, -1e+30  ;;  %v5395_v37 = vsel %vm3474_vm10, %v16372_v22, -inf  ;;  %v16390_v53 = vsel %vm5135_vm11, %v4036_v17, -1e+30  ;;  %v5668_v17 = vsub.f32 %v16110_v62, %v5322_v43 }
 0x7cc   : > { %v6085_v42 = vsel %vm3474_vm10, %v16338_v2, 0.0  ;;  %v16344_v50 = vpop.eup %12142  ;;  %v5377_v30 = vsel %vm3474_vm10, %v16376_v39, -inf }
 0x7cd   : > { %6068 = vadd.xlane.f32.xlu2 %v6067_v58  ;;  %6086 = vadd.xlane.f32.xlu0 %v6085_v42  ;;  %v6082_v51 = vsel %vm3474_vm10, %v16344_v50, 0.0  ;;  %v5374_v58 = vsel %vm3474_vm10, %v16348_v36, -inf  ;;  %v5356_v42 = vsel %vm3474_vm10, %v16353_v20, -inf }
 0x7ce   : > { %v16392_v48 = vpop.xlane.xlu1 %5333 }
 0x7d2   : > { %6083 = vadd.xlane.f32.xlu1 %v6082_v51  ;;  %v16368_v51 = vpop.xlane.xlu2 %5330 }
 0x7d5   : > { %5357 = vmax.xlane.f32.xlu2 %v5356_v42  ;;  %5375 = vmax.xlane.f32.xlu0 %v5374_v58  ;;  %v5359_v58 = vsel %vm3474_vm10, %v16366_v49, -inf  ;;  %v5657_v42 = vsub.f32 %v15952_v61, %v16246_v47  ;;  %v5804_v61 = vmul.f32 1.442695, %v5663_v38  ;;  %v16396_v47 = vpop.eup %12144 }
 0x7d7   : > { %v5792_v21 = vmul.f32 1.442695, %v5657_v42  ;;  %v4116_v42 = vpop.f32.mrf.mxu2 }
 0x7d8   : > { %v16412_v0 = vsel %vm5135_vm11, %v4116_v42, -1e+30 }
 0x7d9   : > { %12146 = vpow2.f32 %v5792_v21  ;;  %v5814_v21 = vmul.f32 1.442695, %v5668_v17  ;;  %v5413_v19 = vsel %vm3474_vm10, %v16412_v0, -inf }
 0x7da   : > { %5360 = vmax.xlane.f32.xlu1 %v5359_v58  ;;  %v5340_v12 = vpop.xlane.xlu2 %5339  ;;  %v5392_v58 = vsel %vm3474_vm10, %v16390_v53, -inf  ;;  %12148 = vpow2.f32 %v5804_v61 }
 0x7db   : > { %v5674_v38 = vsub.f32 %v16163_v5, %v5340_v12  ;;  %12150 = vpow2.f32 %v5802_v56  ;;  %v5669_v5 = vsub.f32 %v16084_v35, %v5325_v7 }
 0x7dc   : > { %12152 = vpow2.f32 %v5814_v21 }
 0x7dd   : > { %5378 = vmax.xlane.f32.xlu2 %v5377_v30  ;;  %5396 = vmax.xlane.f32.xlu0 %v5395_v37  ;;  %v6052_v30 = vsel %vm3474_vm10, %v16396_v47, 0.0  ;;  %v5826_v62 = vmul.f32 1.442695, %v5674_v38  ;;  %v5343_v37 = vpop.xlane.xlu1 %5342  ;;  %v5816_v42 = vmul.f32 1.442695, %v5669_v5 }
 0x7de   : > { %v5675_v12 = vsub.f32 %v16145_v41, %v5343_v37 }
 0x7df   : > { %v16414_v43 = vpop.eup %12146  ;;  %12154 = vpow2.f32 %v5826_v62 }
 0x7e0   : > { %v16417_v61 = vpop.eup %12148  ;;  %v6055_v17 = vsel %vm3474_vm10, %v16414_v43, 0.0  ;;  %v5828_v7 = vmul.f32 1.442695, %v5675_v12  ;;  %12156 = vpow2.f32 %v5816_v42  ;;  %v4062_v12 = vpop.f32.mrf.mxu0 }
 0x7e1   : > { %v6073_v38 = vsel %vm3474_vm10, %v16417_v61, 0.0  ;;  %v16426_v35 = vpop.eup %12150  ;;  %v16464_v27 = vsel %vm5135_vm11, %v4062_v12, -1e+30 }
 0x7e2   : > { %5393 = vmax.xlane.f32.xlu1 %v5392_v58  ;;  %v3984_v58 = vpop.f32.mrf.mxu1  ;;  %v6070_v41 = vsel %vm3474_vm10, %v16426_v35, 0.0  ;;  %12158 = vpow2.f32 %v5828_v7  ;;  %v4140_v7 = vpop.f32.mrf.mxu3 }
 0x7e3   : > { %v5349_v3 = vpop.xlane.xlu2 %5348 }
 0x7e5   : > { %5411 = vmax.xlane.f32.xlu2 %v5410_v16  ;;  %6053 = vadd.xlane.f32.xlu0 %v6052_v30  ;;  %v16428_v16 = vpop.eup %12152  ;;  %v5328_v30 = vpop.xlane.xlu0 %5327 }
 0x7e6   : > { %v16430_v56 = vpop.eup %12154  ;;  %v6088_v21 = vsel %vm3474_vm10, %v16428_v16, 0.0 }
 0x7e7   : > { %v6106_v62 = vsel %vm3474_vm10, %v16430_v56, 0.0  ;;  %v16438_v5 = vpop.eup %12156 }
 0x7ea   : > { %5414 = vmax.xlane.f32.xlu1 %v5413_v19  ;;  %v3986_v37 = vpop.f32.mrf.mxu1  ;;  %v16440_v19 = vpop.eup %12158 }
 0x7eb   : > { %19479 = vst [vmem:[#allocation165_spill] sm:$0xff] %v16440_v19  ;;  %v16444_v42 = vsel %vm5135_vm11, %v3986_v37, -1e+30  ;;  %v16456_v37 = vsel %vm5135_vm11, %v3984_v58, -1e+30  ;;  %v5670_v58 = vsub.f32 %v16123_v4, %v5328_v30 }
 0x7ec   : > { %19480 = vst [vmem:[#allocation166_spill] sm:$0xff] %v16444_v42  ;;  %v5380_v28 = vsel %vm3474_vm10, %v16456_v37, -inf }
 0x7ed   : > { %6056 = vadd.xlane.f32.xlu2 %v6055_v17  ;;  %6074 = vadd.xlane.f32.xlu0 %v6073_v38  ;;  %v6091_v17 = vsel %vm3474_vm10, %v16438_v5, 0.0  ;;  %v4218_v38 = vpop.f32.mrf.mxu2  ;;  %19481 = vst [vmem:[#allocation167_spill] sm:$0xff] %v16456_v37 }
 0x7f2   : > { %6071 = vadd.xlane.f32.xlu1 %v6070_v41  ;;  %v6109_v41 = vsel %vm3474_vm10, %v16440_v19, 0.0 }
 0x7f5   : > { %6089 = vadd.xlane.f32.xlu2 %v6088_v21  ;;  %6107 = vadd.xlane.f32.xlu0 %v6106_v62  ;;  %v5383_v21 = vsel %vm3474_vm10, %v16444_v42, -inf  ;;  %v16452_v62 = vpop.xlane.xlu0 %5336  ;;  %v4220_v12 = vpop.f32.mrf.mxu2 }
 0x7f6   : > { %v4142_v42 = vpop.f32.mrf.mxu3 }
 0x7f7   : > { %v16487_v30 = vsel %vm5135_vm11, %v4142_v42, -1e+30 }
 0x7fa   : > { %6092 = vadd.xlane.f32.xlu1 %v6091_v17  ;;  %v16460_v17 = vsel %vm5135_vm11, %v4140_v7, -1e+30  ;;  %v5398_v7 = vsel %vm3474_vm10, %v16464_v27, -inf }
 0x7fb   : > { %v5416_v1 = vsel %vm3474_vm10, %v16460_v17, -inf }
 0x7fd   : > { %6110 = vadd.xlane.f32.xlu2 %v6109_v41  ;;  %5384 = vmax.xlane.f32.xlu0 %v5383_v21  ;;  %v5664_v41 = vsub.f32 %v16059_v13, %v16301_v59  ;;  %v4064_v21 = vpop.f32.mrf.mxu0  ;;  %v5818_v13 = vmul.f32 1.442695, %v5670_v58  ;;  %v5346_v4 = vpop.xlane.xlu0 %5345  ;;  %v16483_v59 = vsel %vm5135_vm11, %v4220_v12, -1e+30  ;;  %v5419_v58 = vsel %vm3474_vm10, %v16487_v30, -inf }
 0x7fe   : > { %v16477_v37 = vsel %vm5135_vm11, %v4064_v21, -1e+30  ;;  %19482 = vst [vmem:[#allocation168_spill] sm:$0xff] %v16483_v59  ;;  %v16493_v21 = vpop.xlane.xlu2 %5351  ;;  %v5437_v42 = vsel %vm3474_vm10, %v16483_v59, -inf  ;;  %v4088_v59 = vpop.f32.mrf.mxu1 }
 0x7ff   : > { %v5806_v19 = vmul.f32 1.442695, %v5664_v41  ;;  %v5671_v41 = vsub.f32 %v16140_v52, %v16368_v51 }
 0x801   : > { %12160 = vpow2.f32 %v5806_v19  ;;  %v16502_v19 = vsel %vm5135_vm11, %v4218_v38, -1e+30  ;;  %v5820_v52 = vmul.f32 1.442695, %v5671_v41 }
 0x802   : > { %5381 = vmax.xlane.f32.xlu1 %v5380_v28  ;;  %v5665_v28 = vsub.f32 %v16075_v32, %v16326_v34  ;;  %12162 = vpow2.f32 %v5818_v13  ;;  %v5677_v34 = vsub.f32 %v16187_v40, %v5349_v3  ;;  %v5676_v3 = vsub.f32 %v16176_v54, %v5346_v4 }
 0x804   : > { %v5808_v32 = vmul.f32 1.442695, %v5665_v28  ;;  %v5832_v51 = vmul.f32 1.442695, %v5677_v34  ;;  %v5434_v28 = vsel %vm3474_vm10, %v16502_v19, -inf }
 0x805   : > { %5399 = vmax.xlane.f32.xlu2 %v5398_v7  ;;  %5417 = vmax.xlane.f32.xlu0 %v5416_v1  ;;  %v5401_v1 = vsel %vm3474_vm10, %v16477_v37, -inf  ;;  %v5830_v13 = vmul.f32 1.442695, %v5676_v3 }
 0x806   : > { %12164 = vpow2.f32 %v5808_v32  ;;  %v5367_v38 = vpop.xlane.xlu2 %5366 }
 0x807   : > { %v16504_v12 = vpop.eup %12160  ;;  %v5683_v34 = vsub.f32 %v16219_v44, %v5367_v38 }
 0x808   : > { %v16507_v40 = vpop.eup %12162 }
 0x809   : > { %v6094_v41 = vsel %vm3474_vm10, %v16507_v40, 0.0 }
 0x80a   : > { %5402 = vmax.xlane.f32.xlu1 %v5401_v1  ;;  %v6076_v1 = vsel %vm3474_vm10, %v16504_v12, 0.0 }
 0x80c   : > { %v16515_v32 = vpop.eup %12164 }
 0x80d   : > { %5420 = vmax.xlane.f32.xlu2 %v5419_v58  ;;  %5438 = vmax.xlane.f32.xlu0 %v5437_v42  ;;  %v6079_v3 = vsel %vm3474_vm10, %v16515_v32, 0.0 }
 0x80f   : > { %v6039_v7 = vpop.xlane.xlu0 %6038 }
 0x810   : > { %12166 = vrcp.f32 %v6039_v7 }
 0x811   : > { %12168 = vpow2.f32 %v5820_v52 }
 0x812   : > { %5435 = vmax.xlane.f32.xlu1 %v5434_v28  ;;  %12170 = vpow2.f32 %v5832_v51 }
 0x815   : > { %6077 = vadd.xlane.f32.xlu2 %v6076_v1  ;;  %6095 = vadd.xlane.f32.xlu0 %v6094_v41  ;;  %v6036_v54 = vpop.xlane.xlu1 %6035  ;;  %v4166_v1 = vpop.f32.mrf.mxu0  ;;  %v5844_v41 = vmul.f32 1.442695, %v5683_v34 }
 0x816   : > { %v12167_v4 = vpop.eup %12166  ;;  %12172 = vrcp.f32 %v6036_v54 }
 0x817   : > { %v5364_v58 = vpop.xlane.xlu0 %5363  ;;  %v16518_v42 = vpop.eup %12168  ;;  %12174 = vpow2.f32 %v5830_v13  ;;  %v6547_v7 = vmul.f32 %v12167_v4, %v16241_v6 }
 0x818   : > { %19483 = vst [vmem:[#allocation169_spill] sm:$0xff] %v16518_v42  ;;  %v5682_v52 = vsub.f32 %v16252_v45, %v5364_v58  ;;  %v16521_v51 = vpop.eup %12170  ;;  %v6097_v44 = vsel %vm3474_vm10, %v16518_v42, 0.0  ;;  %v4090_v42 = vpop.f32.mrf.mxu1 }
 0x819   : > { %19484 = vst [vmem:[#allocation170_spill] sm:$0xff] %v16521_v51  ;;  %v6115_v45 = vsel %vm3474_vm10, %v16521_v51, 0.0  ;;  %v6675_v13 = vpack.c.bf16 %v6547_v7, %v6547_v7 }
 0x81a   : > { %v5842_v28 = vmul.f32 1.442695, %v5682_v52  ;;  %6080 = vadd.xlane.f32.xlu1 %v6079_v3  ;;  %v19486_v52 = vld [vmem:[#allocation58_spill] sm:$0xff] }
 0x81b   : > { %v7016_v3 = vunpack.c.l.b16 %v19486_v52  ;;  %v6805_v51 = vunpack.c.l.b16 %v6675_v13 }
 0x81c   : > { %v12173_v54 = vpop.eup %12172  ;;  %12176 = vpow2.f32 %v5842_v28  ;;  %v16538_v28 = vsel %vm5135_vm11, %v4088_v59, -1e+30 }
 0x81d   : > { %v6546_v38 = vmul.f32 %v12173_v54, %v16248_v60  ;;  %6098 = vadd.xlane.f32.xlu2 %v6097_v44  ;;  %6116 = vadd.xlane.f32.xlu0 %v6115_v45  ;;  %v16531_v6 = vpop.xlane.xlu1 %5354  ;;  %v16533_v4 = vpop.eup %12174  ;;  %12178 = vpow2.f32 %v5844_v41  ;;  %19487 = vst [vmem:[#allocation58_spill] sm:$0xff] %v16538_v28  ;;  %v19489_v44 = vld [vmem:[#allocation57_spill] sm:$0xff] }
 0x81e   : > { %19485 = vst [vmem:[#allocation171_spill] sm:$0xff] %v16533_v4  ;;  %v6112_v60 = vsel %vm3474_vm10, %v16533_v4, 0.0  ;;  %v7015_v45 = vunpack.c.l.b16 %v19489_v44  ;;  %v4168_v13 = vpop.f32.mrf.mxu0  ;;  %v4244_v44 = vpop.f32.mrf.mxu3 }
 0x81f   : > { %v6674_v34 = vpack.c.bf16 %v6546_v38, %v6546_v38  ;;  %v6045_v58 = vpop.xlane.xlu0 %6044 }
 0x820   : > { %12180 = vrcp.f32 %v6045_v58  ;;  %v5404_v58 = vsel %vm3474_vm10, %v16538_v28, -inf  ;;  %v7017_v59 = vpack.c.b16 %v7016_v3, %v7015_v45  ;;  %v16558_v3 = vsel %vm5135_vm11, %v4090_v42, -1e+30 }
 0x821   : > { %v6804_v7 = vunpack.c.l.b16 %v6674_v34  ;;  %19492 = vst [vmem:[#allocation174_spill] sm:$0xff] %v16558_v3 }
 0x822   : > { %v16542_v54 = vpop.eup %12176  ;;  %6113 = vadd.xlane.f32.xlu1 %v6112_v60 }
 0x823   : > { %19488 = vst [vmem:[#allocation172_spill] sm:$0xff] %v16542_v54  ;;  %v6806_v41 = vpack.c.b16 %v6805_v51, %v6804_v7  ;;  %v6130_v38 = vsel %vm3474_vm10, %v16542_v54, 0.0  ;;  %v16549_v52 = vpop.eup %12178  ;;  %v16554_v7 = vsel %vm5135_vm11, %v4168_v13, -1e+30 }
 0x824   : > { %19490 = vst [vmem:[#allocation57_spill] sm:$0xff] %v16549_v52  ;;  %v5425_v13 = vsel %vm3474_vm10, %v16554_v7, -inf }
 0x825   : > { %5405 = vmax.xlane.f32.xlu0 %v5404_v58  ;;  %6131 = vadd.xlane.f32.xlu2 %v6130_v38  ;;  %v6042_v34 = vpop.xlane.xlu1 %6041  ;;  %19491 = vst [vmem:[#allocation173_spill] sm:$0xff] %v16554_v7  ;;  %v6133_v38 = vsel %vm3474_vm10, %v16549_v52, 0.0  ;;  %v5673_v58 = vsub.f32 %v16149_v55, %v16452_v62  ;;  %v5672_v55 = vsub.f32 %v16116_v24, %v16392_v48  ;;  %v19494_v52 = vld [vmem:[#allocation76_spill] sm:$0xff] }
 0x826   : > { %v12181_v4 = vpop.eup %12180  ;;  %12182 = vrcp.f32 %v6042_v34  ;;  %11217 = vmatmul.msk.bf16.vlgmr.msra.gmra.mxu2 %vm3474_vm10, %v6806_v41  ;;  %v4322_v41 = vpop.f32.mrf.mxu2  ;;  %v5407_v34 = vsel %vm3474_vm10, %v16558_v3, -inf  ;;  %v7042_v3 = vunpack.c.l.b16 %v19494_v52 }
 0x827   : > { %7029 = vmatpush.bf16.msra.mxu2 %v7017_v59  ;;  %v5370_v51 = vpop.xlane.xlu0 %5369  ;;  %v6549_v45 = vmul.f32 %v12181_v4, %v16266_v31  ;;  %v16572_v4 = vsel %vm5135_vm11, %v4166_v1, -1e+30  ;;  %v5824_v62 = vmul.f32 1.442695, %v5673_v58  ;;  %v5678_v1 = vsub.f32 %v16201_v9, %v16493_v21 }
 0x828   : > { %v6060_v60 = vpop.xlane.xlu2 %6059  ;;  %19493 = vst [vmem:[#allocation175_spill] sm:$0xff] %v16572_v4  ;;  %v5422_v48 = vsel %vm3474_vm10, %v16572_v4, -inf  ;;  %v5684_v52 = vsub.f32 %v16278_v11, %v5370_v51 }
 0x829   : > { %12184 = vrcp.f32 %v6060_v60  ;;  %v6677_v42 = vpack.c.bf16 %v6549_v45, %v6549_v45  ;;  %v16583_v45 = vsel %vm5135_vm11, %v4244_v44, -1e+30 }
 0x82a   : > { %6134 = vadd.xlane.f32.xlu1 %v6133_v38  ;;  %v5440_v21 = vsel %vm3474_vm10, %v16583_v45, -inf }
 0x82b   : > { %v6831_v24 = vunpack.c.l.b16 %v6677_v42  ;;  %v5834_v42 = vmul.f32 1.442695, %v5678_v1 }
 0x82c   : > { %v12183_v59 = vpop.eup %12182 }
 0x82d   : > { %v6548_v28 = vmul.f32 %v12183_v59, %v16273_v14  ;;  %5426 = vmax.xlane.f32.xlu0 %v5425_v13  ;;  %5408 = vmax.xlane.f32.xlu2 %v5407_v34  ;;  %v6063_v31 = vpop.xlane.xlu1 %6062  ;;  %v16579_v14 = vsel %vm5135_vm11, %v4322_v41, -1e+30  ;;  %v19495_v41 = vld [vmem:[#allocation67_spill] sm:$0xff]  ;;  %v4246_v34 = vpop.f32.mrf.mxu3 }
 0x82e   : > { %12186 = vrcp.f32 %v6063_v31  ;;  %v7041_v13 = vunpack.c.l.b16 %v19495_v41  ;;  %v5822_v31 = vmul.f32 1.442695, %v5672_v55  ;;  %v5458_v9 = vsel %vm3474_vm10, %v16579_v14, -inf  ;;  %v4324_v4 = vpop.f32.mrf.mxu2 }
 0x82f   : > { %v12185_v60 = vpop.eup %12184  ;;  %v6676_v38 = vpack.c.bf16 %v6548_v28, %v6548_v28  ;;  %v5391_v7 = vpop.xlane.xlu0 %5390  ;;  %12188 = vpow2.f32 %v5824_v62  ;;  %v5846_v55 = vmul.f32 1.442695, %v5684_v52  ;;  %v5679_v62 = vsub.f32 %v16264_v8, %v16531_v6  ;;  %v19497_v6 = vld [vmem:[#allocation110_spill] sm:$0xff] }
 0x830   : > { %v5373_v59 = vpop.xlane.xlu2 %5372  ;;  %v6554_v58 = vmul.f32 %v12185_v60, %v16283_v26  ;;  %v16599_v60 = vsel %vm5135_vm11, %v4246_v34, -1e+30  ;;  %12190 = vpow2.f32 %v5822_v31 }
 0x831   : > { %v6830_v28 = vunpack.c.l.b16 %v6676_v38  ;;  %v7043_v38 = vpack.c.b16 %v7042_v3, %v7041_v13  ;;  %12192 = vpow2.f32 %v5834_v42  ;;  %v5443_v8 = vsel %vm3474_vm10, %v16599_v60, -inf }
 0x832   : > { %5423 = vmax.xlane.f32.xlu1 %v5422_v48  ;;  %v6682_v26 = vpack.c.bf16 %v6554_v58, %v6554_v58  ;;  %v19496_v48 = vld [vmem:[#allocation119_spill] sm:$0xff]  ;;  %v7119_v13 = vunpack.c.l.b16 %v19497_v6  ;;  %v5836_v34 = vmul.f32 1.442695, %v5679_v62 }
 0x833   : > { %v6832_v44 = vpack.c.b16 %v6831_v24, %v6830_v28  ;;  %v7120_v24 = vunpack.c.l.b16 %v19496_v48 }
 0x834   : > { %v12187_v54 = vpop.eup %12186  ;;  %v6908_v52 = vunpack.c.l.b16 %v6682_v26 }
 0x835   : > { %v6555_v11 = vmul.f32 %v12187_v54, %v16292_v23  ;;  %5459 = vmax.xlane.f32.xlu0 %v5458_v9  ;;  %5441 = vmax.xlane.f32.xlu2 %v5440_v21  ;;  %v5388_v51 = vpop.xlane.xlu1 %5387  ;;  %v16607_v23 = vsel %vm5135_vm11, %v4324_v4, -1e+30  ;;  %v5691_v54 = vsub.f32 %v16296_v33, %v5391_v7  ;;  %v16610_v58 = vpop.eup %12188  ;;  %v5685_v4 = vsub.f32 %v16305_v15, %v5373_v59 }
 0x836   : > { %11218 = vmatmul.msk.bf16.vlgmr.msra.gmra.mxu3 %vm3474_vm10, %v6832_v44  ;;  %v6103_v33 = vsel %vm3474_vm10, %v16610_v58, 0.0  ;;  %v5461_v7 = vsel %vm3474_vm10, %v16607_v23, -inf  ;;  %v16620_v9 = vpop.eup %12190  ;;  %v7121_v21 = vpack.c.b16 %v7120_v24, %v7119_v13 }
 0x837   : > { %v6683_v1 = vpack.c.bf16 %v6555_v11, %v6555_v11  ;;  %7055 = vmatpush.bf16.msra.mxu3 %v7043_v38  ;;  %v6066_v3 = vpop.xlane.xlu0 %6065  ;;  %v5860_v44 = vmul.f32 1.442695, %v5691_v54  ;;  %v16622_v38 = vpop.eup %12192  ;;  %v5848_v59 = vmul.f32 1.442695, %v5685_v4  ;;  %v5690_v11 = vsub.f32 %v16316_v63, %v5388_v51 }
 0x838   : > { %v6048_v28 = vpop.xlane.xlu2 %6047  ;;  %v6100_v48 = vsel %vm3474_vm10, %v16620_v9, 0.0 }
 0x839   : > { %v6909_v41 = vunpack.c.l.b16 %v6683_v1  ;;  %12194 = vrcp.f32 %v6048_v28  ;;  %v5858_v54 = vmul.f32 1.442695, %v5690_v11 }
 0x83a   : > { %12196 = vpow2.f32 %v5846_v55  ;;  %5444 = vmax.xlane.f32.xlu1 %v5443_v8 }
 0x83b   : > { %v6910_v31 = vpack.c.b16 %v6909_v41, %v6908_v52  ;;  %12198 = vrcp.f32 %v6066_v3  ;;  %v6118_v52 = vsel %vm3474_vm10, %v16622_v38, 0.0 }
 0x83d   : > { %6104 = vadd.xlane.f32.xlu0 %v6103_v33  ;;  %5462 = vmax.xlane.f32.xlu2 %v5461_v7  ;;  %v6051_v42 = vpop.xlane.xlu1 %6050 }
 0x83e   : > { %12200 = vrcp.f32 %v6051_v42  ;;  %11221 = vmatmul.msk.bf16.vlgmr.msrb.gmra.mxu2 %vm3474_vm10, %v6910_v31  ;;  %v19498_v31 = vld [vmem:[#allocation87_spill] sm:$0xff] }
 0x83f   : > { %v12195_v15 = vpop.eup %12194  ;;  %12202 = vpow2.f32 %v5836_v34  ;;  %7133 = vmatpush.bf16.msrb.mxu2 %v7121_v21  ;;  %v7068_v4 = vunpack.c.l.b16 %v19498_v31 }
 0x840   : > { %v16625_v26 = vpop.eup %12196  ;;  %12204 = vpow2.f32 %v5860_v44  ;;  %v6069_v55 = vpop.xlane.xlu2 %6068  ;;  %v6550_v3 = vmul.f32 %v12195_v15, %v16321_v29 }
 0x841   : > { %v6087_v62 = vpop.xlane.xlu0 %6086  ;;  %v12199_v1 = vpop.eup %12198  ;;  %12206 = vrcp.f32 %v6069_v55  ;;  %v6136_v63 = vsel %vm3474_vm10, %v16625_v26, 0.0 }
 0x842   : > { %12208 = vrcp.f32 %v6087_v62  ;;  %6101 = vadd.xlane.f32.xlu1 %v6100_v48  ;;  %v6556_v28 = vmul.f32 %v12199_v1, %v16318_v18  ;;  %v6678_v29 = vpack.c.bf16 %v6550_v3, %v6550_v3  ;;  %v19499_v1 = vld [vmem:[#allocation74_spill] sm:$0xff]  ;;  %v19500_v48 = vld [vmem:[#allocation127_spill] sm:$0xff] }
 0x843   : > { %12210 = vpow2.f32 %v5848_v59  ;;  %v7067_v3 = vunpack.c.l.b16 %v19499_v1 }
 0x844   : > { %v12201_v24 = vpop.eup %12200  ;;  %v6684_v44 = vpack.c.bf16 %v6556_v28, %v6556_v28  ;;  %v6856_v15 = vunpack.c.l.b16 %v6678_v29  ;;  %v16652_v28 = vpop.f32.mrf.mxu3 }
 0x845   : > { %v16636_v51 = vpop.eup %12202  ;;  %v6551_v41 = vmul.f32 %v12201_v24, %v16332_v46  ;;  %6119 = vadd.xlane.f32.xlu2 %v6118_v52  ;;  %6137 = vadd.xlane.f32.xlu0 %v6136_v63  ;;  %v6084_v8 = vpop.xlane.xlu1 %6083  ;;  %v7146_v24 = vunpack.c.l.b16 %v19500_v48 }
 0x846   : > { %v16639_v6 = vpop.eup %12204  ;;  %12212 = vrcp.f32 %v6084_v8  ;;  %v4192_v46 = vpop.f32.mrf.mxu1  ;;  %v6121_v55 = vsel %vm3474_vm10, %v16636_v51, 0.0  ;;  %v6934_v63 = vunpack.c.l.b16 %v6684_v44  ;;  %v7069_v8 = vpack.c.b16 %v7068_v4, %v7067_v3 }
 0x847   : > { %v12207_v13 = vpop.eup %12206  ;;  %v6679_v34 = vpack.c.bf16 %v6551_v41, %v6551_v41  ;;  %12214 = vpow2.f32 %v5858_v54  ;;  %v4270_v52 = vpop.f32.mrf.mxu0  ;;  %v16673_v3 = vsel %vm5135_vm11, %v4192_v46, -1e+30 }
 0x848   : > { %v12209_v18 = vpop.eup %12208  ;;  %v6557_v33 = vmul.f32 %v12207_v13, %v16334_v57  ;;  %v5358_v7 = vpop.xlane.xlu2 %5357  ;;  %v19501_v13 = vld [vmem:[#allocation118_spill] sm:$0xff]  ;;  %v16666_v4 = vsel %vm5135_vm11, %v4270_v52, -1e+30  ;;  %v5428_v46 = vsel %vm3474_vm10, %v16673_v3, -inf }
 0x849   : > { %v16643_v21 = vpop.xlane.xlu0 %5375  ;;  %v16645_v42 = vpop.eup %12210  ;;  %v6857_v59 = vunpack.c.l.b16 %v6679_v34  ;;  %v6563_v11 = vmul.f32 %v12209_v18, %v16338_v2  ;;  %v6157_v2 = vsel %vm3474_vm10, %v16639_v6, 0.0  ;;  %v7145_v34 = vunpack.c.l.b16 %v19501_v13  ;;  %v19503_v52 = vld [vmem:[#allocation54_spill] sm:$0xff] }
 0x84a   : > { %v6685_v62 = vpack.c.bf16 %v6557_v33, %v6557_v33  ;;  %6122 = vadd.xlane.f32.xlu1 %v6121_v55  ;;  %v6139_v29 = vsel %vm3474_vm10, %v16645_v42, 0.0 }
 0x84b   : > { %v6858_v57 = vpack.c.b16 %v6857_v59, %v6856_v15  ;;  %v6691_v18 = vpack.c.bf16 %v6563_v11, %v6563_v11  ;;  %v7147_v44 = vpack.c.b16 %v7146_v24, %v7145_v34 }
 0x84c   : > { %v12213_v54 = vpop.eup %12212  ;;  %v6935_v41 = vunpack.c.l.b16 %v6685_v62  ;;  %v19502_v62 = vld [vmem:[#allocation61_spill] sm:$0xff]  ;;  %v4350_v34 = vpop.f32.mrf.mxu3 }
 0x84d   : > { %v6562_v31 = vmul.f32 %v12213_v54, %v16344_v50  ;;  %6140 = vadd.xlane.f32.xlu2 %v6139_v29  ;;  %6158 = vadd.xlane.f32.xlu0 %v6157_v2  ;;  %v5361_v33 = vpop.xlane.xlu1 %5360  ;;  %v16660_v15 = vpop.eup %12214  ;;  %v7224_v1 = vunpack.c.l.b16 %v19502_v62  ;;  %v7013_v48 = vunpack.c.l.b16 %v6691_v18  ;;  %v5680_v54 = vsub.f32 %v16353_v20, %v5358_v7 }
 0x84e   : > { %v6936_v59 = vpack.c.b16 %v6935_v41, %v6934_v63  ;;  %11219 = vmatmul.msk.bf16.vlgmr.msrb.gmra.mxu0 %vm3474_vm10, %v6858_v57  ;;  %v6154_v24 = vsel %vm3474_vm10, %v16660_v15, 0.0  ;;  %v7223_v63 = vunpack.c.l.b16 %v19503_v52  ;;  %v4194_v41 = vpop.f32.mrf.mxu1  ;;  %v5446_v2 = vsel %vm3474_vm10, %v16666_v4, -inf }
 0x84f   : > { %v6690_v55 = vpack.c.bf16 %v6562_v31, %v6562_v31  ;;  %7081 = vmatpush.bf16.msrb.mxu0 %v7069_v8  ;;  %v4272_v18 = vpop.f32.mrf.mxu0  ;;  %v16685_v20 = vsel %vm5135_vm11, %v4194_v41, -1e+30  ;;  %v5838_v7 = vmul.f32 1.442695, %v5680_v54  ;;  %v5681_v31 = vsub.f32 %v16366_v49, %v5361_v33 }
 0x850   : > { %v5379_v11 = vpop.xlane.xlu2 %5378  ;;  %11222 = vmatmul.msk.bf16.vlgmr.msrb.gmra.mxu3 %vm3474_vm10, %v6936_v59  ;;  %v7225_v8 = vpack.c.b16 %v7224_v1, %v7223_v63  ;;  %v16691_v62 = vsel %vm5135_vm11, %v4350_v34, -1e+30  ;;  %v16695_v1 = vsel %vm5135_vm11, %v4272_v18, -1e+30  ;;  %v16709_v52 = vsel %vm5135_vm11, %v16652_v28, -1e+30 }
 0x851   : > { %v16669_v50 = vpop.xlane.xlu0 %5396  ;;  %v7012_v57 = vunpack.c.l.b16 %v6690_v55  ;;  %7159 = vmatpush.bf16.msrb.mxu3 %v7147_v44  ;;  %v4426_v55 = vpop.f32.mrf.mxu2  ;;  %12216 = vpow2.f32 %v5838_v7  ;;  %v5840_v49 = vmul.f32 1.442695, %v5681_v31  ;;  %v5449_v33 = vsel %vm3474_vm10, %v16695_v1, -inf }
 0x852   : > { %6155 = vadd.xlane.f32.xlu1 %v6154_v24  ;;  %v5467_v24 = vsel %vm3474_vm10, %v16691_v62, -inf  ;;  %v5464_v28 = vsel %vm3474_vm10, %v16709_v52, -inf }
 0x853   : > { %v7014_v29 = vpack.c.b16 %v7013_v48, %v7012_v57  ;;  %v5431_v48 = vsel %vm3474_vm10, %v16685_v20, -inf  ;;  %v5687_v57 = vsub.f32 %v16376_v39, %v5379_v11  ;;  %v5686_v39 = vsub.f32 %v16348_v36, %v16643_v21 }
 0x855   : > { %5429 = vmax.xlane.f32.xlu2 %v5428_v46  ;;  %5447 = vmax.xlane.f32.xlu0 %v5446_v2  ;;  %v5394_v13 = vpop.xlane.xlu1 %5393  ;;  %v5852_v63 = vmul.f32 1.442695, %v5687_v57  ;;  %v5850_v21 = vmul.f32 1.442695, %v5686_v39 }
 0x856   : > { %11225 = vmatmul.msk.bf16.vlgmr.msra.gmra.mxu2 %vm3474_vm10, %v7014_v29  ;;  %v5692_v41 = vsub.f32 %v16390_v53, %v5394_v13 }
 0x857   : > { %7237 = vmatpush.bf16.msra.mxu2 %v7225_v8  ;;  %v16713_v11 = vpop.eup %12216  ;;  %v16718_v8 = vsel %vm5135_vm11, %v4426_v55, -1e+30 }
 0x858   : > { %v5412_v59 = vpop.xlane.xlu2 %5411  ;;  %v5482_v53 = vsel %vm3474_vm10, %v16718_v8, -inf  ;;  %v5862_v13 = vmul.f32 1.442695, %v5692_v41  ;;  %v6124_v7 = vsel %vm3474_vm10, %v16713_v11, 0.0  ;;  %v19504_v41 = vld [vmem:[#allocation100_spill] sm:$0xff] }
 0x859   : > { %v6054_v44 = vpop.xlane.xlu0 %6053  ;;  %v5698_v34 = vsub.f32 %v16400_v10, %v5412_v59  ;;  %v4428_v36 = vpop.f32.mrf.mxu2 }
 0x85a   : > { %5432 = vmax.xlane.f32.xlu1 %v5431_v48  ;;  %12218 = vrcp.f32 %v6054_v44  ;;  %v16732_v10 = vsel %vm5135_vm11, %v4428_v36, -1e+30  ;;  %v5693_v48 = vsub.f32 %v16372_v22, %v16669_v50  ;;  %v19505_v22 = vld [vmem:[#allocation102_spill] sm:$0xff]  ;;  %v16746_v36 = vpop.f32.mrf.mxu1 }
 0x85b   : > { %12220 = vpow2.f32 %v5840_v49  ;;  %v5874_v59 = vmul.f32 1.442695, %v5698_v34  ;;  %v5485_v39 = vsel %vm3474_vm10, %v16732_v10, -inf  ;;  %v7093_v50 = vunpack.c.l.b16 %v19505_v22 }
 0x85d   : > { %5450 = vmax.xlane.f32.xlu2 %v5449_v33  ;;  %5468 = vmax.xlane.f32.xlu0 %v5467_v24  ;;  %v16704_v54 = vpop.xlane.xlu1 %5414 }
 0x860   : > { %v6057_v29 = vpop.xlane.xlu2 %6056  ;;  %v12219_v46 = vpop.eup %12218 }
 0x861   : > { %v6075_v2 = vpop.xlane.xlu0 %6074  ;;  %12222 = vrcp.f32 %v6057_v29  ;;  %v6552_v18 = vmul.f32 %v12219_v46, %v16396_v47  ;;  %v16728_v44 = vpop.eup %12220  ;;  %v7094_v29 = vunpack.c.l.b16 %v19504_v41 }
 0x862   : > { %12224 = vpow2.f32 %v5852_v63  ;;  %5465 = vmax.xlane.f32.xlu1 %v5464_v28  ;;  %v5864_v28 = vmul.f32 1.442695, %v5693_v48 }
 0x863   : > { %12226 = vrcp.f32 %v6075_v2  ;;  %v6680_v57 = vpack.c.bf16 %v6552_v18, %v6552_v18  ;;  %v7095_v48 = vpack.c.b16 %v7094_v29, %v7093_v50 }
 0x865   : > { %5483 = vmax.xlane.f32.xlu2 %v5482_v53  ;;  %6125 = vadd.xlane.f32.xlu0 %v6124_v7  ;;  %v6072_v31 = vpop.xlane.xlu1 %6071 }
 0x866   : > { %12228 = vrcp.f32 %v6072_v31 }
 0x867   : > { %v12223_v55 = vpop.eup %12222  ;;  %12230 = vpow2.f32 %v5850_v21  ;;  %v6882_v21 = vunpack.c.l.b16 %v6680_v57 }
 0x868   : > { %v16736_v47 = vpop.eup %12224  ;;  %12232 = vpow2.f32 %v5862_v13  ;;  %v6553_v49 = vmul.f32 %v12223_v55, %v16414_v43  ;;  %v6090_v33 = vpop.xlane.xlu2 %6089  ;;  %v5699_v43 = vsub.f32 %v16412_v0, %v16704_v54  ;;  %v6127_v13 = vsel %vm3474_vm10, %v16728_v44, 0.0 }
 0x869   : > { %v6108_v24 = vpop.xlane.xlu0 %6107  ;;  %v12227_v63 = vpop.eup %12226  ;;  %12234 = vrcp.f32 %v6090_v33  ;;  %v6145_v18 = vsel %vm3474_vm10, %v16736_v47, 0.0 }
 0x86a   : > { %12236 = vpow2.f32 %v5874_v59  ;;  %v6681_v2 = vpack.c.bf16 %v6553_v49, %v6553_v49  ;;  %v6559_v46 = vmul.f32 %v12227_v63, %v16417_v61  ;;  %5486 = vmax.xlane.f32.xlu1 %v5485_v39  ;;  %v5876_v57 = vmul.f32 1.442695, %v5699_v43  ;;  %v19507_v39 = vld [vmem:[#allocation139_spill] sm:$0xff] }
 0x86b   : > { %12238 = vrcp.f32 %v6108_v24  ;;  %v19506_v24 = vld [vmem:[#allocation141_spill] sm:$0xff]  ;;  %v7171_v41 = vunpack.c.l.b16 %v19507_v39 }
 0x86c   : > { %v12229_v34 = vpop.eup %12228  ;;  %v6883_v53 = vunpack.c.l.b16 %v6681_v2  ;;  %v6687_v7 = vpack.c.bf16 %v6559_v46, %v6559_v46  ;;  %v7172_v63 = vunpack.c.l.b16 %v19506_v24 }
 0x86d   : > { %v16752_v61 = vpop.eup %12230  ;;  %v6558_v31 = vmul.f32 %v12229_v34, %v16426_v35  ;;  %6128 = vadd.xlane.f32.xlu2 %v6127_v13  ;;  %6146 = vadd.xlane.f32.xlu0 %v6145_v18  ;;  %v6093_v0 = vpop.xlane.xlu1 %6092 }
 0x86e   : > { %v16755_v54 = vpop.eup %12232  ;;  %v6884_v59 = vpack.c.b16 %v6883_v53, %v6882_v21  ;;  %12240 = vrcp.f32 %v6093_v0  ;;  %v6142_v46 = vsel %vm3474_vm10, %v16752_v61, 0.0  ;;  %v6961_v34 = vunpack.c.l.b16 %v6687_v7 }
 0x86f   : > { %v12235_v55 = vpop.eup %12234  ;;  %v6686_v49 = vpack.c.bf16 %v6558_v31, %v6558_v31  ;;  %12242 = vpow2.f32 %v5864_v28  ;;  %v6160_v53 = vsel %vm3474_vm10, %v16755_v54, 0.0  ;;  %v7173_v18 = vpack.c.b16 %v7172_v63, %v7171_v41  ;;  %v19510_v63 = vld [vmem:[#allocation165_spill] sm:$0xff] }
 0x870   : > { %v16757_v33 = vpop.eup %12236  ;;  %v6111_v2 = vpop.xlane.xlu2 %6110  ;;  %11220 = vmatmul.msk.bf16.vlgmr.msra.gmra.mxu1 %vm3474_vm10, %v6884_v59  ;;  %v6564_v50 = vmul.f32 %v12235_v55, %v16428_v16 }
 0x871   : > { %v16762_v35 = vpop.xlane.xlu0 %5384  ;;  %v12239_v22 = vpop.eup %12238  ;;  %v6960_v29 = vunpack.c.l.b16 %v6686_v49  ;;  %12244 = vrcp.f32 %v6111_v2  ;;  %7107 = vmatpush.bf16.msra.mxu1 %v7095_v48  ;;  %v6178_v13 = vsel %vm3474_vm10, %v16757_v33, 0.0  ;;  %v19508_v48 = vld [vmem:[#allocation69_spill] sm:$0xff]  ;;  %v19509_v49 = vld [vmem:[#allocation70_spill] sm:$0xff] }
 0x872   : > { %6143 = vadd.xlane.f32.xlu1 %v6142_v46  ;;  %12246 = vpow2.f32 %v5876_v57  ;;  %v6570_v28 = vmul.f32 %v12239_v22, %v16430_v56  ;;  %v6692_v31 = vpack.c.bf16 %v6564_v50, %v6564_v50  ;;  %v4298_v59 = vpop.f32.mrf.mxu1  ;;  %v7250_v57 = vunpack.c.l.b16 %v19508_v48  ;;  %v4374_v22 = vpop.f32.mrf.mxu0 }
 0x873   : > { %v6962_v43 = vpack.c.b16 %v6961_v34, %v6960_v29  ;;  %v7249_v24 = vunpack.c.l.b16 %v19509_v49  ;;  %v16785_v34 = vsel %vm5135_vm11, %v4298_v59, -1e+30  ;;  %v4452_v48 = vpop.f32.mrf.mxu3 }
 0x874   : > { %v12241_v21 = vpop.eup %12240  ;;  %v6698_v39 = vpack.c.bf16 %v6570_v28, %v6570_v28  ;;  %v7038_v29 = vunpack.c.l.b16 %v6692_v31  ;;  %v19511_v28 = vld [vmem:[#allocation113_spill] sm:$0xff]  ;;  %v5455_v31 = vsel %vm3474_vm10, %v16785_v34, -inf }
 0x875   : > { %v6565_v7 = vmul.f32 %v12241_v21, %v16438_v5  ;;  %6161 = vadd.xlane.f32.xlu2 %v6160_v53  ;;  %6179 = vadd.xlane.f32.xlu0 %v6178_v13  ;;  %v5382_v16 = vpop.xlane.xlu1 %5381  ;;  %v16773_v0 = vpop.eup %12242  ;;  %v7328_v53 = vunpack.c.l.b16 %v19511_v28  ;;  %v19512_v13 = vld [vmem:[#allocation114_spill] sm:$0xff] }
 0x876   : > { %11223 = vmatmul.msk.bf16.vlgmr.msra.gmra.mxu0 %vm3474_vm10, %v6962_v43  ;;  %v6163_v43 = vsel %vm3474_vm10, %v16773_v0, 0.0  ;;  %v7116_v49 = vunpack.c.l.b16 %v6698_v39 }
 0x877   : > { %v12245_v55 = vpop.eup %12244  ;;  %v6693_v56 = vpack.c.bf16 %v6565_v7, %v6565_v7  ;;  %7185 = vmatpush.bf16.msra.mxu0 %v7173_v18  ;;  %v7327_v18 = vunpack.c.l.b16 %v19512_v13 }
 0x878   : > { %v6571_v41 = vmul.f32 %v12245_v55, %v19510_v63  ;;  %v5400_v2 = vpop.xlane.xlu2 %5399  ;;  %v16781_v46 = vpop.eup %12246 }
 0x879   : > { %v16779_v5 = vpop.xlane.xlu0 %5417  ;;  %v7039_v50 = vunpack.c.l.b16 %v6693_v56  ;;  %v4530_v55 = vpop.f32.mrf.mxu2  ;;  %v6181_v59 = vsel %vm3474_vm10, %v16781_v46, 0.0  ;;  %v7251_v56 = vpack.c.b16 %v7250_v57, %v7249_v24  ;;  %v7329_v39 = vpack.c.b16 %v7328_v53, %v7327_v18 }
 0x87a   : > { %v6699_v21 = vpack.c.bf16 %v6571_v41, %v6571_v41  ;;  %6164 = vadd.xlane.f32.xlu1 %v6163_v43  ;;  %v16798_v43 = vsel %vm5135_vm11, %v16746_v36, -1e+30  ;;  %v16807_v57 = vsel %vm5135_vm11, %v4452_v48, -1e+30  ;;  %v16811_v36 = vsel %vm5135_vm11, %v4374_v22, -1e+30 }
 0x87b   : > { %v7040_v7 = vpack.c.b16 %v7039_v50, %v7038_v29  ;;  %v19513_v50 = vld [vmem:[#allocation167_spill] sm:$0xff]  ;;  %v5452_v24 = vsel %vm3474_vm10, %v16798_v43, -inf  ;;  %v5694_v53 = vsub.f32 %v16464_v27, %v5400_v2  ;;  %v5488_v18 = vsel %vm3474_vm10, %v16807_v57, -inf  ;;  %v19514_v27 = vld [vmem:[#allocation166_spill] sm:$0xff] }
 0x87c   : > { %v7117_v63 = vunpack.c.l.b16 %v6699_v21  ;;  %v5688_v21 = vsub.f32 %v19513_v50, %v5382_v16  ;;  %v4376_v16 = vpop.f32.mrf.mxu0  ;;  %v5689_v2 = vsub.f32 %v19514_v27, %v16762_v35 }
 0x87d   : > { %6182 = vadd.xlane.f32.xlu2 %v6181_v59  ;;  %5456 = vmax.xlane.f32.xlu0 %v5455_v31  ;;  %v5403_v41 = vpop.xlane.xlu1 %5402  ;;  %v16822_v59 = vsel %vm5135_vm11, %v4376_v16, -1e+30  ;;  %v5866_v31 = vmul.f32 1.442695, %v5694_v53 }
 0x87e   : > { %v7118_v29 = vpack.c.b16 %v7117_v63, %v7116_v49  ;;  %11226 = vmatmul.msk.bf16.vlgmr.msra.gmra.mxu3 %vm3474_vm10, %v7040_v7  ;;  %v5470_v7 = vsel %vm3474_vm10, %v16811_v36, -inf  ;;  %v5854_v48 = vmul.f32 1.442695, %v5688_v21  ;;  %v4454_v63 = vpop.f32.mrf.mxu3  ;;  %v5856_v35 = vmul.f32 1.442695, %v5689_v2 }
 0x87f   : > { %7263 = vmatpush.bf16.msra.mxu3 %v7251_v56  ;;  %v5695_v56 = vsub.f32 %v16477_v37, %v5403_v41  ;;  %v16833_v21 = vsel %vm5135_vm11, %v4454_v63, -1e+30  ;;  %v5700_v63 = vsub.f32 %v16460_v17, %v16779_v5 }
 0x880   : > { %v5421_v28 = vpop.xlane.xlu2 %5420  ;;  %11229 = vmatmul.msk.bf16.vlgmr.msrb.gmra.mxu2 %vm3474_vm10, %v7118_v29  ;;  %12248 = vpow2.f32 %v5854_v48  ;;  %v5491_v41 = vsel %vm3474_vm10, %v16833_v21, -inf  ;;  %v16846_v48 = vsel %vm5135_vm11, %v4530_v55, -1e+30 }
 0x881   : > { %v16803_v13 = vpop.xlane.xlu0 %5438  ;;  %7341 = vmatpush.bf16.msrb.mxu2 %v7329_v39  ;;  %v4532_v22 = vpop.f32.mrf.mxu2  ;;  %v5701_v53 = vsub.f32 %v16487_v30, %v5421_v28  ;;  %v5868_v37 = vmul.f32 1.442695, %v5695_v56  ;;  %19517 = vst [vmem:[#allocation119_spill] sm:$0xff] %v16846_v48  ;;  %v5506_v56 = vsel %vm3474_vm10, %v16846_v48, -inf }
 0x882   : > { %5453 = vmax.xlane.f32.xlu1 %v5452_v24  ;;  %v16829_v50 = vsel %vm5135_vm11, %v4532_v22, -1e+30  ;;  %v5473_v24 = vsel %vm3474_vm10, %v16822_v59, -inf }
 0x883   : > { %19515 = vst [vmem:[#allocation76_spill] sm:$0xff] %v16829_v50  ;;  %v5509_v16 = vsel %vm3474_vm10, %v16829_v50, -inf  ;;  %v5880_v30 = vmul.f32 1.442695, %v5701_v53 }
 0x885   : > { %5471 = vmax.xlane.f32.xlu2 %v5470_v7  ;;  %5489 = vmax.xlane.f32.xlu0 %v5488_v18  ;;  %v5436_v49 = vpop.xlane.xlu1 %5435 }
 0x886   : > { %v16842_v7 = vpop.eup %12248  ;;  %v5706_v55 = vsub.f32 %v16502_v19, %v5436_v49  ;;  %v19520_v49 = vld [vmem:[#allocation106_spill] sm:$0xff] }
 0x887   : > { %19516 = vst [vmem:[#allocation67_spill] sm:$0xff] %v16842_v7  ;;  %v6148_v17 = vsel %vm3474_vm10, %v16842_v7, 0.0 }
 0x888   : > { %v6078_v29 = vpop.xlane.xlu2 %6077 }
 0x889   : > { %v6096_v39 = vpop.xlane.xlu0 %6095  ;;  %12250 = vrcp.f32 %v6078_v29 }
 0x88a   : > { %12252 = vpow2.f32 %v5866_v31  ;;  %5474 = vmax.xlane.f32.xlu1 %v5473_v24  ;;  %v5878_v24 = vmul.f32 1.442695, %v5700_v63 }
 0x88b   : > { %12254 = vrcp.f32 %v6096_v39 }
 0x88d   : > { %5492 = vmax.xlane.f32.xlu2 %v5491_v41  ;;  %5510 = vmax.xlane.f32.xlu0 %v5509_v16  ;;  %v6081_v18 = vpop.xlane.xlu1 %6080 }
 0x88e   : > { %12256 = vrcp.f32 %v6081_v18  ;;  %v19521_v18 = vld [vmem:[#allocation168_spill] sm:$0xff] }
 0x88f   : > { %v12251_v22 = vpop.eup %12250  ;;  %12258 = vpow2.f32 %v5856_v35 }
 0x890   : > { %v16848_v28 = vpop.eup %12252  ;;  %12260 = vpow2.f32 %v5868_v37  ;;  %v6099_v31 = vpop.xlane.xlu2 %6098  ;;  %v6560_v29 = vmul.f32 %v12251_v22, %v16504_v12  ;;  %v5707_v22 = vsub.f32 %v19521_v18, %v16803_v13  ;;  %v19525_v13 = vld [vmem:[#allocation93_spill] sm:$0xff] }
 0x891   : > { %19518 = vst [vmem:[#allocation110_spill] sm:$0xff] %v16848_v28  ;;  %v6117_v27 = vpop.xlane.xlu0 %6116  ;;  %v12255_v2 = vpop.eup %12254  ;;  %12262 = vrcp.f32 %v6099_v31  ;;  %v6166_v5 = vsel %vm3474_vm10, %v16848_v28, 0.0 }
 0x892   : > { %12264 = vrcp.f32 %v6117_v27  ;;  %5507 = vmax.xlane.f32.xlu1 %v5506_v56  ;;  %v6566_v35 = vmul.f32 %v12255_v2, %v16507_v40  ;;  %v6688_v37 = vpack.c.bf16 %v6560_v29, %v6560_v29  ;;  %v7198_v40 = vunpack.c.l.b16 %v19520_v49  ;;  %v19522_v2 = vld [vmem:[#allocation169_spill] sm:$0xff]  ;;  %v19524_v49 = vld [vmem:[#allocation170_spill] sm:$0xff] }
 0x893   : > { %12266 = vpow2.f32 %v5880_v30  ;;  %v5890_v30 = vmul.f32 1.442695, %v5706_v55  ;;  %v7276_v55 = vunpack.c.l.b16 %v19525_v13  ;;  %v5892_v18 = vmul.f32 1.442695, %v5707_v22 }
 0x894   : > { %v12257_v39 = vpop.eup %12256  ;;  %v6694_v27 = vpack.c.bf16 %v6566_v35, %v6566_v35 }
 0x895   : > { %v16861_v53 = vpop.eup %12258  ;;  %v6561_v12 = vmul.f32 %v12257_v39, %v16515_v32  ;;  %6149 = vadd.xlane.f32.xlu2 %v6148_v17  ;;  %6167 = vadd.xlane.f32.xlu0 %v6166_v5  ;;  %v6114_v41 = vpop.xlane.xlu1 %6113  ;;  %v6986_v5 = vunpack.c.l.b16 %v6688_v37 }
 0x896   : > { %19519 = vst [vmem:[#allocation87_spill] sm:$0xff] %v16861_v53  ;;  %v16864_v16 = vpop.eup %12260  ;;  %12268 = vrcp.f32 %v6114_v41  ;;  %v6151_v39 = vsel %vm3474_vm10, %v16861_v53, 0.0  ;;  %v4400_v53 = vpop.f32.mrf.mxu1  ;;  %v7064_v48 = vunpack.c.l.b16 %v6694_v27 }
 0x897   : > { %v12263_v19 = vpop.eup %12262  ;;  %v6689_v63 = vpack.c.bf16 %v6561_v12, %v6561_v12  ;;  %12270 = vpow2.f32 %v5878_v24  ;;  %v19526_v24 = vld [vmem:[#allocation63_spill] sm:$0xff]  ;;  %v6169_v37 = vsel %vm3474_vm10, %v16864_v16, 0.0 }
 0x898   : > { %v12265_v31 = vpop.eup %12264  ;;  %v6567_v56 = vmul.f32 %v12263_v19, %v19522_v2  ;;  %v6132_v32 = vpop.xlane.xlu2 %6131  ;;  %v7197_v35 = vunpack.c.l.b16 %v19526_v24  ;;  %v19529_v24 = vld [vmem:[#allocation132_spill] sm:$0xff] }
 0x899   : > { %v16870_v29 = vpop.xlane.xlu0 %5405  ;;  %v16874_v17 = vpop.eup %12266  ;;  %v6987_v41 = vunpack.c.l.b16 %v6689_v63  ;;  %v6573_v50 = vmul.f32 %v12265_v31, %v19524_v49  ;;  %12272 = vrcp.f32 %v6132_v32  ;;  %v19527_v31 = vld [vmem:[#allocation79_spill] sm:$0xff] }
 0x89a   : > { %19523 = vst [vmem:[#allocation74_spill] sm:$0xff] %v16874_v17  ;;  %v6695_v12 = vpack.c.bf16 %v6567_v56, %v6567_v56  ;;  %6152 = vadd.xlane.f32.xlu1 %v6151_v39  ;;  %v16879_v19 = vpop.f32.mrf.mxu0  ;;  %12274 = vpow2.f32 %v5890_v30  ;;  %v6187_v63 = vsel %vm3474_vm10, %v16874_v17, 0.0  ;;  %v7275_v56 = vunpack.c.l.b16 %v19527_v31  ;;  %v19528_v49 = vld [vmem:[#allocation171_spill] sm:$0xff] }
 0x89b   : > { %v6988_v2 = vpack.c.b16 %v6987_v41, %v6986_v5  ;;  %v7199_v32 = vpack.c.b16 %v7198_v40, %v7197_v35  ;;  %v6701_v39 = vpack.c.bf16 %v6573_v50, %v6573_v50  ;;  %v7354_v17 = vunpack.c.l.b16 %v19529_v24 }
 0x89c   : > { %v12269_v28 = vpop.eup %12268  ;;  %v7065_v7 = vunpack.c.l.b16 %v6695_v12  ;;  %v7277_v41 = vpack.c.b16 %v7276_v55, %v7275_v56  ;;  %v16893_v50 = vsel %vm5135_vm11, %v4400_v53, -1e+30 }
 0x89d   : > { %v6572_v13 = vmul.f32 %v12269_v28, %v19528_v49  ;;  %6170 = vadd.xlane.f32.xlu2 %v6169_v37  ;;  %6188 = vadd.xlane.f32.xlu0 %v6187_v63  ;;  %v6135_v22 = vpop.xlane.xlu1 %6134  ;;  %v16887_v30 = vpop.eup %12270  ;;  %19530 = vst [vmem:[#allocation127_spill] sm:$0xff] %v16893_v50  ;;  %v19532_v63 = vld [vmem:[#allocation121_spill] sm:$0xff]  ;;  %v5476_v56 = vsel %vm3474_vm10, %v16893_v50, -inf }
 0x89e   : > { %v7066_v5 = vpack.c.b16 %v7065_v7, %v7064_v48  ;;  %12276 = vrcp.f32 %v6135_v22  ;;  %11224 = vmatmul.msk.bf16.vlgmr.msrb.gmra.mxu1 %vm3474_vm10, %v6988_v2  ;;  %v7143_v48 = vunpack.c.l.b16 %v6701_v39  ;;  %v19531_v2 = vld [vmem:[#allocation172_spill] sm:$0xff]  ;;  %v6184_v37 = vsel %vm3474_vm10, %v16887_v30, 0.0  ;;  %v19533_v22 = vld [vmem:[#allocation57_spill] sm:$0xff] }
 0x89f   : > { %v12273_v27 = vpop.eup %12272  ;;  %v6700_v12 = vpack.c.bf16 %v6572_v13, %v6572_v13  ;;  %7211 = vmatpush.bf16.msrb.mxu1 %v7199_v32  ;;  %12278 = vpow2.f32 %v5892_v18  ;;  %v7353_v53 = vunpack.c.l.b16 %v19532_v63 }
 0x8a0   : > { %v5409_v28 = vpop.xlane.xlu2 %5408  ;;  %11227 = vmatmul.msk.bf16.vlgmr.msrb.gmra.mxu0 %vm3474_vm10, %v7066_v5  ;;  %v16898_v7 = vpop.eup %12274  ;;  %v6578_v55 = vmul.f32 %v12273_v27, %v19531_v2 }
 0x8a1   : > { %v16896_v40 = vpop.xlane.xlu0 %5426  ;;  %v7142_v35 = vunpack.c.l.b16 %v6700_v12  ;;  %7289 = vmatpush.bf16.msrb.mxu0 %v7277_v41  ;;  %v6202_v32 = vsel %vm3474_vm10, %v16898_v7, 0.0  ;;  %v7355_v49 = vpack.c.b16 %v7354_v17, %v7353_v53  ;;  %v4402_v12 = vpop.f32.mrf.mxu1 }
 0x8a2   : > { %6185 = vadd.xlane.f32.xlu1 %v6184_v37  ;;  %v4480_v39 = vpop.f32.mrf.mxu0  ;;  %v6706_v13 = vpack.c.bf16 %v6578_v55, %v6578_v55  ;;  %v4556_v37 = vpop.f32.mrf.mxu3  ;;  %v16921_v63 = vsel %vm5135_vm11, %v4402_v12, -1e+30 }
 0x8a3   : > { %v7144_v31 = vpack.c.b16 %v7143_v48, %v7142_v35  ;;  %v19534_v48 = vld [vmem:[#allocation64_spill] sm:$0xff]  ;;  %v16915_v2 = vsel %vm5135_vm11, %v4480_v39, -1e+30 }
 0x8a4   : > { %v12277_v18 = vpop.eup %12276  ;;  %v7432_v35 = vunpack.c.l.b16 %v19534_v48  ;;  %19535 = vst [vmem:[#allocation118_spill] sm:$0xff] %v16915_v2  ;;  %v7220_v53 = vunpack.c.l.b16 %v6706_v13  ;;  %v5479_v48 = vsel %vm3474_vm10, %v16921_v63, -inf  ;;  %v5497_v50 = vsel %vm3474_vm10, %v16915_v2, -inf }
 0x8a5   : > { %v6579_v5 = vmul.f32 %v12277_v18, %v19533_v22  ;;  %6203 = vadd.xlane.f32.xlu2 %v6202_v32  ;;  %5477 = vmax.xlane.f32.xlu0 %v5476_v56  ;;  %v5424_v27 = vpop.xlane.xlu1 %5423  ;;  %v16909_v41 = vpop.eup %12278  ;;  %v19536_v56 = vld [vmem:[#allocation56_spill] sm:$0xff]  ;;  %v19537_v22 = vld [vmem:[#allocation174_spill] sm:$0xff] }
 0x8a6   : > { %11230 = vmatmul.msk.bf16.vlgmr.msrb.gmra.mxu3 %vm3474_vm10, %v7144_v31  ;;  %v6205_v31 = vsel %vm3474_vm10, %v16909_v41, 0.0  ;;  %v7431_v32 = vunpack.c.l.b16 %v19536_v56  ;;  %v5697_v39 = vsub.f32 %v19537_v22, %v5409_v28  ;;  %v19538_v28 = vld [vmem:[#allocation58_spill] sm:$0xff] }
 0x8a7   : > { %v6707_v24 = vpack.c.bf16 %v6579_v5, %v6579_v5  ;;  %7367 = vmatpush.bf16.msrb.mxu3 %v7355_v49  ;;  %v4634_v5 = vpop.f32.mrf.mxu2 }
 0x8a8   : > { %v5442_v17 = vpop.xlane.xlu2 %5441  ;;  %v7433_v12 = vpack.c.b16 %v7432_v35, %v7431_v32  ;;  %v16946_v35 = vsel %vm5135_vm11, %v4556_v37, -1e+30 }
 0x8a9   : > { %v16917_v55 = vpop.xlane.xlu0 %5459  ;;  %v7221_v18 = vunpack.c.l.b16 %v6707_v24  ;;  %v16934_v24 = vsel %vm5135_vm11, %v16879_v19, -1e+30 }
 0x8aa   : > { %6206 = vadd.xlane.f32.xlu1 %v6205_v31  ;;  %v19539_v31 = vld [vmem:[#allocation175_spill] sm:$0xff]  ;;  %v5494_v19 = vsel %vm3474_vm10, %v16934_v24, -inf  ;;  %v4558_v32 = vpop.f32.mrf.mxu3 }
 0x8ab   : > { %v7222_v49 = vpack.c.b16 %v7221_v18, %v7220_v53  ;;  %v5696_v53 = vsub.f32 %v19538_v28, %v16870_v29  ;;  %v5872_v18 = vmul.f32 1.442695, %v5697_v39  ;;  %v5702_v56 = vsub.f32 %v19539_v31, %v5424_v27 }
 0x8ac   : > { %v5708_v29 = vsub.f32 %v16583_v45, %v5442_v17  ;;  %v5512_v39 = vsel %vm3474_vm10, %v16946_v35, -inf }
 0x8ad   : > { %5480 = vmax.xlane.f32.xlu2 %v5479_v48  ;;  %5498 = vmax.xlane.f32.xlu0 %v5497_v50  ;;  %v5445_v13 = vpop.xlane.xlu1 %5444  ;;  %v16942_v50 = vsel %vm5135_vm11, %v4634_v5, -1e+30  ;;  %v5882_v5 = vmul.f32 1.442695, %v5702_v56 }
 0x8ae   : > { %11233 = vmatmul.msk.bf16.vlgmr.msra.gmra.mxu2 %vm3474_vm10, %v7222_v49  ;;  %v5870_v49 = vmul.f32 1.442695, %v5696_v53  ;;  %v5530_v27 = vsel %vm3474_vm10, %v16942_v50, -inf  ;;  %v5894_v45 = vmul.f32 1.442695, %v5708_v29  ;;  %v5709_v53 = vsub.f32 %v16599_v60, %v5445_v13 }
 0x8af   : > { %7445 = vmatpush.bf16.msra.mxu2 %v7433_v12  ;;  %v4636_v48 = vpop.f32.mrf.mxu2  ;;  %v19540_v12 = vld [vmem:[#allocation173_spill] sm:$0xff] }
 0x8b0   : > { %v5463_v22 = vpop.xlane.xlu2 %5462  ;;  %v5703_v28 = vsub.f32 %v19540_v12, %v16896_v40  ;;  %v5896_v13 = vmul.f32 1.442695, %v5709_v53 }
 0x8b1   : > { %v6105_v2 = vpop.xlane.xlu0 %6104 }
 0x8b2   : > { %12280 = vrcp.f32 %v6105_v2  ;;  %5495 = vmax.xlane.f32.xlu1 %v5494_v19  ;;  %v16957_v2 = vsel %vm5135_vm11, %v4558_v32, -1e+30  ;;  %v16966_v19 = vsel %vm5135_vm11, %v4636_v48, -1e+30  ;;  %v5884_v40 = vmul.f32 1.442695, %v5703_v28 }
 0x8b3   : > { %12282 = vpow2.f32 %v5872_v18  ;;  %v5515_v29 = vsel %vm3474_vm10, %v16957_v2, -inf  ;;  %v19543_v28 = vld [vmem:[#allocation104_spill] sm:$0xff] }
 0x8b4   : > { %v7302_v53 = vunpack.c.l.b16 %v19543_v28 }
 0x8b5   : > { %5513 = vmax.xlane.f32.xlu2 %v5512_v39  ;;  %5531 = vmax.xlane.f32.xlu0 %v5530_v27  ;;  %v6102_v37 = vpop.xlane.xlu1 %6101  ;;  %v5533_v27 = vsel %vm3474_vm10, %v16966_v19, -inf }
 0x8b6   : > { %12284 = vrcp.f32 %v6102_v37 }
 0x8b7   : > { %12286 = vpow2.f32 %v5870_v49  ;;  %v5715_v49 = vsub.f32 %v16607_v23, %v5463_v22 }
 0x8b8   : > { %v12281_v17 = vpop.eup %12280  ;;  %12288 = vpow2.f32 %v5882_v5  ;;  %v6120_v18 = vpop.xlane.xlu2 %6119 }
 0x8b9   : > { %v6138_v31 = vpop.xlane.xlu0 %6137  ;;  %v16962_v56 = vpop.eup %12282  ;;  %v6569_v32 = vmul.f32 %v12281_v17, %v16610_v58  ;;  %12290 = vrcp.f32 %v6120_v18  ;;  %v5908_v22 = vmul.f32 1.442695, %v5715_v49  ;;  %v5714_v18 = vsub.f32 %v16579_v14, %v16917_v55  ;;  %v19544_v49 = vld [vmem:[#allocation91_spill] sm:$0xff] }
 0x8ba   : > { %12292 = vpow2.f32 %v5894_v45  ;;  %5516 = vmax.xlane.f32.xlu1 %v5515_v29  ;;  %v6175_v39 = vsel %vm3474_vm10, %v16962_v56, 0.0 }
 0x8bb   : > { %12294 = vrcp.f32 %v6138_v31  ;;  %v6697_v58 = vpack.c.bf16 %v6569_v32, %v6569_v32  ;;  %v5906_v14 = vmul.f32 1.442695, %v5714_v18 }
 0x8bc   : > { %v12285_v60 = vpop.eup %12284 }
 0x8bd   : > { %v16976_v5 = vpop.eup %12286  ;;  %v6568_v37 = vmul.f32 %v12285_v60, %v16620_v9  ;;  %5534 = vmax.xlane.f32.xlu2 %v5533_v27  ;;  %6176 = vadd.xlane.f32.xlu0 %v6175_v39  ;;  %v6123_v48 = vpop.xlane.xlu1 %6122  ;;  %v7091_v60 = vunpack.c.l.b16 %v6697_v58  ;;  %v7301_v39 = vunpack.c.l.b16 %v19544_v49 }
 0x8be   : > { %v16979_v45 = vpop.eup %12288  ;;  %12296 = vrcp.f32 %v6123_v48  ;;  %v6172_v32 = vsel %vm3474_vm10, %v16976_v5, 0.0  ;;  %v4504_v49 = vpop.f32.mrf.mxu1 }
 0x8bf   : > { %19541 = vst [vmem:[#allocation61_spill] sm:$0xff] %v16979_v45  ;;  %v12291_v23 = vpop.eup %12290  ;;  %12298 = vpow2.f32 %v5884_v40  ;;  %v6696_v17 = vpack.c.bf16 %v6568_v37, %v6568_v37 }
 0x8c0   : > { %v16981_v12 = vpop.eup %12292  ;;  %12300 = vpow2.f32 %v5896_v13  ;;  %v6141_v31 = vpop.xlane.xlu2 %6140  ;;  %v6574_v40 = vmul.f32 %v12291_v23, %v16622_v38  ;;  %v6190_v13 = vsel %vm3474_vm10, %v16979_v45, 0.0  ;;  %v7303_v38 = vpack.c.b16 %v7302_v53, %v7301_v39 }
 0x8c1   : > { %19542 = vst [vmem:[#allocation54_spill] sm:$0xff] %v16981_v12  ;;  %v6159_v9 = vpop.xlane.xlu0 %6158  ;;  %v12295_v29 = vpop.eup %12294  ;;  %v7090_v27 = vunpack.c.l.b16 %v6696_v17  ;;  %12302 = vrcp.f32 %v6141_v31  ;;  %v6208_v58 = vsel %vm3474_vm10, %v16981_v12, 0.0 }
 0x8c2   : > { %12304 = vrcp.f32 %v6159_v9  ;;  %6173 = vadd.xlane.f32.xlu1 %v6172_v32  ;;  %v6580_v55 = vmul.f32 %v12295_v29, %v16625_v26  ;;  %v6702_v23 = vpack.c.bf16 %v6574_v40, %v6574_v40  ;;  %v19547_v32 = vld [vmem:[#allocation65_spill] sm:$0xff] }
 0x8c3   : > { %12306 = vpow2.f32 %v5908_v22  ;;  %v7092_v37 = vpack.c.b16 %v7091_v60, %v7090_v27  ;;  %v7380_v29 = vunpack.c.l.b16 %v19547_v32  ;;  %v4582_v32 = vpop.f32.mrf.mxu0 }
 0x8c4   : > { %v12297_v48 = vpop.eup %12296  ;;  %v6708_v60 = vpack.c.bf16 %v6580_v55, %v6580_v55  ;;  %v7168_v39 = vunpack.c.l.b16 %v6702_v23  ;;  %v19549_v55 = vld [vmem:[#allocation131_spill] sm:$0xff] }
 0x8c5   : > { %v16995_v17 = vpop.eup %12298  ;;  %v6575_v28 = vmul.f32 %v12297_v48, %v16636_v51  ;;  %6191 = vadd.xlane.f32.xlu2 %v6190_v13  ;;  %6209 = vadd.xlane.f32.xlu0 %v6208_v58  ;;  %v6156_v22 = vpop.xlane.xlu1 %6155 }
 0x8c6   : > { %19545 = vst [vmem:[#allocation100_spill] sm:$0xff] %v16995_v17  ;;  %v16998_v31 = vpop.eup %12300  ;;  %12308 = vrcp.f32 %v6156_v22  ;;  %11228 = vmatmul.msk.bf16.vlgmr.msra.gmra.mxu1 %vm3474_vm10, %v7092_v37  ;;  %v6193_v13 = vsel %vm3474_vm10, %v16995_v17, 0.0  ;;  %v7246_v12 = vunpack.c.l.b16 %v6708_v60 }
 0x8c7   : > { %19546 = vst [vmem:[#allocation102_spill] sm:$0xff] %v16998_v31  ;;  %v12303_v26 = vpop.eup %12302  ;;  %v6703_v18 = vpack.c.bf16 %v6575_v28, %v6575_v28  ;;  %7315 = vmatpush.bf16.msra.mxu1 %v7303_v38  ;;  %12310 = vpow2.f32 %v5906_v14  ;;  %v19548_v38 = vld [vmem:[#allocation73_spill] sm:$0xff]  ;;  %v7379_v28 = vunpack.c.l.b16 %v19549_v55  ;;  %v6211_v23 = vsel %vm3474_vm10, %v16998_v31, 0.0 }
 0x8c8   : > { %v12305_v9 = vpop.eup %12304  ;;  %v6581_v53 = vmul.f32 %v12303_v26, %v16645_v42  ;;  %v5430_v27 = vpop.xlane.xlu2 %5429  ;;  %v7458_v14 = vunpack.c.l.b16 %v19548_v38  ;;  %v19551_v31 = vld [vmem:[#allocation117_spill] sm:$0xff] }
 0x8c9   : > { %v17003_v51 = vpop.xlane.xlu0 %5447  ;;  %v17005_v40 = vpop.eup %12306  ;;  %v7169_v48 = vunpack.c.l.b16 %v6703_v18  ;;  %v6587_v37 = vmul.f32 %v12305_v9, %v16639_v6  ;;  %v19550_v18 = vld [vmem:[#allocation62_spill] sm:$0xff]  ;;  %v7536_v17 = vunpack.c.l.b16 %v19551_v31  ;;  %v5704_v31 = vsub.f32 %v16673_v3, %v5430_v27 }
 0x8ca   : > { %v6709_v58 = vpack.c.bf16 %v6581_v53, %v6581_v53  ;;  %6194 = vadd.xlane.f32.xlu1 %v6193_v13  ;;  %v17012_v26 = vpop.f32.mrf.mxu3  ;;  %v6229_v6 = vsel %vm3474_vm10, %v17005_v40, 0.0  ;;  %v7457_v9 = vunpack.c.l.b16 %v19550_v18  ;;  %v7381_v53 = vpack.c.b16 %v7380_v29, %v7379_v28  ;;  %v19552_v28 = vld [vmem:[#allocation108_spill] sm:$0xff] }
 0x8cb   : > { %v7170_v42 = vpack.c.b16 %v7169_v48, %v7168_v39  ;;  %v6715_v13 = vpack.c.bf16 %v6587_v37, %v6587_v37  ;;  %v17026_v18 = vsel %vm5135_vm11, %v4582_v32, -1e+30  ;;  %v17033_v37 = vsel %vm5135_vm11, %v4504_v49, -1e+30 }
 0x8cc   : > { %v12309_v22 = vpop.eup %12308  ;;  %v7247_v45 = vunpack.c.l.b16 %v6709_v58  ;;  %v7459_v60 = vpack.c.b16 %v7458_v14, %v7457_v9  ;;  %v5500_v49 = vsel %vm3474_vm10, %v17033_v37, -inf  ;;  %v5886_v27 = vmul.f32 1.442695, %v5704_v31 }
 0x8cd   : > { %v6586_v38 = vmul.f32 %v12309_v22, %v16660_v15  ;;  %6212 = vadd.xlane.f32.xlu2 %v6211_v23  ;;  %6230 = vadd.xlane.f32.xlu0 %v6229_v6  ;;  %v5433_v39 = vpop.xlane.xlu1 %5432  ;;  %v17020_v48 = vpop.eup %12310  ;;  %v5518_v23 = vsel %vm3474_vm10, %v17026_v18, -inf }
 0x8ce   : > { %v7248_v55 = vpack.c.b16 %v7247_v45, %v7246_v12  ;;  %11231 = vmatmul.msk.bf16.vlgmr.msra.gmra.mxu0 %vm3474_vm10, %v7170_v42  ;;  %v7325_v45 = vunpack.c.l.b16 %v6715_v13  ;;  %v6226_v14 = vsel %vm3474_vm10, %v17020_v48, 0.0  ;;  %v7535_v42 = vunpack.c.l.b16 %v19552_v28  ;;  %v4506_v22 = vpop.f32.mrf.mxu1  ;;  %v4584_v13 = vpop.f32.mrf.mxu0 }
 0x8cf   : > { %v6714_v58 = vpack.c.bf16 %v6586_v38, %v6586_v38  ;;  %7393 = vmatpush.bf16.msra.mxu0 %v7381_v53  ;;  %v17045_v3 = vsel %vm5135_vm11, %v4506_v22, -1e+30  ;;  %v5705_v38 = vsub.f32 %v16685_v20, %v5433_v39  ;;  %12312 = vpow2.f32 %v5886_v27 }
 0x8d0   : > { %v5451_v29 = vpop.xlane.xlu2 %5450  ;;  %11234 = vmatmul.msk.bf16.vlgmr.msra.gmra.mxu3 %vm3474_vm10, %v7248_v55  ;;  %v7537_v6 = vpack.c.b16 %v7536_v17, %v7535_v42  ;;  %v17069_v42 = vsel %vm5135_vm11, %v17012_v26, -1e+30 }
 0x8d1   : > { %v17029_v15 = vpop.xlane.xlu0 %5468  ;;  %v7324_v12 = vunpack.c.l.b16 %v6714_v58  ;;  %7471 = vmatpush.bf16.msra.mxu3 %v7459_v60  ;;  %v4738_v58 = vpop.f32.mrf.mxu2  ;;  %v5888_v20 = vmul.f32 1.442695, %v5705_v38  ;;  %v5536_v26 = vsel %vm3474_vm10, %v17069_v42, -inf }
 0x8d2   : > { %6227 = vadd.xlane.f32.xlu1 %v6226_v14  ;;  %v4662_v53 = vpop.f32.mrf.mxu3  ;;  %v5711_v14 = vsub.f32 %v16695_v1, %v5451_v29  ;;  %v5710_v1 = vsub.f32 %v16666_v4, %v17003_v51 }
 0x8d3   : > { %v7326_v32 = vpack.c.b16 %v7325_v45, %v7324_v12  ;;  %v17051_v17 = vsel %vm5135_vm11, %v4662_v53, -1e+30  ;;  %v17055_v45 = vsel %vm5135_vm11, %v4584_v13, -1e+30  ;;  %v5503_v12 = vsel %vm3474_vm10, %v17045_v3, -inf }
 0x8d4   : > { %v5521_v39 = vsel %vm3474_vm10, %v17055_v45, -inf  ;;  %v5539_v31 = vsel %vm3474_vm10, %v17051_v17, -inf  ;;  %v5900_v22 = vmul.f32 1.442695, %v5711_v14  ;;  %v17078_v53 = vsel %vm5135_vm11, %v4738_v58, -1e+30 }
 0x8d5   : > { %5501 = vmax.xlane.f32.xlu2 %v5500_v49  ;;  %5519 = vmax.xlane.f32.xlu0 %v5518_v23  ;;  %v5466_v9 = vpop.xlane.xlu1 %5465  ;;  %v17073_v29 = vpop.eup %12312  ;;  %v5898_v51 = vmul.f32 1.442695, %v5710_v1  ;;  %v5717_v14 = vsub.f32 %v16691_v62, %v17029_v15  ;;  %v19554_v62 = vld [vmem:[#allocation68_spill] sm:$0xff] }
 0x8d6   : > { %11237 = vmatmul.msk.bf16.vlgmr.msrb.gmra.mxu2 %vm3474_vm10, %v7326_v32  ;;  %v5716_v32 = vsub.f32 %v16709_v52, %v5466_v9  ;;  %v5554_v52 = vsel %vm3474_vm10, %v17078_v53, -inf  ;;  %v6196_v38 = vsel %vm3474_vm10, %v17073_v29, 0.0  ;;  %v7405_v15 = vunpack.c.l.b16 %v19554_v62 }
 0x8d7   : > { %7549 = vmatpush.bf16.msrb.mxu2 %v7537_v6 }
 0x8d8   : > { %v5484_v55 = vpop.xlane.xlu2 %5483  ;;  %v5910_v9 = vmul.f32 1.442695, %v5716_v32 }
 0x8d9   : > { %v6126_v60 = vpop.xlane.xlu0 %6125  ;;  %v5722_v13 = vsub.f32 %v16718_v8, %v5484_v55  ;;  %v4740_v4 = vpop.f32.mrf.mxu2 }
 0x8da   : > { %5504 = vmax.xlane.f32.xlu1 %v5503_v12  ;;  %12314 = vrcp.f32 %v6126_v60  ;;  %v17092_v8 = vsel %vm5135_vm11, %v4740_v4, -1e+30 }
 0x8db   : > { %12316 = vpow2.f32 %v5888_v20  ;;  %v5922_v55 = vmul.f32 1.442695, %v5722_v13  ;;  %v5557_v32 = vsel %vm3474_vm10, %v17092_v8, -inf  ;;  %v5912_v13 = vmul.f32 1.442695, %v5717_v14 }
 0x8dd   : > { %5522 = vmax.xlane.f32.xlu2 %v5521_v39  ;;  %5540 = vmax.xlane.f32.xlu0 %v5539_v31  ;;  %v17064_v28 = vpop.xlane.xlu1 %5486 }
 0x8e0   : > { %v6129_v23 = vpop.xlane.xlu2 %6128  ;;  %v12315_v6 = vpop.eup %12314 }
 0x8e1   : > { %v6147_v49 = vpop.xlane.xlu0 %6146  ;;  %12318 = vrcp.f32 %v6129_v23  ;;  %v6576_v27 = vmul.f32 %v12315_v6, %v16713_v11  ;;  %v17088_v58 = vpop.eup %12316  ;;  %v19553_v23 = vld [vmem:[#allocation94_spill] sm:$0xff] }
 0x8e2   : > { %12320 = vpow2.f32 %v5900_v22  ;;  %5537 = vmax.xlane.f32.xlu1 %v5536_v26 }
 0x8e3   : > { %12322 = vrcp.f32 %v6147_v49  ;;  %v6704_v20 = vpack.c.bf16 %v6576_v27, %v6576_v27  ;;  %v7406_v49 = vunpack.c.l.b16 %v19553_v23  ;;  %v6199_v27 = vsel %vm3474_vm10, %v17088_v58, 0.0  ;;  %v19556_v23 = vld [vmem:[#allocation85_spill] sm:$0xff] }
 0x8e5   : > { %5555 = vmax.xlane.f32.xlu2 %v5554_v52  ;;  %6197 = vadd.xlane.f32.xlu0 %v6196_v38  ;;  %v6144_v60 = vpop.xlane.xlu1 %6143  ;;  %v7194_v52 = vunpack.c.l.b16 %v6704_v20  ;;  %v7407_v20 = vpack.c.b16 %v7406_v49, %v7405_v15 }
 0x8e6   : > { %12324 = vrcp.f32 %v6144_v60 }
 0x8e7   : > { %v12319_v12 = vpop.eup %12318  ;;  %12326 = vpow2.f32 %v5898_v51  ;;  %v17106_v51 = vpop.f32.mrf.mxu1 }
 0x8e8   : > { %v17096_v11 = vpop.eup %12320  ;;  %12328 = vpow2.f32 %v5910_v9  ;;  %v6577_v39 = vmul.f32 %v12319_v12, %v16728_v44  ;;  %v6162_v31 = vpop.xlane.xlu2 %6161  ;;  %v5723_v44 = vsub.f32 %v16732_v10, %v17064_v28 }
 0x8e9   : > { %v6180_v22 = vpop.xlane.xlu0 %6179  ;;  %v12323_v1 = vpop.eup %12322  ;;  %12330 = vrcp.f32 %v6162_v31  ;;  %v6217_v38 = vsel %vm3474_vm10, %v17096_v11, 0.0 }
 0x8ea   : > { %12332 = vpow2.f32 %v5922_v55  ;;  %v6705_v6 = vpack.c.bf16 %v6577_v39, %v6577_v39  ;;  %v6583_v26 = vmul.f32 %v12323_v1, %v16736_v47  ;;  %5558 = vmax.xlane.f32.xlu1 %v5557_v32  ;;  %v5924_v39 = vmul.f32 1.442695, %v5723_v44  ;;  %v19555_v1 = vld [vmem:[#allocation83_spill] sm:$0xff] }
 0x8eb   : > { %12334 = vrcp.f32 %v6180_v22  ;;  %v7484_v32 = vunpack.c.l.b16 %v19555_v1  ;;  %v19558_v1 = vld [vmem:[#allocation126_spill] sm:$0xff] }
 0x8ec   : > { %v12325_v4 = vpop.eup %12324  ;;  %v7195_v9 = vunpack.c.l.b16 %v6705_v6  ;;  %v6711_v60 = vpack.c.bf16 %v6583_v26, %v6583_v26  ;;  %v7483_v6 = vunpack.c.l.b16 %v19556_v23  ;;  %v7561_v23 = vunpack.c.l.b16 %v19558_v1 }
 0x8ed   : > { %v17112_v47 = vpop.eup %12326  ;;  %v6582_v55 = vmul.f32 %v12325_v4, %v16752_v61  ;;  %6200 = vadd.xlane.f32.xlu2 %v6199_v27  ;;  %6218 = vadd.xlane.f32.xlu0 %v6217_v38  ;;  %v6165_v10 = vpop.xlane.xlu1 %6164 }
 0x8ee   : > { %v17115_v28 = vpop.eup %12328  ;;  %v7196_v12 = vpack.c.b16 %v7195_v9, %v7194_v52  ;;  %12336 = vrcp.f32 %v6165_v10  ;;  %v6214_v62 = vsel %vm3474_vm10, %v17112_v47, 0.0  ;;  %v7273_v52 = vunpack.c.l.b16 %v6711_v60 }
 0x8ef   : > { %v12331_v14 = vpop.eup %12330  ;;  %v6710_v31 = vpack.c.bf16 %v6582_v55, %v6582_v55  ;;  %12338 = vpow2.f32 %v5912_v13  ;;  %v6232_v27 = vsel %vm3474_vm10, %v17115_v28, 0.0  ;;  %v7485_v55 = vpack.c.b16 %v7484_v32, %v7483_v6 }
 0x8f0   : > { %v17117_v22 = vpop.eup %12332  ;;  %v6183_v26 = vpop.xlane.xlu2 %6182  ;;  %11232 = vmatmul.msk.bf16.vlgmr.msrb.gmra.mxu1 %vm3474_vm10, %v7196_v12  ;;  %v6588_v15 = vmul.f32 %v12331_v14, %v16755_v54 }
 0x8f1   : > { %v17122_v61 = vpop.xlane.xlu0 %5456  ;;  %v12335_v4 = vpop.eup %12334  ;;  %v7272_v49 = vunpack.c.l.b16 %v6710_v31  ;;  %12340 = vrcp.f32 %v6183_v26  ;;  %7419 = vmatpush.bf16.msrb.mxu1 %v7407_v20  ;;  %v6250_v38 = vsel %vm3474_vm10, %v17117_v22, 0.0 }
 0x8f2   : > { %6215 = vadd.xlane.f32.xlu1 %v6214_v62  ;;  %12342 = vpow2.f32 %v5924_v39  ;;  %v6594_v13 = vmul.f32 %v12335_v4, %v16757_v33  ;;  %v6716_v10 = vpack.c.bf16 %v6588_v15, %v6588_v15  ;;  %v4610_v14 = vpop.f32.mrf.mxu1  ;;  %v19557_v39 = vld [vmem:[#allocation125_spill] sm:$0xff]  ;;  %v4686_v4 = vpop.f32.mrf.mxu0 }
 0x8f3   : > { %v7274_v44 = vpack.c.b16 %v7273_v52, %v7272_v49  ;;  %v7562_v31 = vunpack.c.l.b16 %v19557_v39  ;;  %v17145_v52 = vsel %vm5135_vm11, %v4610_v14, -1e+30 }
 0x8f4   : > { %v12337_v9 = vpop.eup %12336  ;;  %v6722_v26 = vpack.c.bf16 %v6594_v13, %v6594_v13  ;;  %v7350_v49 = vunpack.c.l.b16 %v6716_v10  ;;  %v19559_v13 = vld [vmem:[#allocation78_spill] sm:$0xff]  ;;  %v5527_v14 = vsel %vm3474_vm10, %v17145_v52, -inf  ;;  %v19560_v10 = vld [vmem:[#allocation59_spill] sm:$0xff] }
 0x8f5   : > { %v6589_v60 = vmul.f32 %v12337_v9, %v16773_v0  ;;  %6233 = vadd.xlane.f32.xlu2 %v6232_v27  ;;  %6251 = vadd.xlane.f32.xlu0 %v6250_v38  ;;  %v5454_v54 = vpop.xlane.xlu1 %5453  ;;  %v17133_v12 = vpop.eup %12338  ;;  %v7640_v27 = vunpack.c.l.b16 %v19559_v13  ;;  %v7563_v1 = vpack.c.b16 %v7562_v31, %v7561_v23 }
 0x8f6   : > { %11235 = vmatmul.msk.bf16.vlgmr.msrb.gmra.mxu0 %vm3474_vm10, %v7274_v44  ;;  %v6235_v44 = vsel %vm3474_vm10, %v17133_v12, 0.0  ;;  %v4842_v38 = vpop.f32.mrf.mxu2 }
 0x8f7   : > { %v12341_v20 = vpop.eup %12340  ;;  %v6717_v33 = vpack.c.bf16 %v6589_v60, %v6589_v60  ;;  %7497 = vmatpush.bf16.msrb.mxu0 %v7485_v55  ;;  %v4764_v55 = vpop.f32.mrf.mxu3  ;;  %v7428_v60 = vunpack.c.l.b16 %v6722_v26 }
 0x8f8   : > { %v6595_v32 = vmul.f32 %v12341_v20, %v16781_v46  ;;  %v5472_v6 = vpop.xlane.xlu2 %5471  ;;  %v17141_v62 = vpop.eup %12342  ;;  %v17167_v31 = vsel %vm5135_vm11, %v4764_v55, -1e+30 }
 0x8f9   : > { %v17139_v0 = vpop.xlane.xlu0 %5489  ;;  %v7351_v15 = vunpack.c.l.b16 %v6717_v33  ;;  %v6253_v39 = vsel %vm3474_vm10, %v17141_v62, 0.0  ;;  %v7639_v33 = vunpack.c.l.b16 %v19560_v10 }
 0x8fa   : > { %v6723_v9 = vpack.c.bf16 %v6595_v32, %v6595_v32  ;;  %6236 = vadd.xlane.f32.xlu1 %v6235_v44  ;;  %v5712_v44 = vsub.f32 %v16798_v43, %v5454_v54  ;;  %v4688_v43 = vpop.f32.mrf.mxu0  ;;  %v5560_v54 = vsel %vm3474_vm10, %v17167_v31, -inf }
 0x8fb   : > { %v7352_v46 = vpack.c.b16 %v7351_v15, %v7350_v49  ;;  %v17158_v49 = vsel %vm5135_vm11, %v17106_v51, -1e+30  ;;  %v7641_v26 = vpack.c.b16 %v7640_v27, %v7639_v33  ;;  %v17171_v51 = vsel %vm5135_vm11, %v4686_v4, -1e+30 }
 0x8fc   : > { %v7429_v20 = vunpack.c.l.b16 %v6723_v9  ;;  %v5524_v23 = vsel %vm3474_vm10, %v17158_v49, -inf  ;;  %v5718_v27 = vsub.f32 %v16811_v36, %v5472_v6  ;;  %v5902_v55 = vmul.f32 1.442695, %v5712_v44 }
 0x8fd   : > { %6254 = vadd.xlane.f32.xlu2 %v6253_v39  ;;  %5528 = vmax.xlane.f32.xlu0 %v5527_v14  ;;  %v5475_v32 = vpop.xlane.xlu1 %5474  ;;  %v17182_v39 = vsel %vm5135_vm11, %v4688_v43, -1e+30  ;;  %v5713_v36 = vsub.f32 %v16785_v34, %v17122_v61  ;;  %v17206_v43 = vsel %vm5135_vm11, %v4842_v38, -1e+30  ;;  %v19567_v38 = vld [vmem:[#allocation119_spill] sm:$0xff] }
 0x8fe   : > { %v7430_v15 = vpack.c.b16 %v7429_v20, %v7428_v60  ;;  %11238 = vmatmul.msk.bf16.vlgmr.msrb.gmra.mxu3 %vm3474_vm10, %v7352_v46  ;;  %v5542_v46 = vsel %vm3474_vm10, %v17171_v51, -inf  ;;  %v4844_v4 = vpop.f32.mrf.mxu2  ;;  %v5914_v14 = vmul.f32 1.442695, %v5718_v27  ;;  %12344 = vpow2.f32 %v5902_v55  ;;  %19564 = vst [vmem:[#allocation70_spill] sm:$0xff] %v17206_v43 }
 0x8ff   : > { %7575 = vmatpush.bf16.msrb.mxu3 %v7563_v1  ;;  %v4766_v20 = vpop.f32.mrf.mxu3  ;;  %v5719_v6 = vsub.f32 %v16822_v59, %v5475_v32  ;;  %v17189_v1 = vsel %vm5135_vm11, %v4844_v4, -1e+30  ;;  %v5904_v34 = vmul.f32 1.442695, %v5713_v36  ;;  %v19566_v36 = vld [vmem:[#allocation67_spill] sm:$0xff] }
 0x900   : > { %v5493_v9 = vpop.xlane.xlu2 %5492  ;;  %11241 = vmatmul.msk.bf16.vlgmr.msra.gmra.mxu2 %vm3474_vm10, %v7430_v15  ;;  %19561 = vst [vmem:[#allocation141_spill] sm:$0xff] %v17189_v1  ;;  %v17193_v15 = vsel %vm5135_vm11, %v4766_v20, -1e+30  ;;  %v5581_v44 = vsel %vm3474_vm10, %v17189_v1, -inf }
 0x901   : > { %v17163_v13 = vpop.xlane.xlu0 %5510  ;;  %7653 = vmatpush.bf16.msra.mxu2 %v7641_v26  ;;  %19562 = vst [vmem:[#allocation139_spill] sm:$0xff] %v17193_v15  ;;  %v5545_v26 = vsel %vm3474_vm10, %v17182_v39, -inf  ;;  %v5725_v61 = vsub.f32 %v16833_v21, %v5493_v9  ;;  %v5916_v59 = vmul.f32 1.442695, %v5719_v6  ;;  %v5563_v32 = vsel %vm3474_vm10, %v17193_v15, -inf }
 0x902   : > { %5525 = vmax.xlane.f32.xlu1 %v5524_v23 }
 0x903   : > { %v5928_v21 = vmul.f32 1.442695, %v5725_v61 }
 0x904   : > { %v17202_v27 = vpop.eup %12344 }
 0x905   : > { %5543 = vmax.xlane.f32.xlu2 %v5542_v46  ;;  %5561 = vmax.xlane.f32.xlu0 %v5560_v54  ;;  %v5508_v60 = vpop.xlane.xlu1 %5507  ;;  %19563 = vst [vmem:[#allocation69_spill] sm:$0xff] %v17202_v27  ;;  %v5724_v46 = vsub.f32 %v16807_v57, %v17139_v0  ;;  %v6220_v0 = vsel %vm3474_vm10, %v17202_v27, 0.0 }
 0x908   : > { %v6150_v10 = vpop.xlane.xlu2 %6149 }
 0x909   : > { %v6168_v33 = vpop.xlane.xlu0 %6167  ;;  %12346 = vrcp.f32 %v6150_v10  ;;  %v5730_v10 = vsub.f32 %v19567_v38, %v5508_v60 }
 0x90a   : > { %12348 = vpow2.f32 %v5914_v14  ;;  %5546 = vmax.xlane.f32.xlu1 %v5545_v26  ;;  %v5578_v14 = vsel %vm3474_vm10, %v17206_v43, -inf  ;;  %v5926_v26 = vmul.f32 1.442695, %v5724_v46  ;;  %v19571_v46 = vld [vmem:[#allocation109_spill] sm:$0xff] }
 0x90b   : > { %12350 = vrcp.f32 %v6168_v33 }
 0x90d   : > { %5564 = vmax.xlane.f32.xlu2 %v5563_v32  ;;  %5582 = vmax.xlane.f32.xlu0 %v5581_v44  ;;  %v6153_v23 = vpop.xlane.xlu1 %6152  ;;  %v19570_v44 = vld [vmem:[#allocation87_spill] sm:$0xff] }
 0x90e   : > { %12352 = vrcp.f32 %v6153_v23 }
 0x90f   : > { %v12347_v54 = vpop.eup %12346  ;;  %12354 = vpow2.f32 %v5904_v34  ;;  %v19568_v34 = vld [vmem:[#allocation110_spill] sm:$0xff] }
 0x910   : > { %v17208_v9 = vpop.eup %12348  ;;  %12356 = vpow2.f32 %v5916_v59  ;;  %v6171_v55 = vpop.xlane.xlu2 %6170  ;;  %v6584_v6 = vmul.f32 %v12347_v54, %v19566_v36 }
 0x911   : > { %19565 = vst [vmem:[#allocation165_spill] sm:$0xff] %v17208_v9  ;;  %v6189_v4 = vpop.xlane.xlu0 %6188  ;;  %v12351_v20 = vpop.eup %12350  ;;  %12358 = vrcp.f32 %v6171_v55  ;;  %v6238_v57 = vsel %vm3474_vm10, %v17208_v9, 0.0  ;;  %v7510_v55 = vunpack.c.l.b16 %v19571_v46  ;;  %v19573_v9 = vld [vmem:[#allocation74_spill] sm:$0xff] }
 0x912   : > { %12360 = vrcp.f32 %v6189_v4  ;;  %5579 = vmax.xlane.f32.xlu1 %v5578_v14  ;;  %v6590_v61 = vmul.f32 %v12351_v20, %v19568_v34  ;;  %v6712_v32 = vpack.c.bf16 %v6584_v6, %v6584_v6  ;;  %v19572_v4 = vld [vmem:[#allocation76_spill] sm:$0xff]  ;;  %v5938_v14 = vmul.f32 1.442695, %v5730_v10 }
 0x913   : > { %12362 = vpow2.f32 %v5928_v21  ;;  %v5731_v20 = vsub.f32 %v19572_v4, %v17163_v13  ;;  %v19574_v13 = vld [vmem:[#allocation98_spill] sm:$0xff] }
 0x914   : > { %v12353_v33 = vpop.eup %12352  ;;  %v6718_v34 = vpack.c.bf16 %v6590_v61, %v6590_v61  ;;  %v7509_v10 = vunpack.c.l.b16 %v19574_v13 }
 0x915   : > { %v17221_v59 = vpop.eup %12354  ;;  %v6585_v23 = vmul.f32 %v12353_v33, %v19570_v44  ;;  %6239 = vadd.xlane.f32.xlu0 %v6238_v57  ;;  %6221 = vadd.xlane.f32.xlu2 %v6220_v0  ;;  %v6186_v54 = vpop.xlane.xlu1 %6185 }
 0x916   : > { %19569 = vst [vmem:[#allocation113_spill] sm:$0xff] %v17221_v59  ;;  %v17224_v21 = vpop.eup %12356  ;;  %12364 = vrcp.f32 %v6186_v54  ;;  %v6223_v0 = vsel %vm3474_vm10, %v17221_v59, 0.0  ;;  %v7298_v54 = vunpack.c.l.b16 %v6712_v32  ;;  %v4712_v59 = vpop.f32.mrf.mxu1  ;;  %v7376_v43 = vunpack.c.l.b16 %v6718_v34 }
 0x917   : > { %v12359_v60 = vpop.eup %12358  ;;  %v6713_v36 = vpack.c.bf16 %v6585_v23, %v6585_v23  ;;  %12366 = vpow2.f32 %v5926_v26  ;;  %v19575_v26 = vld [vmem:[#allocation144_spill] sm:$0xff] }
 0x918   : > { %v12361_v38 = vpop.eup %12360  ;;  %v6591_v6 = vmul.f32 %v12359_v60, %v16864_v16  ;;  %v6204_v33 = vpop.xlane.xlu2 %6203  ;;  %v7588_v61 = vunpack.c.l.b16 %v19575_v26  ;;  %v5940_v60 = vmul.f32 1.442695, %v5731_v20 }
 0x919   : > { %v17230_v57 = vpop.xlane.xlu0 %5477  ;;  %v17234_v44 = vpop.eup %12362  ;;  %v7299_v46 = vunpack.c.l.b16 %v6713_v36  ;;  %v6597_v27 = vmul.f32 %v12361_v38, %v19573_v9  ;;  %12368 = vrcp.f32 %v6204_v33  ;;  %v6241_v9 = vsel %vm3474_vm10, %v17224_v21, 0.0  ;;  %v19576_v38 = vld [vmem:[#allocation137_spill] sm:$0xff] }
 0x91a   : > { %v6719_v23 = vpack.c.bf16 %v6591_v6, %v6591_v6  ;;  %6224 = vadd.xlane.f32.xlu1 %v6223_v0  ;;  %v17239_v16 = vpop.f32.mrf.mxu0  ;;  %12370 = vpow2.f32 %v5938_v14  ;;  %v6259_v32 = vsel %vm3474_vm10, %v17234_v44, 0.0  ;;  %v7511_v36 = vpack.c.b16 %v7510_v55, %v7509_v10 }
 0x91b   : > { %v7300_v4 = vpack.c.b16 %v7299_v46, %v7298_v54  ;;  %v7587_v6 = vunpack.c.l.b16 %v19576_v38  ;;  %v6725_v33 = vpack.c.bf16 %v6597_v27, %v6597_v27  ;;  %v17253_v27 = vsel %vm5135_vm11, %v4712_v59, -1e+30 }
 0x91c   : > { %v12365_v1 = vpop.eup %12364  ;;  %v7377_v15 = vunpack.c.l.b16 %v6719_v23  ;;  %v19577_v23 = vld [vmem:[#allocation101_spill] sm:$0xff] }
 0x91d   : > { %v6596_v0 = vmul.f32 %v12365_v1, %v16887_v30  ;;  %6260 = vadd.xlane.f32.xlu0 %v6259_v32  ;;  %6242 = vadd.xlane.f32.xlu2 %v6241_v9  ;;  %v6207_v20 = vpop.xlane.xlu1 %6206  ;;  %v17247_v14 = vpop.eup %12366  ;;  %v7589_v46 = vpack.c.b16 %v7588_v61, %v7587_v6  ;;  %v7666_v55 = vunpack.c.l.b16 %v19577_v23  ;;  %v5548_v9 = vsel %vm3474_vm10, %v17253_v27, -inf }
 0x91e   : > { %v7378_v54 = vpack.c.b16 %v7377_v15, %v7376_v43  ;;  %12372 = vrcp.f32 %v6207_v20  ;;  %11236 = vmatmul.msk.bf16.vlgmr.msra.gmra.mxu1 %vm3474_vm10, %v7300_v4  ;;  %v7455_v43 = vunpack.c.l.b16 %v6725_v33  ;;  %v6256_v61 = vsel %vm3474_vm10, %v17247_v14, 0.0  ;;  %v19578_v4 = vld [vmem:[#allocation115_spill] sm:$0xff] }
 0x91f   : > { %v12369_v34 = vpop.eup %12368  ;;  %v6724_v13 = vpack.c.bf16 %v6596_v0, %v6596_v0  ;;  %7523 = vmatpush.bf16.msra.mxu1 %v7511_v36  ;;  %12374 = vpow2.f32 %v5940_v60  ;;  %v7665_v59 = vunpack.c.l.b16 %v19578_v4 }
 0x920   : > { %v5481_v30 = vpop.xlane.xlu2 %5480  ;;  %11239 = vmatmul.msk.bf16.vlgmr.msra.gmra.mxu0 %vm3474_vm10, %v7378_v54  ;;  %v17258_v15 = vpop.eup %12370  ;;  %v6602_v26 = vmul.f32 %v12369_v34, %v16898_v7 }
 0x921   : > { %v17256_v1 = vpop.xlane.xlu0 %5498  ;;  %v7454_v10 = vunpack.c.l.b16 %v6724_v13  ;;  %7601 = vmatpush.bf16.msra.mxu0 %v7589_v46  ;;  %v6274_v36 = vsel %vm3474_vm10, %v17258_v15, 0.0  ;;  %v7667_v38 = vpack.c.b16 %v7666_v55, %v7665_v59  ;;  %v4714_v54 = vpop.f32.mrf.mxu1  ;;  %v19579_v46 = vld [vmem:[#allocation122_spill] sm:$0xff]  ;;  %v19580_v59 = vld [vmem:[#allocation71_spill] sm:$0xff] }
 0x922   : > { %6257 = vadd.xlane.f32.xlu1 %v6256_v61  ;;  %v4792_v6 = vpop.f32.mrf.mxu0  ;;  %v6730_v33 = vpack.c.bf16 %v6602_v26, %v6602_v26  ;;  %v7744_v13 = vunpack.c.l.b16 %v19579_v46 }
 0x923   : > { %v7456_v32 = vpack.c.b16 %v7455_v43, %v7454_v10  ;;  %v17275_v23 = vsel %vm5135_vm11, %v4792_v6, -1e+30  ;;  %v17281_v10 = vsel %vm5135_vm11, %v4714_v54, -1e+30  ;;  %v17294_v54 = vsel %vm5135_vm11, %v17239_v16, -1e+30 }
 0x924   : > { %v12373_v60 = vpop.eup %12372  ;;  %v7532_v26 = vunpack.c.l.b16 %v6730_v33  ;;  %v5551_v6 = vsel %vm3474_vm10, %v17281_v10, -inf  ;;  %v5566_v16 = vsel %vm3474_vm10, %v17294_v54, -inf }
 0x925   : > { %v6603_v7 = vmul.f32 %v12373_v60, %v16909_v41  ;;  %5549 = vmax.xlane.f32.xlu0 %v5548_v9  ;;  %6275 = vadd.xlane.f32.xlu2 %v6274_v36  ;;  %v5496_v0 = vpop.xlane.xlu1 %5495  ;;  %v17269_v20 = vpop.eup %12374  ;;  %v5721_v9 = vsub.f32 %v16921_v63, %v5481_v30  ;;  %v19581_v63 = vld [vmem:[#allocation127_spill] sm:$0xff] }
 0x926   : > { %11242 = vmatmul.msk.bf16.vlgmr.msra.gmra.mxu3 %vm3474_vm10, %v7456_v32  ;;  %v4868_v41 = vpop.f32.mrf.mxu3  ;;  %v6277_v4 = vsel %vm3474_vm10, %v17269_v20, 0.0  ;;  %v7743_v32 = vunpack.c.l.b16 %v19580_v59  ;;  %v4946_v36 = vpop.f32.mrf.mxu2  ;;  %v5720_v30 = vsub.f32 %v19581_v63, %v17230_v57  ;;  %v5726_v46 = vsub.f32 %v16934_v24, %v5496_v0 }
 0x927   : > { %v6731_v34 = vpack.c.bf16 %v6603_v7, %v6603_v7  ;;  %7679 = vmatpush.bf16.msra.mxu3 %v7667_v38  ;;  %v5569_v38 = vsel %vm3474_vm10, %v17275_v23, -inf }
 0x928   : > { %v5514_v55 = vpop.xlane.xlu2 %5513  ;;  %v7745_v7 = vpack.c.b16 %v7744_v13, %v7743_v32  ;;  %v17302_v13 = vsel %vm5135_vm11, %v4946_v36, -1e+30  ;;  %v5918_v32 = vmul.f32 1.442695, %v5720_v30 }
 0x929   : > { %v17277_v43 = vpop.xlane.xlu0 %5531  ;;  %v7533_v61 = vunpack.c.l.b16 %v6731_v34  ;;  %v5920_v34 = vmul.f32 1.442695, %v5721_v9  ;;  %v5732_v57 = vsub.f32 %v16946_v35, %v5514_v55  ;;  %v5602_v24 = vsel %vm3474_vm10, %v17302_v13, -inf }
 0x92a   : > { %6278 = vadd.xlane.f32.xlu1 %v6277_v4  ;;  %v17306_v4 = vsel %vm5135_vm11, %v4868_v41, -1e+30 }
 0x92b   : > { %v7534_v60 = vpack.c.b16 %v7533_v61, %v7532_v26  ;;  %v5584_v0 = vsel %vm3474_vm10, %v17306_v4, -inf  ;;  %v5942_v35 = vmul.f32 1.442695, %v5732_v57 }
 0x92d   : > { %5570 = vmax.xlane.f32.xlu0 %v5569_v38  ;;  %5552 = vmax.xlane.f32.xlu2 %v5551_v6  ;;  %v5517_v33 = vpop.xlane.xlu1 %5516  ;;  %v19582_v38 = vld [vmem:[#allocation118_spill] sm:$0xff] }
 0x92e   : > { %11245 = vmatmul.msk.bf16.vlgmr.msrb.gmra.mxu2 %vm3474_vm10, %v7534_v60  ;;  %v4870_v59 = vpop.f32.mrf.mxu3  ;;  %v5930_v60 = vmul.f32 1.442695, %v5726_v46  ;;  %v4948_v9 = vpop.f32.mrf.mxu2  ;;  %v5727_v6 = vsub.f32 %v19582_v38, %v17256_v1 }
 0x92f   : > { %7757 = vmatpush.bf16.msrb.mxu2 %v7745_v7  ;;  %v17317_v36 = vsel %vm5135_vm11, %v4870_v59, -1e+30  ;;  %v5733_v7 = vsub.f32 %v16957_v2, %v5517_v33  ;;  %v17326_v46 = vsel %vm5135_vm11, %v4948_v9, -1e+30 }
 0x930   : > { %v5535_v26 = vpop.xlane.xlu2 %5534  ;;  %v5932_v1 = vmul.f32 1.442695, %v5727_v6  ;;  %v5738_v6 = vsub.f32 %v16942_v50, %v17277_v43  ;;  %v19590_v43 = vld [vmem:[#allocation54_spill] sm:$0xff] }
 0x931   : > { %v6177_v61 = vpop.xlane.xlu0 %6176  ;;  %v5739_v57 = vsub.f32 %v16966_v19, %v5535_v26  ;;  %v5944_v33 = vmul.f32 1.442695, %v5733_v7 }
 0x932   : > { %12376 = vrcp.f32 %v6177_v61  ;;  %5567 = vmax.xlane.f32.xlu1 %v5566_v16  ;;  %v5587_v16 = vsel %vm3474_vm10, %v17317_v36, -inf  ;;  %v5954_v50 = vmul.f32 1.442695, %v5738_v6 }
 0x933   : > { %12378 = vpow2.f32 %v5920_v34  ;;  %v5956_v26 = vmul.f32 1.442695, %v5739_v57  ;;  %v19589_v57 = vld [vmem:[#allocation145_spill] sm:$0xff] }
 0x935   : > { %5603 = vmax.xlane.f32.xlu0 %v5602_v24  ;;  %5585 = vmax.xlane.f32.xlu2 %v5584_v0  ;;  %v6174_v41 = vpop.xlane.xlu1 %6173 }
 0x936   : > { %12380 = vrcp.f32 %v6174_v41 }
 0x937   : > { %12382 = vpow2.f32 %v5918_v32  ;;  %v5605_v32 = vsel %vm3474_vm10, %v17326_v46, -inf }
 0x938   : > { %v12377_v55 = vpop.eup %12376  ;;  %12384 = vpow2.f32 %v5930_v60  ;;  %v6192_v63 = vpop.xlane.xlu2 %6191 }
 0x939   : > { %v6210_v30 = vpop.xlane.xlu0 %6209  ;;  %v17322_v34 = vpop.eup %12378  ;;  %v6593_v61 = vmul.f32 %v12377_v55, %v16962_v56  ;;  %12386 = vrcp.f32 %v6192_v63  ;;  %v19587_v55 = vld [vmem:[#allocation96_spill] sm:$0xff] }
 0x93a   : > { %19583 = vst [vmem:[#allocation114_spill] sm:$0xff] %v17322_v34  ;;  %12388 = vpow2.f32 %v5942_v35  ;;  %5588 = vmax.xlane.f32.xlu1 %v5587_v16  ;;  %v6247_v59 = vsel %vm3474_vm10, %v17322_v34, 0.0  ;;  %v7614_v38 = vunpack.c.l.b16 %v19587_v55 }
 0x93b   : > { %12390 = vrcp.f32 %v6210_v30  ;;  %v6721_v56 = vpack.c.bf16 %v6593_v61, %v6593_v61 }
 0x93c   : > { %v12381_v2 = vpop.eup %12380 }
 0x93d   : > { %v17336_v24 = vpop.eup %12382  ;;  %v6592_v0 = vmul.f32 %v12381_v2, %v16976_v5  ;;  %6248 = vadd.xlane.f32.xlu0 %v6247_v59  ;;  %5606 = vmax.xlane.f32.xlu2 %v5605_v32  ;;  %v6195_v60 = vpop.xlane.xlu1 %6194  ;;  %v7403_v61 = vunpack.c.l.b16 %v6721_v56  ;;  %v19588_v2 = vld [vmem:[#allocation61_spill] sm:$0xff]  ;;  %v7613_v59 = vunpack.c.l.b16 %v19589_v57 }
 0x93e   : > { %19584 = vst [vmem:[#allocation167_spill] sm:$0xff] %v17336_v24  ;;  %v17339_v41 = vpop.eup %12384  ;;  %12392 = vrcp.f32 %v6195_v60  ;;  %v6244_v63 = vsel %vm3474_vm10, %v17336_v24, 0.0 }
 0x93f   : > { %19585 = vst [vmem:[#allocation166_spill] sm:$0xff] %v17339_v41  ;;  %v12387_v19 = vpop.eup %12386  ;;  %12394 = vpow2.f32 %v5932_v1  ;;  %v6720_v9 = vpack.c.bf16 %v6592_v0, %v6592_v0  ;;  %v6262_v56 = vsel %vm3474_vm10, %v17339_v41, 0.0  ;;  %v4894_v41 = vpop.f32.mrf.mxu0 }
 0x940   : > { %v17341_v35 = vpop.eup %12388  ;;  %12396 = vpow2.f32 %v5944_v33  ;;  %v6213_v7 = vpop.xlane.xlu2 %6212  ;;  %v6598_v1 = vmul.f32 %v12387_v19, %v19588_v2  ;;  %v7615_v19 = vpack.c.b16 %v7614_v38, %v7613_v59  ;;  %v19594_v38 = vld [vmem:[#allocation102_spill] sm:$0xff] }
 0x941   : > { %19586 = vst [vmem:[#allocation106_spill] sm:$0xff] %v17341_v35  ;;  %v6231_v5 = vpop.xlane.xlu0 %6230  ;;  %v12391_v30 = vpop.eup %12390  ;;  %v7402_v16 = vunpack.c.l.b16 %v6720_v9  ;;  %12398 = vrcp.f32 %v6213_v7  ;;  %v6280_v60 = vsel %vm3474_vm10, %v17341_v35, 0.0  ;;  %v19592_v7 = vld [vmem:[#allocation100_spill] sm:$0xff] }
 0x942   : > { %12400 = vrcp.f32 %v6231_v5  ;;  %6245 = vadd.xlane.f32.xlu1 %v6244_v63  ;;  %v6604_v33 = vmul.f32 %v12391_v30, %v19590_v43  ;;  %v6726_v55 = vpack.c.bf16 %v6598_v1, %v6598_v1 }
 0x943   : > { %12402 = vpow2.f32 %v5956_v26  ;;  %v7404_v32 = vpack.c.b16 %v7403_v61, %v7402_v16  ;;  %v19593_v16 = vld [vmem:[#allocation80_spill] sm:$0xff] }
 0x944   : > { %v12393_v0 = vpop.eup %12392  ;;  %v7692_v2 = vunpack.c.l.b16 %v19593_v16  ;;  %v6732_v57 = vpack.c.bf16 %v6604_v33, %v6604_v33 }
 0x945   : > { %v17355_v9 = vpop.eup %12394  ;;  %v6599_v5 = vmul.f32 %v12393_v0, %v19592_v7  ;;  %6281 = vadd.xlane.f32.xlu0 %v6280_v60  ;;  %6263 = vadd.xlane.f32.xlu2 %v6262_v56  ;;  %v6228_v26 = vpop.xlane.xlu1 %6227  ;;  %v7480_v56 = vunpack.c.l.b16 %v6726_v55 }
 0x946   : > { %19591 = vst [vmem:[#allocation168_spill] sm:$0xff] %v17355_v9  ;;  %v17358_v63 = vpop.eup %12396  ;;  %12404 = vrcp.f32 %v6228_v26  ;;  %11240 = vmatmul.msk.bf16.vlgmr.msrb.gmra.mxu1 %vm3474_vm10, %v7404_v32  ;;  %v4816_v60 = vpop.f32.mrf.mxu1  ;;  %v6265_v32 = vsel %vm3474_vm10, %v17355_v9, 0.0  ;;  %v7558_v24 = vunpack.c.l.b16 %v6732_v57 }
 0x947   : > { %v12399_v6 = vpop.eup %12398  ;;  %v6727_v30 = vpack.c.bf16 %v6599_v5, %v6599_v5  ;;  %7627 = vmatpush.bf16.msrb.mxu1 %v7615_v19  ;;  %12406 = vpow2.f32 %v5954_v50  ;;  %v19596_v5 = vld [vmem:[#allocation86_spill] sm:$0xff]  ;;  %v19597_v50 = vld [vmem:[#allocation123_spill] sm:$0xff] }
 0x948   : > { %v12401_v61 = vpop.eup %12400  ;;  %v6605_v1 = vmul.f32 %v12399_v6, %v19594_v38  ;;  %v5502_v59 = vpop.xlane.xlu2 %5501  ;;  %v7691_v16 = vunpack.c.l.b16 %v19596_v5  ;;  %v7770_v33 = vunpack.c.l.b16 %v19597_v50 }
 0x949   : > { %v5520_v0 = vpop.xlane.xlu0 %5519  ;;  %v17363_v43 = vpop.eup %12402  ;;  %v7481_v7 = vunpack.c.l.b16 %v6727_v30  ;;  %v6611_v26 = vmul.f32 %v12401_v61, %v17005_v40  ;;  %v6283_v40 = vsel %vm3474_vm10, %v17358_v63, 0.0  ;;  %v19598_v61 = vld [vmem:[#allocation72_spill] sm:$0xff] }
 0x94a   : > { %19595 = vst [vmem:[#allocation169_spill] sm:$0xff] %v17363_v43  ;;  %v6733_v19 = vpack.c.bf16 %v6605_v1, %v6605_v1  ;;  %6266 = vadd.xlane.f32.xlu1 %v6265_v32  ;;  %v17370_v38 = vpop.f32.mrf.mxu3  ;;  %v6301_v55 = vsel %vm3474_vm10, %v17363_v43, 0.0  ;;  %v7693_v30 = vpack.c.b16 %v7692_v2, %v7691_v16  ;;  %v7769_v1 = vunpack.c.l.b16 %v19598_v61  ;;  %v19599_v43 = vld [vmem:[#allocation138_spill] sm:$0xff] }
 0x94b   : > { %v7482_v35 = vpack.c.b16 %v7481_v7, %v7480_v56  ;;  %v6739_v32 = vpack.c.bf16 %v6611_v26, %v6611_v26  ;;  %v7848_v9 = vunpack.c.l.b16 %v19599_v43  ;;  %v17384_v2 = vsel %vm5135_vm11, %v4894_v41, -1e+30  ;;  %v19600_v41 = vld [vmem:[#allocation111_spill] sm:$0xff] }
 0x94c   : > { %v12405_v6 = vpop.eup %12404  ;;  %v7559_v34 = vunpack.c.l.b16 %v6733_v19  ;;  %v7771_v57 = vpack.c.b16 %v7770_v33, %v7769_v1  ;;  %v5734_v33 = vsub.f32 %v17026_v18, %v5520_v0 }
 0x94d   : > { %v6610_v5 = vmul.f32 %v12405_v6, %v17020_v48  ;;  %6302 = vadd.xlane.f32.xlu0 %v6301_v55  ;;  %6284 = vadd.xlane.f32.xlu2 %v6283_v40  ;;  %v5505_v56 = vpop.xlane.xlu1 %5504  ;;  %v17378_v7 = vpop.eup %12406  ;;  %v17388_v48 = vsel %vm5135_vm11, %v4816_v60, -1e+30  ;;  %v7847_v6 = vunpack.c.l.b16 %v19600_v41  ;;  %v5590_v40 = vsel %vm3474_vm10, %v17384_v2, -inf }
 0x94e   : > { %v7560_v50 = vpack.c.b16 %v7559_v34, %v7558_v24  ;;  %11243 = vmatmul.msk.bf16.vlgmr.msrb.gmra.mxu0 %vm3474_vm10, %v7482_v35  ;;  %v7637_v34 = vunpack.c.l.b16 %v6739_v32  ;;  %v5728_v35 = vsub.f32 %v17033_v37, %v5502_v59  ;;  %v6298_v43 = vsel %vm3474_vm10, %v17378_v7, 0.0  ;;  %v4818_v55 = vpop.f32.mrf.mxu1  ;;  %v4896_v32 = vpop.f32.mrf.mxu0 }
 0x94f   : > { %v6738_v19 = vpack.c.bf16 %v6610_v5, %v6610_v5  ;;  %7705 = vmatpush.bf16.msrb.mxu0 %v7693_v30  ;;  %v5572_v30 = vsel %vm3474_vm10, %v17388_v48, -inf  ;;  %v7849_v61 = vpack.c.b16 %v7848_v9, %v7847_v6  ;;  %v17402_v18 = vsel %vm5135_vm11, %v4818_v55, -1e+30 }
 0x950   : > { %v5523_v26 = vpop.xlane.xlu2 %5522  ;;  %11246 = vmatmul.msk.bf16.vlgmr.msrb.gmra.mxu3 %vm3474_vm10, %v7560_v50  ;;  %v5934_v1 = vmul.f32 1.442695, %v5728_v35  ;;  %v5946_v0 = vmul.f32 1.442695, %v5734_v33  ;;  %v5729_v5 = vsub.f32 %v17045_v3, %v5505_v56  ;;  %v17425_v33 = vsel %vm5135_vm11, %v17370_v38, -1e+30 }
 0x951   : > { %v5541_v16 = vpop.xlane.xlu0 %5540  ;;  %v7636_v24 = vunpack.c.l.b16 %v6738_v19  ;;  %7783 = vmatpush.bf16.msrb.mxu3 %v7771_v57  ;;  %v5735_v50 = vsub.f32 %v17055_v45, %v5523_v26 }
 0x952   : > { %6299 = vadd.xlane.f32.xlu1 %v6298_v43  ;;  %v4974_v59 = vpop.f32.mrf.mxu3  ;;  %12408 = vpow2.f32 %v5934_v1  ;;  %v5741_v3 = vsub.f32 %v17051_v17, %v5541_v16  ;;  %v5936_v56 = vmul.f32 1.442695, %v5729_v5 }
 0x953   : > { %v7638_v60 = vpack.c.b16 %v7637_v34, %v7636_v24  ;;  %v17409_v19 = vsel %vm5135_vm11, %v4974_v59, -1e+30  ;;  %v17413_v34 = vsel %vm5135_vm11, %v4896_v32, -1e+30  ;;  %v5575_v24 = vsel %vm3474_vm10, %v17402_v18, -inf }
 0x954   : > { %12410 = vpow2.f32 %v5946_v0  ;;  %v5948_v45 = vmul.f32 1.442695, %v5735_v50  ;;  %v5611_v26 = vsel %vm3474_vm10, %v17409_v19, -inf  ;;  %v5593_v35 = vsel %vm3474_vm10, %v17413_v34, -inf }
 0x955   : > { %5591 = vmax.xlane.f32.xlu0 %v5590_v40  ;;  %5573 = vmax.xlane.f32.xlu2 %v5572_v30  ;;  %v5538_v37 = vpop.xlane.xlu1 %5537  ;;  %v5960_v41 = vmul.f32 1.442695, %v5741_v3  ;;  %v5608_v30 = vsel %vm3474_vm10, %v17425_v33, -inf }
 0x956   : > { %11249 = vmatmul.msk.bf16.vlgmr.msra.gmra.mxu2 %vm3474_vm10, %v7638_v60  ;;  %v5740_v16 = vsub.f32 %v17069_v42, %v5538_v37 }
 0x957   : > { %7861 = vmatpush.bf16.msra.mxu2 %v7849_v61 }
 0x958   : > { %v5556_v57 = vpop.xlane.xlu2 %5555  ;;  %v17427_v17 = vpop.eup %12408  ;;  %v5958_v61 = vmul.f32 1.442695, %v5740_v16 }
 0x959   : > { %v6198_v9 = vpop.xlane.xlu0 %6197  ;;  %v5746_v38 = vsub.f32 %v17078_v53, %v5556_v57  ;;  %v6268_v42 = vsel %vm3474_vm10, %v17427_v17, 0.0 }
 0x95a   : > { %5576 = vmax.xlane.f32.xlu1 %v5575_v24  ;;  %12412 = vrcp.f32 %v6198_v9  ;;  %v17430_v6 = vpop.eup %12410 }
 0x95b   : > { %12414 = vpow2.f32 %v5936_v56  ;;  %v6286_v37 = vsel %vm3474_vm10, %v17430_v6, 0.0  ;;  %v5970_v5 = vmul.f32 1.442695, %v5746_v38 }
 0x95c   : > { %12416 = vpow2.f32 %v5948_v45 }
 0x95d   : > { %5612 = vmax.xlane.f32.xlu0 %v5611_v26  ;;  %5594 = vmax.xlane.f32.xlu2 %v5593_v35  ;;  %v5559_v43 = vpop.xlane.xlu1 %5558  ;;  %v17450_v26 = vpop.f32.mrf.mxu0 }
 0x95e   : > { %v5747_v57 = vsub.f32 %v17092_v8, %v5559_v43  ;;  %v4920_v35 = vpop.f32.mrf.mxu1 }
 0x960   : > { %v6201_v55 = vpop.xlane.xlu2 %6200  ;;  %v12413_v40 = vpop.eup %12412 }
 0x961   : > { %v6219_v60 = vpop.xlane.xlu0 %6218  ;;  %12418 = vrcp.f32 %v6201_v55  ;;  %v6600_v1 = vmul.f32 %v12413_v40, %v17073_v29  ;;  %v17440_v59 = vpop.eup %12414  ;;  %v19601_v55 = vld [vmem:[#allocation60_spill] sm:$0xff]  ;;  %v5972_v40 = vmul.f32 1.442695, %v5747_v57 }
 0x962   : > { %12420 = vpow2.f32 %v5960_v41  ;;  %5609 = vmax.xlane.f32.xlu1 %v5608_v30  ;;  %v17442_v0 = vpop.eup %12416  ;;  %v6271_v45 = vsel %vm3474_vm10, %v17440_v59, 0.0 }
 0x963   : > { %12422 = vrcp.f32 %v6219_v60  ;;  %v6728_v29 = vpack.c.bf16 %v6600_v1, %v6600_v1  ;;  %v7717_v60 = vunpack.c.l.b16 %v19601_v55  ;;  %v19602_v1 = vld [vmem:[#allocation84_spill] sm:$0xff] }
 0x965   : > { %6269 = vadd.xlane.f32.xlu2 %v6268_v42  ;;  %6287 = vadd.xlane.f32.xlu0 %v6286_v37  ;;  %v6216_v32 = vpop.xlane.xlu1 %6215  ;;  %v7506_v43 = vunpack.c.l.b16 %v6728_v29  ;;  %v7718_v42 = vunpack.c.l.b16 %v19602_v1 }
 0x966   : > { %12424 = vrcp.f32 %v6216_v32  ;;  %v4922_v1 = vpop.f32.mrf.mxu1 }
 0x967   : > { %v12419_v53 = vpop.eup %12418  ;;  %12426 = vpow2.f32 %v5958_v61 }
 0x968   : > { %v17444_v50 = vpop.eup %12420  ;;  %v6601_v9 = vmul.f32 %v12419_v53, %v17088_v58  ;;  %v6234_v24 = vpop.xlane.xlu2 %6233  ;;  %v6289_v58 = vsel %vm3474_vm10, %v17442_v0, 0.0 }
 0x969   : > { %v6252_v3 = vpop.xlane.xlu0 %6251  ;;  %v12423_v56 = vpop.eup %12422  ;;  %12428 = vrcp.f32 %v6234_v24  ;;  %v6307_v38 = vsel %vm3474_vm10, %v17444_v50, 0.0  ;;  %v19603_v24 = vld [vmem:[#allocation120_spill] sm:$0xff] }
 0x96a   : > { %12430 = vpow2.f32 %v5970_v5  ;;  %v6729_v41 = vpack.c.bf16 %v6601_v9, %v6601_v9  ;;  %v6607_v16 = vmul.f32 %v12423_v56, %v17096_v11  ;;  %6272 = vadd.xlane.f32.xlu1 %v6271_v45  ;;  %v7719_v9 = vpack.c.b16 %v7718_v42, %v7717_v60 }
 0x96b   : > { %12432 = vrcp.f32 %v6252_v3  ;;  %v7795_v3 = vunpack.c.l.b16 %v19603_v24  ;;  %v17467_v56 = vsel %vm5135_vm11, %v4920_v35, -1e+30  ;;  %v19605_v24 = vld [vmem:[#allocation90_spill] sm:$0xff] }
 0x96c   : > { %v12425_v8 = vpop.eup %12424  ;;  %v7507_v30 = vunpack.c.l.b16 %v6729_v41  ;;  %v6735_v37 = vpack.c.bf16 %v6607_v16, %v6607_v16 }
 0x96d   : > { %v17458_v61 = vpop.eup %12426  ;;  %v6606_v11 = vmul.f32 %v12425_v8, %v17112_v47  ;;  %6290 = vadd.xlane.f32.xlu2 %v6289_v58  ;;  %6308 = vadd.xlane.f32.xlu0 %v6307_v38  ;;  %v6237_v32 = vpop.xlane.xlu1 %6236  ;;  %v19604_v8 = vld [vmem:[#allocation92_spill] sm:$0xff]  ;;  %v5596_v38 = vsel %vm3474_vm10, %v17467_v56, -inf }
 0x96e   : > { %v7508_v5 = vpack.c.b16 %v7507_v30, %v7506_v43  ;;  %12434 = vrcp.f32 %v6237_v32  ;;  %v6304_v41 = vsel %vm3474_vm10, %v17458_v61, 0.0  ;;  %v7585_v55 = vunpack.c.l.b16 %v6735_v37 }
 0x96f   : > { %v12429_v53 = vpop.eup %12428  ;;  %v6734_v29 = vpack.c.bf16 %v6606_v11, %v6606_v11  ;;  %12436 = vpow2.f32 %v5972_v40  ;;  %v7796_v43 = vunpack.c.l.b16 %v19604_v8  ;;  %v5000_v40 = vpop.f32.mrf.mxu0 }
 0x970   : > { %v17462_v57 = vpop.eup %12430  ;;  %v6255_v45 = vpop.xlane.xlu2 %6254  ;;  %11244 = vmatmul.msk.bf16.vlgmr.msra.gmra.mxu1 %vm3474_vm10, %v7508_v5  ;;  %v6612_v58 = vmul.f32 %v12429_v53, %v17115_v28 }
 0x971   : > { %v5529_v47 = vpop.xlane.xlu0 %5528  ;;  %v12433_v16 = vpop.eup %12432  ;;  %v7584_v60 = vunpack.c.l.b16 %v6734_v29  ;;  %12438 = vrcp.f32 %v6255_v45  ;;  %7731 = vmatpush.bf16.msra.mxu1 %v7719_v9  ;;  %v6322_v37 = vsel %vm3474_vm10, %v17462_v57, 0.0  ;;  %v7797_v11 = vpack.c.b16 %v7796_v43, %v7795_v3 }
 0x972   : > { %6305 = vadd.xlane.f32.xlu1 %v6304_v41  ;;  %v6618_v42 = vmul.f32 %v12433_v16, %v17117_v22  ;;  %v6740_v32 = vpack.c.bf16 %v6612_v58, %v6612_v58  ;;  %v7873_v45 = vunpack.c.l.b16 %v19605_v24  ;;  %v17487_v22 = vsel %vm5135_vm11, %v5000_v40, -1e+30  ;;  %v19606_v40 = vld [vmem:[#allocation97_spill] sm:$0xff] }
 0x973   : > { %v7586_v35 = vpack.c.b16 %v7585_v55, %v7584_v60  ;;  %v17491_v3 = vsel %vm5135_vm11, %v4922_v1, -1e+30 }
 0x974   : > { %v12435_v30 = vpop.eup %12434  ;;  %v6746_v41 = vpack.c.bf16 %v6618_v42, %v6618_v42  ;;  %v7662_v8 = vunpack.c.l.b16 %v6740_v32  ;;  %v19607_v42 = vld [vmem:[#allocation116_spill] sm:$0xff] }
 0x975   : > { %v6613_v28 = vmul.f32 %v12435_v30, %v17133_v12  ;;  %6323 = vadd.xlane.f32.xlu2 %v6322_v37  ;;  %5597 = vmax.xlane.f32.xlu0 %v5596_v38  ;;  %v5526_v5 = vpop.xlane.xlu1 %5525  ;;  %v17480_v53 = vpop.eup %12436  ;;  %v7874_v38 = vunpack.c.l.b16 %v19606_v40  ;;  %v7951_v37 = vunpack.c.l.b16 %v19607_v42 }
 0x976   : > { %v5736_v9 = vsub.f32 %v17158_v49, %v5526_v5  ;;  %11247 = vmatmul.msk.bf16.vlgmr.msra.gmra.mxu0 %vm3474_vm10, %v7586_v35  ;;  %v5737_v49 = vsub.f32 %v17145_v52, %v5529_v47  ;;  %v6325_v30 = vsel %vm3474_vm10, %v17480_v53, 0.0  ;;  %v5617_v52 = vsel %vm3474_vm10, %v17487_v22, -inf  ;;  %v19608_v5 = vld [vmem:[#allocation82_spill] sm:$0xff] }
 0x977   : > { %v12439_v29 = vpop.eup %12438  ;;  %v6741_v12 = vpack.c.bf16 %v6613_v28, %v6613_v28  ;;  %7809 = vmatpush.bf16.msra.mxu0 %v7797_v11  ;;  %v7740_v47 = vunpack.c.l.b16 %v6746_v41 }
 0x978   : > { %v6619_v16 = vmul.f32 %v12439_v29, %v17141_v62  ;;  %v5950_v55 = vmul.f32 1.442695, %v5736_v9  ;;  %v5544_v60 = vpop.xlane.xlu2 %5543  ;;  %v5952_v28 = vmul.f32 1.442695, %v5737_v49  ;;  %v7952_v9 = vunpack.c.l.b16 %v19608_v5 }
 0x979   : > { %v5562_v58 = vpop.xlane.xlu0 %5561  ;;  %v7663_v43 = vunpack.c.l.b16 %v6741_v12  ;;  %v5742_v35 = vsub.f32 %v17171_v51, %v5544_v60  ;;  %v5599_v51 = vsel %vm3474_vm10, %v17491_v3, -inf  ;;  %v7875_v29 = vpack.c.b16 %v7874_v38, %v7873_v45 }
 0x97a   : > { %v6747_v1 = vpack.c.bf16 %v6619_v16, %v6619_v16  ;;  %12440 = vpow2.f32 %v5950_v55  ;;  %6326 = vadd.xlane.f32.xlu1 %v6325_v30  ;;  %v17508_v12 = vsel %vm5135_vm11, %v17450_v26, -1e+30  ;;  %v7953_v49 = vpack.c.b16 %v7952_v9, %v7951_v37  ;;  %v19610_v37 = vld [vmem:[#allocation70_spill] sm:$0xff]  ;;  %v5024_v9 = vpop.f32.mrf.mxu1 }
 0x97b   : > { %v7664_v62 = vpack.c.b16 %v7663_v43, %v7662_v8  ;;  %v5962_v11 = vmul.f32 1.442695, %v5742_v35  ;;  %v5748_v45 = vsub.f32 %v17167_v31, %v5562_v58  ;;  %v5614_v26 = vsel %vm3474_vm10, %v17508_v12, -inf  ;;  %v19609_v35 = vld [vmem:[#allocation139_spill] sm:$0xff] }
 0x97c   : > { %v7741_v32 = vunpack.c.l.b16 %v6747_v1 }
 0x97d   : > { %12442 = vpow2.f32 %v5962_v11  ;;  %5600 = vmax.xlane.f32.xlu2 %v5599_v51  ;;  %5618 = vmax.xlane.f32.xlu0 %v5617_v52  ;;  %v5547_v24 = vpop.xlane.xlu1 %5546  ;;  %v5974_v31 = vmul.f32 1.442695, %v5748_v45  ;;  %v19611_v11 = vld [vmem:[#allocation141_spill] sm:$0xff] }
 0x97e   : > { %v7742_v16 = vpack.c.b16 %v7741_v32, %v7740_v47  ;;  %v5743_v41 = vsub.f32 %v17182_v39, %v5547_v24  ;;  %11250 = vmatmul.msk.bf16.vlgmr.msra.gmra.mxu3 %vm3474_vm10, %v7664_v62  ;;  %12444 = vpow2.f32 %v5952_v28 }
 0x97f   : > { %7887 = vmatpush.bf16.msra.mxu3 %v7875_v29 }
 0x980   : > { %v17512_v55 = vpop.eup %12440  ;;  %v5964_v60 = vmul.f32 1.442695, %v5743_v41  ;;  %v5565_v8 = vpop.xlane.xlu2 %5564  ;;  %11253 = vmatmul.msk.bf16.vlgmr.msrb.gmra.mxu2 %vm3474_vm10, %v7742_v16 }
 0x981   : > { %v5583_v43 = vpop.xlane.xlu0 %5582  ;;  %v5749_v30 = vsub.f32 %v19609_v35, %v5565_v8  ;;  %7965 = vmatpush.bf16.msrb.mxu2 %v7953_v49  ;;  %v6292_v39 = vsel %vm3474_vm10, %v17512_v55, 0.0 }
 0x982   : > { %12446 = vpow2.f32 %v5964_v60  ;;  %5615 = vmax.xlane.f32.xlu1 %v5614_v26  ;;  %v5755_v52 = vsub.f32 %v19611_v11, %v5583_v43  ;;  %v19614_v43 = vld [vmem:[#allocation69_spill] sm:$0xff] }
 0x983   : > { %v17521_v40 = vpop.eup %12442  ;;  %v5976_v38 = vmul.f32 1.442695, %v5749_v30 }
 0x984   : > { %v6310_v58 = vsel %vm3474_vm10, %v17521_v40, 0.0  ;;  %v17525_v42 = vpop.eup %12444  ;;  %v5988_v16 = vmul.f32 1.442695, %v5755_v52  ;;  %v19616_v52 = vld [vmem:[#allocation165_spill] sm:$0xff] }
 0x985   : > { %12448 = vpow2.f32 %v5976_v38  ;;  %6293 = vadd.xlane.f32.xlu2 %v6292_v39  ;;  %6311 = vadd.xlane.f32.xlu0 %v6310_v58  ;;  %v5580_v1 = vpop.xlane.xlu1 %5579  ;;  %v6295_v5 = vsel %vm3474_vm10, %v17525_v42, 0.0  ;;  %v17546_v38 = vsel %vm5135_vm11, %v5024_v9, -1e+30 }
 0x986   : > { %v5754_v62 = vsub.f32 %v19610_v37, %v5580_v1  ;;  %12450 = vpow2.f32 %v5974_v31  ;;  %19615 = vst [vmem:[#allocation63_spill] sm:$0xff] %v17546_v38  ;;  %v5620_v37 = vsel %vm3474_vm10, %v17546_v38, -inf }
 0x988   : > { %v17529_v47 = vpop.eup %12446  ;;  %v5986_v32 = vmul.f32 1.442695, %v5754_v62  ;;  %v6222_v28 = vpop.xlane.xlu2 %6221 }
 0x989   : > { %v6240_v51 = vpop.xlane.xlu0 %6239  ;;  %12452 = vrcp.f32 %v6222_v28  ;;  %v6313_v29 = vsel %vm3474_vm10, %v17529_v47, 0.0  ;;  %v5026_v62 = vpop.f32.mrf.mxu1 }
 0x98a   : > { %12454 = vpow2.f32 %v5986_v32  ;;  %6296 = vadd.xlane.f32.xlu1 %v6295_v5 }
 0x98b   : > { %v17535_v24 = vpop.eup %12448  ;;  %12456 = vrcp.f32 %v6240_v51  ;;  %v19618_v51 = vld [vmem:[#allocation113_spill] sm:$0xff] }
 0x98c   : > { %v6331_v41 = vsel %vm3474_vm10, %v17535_v24, 0.0  ;;  %v17539_v45 = vpop.eup %12450 }
 0x98d   : > { %6314 = vadd.xlane.f32.xlu2 %v6313_v29  ;;  %6332 = vadd.xlane.f32.xlu0 %v6331_v41  ;;  %v6225_v49 = vpop.xlane.xlu1 %6224  ;;  %19612 = vst [vmem:[#allocation170_spill] sm:$0xff] %v17539_v45  ;;  %v6328_v31 = vsel %vm3474_vm10, %v17539_v45, 0.0 }
 0x98e   : > { %12458 = vrcp.f32 %v6225_v49  ;;  %v19620_v49 = vld [vmem:[#allocation136_spill] sm:$0xff] }
 0x98f   : > { %v12453_v60 = vpop.eup %12452  ;;  %12460 = vpow2.f32 %v5988_v16  ;;  %v19619_v16 = vld [vmem:[#allocation105_spill] sm:$0xff] }
 0x990   : > { %v17541_v8 = vpop.eup %12454  ;;  %v6608_v26 = vmul.f32 %v12453_v60, %v19614_v43  ;;  %v6243_v35 = vpop.xlane.xlu2 %6242  ;;  %v7821_v41 = vunpack.c.l.b16 %v19619_v16  ;;  %v7822_v60 = vunpack.c.l.b16 %v19620_v49  ;;  %v17562_v43 = vsel %vm5135_vm11, %v5026_v62, -1e+30 }
 0x991   : > { %19613 = vst [vmem:[#allocation93_spill] sm:$0xff] %v17541_v8  ;;  %v6261_v30 = vpop.xlane.xlu0 %6260  ;;  %v12457_v39 = vpop.eup %12456  ;;  %12462 = vrcp.f32 %v6243_v35  ;;  %v6346_v58 = vsel %vm3474_vm10, %v17541_v8, 0.0 }
 0x992   : > { %12464 = vrcp.f32 %v6261_v30  ;;  %6329 = vadd.xlane.f32.xlu1 %v6328_v31  ;;  %v6736_v11 = vpack.c.bf16 %v6608_v26, %v6608_v26  ;;  %v6614_v32 = vmul.f32 %v12457_v39, %v19616_v52  ;;  %v7823_v62 = vpack.c.b16 %v7822_v60, %v7821_v41 }
 0x994   : > { %v12459_v1 = vpop.eup %12458  ;;  %v7610_v30 = vunpack.c.l.b16 %v6736_v11  ;;  %v6742_v39 = vpack.c.bf16 %v6614_v32, %v6614_v32 }
 0x995   : > { %v17555_v28 = vpop.eup %12460  ;;  %v6609_v5 = vmul.f32 %v12459_v1, %v19618_v51  ;;  %6347 = vadd.xlane.f32.xlu2 %v6346_v58  ;;  %5621 = vmax.xlane.f32.xlu0 %v5620_v37  ;;  %v6258_v9 = vpop.xlane.xlu1 %6257 }
 0x996   : > { %19617 = vst [vmem:[#allocation79_spill] sm:$0xff] %v17555_v28  ;;  %12466 = vrcp.f32 %v6258_v9  ;;  %v6349_v37 = vsel %vm3474_vm10, %v17555_v28, 0.0  ;;  %v5623_v28 = vsel %vm3474_vm10, %v17562_v43, -inf }
 0x997   : > { %v12463_v29 = vpop.eup %12462  ;;  %v6737_v26 = vpack.c.bf16 %v6609_v5, %v6609_v5  ;;  %v19621_v5 = vld [vmem:[#allocation99_spill] sm:$0xff] }
 0x998   : > { %v12465_v35 = vpop.eup %12464  ;;  %v6615_v31 = vmul.f32 %v12463_v29, %v17224_v21  ;;  %v6276_v1 = vpop.xlane.xlu2 %6275  ;;  %v7900_v49 = vunpack.c.l.b16 %v19621_v5  ;;  %v7688_v21 = vunpack.c.l.b16 %v6742_v39  ;;  %v19623_v39 = vld [vmem:[#allocation103_spill] sm:$0xff] }
 0x999   : > { %v5550_v58 = vpop.xlane.xlu0 %5549  ;;  %v7611_v52 = vunpack.c.l.b16 %v6737_v26  ;;  %v6621_v51 = vmul.f32 %v12465_v35, %v17234_v44  ;;  %12468 = vrcp.f32 %v6276_v1  ;;  %v19622_v26 = vld [vmem:[#allocation77_spill] sm:$0xff] }
 0x99a   : > { %v5744_v9 = vsub.f32 %v17253_v27, %v5550_v58  ;;  %v6743_v16 = vpack.c.bf16 %v6615_v31, %v6615_v31  ;;  %6350 = vadd.xlane.f32.xlu1 %v6349_v37  ;;  %v7899_v38 = vunpack.c.l.b16 %v19622_v26  ;;  %v7978_v31 = vunpack.c.l.b16 %v19623_v39  ;;  %v19626_v39 = vld [vmem:[#allocation130_spill] sm:$0xff] }
 0x99b   : > { %v7612_v11 = vpack.c.b16 %v7611_v52, %v7610_v30  ;;  %v6749_v45 = vpack.c.bf16 %v6621_v51, %v6621_v51  ;;  %v19624_v51 = vld [vmem:[#allocation81_spill] sm:$0xff] }
 0x99c   : > { %v5966_v32 = vmul.f32 1.442695, %v5744_v9  ;;  %v12467_v8 = vpop.eup %12466  ;;  %v7689_v29 = vunpack.c.l.b16 %v6743_v16  ;;  %v7901_v35 = vpack.c.b16 %v7900_v49, %v7899_v38  ;;  %v7977_v9 = vunpack.c.l.b16 %v19624_v51 }
 0x99d   : > { %v6620_v44 = vmul.f32 %v12467_v8, %v17247_v14  ;;  %5624 = vmax.xlane.f32.xlu2 %v5623_v28  ;;  %v6279_v27 = vpop.xlane.xlu1 %6278  ;;  %11248 = vmatmul.msk.bf16.vlgmr.msrb.gmra.mxu1 %vm3474_vm10, %v7612_v11  ;;  %v7767_v1 = vunpack.c.l.b16 %v6749_v45 }
 0x99e   : > { %12470 = vpow2.f32 %v5966_v32  ;;  %v7690_v41 = vpack.c.b16 %v7689_v29, %v7688_v21  ;;  %7835 = vmatpush.bf16.msrb.mxu1 %v7823_v62  ;;  %v7979_v49 = vpack.c.b16 %v7978_v31, %v7977_v9  ;;  %v19625_v29 = vld [vmem:[#allocation134_spill] sm:$0xff]  ;;  %v8055_v31 = vunpack.c.l.b16 %v19626_v39 }
 0x99f   : > { %12472 = vrcp.f32 %v6279_v27  ;;  %v12469_v60 = vpop.eup %12468  ;;  %v6748_v30 = vpack.c.bf16 %v6620_v44, %v6620_v44  ;;  %v8056_v26 = vunpack.c.l.b16 %v19625_v29 }
 0x9a0   : > { %v5553_v58 = vpop.xlane.xlu2 %5552  ;;  %11251 = vmatmul.msk.bf16.vlgmr.msrb.gmra.mxu0 %vm3474_vm10, %v7690_v41  ;;  %v6626_v14 = vmul.f32 %v12469_v60, %v17258_v15 }
 0x9a1   : > { %v5571_v37 = vpop.xlane.xlu0 %5570  ;;  %v7766_v52 = vunpack.c.l.b16 %v6748_v30  ;;  %v5745_v8 = vsub.f32 %v17281_v10, %v5553_v58  ;;  %7913 = vmatpush.bf16.msrb.mxu0 %v7901_v35 }
 0x9a2   : > { %v5751_v28 = vsub.f32 %v17275_v23, %v5571_v37  ;;  %v6754_v32 = vpack.c.bf16 %v6626_v14, %v6626_v14  ;;  %v8057_v14 = vpack.c.b16 %v8056_v26, %v8055_v31 }
 0x9a3   : > { %v7768_v38 = vpack.c.b16 %v7767_v1, %v7766_v52  ;;  %v5968_v62 = vmul.f32 1.442695, %v5745_v8 }
 0x9a4   : > { %v17581_v16 = vpop.eup %12470  ;;  %v5980_v5 = vmul.f32 1.442695, %v5751_v28  ;;  %v7844_v60 = vunpack.c.l.b16 %v6754_v32  ;;  %v5050_v28 = vpop.f32.mrf.mxu2 }
 0x9a5   : > { %v12473_v45 = vpop.eup %12472  ;;  %v6316_v11 = vsel %vm3474_vm10, %v17581_v16, 0.0  ;;  %12474 = vpow2.f32 %v5968_v62  ;;  %v5568_v10 = vpop.xlane.xlu1 %5567  ;;  %11254 = vmatmul.msk.bf16.vlgmr.msrb.gmra.mxu3 %vm3474_vm10, %v7768_v38 }
 0x9a6   : > { %v6627_v15 = vmul.f32 %v12473_v45, %v17269_v20  ;;  %6317 = vadd.xlane.f32.xlu1 %v6316_v11  ;;  %12476 = vpow2.f32 %v5980_v5  ;;  %v5750_v23 = vsub.f32 %v17294_v54, %v5568_v10  ;;  %7991 = vmatpush.bf16.msrb.mxu3 %v7979_v49 }
 0x9a8   : > { %v6755_v21 = vpack.c.bf16 %v6627_v15, %v6627_v15  ;;  %v5978_v44 = vmul.f32 1.442695, %v5750_v23  ;;  %v5586_v27 = vpop.xlane.xlu2 %5585 }
 0x9a9   : > { %v5604_v41 = vpop.xlane.xlu0 %5603  ;;  %v5756_v30 = vsub.f32 %v17306_v4, %v5586_v27  ;;  %v19627_v27 = vld [vmem:[#allocation114_spill] sm:$0xff] }
 0x9aa   : > { %v7845_v35 = vunpack.c.l.b16 %v6755_v21  ;;  %v5762_v20 = vsub.f32 %v17302_v13, %v5604_v41  ;;  %12478 = vpow2.f32 %v5978_v44 }
 0x9ab   : > { %v17592_v1 = vpop.eup %12474  ;;  %v5990_v54 = vmul.f32 1.442695, %v5756_v30 }
 0x9ac   : > { %v7846_v58 = vpack.c.b16 %v7845_v35, %v7844_v60  ;;  %v6002_v37 = vmul.f32 1.442695, %v5762_v20  ;;  %v17594_v52 = vpop.eup %12476  ;;  %v6319_v8 = vsel %vm3474_vm10, %v17592_v1, 0.0  ;;  %v5052_v21 = vpop.f32.mrf.mxu2 }
 0x9ad   : > { %12480 = vpow2.f32 %v5990_v54  ;;  %6320 = vadd.xlane.f32.xlu0 %v6319_v8  ;;  %v6337_v13 = vsel %vm3474_vm10, %v17594_v52, 0.0  ;;  %v5589_v4 = vpop.xlane.xlu1 %5588  ;;  %v17622_v35 = vsel %vm5135_vm11, %v5052_v21, -1e+30  ;;  %v17633_v8 = vsel %vm5135_vm11, %v5050_v28, -1e+30 }
 0x9ae   : > { %11257 = vmatmul.msk.bf16.vlgmr.msra.gmra.mxu2 %vm3474_vm10, %v7846_v58  ;;  %12482 = vpow2.f32 %v6002_v37  ;;  %6338 = vadd.xlane.f32.xlu1 %v6337_v13  ;;  %v5757_v51 = vsub.f32 %v17317_v36, %v5589_v4  ;;  %v19628_v58 = vld [vmem:[#allocation167_spill] sm:$0xff]  ;;  %v5629_v37 = vsel %vm3474_vm10, %v17622_v35, -inf }
 0x9af   : > { %8069 = vmatpush.bf16.msra.mxu2 %v8057_v14 }
 0x9b0   : > { %v17602_v9 = vpop.eup %12478  ;;  %v5992_v38 = vmul.f32 1.442695, %v5757_v51  ;;  %v5607_v62 = vpop.xlane.xlu2 %5606  ;;  %v19629_v51 = vld [vmem:[#allocation142_spill] sm:$0xff] }
 0x9b1   : > { %v6249_v5 = vpop.xlane.xlu0 %6248  ;;  %v5763_v45 = vsub.f32 %v17326_v46, %v5607_v62  ;;  %v6334_v49 = vsel %vm3474_vm10, %v17602_v9, 0.0  ;;  %v19630_v62 = vld [vmem:[#allocation166_spill] sm:$0xff] }
 0x9b2   : > { %12484 = vrcp.f32 %v6249_v5  ;;  %6335 = vadd.xlane.f32.xlu2 %v6334_v49 }
 0x9b3   : > { %12486 = vpow2.f32 %v5992_v38  ;;  %v17607_v11 = vpop.eup %12480  ;;  %v6004_v32 = vmul.f32 1.442695, %v5763_v45  ;;  %v7926_v38 = vunpack.c.l.b16 %v19629_v51 }
 0x9b4   : > { %v17609_v15 = vpop.eup %12482  ;;  %v6352_v36 = vsel %vm3474_vm10, %v17607_v11, 0.0 }
 0x9b5   : > { %12488 = vpow2.f32 %v6004_v32  ;;  %6353 = vadd.xlane.f32.xlu0 %v6352_v36  ;;  %v6370_v10 = vsel %vm3474_vm10, %v17609_v15, 0.0  ;;  %v6246_v46 = vpop.xlane.xlu1 %6245  ;;  %v5626_v36 = vsel %vm3474_vm10, %v17633_v8, -inf }
 0x9b6   : > { %6371 = vadd.xlane.f32.xlu1 %v6370_v10  ;;  %12490 = vrcp.f32 %v6246_v46 }
 0x9b8   : > { %v12485_v23 = vpop.eup %12484  ;;  %v6264_v26 = vpop.xlane.xlu2 %6263 }
 0x9b9   : > { %v17615_v29 = vpop.eup %12486  ;;  %v6282_v44 = vpop.xlane.xlu0 %6281  ;;  %v6617_v41 = vmul.f32 %v12485_v23, %v19627_v27  ;;  %12492 = vrcp.f32 %v6264_v26  ;;  %v19631_v23 = vld [vmem:[#allocation129_spill] sm:$0xff] }
 0x9ba   : > { %v6355_v60 = vsel %vm3474_vm10, %v17615_v29, 0.0  ;;  %12494 = vrcp.f32 %v6282_v44  ;;  %v7925_v28 = vunpack.c.l.b16 %v19631_v23  ;;  %v19637_v23 = vld [vmem:[#allocation89_spill] sm:$0xff] }
 0x9bb   : > { %6356 = vadd.xlane.f32.xlu2 %v6355_v60  ;;  %v17624_v30 = vpop.eup %12488  ;;  %v6745_v31 = vpack.c.bf16 %v6617_v41, %v6617_v41  ;;  %v19632_v41 = vld [vmem:[#allocation106_spill] sm:$0xff] }
 0x9bc   : > { %v12491_v20 = vpop.eup %12490  ;;  %v6373_v39 = vsel %vm3474_vm10, %v17624_v30, 0.0  ;;  %v7927_v44 = vpack.c.b16 %v7926_v38, %v7925_v28  ;;  %v8003_v28 = vunpack.c.l.b16 %v19637_v23 }
 0x9bd   : > { %v6616_v54 = vmul.f32 %v12491_v20, %v19628_v58  ;;  %6374 = vadd.xlane.f32.xlu0 %v6373_v39  ;;  %v6267_v14 = vpop.xlane.xlu1 %6266  ;;  %v7715_v10 = vunpack.c.l.b16 %v6745_v31  ;;  %v19633_v20 = vld [vmem:[#allocation168_spill] sm:$0xff] }
 0x9be   : > { %5630 = vmax.xlane.f32.xlu1 %v5629_v37  ;;  %12496 = vrcp.f32 %v6267_v14 }
 0x9bf   : > { %v12493_v13 = vpop.eup %12492  ;;  %v6744_v4 = vpack.c.bf16 %v6616_v54, %v6616_v54  ;;  %v17643_v54 = vpop.f32.mrf.mxu2 }
 0x9c0   : > { %v6622_v5 = vmul.f32 %v12493_v13, %v19630_v62  ;;  %v6285_v45 = vpop.xlane.xlu2 %6284  ;;  %v12495_v32 = vpop.eup %12494  ;;  %19634 = vst [vmem:[#allocation171_spill] sm:$0xff] %v17643_v54  ;;  %v19635_v13 = vld [vmem:[#allocation146_spill] sm:$0xff]  ;;  %v19693_v54 = vld [vmem:[#allocation161_spill] sm:$0xff] }
 0x9c1   : > { %v6303_v49 = vpop.xlane.xlu0 %6302  ;;  %v7714_v46 = vunpack.c.l.b16 %v6744_v4  ;;  %12498 = vrcp.f32 %v6285_v45  ;;  %v6628_v60 = vmul.f32 %v12495_v32, %v19632_v41  ;;  %v8004_v4 = vunpack.c.l.b16 %v19635_v13  ;;  %v19636_v32 = vld [vmem:[#allocation169_spill] sm:$0xff] }
 0x9c2   : > { %12500 = vrcp.f32 %v6303_v49  ;;  %v6750_v27 = vpack.c.bf16 %v6622_v5, %v6622_v5 }
 0x9c3   : > { %5627 = vmax.xlane.f32.xlu2 %v5626_v36  ;;  %v7716_v21 = vpack.c.b16 %v7715_v10, %v7714_v46  ;;  %v6756_v62 = vpack.c.bf16 %v6628_v60, %v6628_v60 }
 0x9c4   : > { %v12497_v26 = vpop.eup %12496  ;;  %v7792_v51 = vunpack.c.l.b16 %v6750_v27 }
 0x9c5   : > { %v6623_v39 = vmul.f32 %v12497_v26, %v19633_v20  ;;  %v6300_v58 = vpop.xlane.xlu1 %6299  ;;  %11252 = vmatmul.msk.bf16.vlgmr.msra.gmra.mxu1 %vm3474_vm10, %v7716_v21  ;;  %v19638_v26 = vld [vmem:[#allocation128_spill] sm:$0xff] }
 0x9c6   : > { %12502 = vrcp.f32 %v6300_v58  ;;  %7939 = vmatpush.bf16.msra.mxu1 %v7927_v44  ;;  %v8082_v44 = vunpack.c.l.b16 %v19638_v26 }
 0x9c7   : > { %v12499_v31 = vpop.eup %12498  ;;  %v6751_v37 = vpack.c.bf16 %v6623_v39, %v6623_v39  ;;  %v8005_v39 = vpack.c.b16 %v8004_v4, %v8003_v28 }
 0x9c8   : > { %v12501_v14 = vpop.eup %12500  ;;  %v6629_v38 = vmul.f32 %v12499_v31, %v17358_v63  ;;  %v5574_v5 = vpop.xlane.xlu2 %5573  ;;  %v7870_v63 = vunpack.c.l.b16 %v6756_v62  ;;  %v19639_v31 = vld [vmem:[#allocation140_spill] sm:$0xff] }
 0x9c9   : > { %v5592_v45 = vpop.xlane.xlu0 %5591  ;;  %v7793_v49 = vunpack.c.l.b16 %v6751_v37  ;;  %v6635_v36 = vmul.f32 %v12501_v14, %v19636_v32  ;;  %v5752_v10 = vsub.f32 %v17388_v48, %v5574_v5  ;;  %v8081_v37 = vunpack.c.l.b16 %v19639_v31 }
 0x9ca   : > { %v5758_v46 = vsub.f32 %v17384_v2, %v5592_v45  ;;  %v6757_v21 = vpack.c.bf16 %v6629_v38, %v6629_v38  ;;  %v19640_v45 = vld [vmem:[#allocation143_spill] sm:$0xff] }
 0x9cb   : > { %v7794_v41 = vpack.c.b16 %v7793_v49, %v7792_v51  ;;  %v5982_v20 = vmul.f32 1.442695, %v5752_v10  ;;  %v6763_v13 = vpack.c.bf16 %v6635_v36, %v6635_v36  ;;  %v8083_v51 = vpack.c.b16 %v8082_v44, %v8081_v37  ;;  %v17658_v36 = vpop.f32.mrf.mxu2 }
 0x9cc   : > { %v5994_v27 = vmul.f32 1.442695, %v5758_v46  ;;  %v12503_v60 = vpop.eup %12502  ;;  %v7871_v58 = vunpack.c.l.b16 %v6757_v21  ;;  %v8160_v4 = vunpack.c.l.b16 %v19640_v45  ;;  %19641 = vst [vmem:[#allocation132_spill] sm:$0xff] %v17658_v36  ;;  %v8419_v36 = vunpack.c.l.b16 %v19693_v54 }
 0x9cd   : > { %v6634_v14 = vmul.f32 %v12503_v60, %v17378_v7  ;;  %12504 = vpow2.f32 %v5982_v20  ;;  %v5577_v48 = vpop.xlane.xlu1 %5576  ;;  %11255 = vmatmul.msk.bf16.vlgmr.msra.gmra.mxu0 %vm3474_vm10, %v7794_v41  ;;  %v7949_v7 = vunpack.c.l.b16 %v6763_v13 }
 0x9ce   : > { %v7872_v2 = vpack.c.b16 %v7871_v58, %v7870_v63  ;;  %12506 = vpow2.f32 %v5994_v27  ;;  %v5753_v38 = vsub.f32 %v17402_v18, %v5577_v48  ;;  %8017 = vmatpush.bf16.msra.mxu0 %v8005_v39  ;;  %v19642_v18 = vld [vmem:[#allocation53_spill] sm:$0xff]  ;;  %v5076_v63 = vpop.f32.mrf.mxu3 }
 0x9cf   : > { %v6762_v5 = vpack.c.bf16 %v6634_v14, %v6634_v14  ;;  %v8159_v28 = vunpack.c.l.b16 %v19642_v18 }
 0x9d0   : > { %v5984_v62 = vmul.f32 1.442695, %v5753_v38  ;;  %v5595_v49 = vpop.xlane.xlu2 %5594  ;;  %11258 = vmatmul.msk.bf16.vlgmr.msra.gmra.mxu3 %vm3474_vm10, %v7872_v2 }
 0x9d1   : > { %v5613_v32 = vpop.xlane.xlu0 %5612  ;;  %v7948_v10 = vunpack.c.l.b16 %v6762_v5  ;;  %v5759_v46 = vsub.f32 %v17413_v34, %v5595_v49  ;;  %8095 = vmatpush.bf16.msra.mxu3 %v8083_v51  ;;  %v8161_v27 = vpack.c.b16 %v8160_v4, %v8159_v28 }
 0x9d2   : > { %v5765_v23 = vsub.f32 %v17409_v19, %v5613_v32  ;;  %12508 = vpow2.f32 %v5984_v62 }
 0x9d3   : > { %v17663_v21 = vpop.eup %12504  ;;  %v7950_v26 = vpack.c.b16 %v7949_v7, %v7948_v10  ;;  %v5996_v44 = vmul.f32 1.442695, %v5759_v46  ;;  %v17675_v14 = vpop.f32.mrf.mxu2  ;;  %v17692_v10 = vsel %vm5135_vm11, %v5076_v63, -1e+30 }
 0x9d4   : > { %v6008_v41 = vmul.f32 1.442695, %v5765_v23  ;;  %v17665_v20 = vpop.eup %12506  ;;  %v6340_v60 = vsel %vm3474_vm10, %v17663_v21, 0.0  ;;  %19643 = vst [vmem:[#allocation172_spill] sm:$0xff] %v17675_v14 }
 0x9d5   : > { %12510 = vpow2.f32 %v5996_v44  ;;  %6341 = vadd.xlane.f32.xlu0 %v6340_v60  ;;  %v6358_v34 = vsel %vm3474_vm10, %v17665_v20, 0.0  ;;  %v5610_v19 = vpop.xlane.xlu1 %5609  ;;  %11261 = vmatmul.msk.bf16.vlgmr.msrb.gmra.mxu2 %vm3474_vm10, %v7950_v26 }
 0x9d6   : > { %12512 = vpow2.f32 %v6008_v41  ;;  %6359 = vadd.xlane.f32.xlu1 %v6358_v34  ;;  %v5764_v39 = vsub.f32 %v17425_v33, %v5610_v19  ;;  %8173 = vmatpush.bf16.msrb.mxu2 %v8161_v27  ;;  %v5078_v23 = vpop.f32.mrf.mxu3  ;;  %v19645_v19 = vld [vmem:[#allocation112_spill] sm:$0xff] }
 0x9d7   : > { %v17703_v41 = vsel %vm5135_vm11, %v5078_v23, -1e+30 }
 0x9d8   : > { %v17673_v58 = vpop.eup %12508  ;;  %v6006_v31 = vmul.f32 1.442695, %v5764_v39  ;;  %v6270_v37 = vpop.xlane.xlu2 %6269  ;;  %v8029_v39 = vunpack.c.l.b16 %v19645_v19 }
 0x9d9   : > { %v6288_v13 = vpop.xlane.xlu0 %6287  ;;  %12514 = vrcp.f32 %v6270_v37  ;;  %v6343_v48 = vsel %vm3474_vm10, %v17673_v58, 0.0 }
 0x9da   : > { %12516 = vpow2.f32 %v6006_v31  ;;  %6344 = vadd.xlane.f32.xlu2 %v6343_v48 }
 0x9db   : > { %v17679_v2 = vpop.eup %12510  ;;  %12518 = vrcp.f32 %v6288_v13  ;;  %v17696_v18 = vpop.f32.mrf.mxu2 }
 0x9dc   : > { %v17681_v38 = vpop.eup %12512  ;;  %v6361_v33 = vsel %vm3474_vm10, %v17679_v2, 0.0  ;;  %19644 = vst [vmem:[#allocation121_spill] sm:$0xff] %v17696_v18 }
 0x9dd   : > { %6362 = vadd.xlane.f32.xlu0 %v6361_v33  ;;  %v6379_v51 = vsel %vm3474_vm10, %v17681_v38, 0.0  ;;  %v6273_v5 = vpop.xlane.xlu1 %6272 }
 0x9de   : > { %6380 = vadd.xlane.f32.xlu1 %v6379_v51  ;;  %12520 = vrcp.f32 %v6273_v5  ;;  %v5635_v51 = vsel %vm3474_vm10, %v17703_v41, -inf }
 0x9df   : > { %v12515_v45 = vpop.eup %12514 }
 0x9e0   : > { %v17687_v4 = vpop.eup %12516  ;;  %v6624_v62 = vmul.f32 %v12515_v45, %v17427_v17  ;;  %v6291_v49 = vpop.xlane.xlu2 %6290  ;;  %v5632_v17 = vsel %vm3474_vm10, %v17692_v10, -inf }
 0x9e1   : > { %v6309_v32 = vpop.xlane.xlu0 %6308  ;;  %v12519_v7 = vpop.eup %12518  ;;  %12522 = vrcp.f32 %v6291_v49  ;;  %v6376_v46 = vsel %vm3474_vm10, %v17687_v4, 0.0 }
 0x9e2   : > { %12524 = vrcp.f32 %v6309_v32  ;;  %6377 = vadd.xlane.f32.xlu2 %v6376_v46  ;;  %v6752_v26 = vpack.c.bf16 %v6624_v62, %v6624_v62  ;;  %v6630_v44 = vmul.f32 %v12519_v7, %v17430_v6  ;;  %v19646_v62 = vld [vmem:[#allocation124_spill] sm:$0xff]  ;;  %v17713_v32 = vpop.f32.mrf.mxu3  ;;  %v19648_v46 = vld [vmem:[#allocation66_spill] sm:$0xff] }
 0x9e3   : > { %v8030_v49 = vunpack.c.l.b16 %v19646_v62  ;;  %19647 = vst [vmem:[#allocation57_spill] sm:$0xff] %v17713_v32  ;;  %v8107_v23 = vunpack.c.l.b16 %v19648_v46 }
 0x9e4   : > { %v12521_v28 = vpop.eup %12520  ;;  %v7818_v37 = vunpack.c.l.b16 %v6752_v26  ;;  %v6758_v13 = vpack.c.bf16 %v6630_v44, %v6630_v44 }
 0x9e5   : > { %v6625_v27 = vmul.f32 %v12521_v28, %v17440_v59  ;;  %5633 = vmax.xlane.f32.xlu0 %v5632_v17  ;;  %v6306_v60 = vpop.xlane.xlu1 %6305  ;;  %v8031_v44 = vpack.c.b16 %v8030_v49, %v8029_v39  ;;  %v19651_v49 = vld [vmem:[#allocation95_spill] sm:$0xff] }
 0x9e6   : > { %12526 = vrcp.f32 %v6306_v60 }
 0x9e7   : > { %v12523_v34 = vpop.eup %12522  ;;  %v6753_v63 = vpack.c.bf16 %v6625_v27, %v6625_v27  ;;  %v7896_v27 = vunpack.c.l.b16 %v6758_v13 }
 0x9e8   : > { %v12525_v31 = vpop.eup %12524  ;;  %v6631_v48 = vmul.f32 %v12523_v34, %v17442_v0  ;;  %v6324_v33 = vpop.xlane.xlu2 %6323  ;;  %v19649_v34 = vld [vmem:[#allocation135_spill] sm:$0xff] }
 0x9e9   : > { %v5598_v6 = vpop.xlane.xlu0 %5597  ;;  %v7819_v5 = vunpack.c.l.b16 %v6753_v63  ;;  %v6637_v59 = vmul.f32 %v12525_v31, %v17444_v50  ;;  %12528 = vrcp.f32 %v6324_v33  ;;  %v17716_v0 = vpop.f32.mrf.mxu2  ;;  %v8108_v19 = vunpack.c.l.b16 %v19649_v34 }
 0x9ea   : > { %v5760_v45 = vsub.f32 %v17467_v56, %v5598_v6  ;;  %v6759_v7 = vpack.c.bf16 %v6631_v48, %v6631_v48  ;;  %5636 = vmax.xlane.f32.xlu2 %v5635_v51  ;;  %v19650_v6 = vld [vmem:[#allocation107_spill] sm:$0xff] }
 0x9eb   : > { %v7820_v28 = vpack.c.b16 %v7819_v5, %v7818_v37  ;;  %v6765_v50 = vpack.c.bf16 %v6637_v59, %v6637_v59  ;;  %v8109_v33 = vpack.c.b16 %v8108_v19, %v8107_v23  ;;  %v8185_v51 = vunpack.c.l.b16 %v19650_v6 }
 0x9ec   : > { %v5998_v17 = vmul.f32 1.442695, %v5760_v45  ;;  %v12527_v26 = vpop.eup %12526  ;;  %v7897_v60 = vunpack.c.l.b16 %v6759_v7  ;;  %v8186_v7 = vunpack.c.l.b16 %v19651_v49 }
 0x9ed   : > { %v6636_v56 = vmul.f32 %v12527_v26, %v17458_v61  ;;  %v6327_v63 = vpop.xlane.xlu1 %6326  ;;  %11256 = vmatmul.msk.bf16.vlgmr.msrb.gmra.mxu1 %vm3474_vm10, %v7820_v28  ;;  %v7975_v39 = vunpack.c.l.b16 %v6765_v50 }
 0x9ee   : > { %12530 = vpow2.f32 %v5998_v17  ;;  %v7898_v31 = vpack.c.b16 %v7897_v60, %v7896_v27  ;;  %8043 = vmatpush.bf16.msrb.mxu1 %v8031_v44  ;;  %v8187_v44 = vpack.c.b16 %v8186_v7, %v8185_v51  ;;  %v5102_v27 = vpop.f32.mrf.mxu0  ;;  %v17729_v60 = vpop.f32.mrf.mxu3 }
 0x9ef   : > { %12532 = vrcp.f32 %v6327_v63  ;;  %v12529_v48 = vpop.eup %12528  ;;  %v6764_v37 = vpack.c.bf16 %v6636_v56, %v6636_v56  ;;  %19652 = vst [vmem:[#allocation64_spill] sm:$0xff] %v17729_v60  ;;  %v19653_v63 = vld [vmem:[#allocation149_spill] sm:$0xff] }
 0x9f0   : > { %v5601_v13 = vpop.xlane.xlu2 %5600  ;;  %11259 = vmatmul.msk.bf16.vlgmr.msrb.gmra.mxu0 %vm3474_vm10, %v7898_v31  ;;  %v6642_v61 = vmul.f32 %v12529_v48, %v17462_v57  ;;  %v8263_v31 = vunpack.c.l.b16 %v19653_v63 }
 0x9f1   : > { %v5619_v5 = vpop.xlane.xlu0 %5618  ;;  %v7974_v59 = vunpack.c.l.b16 %v6764_v37  ;;  %v5761_v45 = vsub.f32 %v17491_v3, %v5601_v13  ;;  %8121 = vmatpush.bf16.msrb.mxu0 %v8109_v33  ;;  %v17733_v50 = vpop.f32.mrf.mxu2 }
 0x9f2   : > { %v5767_v62 = vsub.f32 %v17487_v22, %v5619_v5  ;;  %v6770_v3 = vpack.c.bf16 %v6642_v61, %v6642_v61 }
 0x9f3   : > { %v7976_v23 = vpack.c.b16 %v7975_v39, %v7974_v59  ;;  %v6000_v28 = vmul.f32 1.442695, %v5761_v45  ;;  %v19654_v39 = vld [vmem:[#allocation151_spill] sm:$0xff] }
 0x9f4   : > { %v17727_v46 = vpop.eup %12530  ;;  %v6012_v17 = vmul.f32 1.442695, %v5767_v62  ;;  %v8052_v6 = vunpack.c.l.b16 %v6770_v3 }
 0x9f5   : > { %v12533_v26 = vpop.eup %12532  ;;  %v6364_v57 = vsel %vm3474_vm10, %v17727_v46, 0.0  ;;  %12534 = vpow2.f32 %v6000_v28  ;;  %v5616_v34 = vpop.xlane.xlu1 %5615  ;;  %11262 = vmatmul.msk.bf16.vlgmr.msrb.gmra.mxu3 %vm3474_vm10, %v7976_v23 }
 0x9f6   : > { %v6643_v22 = vmul.f32 %v12533_v26, %v17480_v53  ;;  %6365 = vadd.xlane.f32.xlu1 %v6364_v57  ;;  %12536 = vpow2.f32 %v6012_v17  ;;  %v5766_v19 = vsub.f32 %v17508_v12, %v5616_v34  ;;  %8199 = vmatpush.bf16.msrb.mxu3 %v8187_v44  ;;  %v8264_v53 = vunpack.c.l.b16 %v19654_v39  ;;  %v17744_v61 = vpop.f32.mrf.mxu3  ;;  %v5104_v23 = vpop.f32.mrf.mxu0 }
 0x9f7   : > { %19655 = vst [vmem:[#allocation56_spill] sm:$0xff] %v17744_v61  ;;  %v17760_v34 = vpop.f32.mrf.mxu1 }
 0x9f8   : > { %v6771_v56 = vpack.c.bf16 %v6643_v22, %v6643_v22  ;;  %v6010_v48 = vmul.f32 1.442695, %v5766_v19  ;;  %v6294_v33 = vpop.xlane.xlu2 %6293  ;;  %v8265_v12 = vpack.c.b16 %v8264_v53, %v8263_v31  ;;  %v17758_v22 = vsel %vm5135_vm11, %v5102_v27, -1e+30 }
 0x9f9   : > { %v6312_v37 = vpop.xlane.xlu0 %6311  ;;  %12538 = vrcp.f32 %v6294_v33  ;;  %v17748_v62 = vpop.f32.mrf.mxu2  ;;  %v5638_v63 = vsel %vm3474_vm10, %v17758_v22, -inf }
 0x9fa   : > { %v8053_v51 = vunpack.c.l.b16 %v6771_v56  ;;  %12540 = vpow2.f32 %v6010_v48  ;;  %v17769_v48 = vsel %vm5135_vm11, %v5104_v23, -1e+30 }
 0x9fb   : > { %v17740_v13 = vpop.eup %12534  ;;  %12542 = vrcp.f32 %v6312_v37 }
 0x9fc   : > { %v8054_v5 = vpack.c.b16 %v8053_v51, %v8052_v6  ;;  %v17742_v59 = vpop.eup %12536  ;;  %v6367_v45 = vsel %vm3474_vm10, %v17740_v13, 0.0  ;;  %v19657_v51 = vld [vmem:[#allocation88_spill] sm:$0xff] }
 0x9fd   : > { %6368 = vadd.xlane.f32.xlu0 %v6367_v45  ;;  %v6385_v49 = vsel %vm3474_vm10, %v17742_v59, 0.0  ;;  %v6297_v7 = vpop.xlane.xlu1 %6296  ;;  %v8134_v39 = vunpack.c.l.b16 %v19657_v51 }
 0x9fe   : > { %11265 = vmatmul.msk.bf16.vlgmr.msra.gmra.mxu2 %vm3474_vm10, %v8054_v5  ;;  %6386 = vadd.xlane.f32.xlu1 %v6385_v49  ;;  %12544 = vrcp.f32 %v6297_v7  ;;  %v17772_v37 = vpop.f32.mrf.mxu0  ;;  %v17775_v53 = vpop.f32.mrf.mxu3 }
 0x9ff   : > { %8277 = vmatpush.bf16.msra.mxu2 %v8265_v12  ;;  %v12539_v28 = vpop.eup %12538  ;;  %19656 = vst [vmem:[#allocation174_spill] sm:$0xff] %v17772_v37 }
 0xa00   : > { %v17753_v17 = vpop.eup %12540  ;;  %v6632_v26 = vmul.f32 %v12539_v28, %v17512_v55  ;;  %v6315_v44 = vpop.xlane.xlu2 %6314  ;;  %19658 = vst [vmem:[#allocation58_spill] sm:$0xff] %v17775_v53  ;;  %v5641_v28 = vsel %vm3474_vm10, %v17769_v48, -inf }
 0xa01   : > { %v6333_v57 = vpop.xlane.xlu0 %6332  ;;  %v12543_v3 = vpop.eup %12542  ;;  %12546 = vrcp.f32 %v6315_v44  ;;  %v6382_v19 = vsel %vm3474_vm10, %v17753_v17, 0.0 }
 0xa02   : > { %12548 = vrcp.f32 %v6333_v57  ;;  %6383 = vadd.xlane.f32.xlu2 %v6382_v19  ;;  %v6760_v55 = vpack.c.bf16 %v6632_v26, %v6632_v26  ;;  %v6638_v31 = vmul.f32 %v12543_v3, %v17521_v40  ;;  %v17777_v5 = vpop.f32.mrf.mxu2  ;;  %v19659_v57 = vld [vmem:[#allocation63_spill] sm:$0xff]  ;;  %v19660_v19 = vld [vmem:[#allocation133_spill] sm:$0xff] }
 0xa04   : > { %v12545_v56 = vpop.eup %12544  ;;  %v7922_v45 = vunpack.c.l.b16 %v6760_v55  ;;  %v6766_v49 = vpack.c.bf16 %v6638_v31, %v6638_v31  ;;  %v17786_v31 = vpop.f32.mrf.mxu1 }
 0xa05   : > { %v6633_v27 = vmul.f32 %v12545_v56, %v17525_v42  ;;  %5639 = vmax.xlane.f32.xlu0 %v5638_v63  ;;  %v6330_v33 = vpop.xlane.xlu1 %6329  ;;  %v8133_v56 = vunpack.c.l.b16 %v19660_v19 }
 0xa06   : > { %12550 = vrcp.f32 %v6330_v33  ;;  %v8000_v61 = vunpack.c.l.b16 %v6766_v49 }
 0xa07   : > { %v12547_v6 = vpop.eup %12546  ;;  %v6761_v12 = vpack.c.bf16 %v6633_v27, %v6633_v27  ;;  %v19661_v27 = vld [vmem:[#allocation75_spill] sm:$0xff]  ;;  %v8135_v51 = vpack.c.b16 %v8134_v39, %v8133_v56  ;;  %v19664_v39 = vld [vmem:[#allocation152_spill] sm:$0xff] }
 0xa08   : > { %v12549_v40 = vpop.eup %12548  ;;  %v6639_v7 = vmul.f32 %v12547_v6, %v17529_v47  ;;  %v6348_v23 = vpop.xlane.xlu2 %6347  ;;  %v8212_v55 = vunpack.c.l.b16 %v19661_v27  ;;  %v8290_v49 = vunpack.c.l.b16 %v19664_v39  ;;  %v19666_v27 = vld [vmem:[#allocation93_spill] sm:$0xff] }
 0xa09   : > { %v5622_v42 = vpop.xlane.xlu0 %5621  ;;  %v7923_v26 = vunpack.c.l.b16 %v6761_v12  ;;  %v6645_v44 = vmul.f32 %v12549_v40, %v17535_v24  ;;  %12552 = vrcp.f32 %v6348_v23  ;;  %v19662_v12 = vld [vmem:[#allocation55_spill] sm:$0xff]  ;;  %v19663_v40 = vld [vmem:[#allocation170_spill] sm:$0xff] }
 0xa0a   : > { %v5768_v3 = vsub.f32 %v19659_v57, %v5622_v42  ;;  %v6767_v63 = vpack.c.bf16 %v6639_v7, %v6639_v7  ;;  %5642 = vmax.xlane.f32.xlu2 %v5641_v28  ;;  %v8211_v14 = vunpack.c.l.b16 %v19662_v12 }
 0xa0b   : > { %v7924_v47 = vpack.c.b16 %v7923_v26, %v7922_v45  ;;  %v6773_v24 = vpack.c.bf16 %v6645_v44, %v6645_v44  ;;  %v17791_v45 = vpop.f32.mrf.mxu2  ;;  %v17797_v44 = vpop.f32.mrf.mxu0 }
 0xa0c   : > { %v6014_v33 = vmul.f32 1.442695, %v5768_v3  ;;  %v12551_v6 = vpop.eup %12550  ;;  %v8001_v53 = vunpack.c.l.b16 %v6767_v63  ;;  %v8213_v57 = vpack.c.b16 %v8212_v55, %v8211_v14  ;;  %v17794_v3 = vpop.f32.mrf.mxu3  ;;  %19665 = vst [vmem:[#allocation175_spill] sm:$0xff] %v17797_v44  ;;  %v19667_v14 = vld [vmem:[#allocation150_spill] sm:$0xff] }
 0xa0d   : > { %v6644_v23 = vmul.f32 %v12551_v6, %v19663_v40  ;;  %v6351_v42 = vpop.xlane.xlu1 %6350  ;;  %11260 = vmatmul.msk.bf16.vlgmr.msra.gmra.mxu1 %vm3474_vm10, %v7924_v47  ;;  %v8079_v56 = vunpack.c.l.b16 %v6773_v24  ;;  %v8289_v55 = vunpack.c.l.b16 %v19667_v14 }
 0xa0e   : > { %12554 = vpow2.f32 %v6014_v33  ;;  %v8002_v7 = vpack.c.b16 %v8001_v53, %v8000_v61  ;;  %8147 = vmatpush.bf16.msra.mxu1 %v8135_v51  ;;  %v17804_v33 = vpop.f32.mrf.mxu1 }
 0xa0f   : > { %12556 = vrcp.f32 %v6351_v42  ;;  %v12553_v28 = vpop.eup %12552  ;;  %v6772_v26 = vpack.c.bf16 %v6644_v23, %v6644_v23  ;;  %19668 = vst [vmem:[#allocation173_spill] sm:$0xff] %v17804_v33  ;;  %v8291_v40 = vpack.c.b16 %v8290_v49, %v8289_v55  ;;  %v19669_v42 = vld [vmem:[#allocation79_spill] sm:$0xff] }
 0xa10   : > { %v5625_v19 = vpop.xlane.xlu2 %5624  ;;  %11263 = vmatmul.msk.bf16.vlgmr.msra.gmra.mxu0 %vm3474_vm10, %v8002_v7  ;;  %v6650_v61 = vmul.f32 %v12553_v28, %v19666_v27  ;;  %v19670_v28 = vld [vmem:[#allocation158_spill] sm:$0xff] }
 0xa11   : > { %v8078_v63 = vunpack.c.l.b16 %v6772_v26  ;;  %v5769_v53 = vsub.f32 %v17562_v43, %v5625_v19  ;;  %8225 = vmatpush.bf16.msra.mxu0 %v8213_v57  ;;  %v8368_v57 = vunpack.c.l.b16 %v19670_v28 }
 0xa12   : > { %v6778_v24 = vpack.c.bf16 %v6650_v61, %v6650_v61 }
 0xa13   : > { %v8080_v6 = vpack.c.b16 %v8079_v56, %v8078_v63  ;;  %v6016_v51 = vmul.f32 1.442695, %v5769_v53  ;;  %v17811_v39 = vpop.f32.mrf.mxu0  ;;  %v17813_v19 = vpop.f32.mrf.mxu2  ;;  %v19672_v63 = vld [vmem:[#allocation156_spill] sm:$0xff] }
 0xa14   : > { %v17802_v47 = vpop.eup %12554  ;;  %19671 = vst [vmem:[#allocation104_spill] sm:$0xff] %v17811_v39  ;;  %v8156_v49 = vunpack.c.l.b16 %v6778_v24  ;;  %v8367_v27 = vunpack.c.l.b16 %v19672_v63  ;;  %v17816_v61 = vpop.f32.mrf.mxu3 }
 0xa15   : > { %v12557_v12 = vpop.eup %12556  ;;  %v6388_v23 = vsel %vm3474_vm10, %v17802_v47, 0.0  ;;  %12558 = vpow2.f32 %v6016_v51  ;;  %11266 = vmatmul.msk.bf16.vlgmr.msra.gmra.mxu3 %vm3474_vm10, %v8080_v6 }
 0xa16   : > { %v6651_v7 = vmul.f32 %v12557_v12, %v19669_v42  ;;  %6389 = vadd.xlane.f32.xlu1 %v6388_v23  ;;  %8303 = vmatpush.bf16.msra.mxu3 %v8291_v40  ;;  %v8369_v55 = vpack.c.b16 %v8368_v57, %v8367_v27  ;;  %v17822_v51 = vpop.f32.mrf.mxu1  ;;  %v17828_v23 = vsel %vm5135_vm11, %v17760_v34, -1e+30 }
 0xa17   : > { %19673 = vst [vmem:[#allocation91_spill] sm:$0xff] %v17822_v51  ;;  %v5644_v28 = vsel %vm3474_vm10, %v17828_v23, -inf  ;;  %v19681_v51 = vld [vmem:[#allocation153_spill] sm:$0xff] }
 0xa18   : > { %v6779_v43 = vpack.c.bf16 %v6651_v7, %v6651_v7 }
 0xa19   : > { %v6318_v26 = vpop.xlane.xlu1 %6317 }
 0xa1a   : > { %v8157_v56 = vunpack.c.l.b16 %v6779_v43  ;;  %12560 = vrcp.f32 %v6318_v26 }
 0xa1b   : > { %v17818_v53 = vpop.eup %12558  ;;  %v17830_v24 = vpop.f32.mrf.mxu2 }
 0xa1c   : > { %v8158_v14 = vpack.c.b16 %v8157_v56, %v8156_v49  ;;  %v6391_v6 = vsel %vm3474_vm10, %v17818_v53, 0.0  ;;  %v17832_v7 = vpop.f32.mrf.mxu3  ;;  %v17834_v43 = vpop.f32.mrf.mxu0 }
 0xa1d   : > { %6392 = vadd.xlane.f32.xlu0 %v6391_v6  ;;  %19674 = vst [vmem:[#allocation65_spill] sm:$0xff] %v17832_v7  ;;  %v19694_v7 = vld [vmem:[#allocation163_spill] sm:$0xff] }
 0xa1e   : > { %11269 = vmatmul.msk.bf16.vlgmr.msrb.gmra.mxu2 %vm3474_vm10, %v8158_v14  ;;  %19675 = vst [vmem:[#allocation73_spill] sm:$0xff] %v17834_v43  ;;  %v17839_v26 = vpop.f32.mrf.mxu1 }
 0xa1f   : > { %8381 = vmatpush.bf16.msrb.mxu2 %v8369_v55  ;;  %19676 = vst [vmem:[#allocation131_spill] sm:$0xff] %v17839_v26  ;;  %v19679_v26 = vld [vmem:[#allocation148_spill] sm:$0xff] }
 0xa20   : > { %v6321_v12 = vpop.xlane.xlu0 %6320  ;;  %v12561_v40 = vpop.eup %12560 }
 0xa21   : > { %v6339_v42 = vpop.xlane.xlu1 %6338  ;;  %12562 = vrcp.f32 %v6321_v12  ;;  %v6640_v57 = vmul.f32 %v12561_v40, %v17581_v16 }
 0xa22   : > { %12564 = vrcp.f32 %v6339_v42  ;;  %v19677_v42 = vld [vmem:[#allocation147_spill] sm:$0xff] }
 0xa23   : > { %v6768_v63 = vpack.c.bf16 %v6640_v57, %v6640_v57  ;;  %v8238_v43 = vunpack.c.l.b16 %v19677_v42  ;;  %v17846_v16 = vpop.f32.mrf.mxu2 }
 0xa24   : > { %v17844_v39 = vpop.f32.mrf.mxu0 }
 0xa25   : > { %5645 = vmax.xlane.f32.xlu0 %v5644_v28  ;;  %v6336_v49 = vpop.xlane.xlu2 %6335  ;;  %v17848_v28 = vpop.f32.mrf.mxu3 }
 0xa26   : > { %12566 = vrcp.f32 %v6336_v49  ;;  %19678 = vst [vmem:[#allocation62_spill] sm:$0xff] %v17848_v28  ;;  %v8026_v49 = vunpack.c.l.b16 %v6768_v63  ;;  %v17852_v18 = vpop.f32.mrf.mxu1 }
 0xa27   : > { %v12563_v34 = vpop.eup %12562  ;;  %19680 = vst [vmem:[#allocation117_spill] sm:$0xff] %v17852_v18 }
 0xa28   : > { %v12565_v56 = vpop.eup %12564  ;;  %v6641_v27 = vmul.f32 %v12563_v34, %v17592_v1  ;;  %v6354_v14 = vpop.xlane.xlu0 %6353  ;;  %v8237_v1 = vunpack.c.l.b16 %v19679_v26 }
 0xa29   : > { %v6647_v55 = vmul.f32 %v12565_v56, %v17594_v52  ;;  %v6372_v6 = vpop.xlane.xlu1 %6371  ;;  %12568 = vrcp.f32 %v6354_v14 }
 0xa2a   : > { %v6769_v12 = vpack.c.bf16 %v6641_v27, %v6641_v27  ;;  %12570 = vrcp.f32 %v6372_v6  ;;  %v8239_v42 = vpack.c.b16 %v8238_v43, %v8237_v1  ;;  %v8316_v6 = vunpack.c.l.b16 %v19681_v51 }
 0xa2b   : > { %v6775_v34 = vpack.c.bf16 %v6647_v55, %v6647_v55 }
 0xa2c   : > { %v12567_v40 = vpop.eup %12566  ;;  %v8027_v57 = vunpack.c.l.b16 %v6769_v12 }
 0xa2d   : > { %v6646_v52 = vmul.f32 %v12567_v40, %v17602_v9  ;;  %v8105_v12 = vunpack.c.l.b16 %v6775_v34  ;;  %v19682_v9 = vld [vmem:[#allocation154_spill] sm:$0xff] }
 0xa2e   : > { %v6357_v56 = vpop.xlane.xlu2 %6356  ;;  %v8028_v14 = vpack.c.b16 %v8027_v57, %v8026_v49  ;;  %v8315_v40 = vunpack.c.l.b16 %v19682_v9  ;;  %v17859_v49 = vpop.f32.mrf.mxu2 }
 0xa2f   : > { %12572 = vrcp.f32 %v6357_v56  ;;  %v12569_v27 = vpop.eup %12568  ;;  %v6774_v33 = vpack.c.bf16 %v6646_v52, %v6646_v52  ;;  %v17861_v52 = vpop.f32.mrf.mxu3 }
 0xa30   : > { %11264 = vmatmul.msk.bf16.vlgmr.msrb.gmra.mxu1 %vm3474_vm10, %v8028_v14  ;;  %v6375_v37 = vpop.xlane.xlu0 %6374  ;;  %v12571_v63 = vpop.eup %12570  ;;  %v6652_v26 = vmul.f32 %v12569_v27, %v17607_v11  ;;  %v8317_v51 = vpack.c.b16 %v8316_v6, %v8315_v40  ;;  %v19683_v6 = vld [vmem:[#allocation159_spill] sm:$0xff] }
 0xa31   : > { %v8104_v44 = vunpack.c.l.b16 %v6774_v33  ;;  %v5631_v55 = vpop.xlane.xlu1 %5630  ;;  %8251 = vmatpush.bf16.msrb.mxu1 %v8239_v42  ;;  %12574 = vrcp.f32 %v6375_v37  ;;  %v6658_v56 = vmul.f32 %v12571_v63, %v17609_v15  ;;  %v17864_v33 = vpop.f32.mrf.mxu0 }
 0xa32   : > { %v5771_v43 = vsub.f32 %v17622_v35, %v5631_v55  ;;  %v6780_v11 = vpack.c.bf16 %v6652_v26, %v6652_v26  ;;  %v17869_v27 = vpop.f32.mrf.mxu1 }
 0xa33   : > { %v8106_v57 = vpack.c.b16 %v8105_v12, %v8104_v44  ;;  %v8394_v12 = vunpack.c.l.b16 %v19683_v6  ;;  %v6786_v15 = vpack.c.bf16 %v6658_v56, %v6658_v56 }
 0xa34   : > { %v6020_v34 = vmul.f32 1.442695, %v5771_v43  ;;  %v8182_v26 = vunpack.c.l.b16 %v6780_v11 }
 0xa35   : > { %v12573_v1 = vpop.eup %12572  ;;  %11267 = vmatmul.msk.bf16.vlgmr.msrb.gmra.mxu0 %vm3474_vm10, %v8106_v57 }
 0xa36   : > { %v6653_v14 = vmul.f32 %v12573_v1, %v17615_v29  ;;  %v5628_v37 = vpop.xlane.xlu2 %5627  ;;  %12576 = vpow2.f32 %v6020_v34  ;;  %8329 = vmatpush.bf16.msrb.mxu0 %v8317_v51  ;;  %v19684_v29 = vld [vmem:[#allocation160_spill] sm:$0xff]  ;;  %v8260_v51 = vunpack.c.l.b16 %v6786_v15 }
 0xa37   : > { %v5770_v35 = vsub.f32 %v17633_v8, %v5628_v37  ;;  %v12575_v44 = vpop.eup %12574  ;;  %v8393_v40 = vunpack.c.l.b16 %v19684_v29  ;;  %v17883_v56 = vpop.f32.mrf.mxu3 }
 0xa38   : > { %v6781_v42 = vpack.c.bf16 %v6653_v14, %v6653_v14  ;;  %v6659_v63 = vmul.f32 %v12575_v44, %v17624_v30  ;;  %v17878_v14 = vpop.f32.mrf.mxu2 }
 0xa39   : > { %v6018_v55 = vmul.f32 1.442695, %v5770_v35  ;;  %v8395_v8 = vpack.c.b16 %v8394_v12, %v8393_v40  ;;  %v17876_v37 = vpop.f32.mrf.mxu0  ;;  %v17897_v12 = vsel %vm5135_vm11, %v17786_v31, -1e+30 }
 0xa3a   : > { %v8183_v9 = vunpack.c.l.b16 %v6781_v42  ;;  %v6787_v43 = vpack.c.bf16 %v6659_v63, %v6659_v63  ;;  %19685 = vst [vmem:[#allocation108_spill] sm:$0xff] %v17876_v37  ;;  %v17888_v44 = vpop.f32.mrf.mxu1  ;;  %v5647_v29 = vsel %vm3474_vm10, %v17897_v12, -inf }
 0xa3b   : > { %12578 = vpow2.f32 %v6018_v55 }
 0xa3c   : > { %v8184_v57 = vpack.c.b16 %v8183_v9, %v8182_v26  ;;  %v17874_v1 = vpop.eup %12576  ;;  %v8261_v34 = vunpack.c.l.b16 %v6787_v43 }
 0xa3d   : > { %v6397_v30 = vsel %vm3474_vm10, %v17874_v1, 0.0 }
 0xa3e   : > { %11270 = vmatmul.msk.bf16.vlgmr.msrb.gmra.mxu3 %vm3474_vm10, %v8184_v57  ;;  %v8262_v11 = vpack.c.b16 %v8261_v34, %v8260_v51  ;;  %6398 = vadd.xlane.f32.xlu1 %v6397_v30 }
 0xa3f   : > { %8407 = vmatpush.bf16.msrb.mxu3 %v8395_v8  ;;  %v17899_v15 = vpop.f32.mrf.mxu3 }
 0xa40   : > { %11273 = vmatmul.msk.bf16.vlgmr.msra.gmra.mxu2 %vm3474_vm10, %v8262_v11  ;;  %v17892_v6 = vpop.f32.mrf.mxu2  ;;  %19686 = vst [vmem:[#allocation94_spill] sm:$0xff] %v17899_v15 }
 0xa41   : > { %v17885_v35 = vpop.eup %12578  ;;  %v17901_v63 = vpop.f32.mrf.mxu0 }
 0xa42   : > { %v6394_v42 = vsel %vm3474_vm10, %v17885_v35, 0.0  ;;  %19687 = vst [vmem:[#allocation68_spill] sm:$0xff] %v17901_v63  ;;  %v17903_v26 = vpop.f32.mrf.mxu1  ;;  %v19691_v63 = vld [vmem:[#allocation155_spill] sm:$0xff] }
 0xa43   : > { %6395 = vadd.xlane.f32.xlu2 %v6394_v42  ;;  %19688 = vst [vmem:[#allocation83_spill] sm:$0xff] %v17903_v26 }
 0xa47   : > { %v17911_v57 = vpop.f32.mrf.mxu3 }
 0xa48   : > { %v6342_v55 = vpop.xlane.xlu0 %6341  ;;  %v17909_v31 = vpop.f32.mrf.mxu2  ;;  %19689 = vst [vmem:[#allocation85_spill] sm:$0xff] %v17911_v57 }
 0xa49   : > { %v6360_v9 = vpop.xlane.xlu1 %6359  ;;  %12580 = vrcp.f32 %v6342_v55  ;;  %v17907_v25 = vpop.f32.mrf.mxu0 }
 0xa4a   : > { %12582 = vrcp.f32 %v6360_v9  ;;  %v17914_v11 = vpop.f32.mrf.mxu1 }
 0xa4b   : > { %5648 = vmax.xlane.f32.xlu2 %v5647_v29  ;;  %19690 = vst [vmem:[#allocation125_spill] sm:$0xff] %v17914_v11 }
 0xa4d   : > { %v6345_v40 = vpop.xlane.xlu2 %6344 }
 0xa4e   : > { %12584 = vrcp.f32 %v6345_v40 }
 0xa4f   : > { %v12581_v43 = vpop.eup %12580 }
 0xa50   : > { %v6363_v8 = vpop.xlane.xlu0 %6362  ;;  %v12583_v51 = vpop.eup %12582  ;;  %v6648_v34 = vmul.f32 %v12581_v43, %v17663_v21  ;;  %v8341_v21 = vunpack.c.l.b16 %v19691_v63 }
 0xa51   : > { %v6381_v30 = vpop.xlane.xlu1 %6380  ;;  %12586 = vrcp.f32 %v6363_v8  ;;  %v6654_v55 = vmul.f32 %v12583_v51, %v17665_v20  ;;  %v17918_v26 = vpop.f32.mrf.mxu2 }
 0xa52   : > { %12588 = vrcp.f32 %v6381_v30  ;;  %v6776_v9 = vpack.c.bf16 %v6648_v34, %v6648_v34  ;;  %v17921_v43 = vpop.f32.mrf.mxu3  ;;  %v17924_v37 = vpop.f32.mrf.mxu0 }
 0xa53   : > { %v6782_v8 = vpack.c.bf16 %v6654_v55, %v6654_v55  ;;  %v17930_v63 = vpop.f32.mrf.mxu1 }
 0xa54   : > { %v12585_v42 = vpop.eup %12584  ;;  %v8130_v20 = vunpack.c.l.b16 %v6776_v9  ;;  %v8420_v9 = vunpack.c.l.b16 %v19694_v7 }
 0xa55   : > { %v6649_v29 = vmul.f32 %v12585_v42, %v17673_v58  ;;  %v6378_v40 = vpop.xlane.xlu2 %6377  ;;  %v19692_v42 = vld [vmem:[#allocation157_spill] sm:$0xff] }
 0xa56   : > { %12590 = vrcp.f32 %v6378_v40  ;;  %v8342_v40 = vunpack.c.l.b16 %v19692_v42 }
 0xa57   : > { %v12587_v18 = vpop.eup %12586  ;;  %v6777_v32 = vpack.c.bf16 %v6649_v29, %v6649_v29 }
 0xa58   : > { %v12589_v60 = vpop.eup %12588  ;;  %v6655_v30 = vmul.f32 %v12587_v18, %v17679_v2  ;;  %v5634_v11 = vpop.xlane.xlu0 %5633  ;;  %v8343_v2 = vpack.c.b16 %v8342_v40, %v8341_v21  ;;  %v8208_v18 = vunpack.c.l.b16 %v6782_v8 }
 0xa59   : > { %v8131_v51 = vunpack.c.l.b16 %v6777_v32  ;;  %v6661_v58 = vmul.f32 %v12589_v60, %v17681_v38  ;;  %v5772_v34 = vsub.f32 %v17692_v10, %v5634_v11  ;;  %v8421_v11 = vpack.c.b16 %v8420_v9, %v8419_v36  ;;  %v17939_v8 = vpop.f32.mrf.mxu2 }
 0xa5a   : > { %v6783_v29 = vpack.c.bf16 %v6655_v30, %v6655_v30  ;;  %v17937_v21 = vpop.f32.mrf.mxu0 }
 0xa5b   : > { %v8132_v57 = vpack.c.b16 %v8131_v51, %v8130_v20  ;;  %v6022_v55 = vmul.f32 1.442695, %v5772_v34  ;;  %v6789_v32 = vpack.c.bf16 %v6661_v58, %v6661_v58  ;;  %19695 = vst [vmem:[#allocation126_spill] sm:$0xff] %v17937_v21  ;;  %v19702_v21 = vld [vmem:[#allocation162_spill] sm:$0xff] }
 0xa5c   : > { %v12591_v15 = vpop.eup %12590  ;;  %v8209_v28 = vunpack.c.l.b16 %v6783_v29 }
 0xa5d   : > { %v6660_v38 = vmul.f32 %v12591_v15, %v17687_v4  ;;  %12592 = vpow2.f32 %v6022_v55  ;;  %v5637_v10 = vpop.xlane.xlu2 %5636  ;;  %11268 = vmatmul.msk.bf16.vlgmr.msra.gmra.mxu1 %vm3474_vm10, %v8132_v57  ;;  %v8287_v7 = vunpack.c.l.b16 %v6789_v32  ;;  %v17941_v4 = vpop.f32.mrf.mxu3 }
 0xa5e   : > { %v8210_v60 = vpack.c.b16 %v8209_v28, %v8208_v18  ;;  %v5773_v54 = vsub.f32 %v17703_v41, %v5637_v10  ;;  %8355 = vmatpush.bf16.msra.mxu1 %v8343_v2  ;;  %v17947_v41 = vpop.f32.mrf.mxu1 }
 0xa5f   : > { %v6788_v30 = vpack.c.bf16 %v6660_v38, %v6660_v38 }
 0xa60   : > { %v6024_v20 = vmul.f32 1.442695, %v5773_v54  ;;  %11271 = vmatmul.msk.bf16.vlgmr.msra.gmra.mxu0 %vm3474_vm10, %v8210_v60 }
 0xa61   : > { %v8286_v51 = vunpack.c.l.b16 %v6788_v30  ;;  %8433 = vmatpush.bf16.msra.mxu0 %v8421_v11  ;;  %v17952_v34 = vpop.f32.mrf.mxu2 }
 0xa62   : > { %12594 = vpow2.f32 %v6024_v20  ;;  %v17958_v29 = vpop.f32.mrf.mxu0 }
 0xa63   : > { %v17943_v15 = vpop.eup %12592  ;;  %v8288_v28 = vpack.c.b16 %v8287_v7, %v8286_v51  ;;  %19697 = vst [vmem:[#allocation59_spill] sm:$0xff] %v17958_v29 }
 0xa64   : > { %v6400_v36 = vsel %vm3474_vm10, %v17943_v15, 0.0 }
 0xa65   : > { %6401 = vadd.xlane.f32.xlu1 %v6400_v36  ;;  %11274 = vmatmul.msk.bf16.vlgmr.msra.gmra.mxu3 %vm3474_vm10, %v8288_v28  ;;  %v17956_v40 = vpop.f32.mrf.mxu3 }
 0xa66   : > { %19696 = vst [vmem:[#allocation78_spill] sm:$0xff] %v17956_v40  ;;  %v17960_v55 = vpop.f32.mrf.mxu1 }
 0xa67   : > { %19698 = vst [vmem:[#allocation67_spill] sm:$0xff] %v17960_v55 }
 0xa68   : > { %v17950_v57 = vpop.eup %12594 }
 0xa69   : > { %v6366_v58 = vpop.xlane.xlu1 %6365  ;;  %v6403_v42 = vsel %vm3474_vm10, %v17950_v57, 0.0  ;;  %v17964_v38 = vpop.f32.mrf.mxu2 }
 0xa6a   : > { %6404 = vadd.xlane.f32.xlu0 %v6403_v42  ;;  %12596 = vrcp.f32 %v6366_v58  ;;  %v17962_v32 = vpop.f32.mrf.mxu0 }
 0xa6d   : > { %v17966_v10 = vpop.f32.mrf.mxu3 }
 0xa6e   : > { %19699 = vst [vmem:[#allocation119_spill] sm:$0xff] %v17966_v10  ;;  %v17969_v30 = vpop.f32.mrf.mxu1 }
 0xa6f   : > { %19700 = vst [vmem:[#allocation110_spill] sm:$0xff] %v17969_v30 }
 0xa70   : > { %v6369_v2 = vpop.xlane.xlu0 %6368  ;;  %v12597_v18 = vpop.eup %12596 }
 0xa71   : > { %v6387_v9 = vpop.xlane.xlu1 %6386  ;;  %12598 = vrcp.f32 %v6369_v2  ;;  %v6656_v60 = vmul.f32 %v12597_v18, %v17727_v46  ;;  %v19701_v2 = vld [vmem:[#allocation164_spill] sm:$0xff]  ;;  %v17975_v55 = vpop.f32.mrf.mxu2 }
 0xa72   : > { %12600 = vrcp.f32 %v6387_v9  ;;  %v8446_v9 = vunpack.c.l.b16 %v19701_v2  ;;  %v17980_v10 = vpop.f32.mrf.mxu0 }
 0xa73   : > { %v6784_v7 = vpack.c.bf16 %v6656_v60, %v6656_v60  ;;  %v8445_v60 = vunpack.c.l.b16 %v19702_v21 }
 0xa75   : > { %v6384_v54 = vpop.xlane.xlu2 %6383  ;;  %v8234_v29 = vunpack.c.l.b16 %v6784_v7 }
 0xa76   : > { %12602 = vrcp.f32 %v6384_v54  ;;  %v17977_v54 = vpop.f32.mrf.mxu3 }
 0xa77   : > { %v12599_v11 = vpop.eup %12598 }
 0xa78   : > { %v12601_v20 = vpop.eup %12600  ;;  %v6657_v51 = vmul.f32 %v12599_v11, %v17740_v13  ;;  %v5640_v28 = vpop.xlane.xlu0 %5639 }
 0xa79   : > { %v6663_v36 = vmul.f32 %v12601_v20, %v17742_v59  ;;  %v5774_v58 = vsub.f32 %v17758_v22, %v5640_v28  ;;  %v17984_v28 = vpop.f32.mrf.mxu1 }
 0xa7a   : > { %v6785_v42 = vpack.c.bf16 %v6657_v51, %v6657_v51  ;;  %v8447_v51 = vpack.c.b16 %v8446_v9, %v8445_v60 }
 0xa7b   : > { %v6026_v46 = vmul.f32 1.442695, %v5774_v58  ;;  %v6791_v13 = vpack.c.bf16 %v6663_v36, %v6663_v36 }
 0xa7c   : > { %v12603_v18 = vpop.eup %12602  ;;  %v8235_v30 = vunpack.c.l.b16 %v6785_v42 }
 0xa7d   : > { %v6662_v59 = vmul.f32 %v12603_v18, %v17753_v17  ;;  %12604 = vpow2.f32 %v6026_v46  ;;  %v5643_v22 = vpop.xlane.xlu2 %5642  ;;  %v8313_v7 = vunpack.c.l.b16 %v6791_v13 }
 0xa7e   : > { %v8236_v11 = vpack.c.b16 %v8235_v30, %v8234_v29  ;;  %v5775_v20 = vsub.f32 %v17769_v48, %v5643_v22  ;;  %v17991_v29 = vpop.f32.mrf.mxu0  ;;  %v7865_v48 = vpop.f32.mrf.mxu2 }
 0xa7f   : > { %v6790_v58 = vpack.c.bf16 %v6662_v59, %v6662_v59  ;;  %19703 = vst [vmem:[#allocation87_spill] sm:$0xff] %v17991_v29  ;;  %v17994_v30 = vpop.f32.mrf.mxu3 }
 0xa80   : > { %v6028_v2 = vmul.f32 1.442695, %v5775_v20  ;;  %11272 = vmatmul.msk.bf16.vlgmr.msrb.gmra.mxu1 %vm3474_vm10, %v8236_v11 }
 0xa81   : > { %v8312_v42 = vunpack.c.l.b16 %v6790_v58  ;;  %8459 = vmatpush.bf16.msrb.mxu1 %v8447_v51  ;;  %v17998_v18 = vpop.f32.mrf.mxu1 }
 0xa82   : > { %12606 = vpow2.f32 %v6028_v2 }
 0xa83   : > { %v17987_v21 = vpop.eup %12604  ;;  %v8314_v36 = vpack.c.b16 %v8313_v7, %v8312_v42 }
 0xa84   : > { %v6406_v17 = vsel %vm3474_vm10, %v17987_v21, 0.0 }
 0xa85   : > { %6407 = vadd.xlane.f32.xlu2 %v6406_v17  ;;  %11275 = vmatmul.msk.bf16.vlgmr.msrb.gmra.mxu0 %vm3474_vm10, %v8314_v36 }
 0xa86   : > { %v18002_v13 = vpop.f32.mrf.mxu2  ;;  %v18006_v22 = vpop.f32.mrf.mxu0 }
 0xa87   : > { %19704 = vst [vmem:[#allocation109_spill] sm:$0xff] %v18002_v13  ;;  %v18004_v59 = vpop.f32.mrf.mxu3 }
 0xa88   : > { %v17996_v9 = vpop.eup %12606  ;;  %19705 = vst [vmem:[#allocation76_spill] sm:$0xff] %v18004_v59 }
 0xa89   : > { %v6390_v46 = vpop.xlane.xlu1 %6389  ;;  %v6409_v60 = vsel %vm3474_vm10, %v17996_v9, 0.0  ;;  %19706 = vst [vmem:[#allocation74_spill] sm:$0xff] %v18006_v22  ;;  %v18008_v51 = vpop.f32.mrf.mxu1 }
 0xa8a   : > { %6410 = vadd.xlane.f32.xlu1 %v6409_v60  ;;  %12608 = vrcp.f32 %v6390_v46  ;;  %19707 = vst [vmem:[#allocation98_spill] sm:$0xff] %v18008_v51 }
 0xa8e   : > { %v18011_v7 = vpop.f32.mrf.mxu0  ;;  %v18013_v42 = vpop.f32.mrf.mxu2 }
 0xa8f   : > { %v18015_v36 = vpop.f32.mrf.mxu3 }
 0xa90   : > { %v6393_v11 = vpop.xlane.xlu0 %6392  ;;  %v12609_v20 = vpop.eup %12608 }
 0xa91   : > { %12610 = vrcp.f32 %v6393_v11  ;;  %v6664_v58 = vmul.f32 %v12609_v20, %v17802_v47  ;;  %v18019_v40 = vpop.f32.mrf.mxu1 }
 0xa92   : > { %19708 = vst [vmem:[#allocation144_spill] sm:$0xff] %v18019_v40 }
 0xa93   : > { %v6792_v17 = vpack.c.bf16 %v6664_v58, %v6664_v58 }
 0xa95   : > { %v8338_v11 = vunpack.c.l.b16 %v6792_v17 }
 0xa96   : > { %v18021_v20 = vpop.f32.mrf.mxu2  ;;  %v18028_v58 = vpop.f32.mrf.mxu0 }
 0xa97   : > { %v12611_v2 = vpop.eup %12610  ;;  %v18023_v13 = vpop.f32.mrf.mxu3 }
 0xa98   : > { %v6665_v46 = vmul.f32 %v12611_v2, %v17818_v53  ;;  %v5646_v60 = vpop.xlane.xlu0 %5645  ;;  %v11800_v53 = vpack.i.bf16 %v17733_v50, %v17716_v0  ;;  %v11835_v50 = vpack.i.bf16 %v17816_v61, %v17794_v3  ;;  %v11850_v3 = vpack.i.bf16 %v17994_v30, %v17977_v54 }
 0xa99   : > { %v5776_v22 = vsub.f32 %v17828_v23, %v5646_v60  ;;  %v18032_v2 = vpop.f32.mrf.mxu1 }
 0xa9a   : > { %v6793_v29 = vpack.c.bf16 %v6665_v46, %v6665_v46 }
 0xa9b   : > { %v6030_v51 = vmul.f32 1.442695, %v5776_v22 }
 0xa9c   : > { %v8339_v59 = vunpack.c.l.b16 %v6793_v29 }
 0xa9d   : > { %12612 = vpow2.f32 %v6030_v51 }
 0xa9e   : > { %v8340_v47 = vpack.c.b16 %v8339_v59, %v8338_v11  ;;  %v11820_v59 = vpack.i.bf16 %v7865_v48, %v17975_v55  ;;  %v18038_v22 = vpop.f32.mrf.mxu0  ;;  %v18040_v51 = vpop.f32.mrf.mxu2 }
 0xa9f   : > { %19709 = vst [vmem:[#allocation137_spill] sm:$0xff] %v18038_v22  ;;  %v18042_v17 = vpop.f32.mrf.mxu3 }
 0xaa0   : > { %11276 = vmatmul.msk.bf16.vlgmr.msra.gmra.mxu1 %vm3474_vm10, %v8340_v47 }
 0xaa1   : > { %v18045_v0 = vpop.f32.mrf.mxu1 }
 0xaa3   : > { %v18030_v23 = vpop.eup %12612  ;;  %11801 = vrot.lane.b32.xlu1 %v11800_v53, %s13331_s1  ;;  %v11805_v53 = vpack.i.bf16 %v17813_v19, %v17791_v45 }
 0xaa4   : > { %v6412_v29 = vsel %vm3474_vm10, %v18030_v23, 0.0 }
 0xaa5   : > { %6413 = vadd.xlane.f32.xlu0 %v6412_v29 }
 0xaa6   : > { %v18049_v46 = vpop.f32.mrf.mxu2  ;;  %v18053_v55 = vpop.f32.mrf.mxu0 }
 0xaa7   : > { %v18051_v11 = vpop.f32.mrf.mxu3  ;;  %19710 = vst [vmem:[#allocation101_spill] sm:$0xff] %v18053_v55 }
 0xaa9   : > { %v18056_v48 = vpop.f32.mrf.mxu1 }
 0xaaa   : > { %19711 = vst [vmem:[#allocation115_spill] sm:$0xff] %v18056_v48 }
 0xaab   : > { %11821 = vrot.lane.b32.xlu1 %v11820_v59, %s13330_s7 }
 0xaae   : > { %v18064_v59 = vpop.f32.mrf.mxu0 }
 0xaaf   : > { %v18069_v40 = vpop.f32.mrf.mxu3 }
 0xab0   : > { %19712 = vst [vmem:[#allocation122_spill] sm:$0xff] %v18069_v40 }
 0xab1   : > { %v6399_v60 = vpop.xlane.xlu1 %6398  ;;  %v18075_v54 = vpop.f32.mrf.mxu1 }
 0xab2   : > { %12614 = vrcp.f32 %v6399_v60  ;;  %v18066_v60 = vpop.f32.mrf.mxu2 }
 0xab3   : > { %11836 = vrot.lane.b32.xlu1 %v11835_v50, %s13331_s1 }
 0xab6   : > { %v6396_v47 = vpop.xlane.xlu2 %6395  ;;  %v7917_v40 = vpop.f32.mrf.mxu0 }
 0xab7   : > { %12616 = vrcp.f32 %v6396_v47 }
 0xab8   : > { %v12615_v29 = vpop.eup %12614 }
 0xab9   : > { %v6667_v61 = vmul.f32 %v12615_v29, %v17874_v1  ;;  %11806 = vrot.lane.b32.xlu0 %v11805_v53, %s13332_s30  ;;  %v11815_v1 = vpack.i.bf16 %v17939_v8, %v17918_v26 }
 0xabb   : > { %11851 = vrot.lane.b32.xlu1 %v11850_v3, %s13328_s27  ;;  %v6795_v47 = vpack.c.bf16 %v6667_v61, %v6667_v61  ;;  %v8097_v61 = vpop.f32.mrf.mxu3 }
 0xabd   : > { %v12617_v50 = vpop.eup %12616  ;;  %v8365_v29 = vunpack.c.l.b16 %v6795_v47 }
 0xabe   : > { %v6666_v45 = vmul.f32 %v12617_v50, %v17885_v35  ;;  %v5649_v19 = vpop.xlane.xlu2 %5648  ;;  %v18079_v35 = vpop.f32.mrf.mxu1 }
 0xabf   : > { %v5777_v48 = vsub.f32 %v17897_v12, %v5649_v19  ;;  %v18085_v50 = vpop.f32.mrf.mxu0 }
 0xac0   : > { %v6794_v30 = vpack.c.bf16 %v6666_v45, %v6666_v45  ;;  %v11845_v45 = vpack.i.bf16 %v17941_v4, %v17921_v43  ;;  %v11810_v43 = vpack.i.bf16 %v17878_v14, %v17859_v49  ;;  %v11825_v49 = vpack.i.bf16 %v18040_v51, %v18021_v20 }
 0xac1   : > { %v6032_v53 = vmul.f32 1.442695, %v5777_v48  ;;  %11816 = vrot.lane.b32.xlu0 %v11815_v1, %s13328_s27 }
 0xac2   : > { %v8364_v55 = vunpack.c.l.b16 %v6794_v30 }
 0xac3   : > { %12618 = vpow2.f32 %v6032_v53  ;;  %v8279_v22 = vpop.f32.mrf.mxu2  ;;  %v8099_v47 = vpop.f32.mrf.mxu3 }
 0xac4   : > { %v8366_v3 = vpack.c.b16 %v8365_v29, %v8364_v55 }
 0xac6   : > { %11277 = vmatmul.msk.bf16.vlgmr.msrb.gmra.mxu2 %vm3474_vm10, %v8366_v3  ;;  %v18088_v55 = vpop.f32.mrf.mxu1 }
 0xac7   : > { %v18095_v1 = vpop.f32.mrf.mxu0 }
 0xac9   : > { %v18081_v12 = vpop.eup %12618 }
 0xaca   : > { %v6415_v26 = vsel %vm3474_vm10, %v18081_v12, 0.0 }
 0xacb   : > { %6416 = vadd.xlane.f32.xlu2 %v6415_v26  ;;  %v8281_v8 = vpop.f32.mrf.mxu2  ;;  %v18092_v19 = vpop.f32.mrf.mxu3 }
 0xacc   : > { %v11830_v48 = vpack.i.bf16 %v8281_v8, %v8279_v22  ;;  %v11860_v22 = vpack.i.bf16 %v8099_v47, %v8097_v61  ;;  %v11875_v61 = vpack.i.bf16 %v17924_v37, %v17907_v25  ;;  %v11890_v37 = vpack.i.bf16 %v7917_v40, %v18064_v59 }
 0xacd   : > { %v11840_v25 = vpack.i.bf16 %v17883_v56, %v17861_v52  ;;  %v11855_v40 = vpack.i.bf16 %v18042_v17, %v18023_v13  ;;  %v11880_v52 = vpack.i.bf16 %v17980_v10, %v17962_v32  ;;  %v11870_v32 = vpack.i.bf16 %v17864_v33, %v17844_v39 }
 0xace   : > { %11831 = vrot.lane.b32.xlu0 %v11830_v48, %s13327_s14  ;;  %v18097_v53 = vpop.f32.mrf.mxu1  ;;  %v11885_v39 = vpack.i.bf16 %v18028_v58, %v18011_v7  ;;  %v11910_v33 = vpack.i.bf16 %v17947_v41, %v17930_v63  ;;  %v11549_v63 = vld [vmem:[%s13763_s25 + $0x38] sm:$0xff]  ;;  %v11915_v41 = vpack.i.bf16 %v17998_v18, %v17984_v28  ;;  %v11548_v7 = vld [vmem:[%s13763_s25 + $0x30] sm:$0xff]  ;;  %v11940_v58 = vpack.i.bf16 %v17777_v5, %v17748_v62 }
 0xacf   : > { %v8123_v26 = vpop.f32.mrf.mxu0  ;;  %9108 = vmatpush.bf16.msrb.mxu0 %v11549_v63  ;;  %11590 = vmatpush.bf16.msra.mxu2 %v11549_v63  ;;  %v11955_v28 = vpack.i.bf16 %v17964_v38, %v17952_v34  ;;  %v11945_v18 = vpack.i.bf16 %v17846_v16, %v17830_v24  ;;  %v11950_v34 = vpack.i.bf16 %v17909_v31, %v17892_v6  ;;  %v19714_v38 = vld [vmem:[#allocation109_spill] sm:$0xff]  ;;  %v11544_v24 = vld [vmem:[%s13763_s25 + $0x10] sm:$0xff]  ;;  %v11543_v16 = vld [vmem:[%s13763_s25 + $0x8] sm:$0xff] }
 0xad0   : > { %11591 = vmatpush.bf16.msra.mxu3 %v11549_v63  ;;  %v11965_v6 = vpack.i.bf16 %v18066_v60, %v18049_v46  ;;  %v19715_v31 = vld [vmem:[#allocation65_spill] sm:$0xff] }
 0xad1   : > { %v19718_v46 = vld [vmem:[#allocation85_spill] sm:$0xff] }
 0xad3   : > { %v18102_v4 = vpop.f32.mrf.mxu3  ;;  %9109 = vmatpush.bf16.msrb.mxu0 %v11548_v7  ;;  %11592 = vmatpush.bf16.msra.mxu2 %v11548_v7 }
 0xad4   : > { %11593 = vmatpush.bf16.msra.mxu3 %v11548_v7 }
 0xad6   : > { %11846 = vrot.lane.b32.xlu0 %v11845_v45, %s13329_s9  ;;  %v18106_v48 = vpop.f32.mrf.mxu1 }
 0xad7   : > { %19713 = vst [vmem:[#allocation71_spill] sm:$0xff] %v18106_v48 }
 0xad8   : > { %v6402_v30 = vpop.xlane.xlu1 %6401 }
 0xad9   : > { %12620 = vrcp.f32 %v6402_v30 }
 0xadd   : > { %v6405_v29 = vpop.xlane.xlu0 %6404 }
 0xade   : > { %11861 = vrot.lane.b32.xlu0 %v11860_v22, %s13326_s8  ;;  %12622 = vrcp.f32 %v6405_v29  ;;  %v8125_v29 = vpop.f32.mrf.mxu0 }
 0xadf   : > { %v12621_v3 = vpop.eup %12620  ;;  %v11895_v10 = vpack.i.bf16 %v8125_v29, %v8123_v26 }
 0xae0   : > { %v6668_v8 = vmul.f32 %v12621_v3, %v17943_v15 }
 0xae2   : > { %v6796_v47 = vpack.c.bf16 %v6668_v8, %v6668_v8  ;;  %v11905_v8 = vpack.i.bf16 %v17888_v44, %v17869_v27  ;;  %v11920_v27 = vpack.i.bf16 %v18045_v0, %v18032_v2 }
 0xae3   : > { %11811 = vrot.lane.b32.xlu2 %v11810_v43, %s13329_s9  ;;  %v18115_v43 = vpop.f32.mrf.mxu1 }
 0xae4   : > { %v12623_v45 = vpop.eup %12622  ;;  %v8390_v15 = vunpack.c.l.b16 %v6796_v47 }
 0xae5   : > { %v6669_v30 = vmul.f32 %v12623_v45, %v17950_v57 }
 0xae6   : > { %11876 = vrot.lane.b32.xlu0 %v11875_v61, %s13332_s30  ;;  %v18122_v20 = vpop.f32.mrf.mxu0 }
 0xae7   : > { %v6797_v22 = vpack.c.bf16 %v6669_v30, %v6669_v30 }
 0xae8   : > { %v8305_v14 = vpop.f32.mrf.mxu3 }
 0xae9   : > { %v8391_v3 = vunpack.c.l.b16 %v6797_v22 }
 0xaeb   : > { %11826 = vrot.lane.b32.xlu2 %v11825_v49, %s13326_s8  ;;  %v8392_v48 = vpack.c.b16 %v8391_v3, %v8390_v15  ;;  %v8151_v45 = vpop.f32.mrf.mxu1  ;;  %v11925_v15 = vpack.i.bf16 %v18088_v55, %v18079_v35  ;;  %v11547_v3 = vld [vmem:[%s13763_s25 + $0x28] sm:$0xff] }
 0xaec   : > { %9110 = vmatpush.bf16.msrb.mxu0 %v11547_v3  ;;  %11594 = vmatpush.bf16.msra.mxu2 %v11547_v3  ;;  %v11930_v55 = vpack.i.bf16 %v8151_v45, %v18115_v43  ;;  %v11546_v43 = vld [vmem:[%s13763_s25 + $0x20] sm:$0xff] }
 0xaed   : > { %11278 = vmatmul.msk.bf16.vlgmr.msrb.gmra.mxu3 %vm3474_vm10, %v8392_v48  ;;  %v11542_v45 = vld [vmem:[%s13763_s25] sm:$0xff] }
 0xaee   : > { %11891 = vrot.lane.b32.xlu0 %v11890_v37, %s13330_s7  ;;  %v18134_v56 = vpop.f32.mrf.mxu0  ;;  %11595 = vmatpush.bf16.msra.mxu3 %v11547_v3  ;;  %v11545_v37 = vld [vmem:[%s13763_s25 + $0x18] sm:$0xff]  ;;  %s19749_s25 = scalar_lea.vmem [#allocation15], %s13737_s2 }
 0xaf0   : > { %v8307_v57 = vpop.f32.mrf.mxu3  ;;  %9111 = vmatpush.bf16.msrb.mxu0 %v11546_v43  ;;  %11596 = vmatpush.bf16.msra.mxu2 %v11546_v43 }
 0xaf1   : > { %v11865_v51 = vpack.i.bf16 %v8307_v57, %v8305_v14 }
 0xaf2   : > { %11597 = vmatpush.bf16.msra.mxu3 %v11546_v43 }
 0xaf3   : > { %11841 = vrot.lane.b32.xlu2 %v11840_v25, %s13332_s30  ;;  %11866 = vrot.lane.b32.xlu1 %v11865_v51, %s13327_s14  ;;  %v11960_v25 = vpack.i.bf16 %v18013_v42, %v19714_v38  ;;  %v19716_v42 = vld [vmem:[#allocation62_spill] sm:$0xff] }
 0xaf4   : > { %9112 = vmatpush.bf16.msrb.mxu0 %v11545_v37  ;;  %11598 = vmatpush.bf16.msra.mxu2 %v11545_v37  ;;  %v11975_v51 = vpack.i.bf16 %v19716_v42, %v19715_v31 }
 0xaf6   : > { %11906 = vrot.lane.b32.xlu0 %v11905_v8, %s13331_s1  ;;  %11599 = vmatpush.bf16.msra.mxu3 %v11545_v37 }
 0xaf8   : > { %v6408_v59 = vpop.xlane.xlu2 %6407  ;;  %9113 = vmatpush.bf16.msrb.mxu0 %v11544_v24  ;;  %11600 = vmatpush.bf16.msra.mxu2 %v11544_v24 }
 0xaf9   : > { %12624 = vrcp.f32 %v6408_v59 }
 0xafa   : > { %11601 = vmatpush.bf16.msra.mxu3 %v11544_v24  ;;  %v19724_v24 = vld [vmem:[#allocation68_spill] sm:$0xff] }
 0xafb   : > { %11856 = vrot.lane.b32.xlu2 %v11855_v40, %s13330_s7  ;;  %11881 = vrot.lane.b32.xlu1 %v11880_v52, %s13329_s9  ;;  %v19717_v52 = vld [vmem:[#allocation94_spill] sm:$0xff] }
 0xafc   : > { %9114 = vmatpush.bf16.msrb.mxu0 %v11543_v16  ;;  %11602 = vmatpush.bf16.msra.mxu2 %v11543_v16  ;;  %v11980_v60 = vpack.i.bf16 %v19718_v46, %v19717_v52 }
 0xafd   : > { %v18139_v44 = vpop.f32.mrf.mxu1  ;;  %v6411_v48 = vpop.xlane.xlu1 %6410 }
 0xafe   : > { %11921 = vrot.lane.b32.xlu0 %v11920_v27, %s13328_s27  ;;  %12626 = vrcp.f32 %v6411_v48  ;;  %11603 = vmatpush.bf16.msra.mxu3 %v11543_v16  ;;  %v19719_v48 = vld [vmem:[#allocation76_spill] sm:$0xff] }
 0xaff   : > { %v12625_v13 = vpop.eup %12624 }
 0xb00   : > { %v6670_v17 = vmul.f32 %v12625_v13, %v17987_v21  ;;  %9115 = vmatpush.bf16.msrb.mxu0 %v11542_v45  ;;  %11604 = vmatpush.bf16.msra.mxu2 %v11542_v45  ;;  %v11990_v13 = vpack.i.bf16 %v18015_v36, %v19719_v48 }
 0xb02   : > { %v8331_v61 = vpop.f32.mrf.mxu0  ;;  %v6798_v2 = vpack.c.bf16 %v6670_v17, %v6670_v17  ;;  %11605 = vmatpush.bf16.msra.mxu3 %v11542_v45 }
 0xb03   : > { %11871 = vrot.lane.b32.xlu2 %v11870_v32, %s13331_s1  ;;  %11896 = vrot.lane.b32.xlu1 %v11895_v10, %s13326_s8 }
 0xb04   : > { %v12627_v47 = vpop.eup %12626  ;;  %v8416_v21 = vunpack.c.l.b16 %v6798_v2 }
 0xb05   : > { %v6671_v0 = vmul.f32 %v12627_v47, %v17996_v9  ;;  %v18148_v30 = vpop.f32.mrf.mxu1 }
 0xb06   : > { %v12070_v22 = vpack.i.bf16 %v18148_v30, %v18139_v44 }
 0xb07   : > { %v6799_v49 = vpack.c.bf16 %v6671_v0, %v6671_v0 }
 0xb09   : > { %v8417_v26 = vunpack.c.l.b16 %v6799_v49 }
 0xb0a   : > { %v8333_v9 = vpop.f32.mrf.mxu0 }
 0xb0b   : > { %11886 = vrot.lane.b32.xlu2 %v11885_v39, %s13328_s27  ;;  %v8418_v14 = vpack.c.b16 %v8417_v26, %v8416_v21  ;;  %11911 = vrot.lane.b32.xlu1 %v11910_v33, %s13332_s30  ;;  %v11900_v29 = vpack.i.bf16 %v8333_v9, %v8331_v61  ;;  %v19720_v21 = vld [vmem:[#allocation122_spill] sm:$0xff] }
 0xb0c   : > { %v11995_v36 = vpack.i.bf16 %v19720_v21, %v18051_v11  ;;  %v19728_v21 = vld [vmem:[#allocation119_spill] sm:$0xff] }
 0xb0d   : > { %11279 = vmatmul.msk.bf16.vlgmr.msra.gmra.mxu0 %vm3474_vm10, %v8418_v14  ;;  %v19721_v14 = vld [vmem:[#allocation132_spill] sm:$0xff] }
 0xb13   : > { %11901 = vrot.lane.b32.xlu2 %v11900_v29, %s13327_s14  ;;  %11926 = vrot.lane.b32.xlu1 %v11925_v15, %s13330_s7  ;;  %v19722_v29 = vld [vmem:[#allocation171_spill] sm:$0xff] }
 0xb15   : > { %v11802_v27 = vpop.permute.xlu1 %11801 }
 0xb16   : > { %v11804_v17 = vunpack.i.h.bf16 %v11802_v27  ;;  %v11803_v61 = vunpack.i.l.bf16 %v11802_v27 }
 0xb18   : > { %v6414_v57 = vpop.xlane.xlu0 %6413  ;;  %v8915_v9 = vsel %vm3474_vm10, %v19721_v14, %v11804_v17  ;;  %v8914_v15 = vsel %vm3474_vm10, %v19722_v29, %v11803_v61  ;;  %v19725_v17 = vld [vmem:[#allocation137_spill] sm:$0xff] }
 0xb19   : > { %12628 = vrcp.f32 %v6414_v57  ;;  %v19723_v57 = vld [vmem:[#allocation108_spill] sm:$0xff]  ;;  %v19726_v61 = vld [vmem:[#allocation101_spill] sm:$0xff] }
 0xb1a   : > { %v12010_v16 = vpack.i.bf16 %v19724_v24, %v19723_v57  ;;  %v19730_v14 = vld [vmem:[#allocation57_spill] sm:$0xff] }
 0xb1b   : > { %11916 = vrot.lane.b32.xlu2 %v11915_v41, %s13329_s9  ;;  %11941 = vrot.lane.b32.xlu1 %v11940_v58, %s13331_s1 }
 0xb1d   : > { %v8357_v35 = vpop.f32.mrf.mxu1  ;;  %v11822_v3 = vpop.permute.xlu1 %11821 }
 0xb1e   : > { %v11823_v38 = vunpack.i.l.bf16 %v11822_v3 }
 0xb1f   : > { %v12629_v40 = vpop.eup %12628 }
 0xb20   : > { %v6672_v32 = vmul.f32 %v12629_v40, %v18030_v23 }
 0xb22   : > { %v6800_v2 = vpack.c.bf16 %v6672_v32, %v6672_v32 }
 0xb23   : > { %11931 = vrot.lane.b32.xlu2 %v11930_v55, %s13326_s8  ;;  %11956 = vrot.lane.b32.xlu1 %v11955_v28, %s13328_s27 }
 0xb24   : > { %v8442_v41 = vunpack.c.l.b16 %v6800_v2 }
 0xb25   : > { %v8359_v62 = vpop.f32.mrf.mxu1 }
 0xb26   : > { %v11935_v5 = vpack.i.bf16 %v8359_v62, %v8357_v35 }
 0xb28   : > { %11936 = vrot.lane.b32.xlu0 %v11935_v5, %s13327_s14 }
 0xb2b   : > { %11946 = vrot.lane.b32.xlu2 %v11945_v18, %s13332_s30  ;;  %v11807_v8 = vpop.permute.xlu0 %11806 }
 0xb2c   : > { %v11809_v0 = vunpack.i.h.bf16 %v11807_v8  ;;  %v11808_v49 = vunpack.i.l.bf16 %v11807_v8 }
 0xb2e   : > { %v8932_v7 = vsel %vm8930_vm12, %v8915_v9, %v11809_v0  ;;  %v8931_v58 = vsel %vm8930_vm12, %v8914_v15, %v11808_v49 }
 0xb30   : > { %11951 = vrot.lane.b32.xlu0 %v11950_v34, %s13329_s9  ;;  %v11824_v34 = vunpack.i.h.bf16 %v11822_v3 }
 0xb33   : > { %11961 = vrot.lane.b32.xlu2 %v11960_v25, %s13330_s7  ;;  %v11817_v10 = vpop.permute.xlu0 %11816 }
 0xb34   : > { %v11819_v28 = vunpack.i.h.bf16 %v11817_v10  ;;  %v11818_v62 = vunpack.i.l.bf16 %v11817_v10 }
 0xb38   : > { %11966 = vrot.lane.b32.xlu0 %v11965_v6, %s13326_s8 }
 0xb3b   : > { %11976 = vrot.lane.b32.xlu2 %v11975_v51, %s13331_s1 }
 0xb3e   : > { %v6417_v59 = vpop.xlane.xlu2 %6416 }
 0xb3f   : > { %12630 = vrcp.f32 %v6417_v59 }
 0xb40   : > { %11981 = vrot.lane.b32.xlu0 %v11980_v60, %s13332_s30  ;;  %v11832_v5 = vpop.permute.xlu0 %11831 }
 0xb41   : > { %v11834_v42 = vunpack.i.h.bf16 %v11832_v5  ;;  %v11833_v51 = vunpack.i.l.bf16 %v11832_v5  ;;  %v12000_v5 = vpack.i.bf16 %v18102_v4, %v18092_v19 }
 0xb43   : > { %11991 = vrot.lane.b32.xlu2 %v11990_v13, %s13328_s27  ;;  %v11837_v13 = vpop.permute.xlu1 %11836 }
 0xb44   : > { %v11839_v2 = vunpack.i.h.bf16 %v11837_v13  ;;  %v11838_v0 = vunpack.i.l.bf16 %v11837_v13 }
 0xb45   : > { %v12631_v47 = vpop.eup %12630 }
 0xb46   : > { %v6673_v39 = vmul.f32 %v12631_v47, %v18081_v12  ;;  %v11812_v33 = vpop.permute.xlu2 %11811  ;;  %v12025_v47 = vpack.i.bf16 %v19726_v61, %v19725_v17  ;;  %v8916_v9 = vsel %vm3474_vm10, %v19730_v14, %v11838_v0 }
 0xb47   : > { %v11814_v23 = vunpack.i.h.bf16 %v11812_v33  ;;  %v11813_v26 = vunpack.i.l.bf16 %v11812_v33  ;;  %v19727_v33 = vld [vmem:[#allocation78_spill] sm:$0xff] }
 0xb48   : > { %v6801_v63 = vpack.c.bf16 %v6673_v39, %v6673_v39  ;;  %11996 = vrot.lane.b32.xlu0 %v11995_v36, %s13330_s7  ;;  %v11847_v32 = vpop.permute.xlu0 %11846  ;;  %v11985_v36 = vpack.i.bf16 %v19728_v21, %v19727_v33 }
 0xb49   : > { %v8383_v12 = vpop.f32.mrf.mxu2  ;;  %v8948_v35 = vsel %vm8947_vm13, %v8931_v58, %v11813_v26  ;;  %v8949_v55 = vsel %vm8947_vm13, %v8932_v7, %v11814_v23  ;;  %v19729_v23 = vld [vmem:[#allocation64_spill] sm:$0xff]  ;;  %v11849_v7 = vunpack.i.h.bf16 %v11847_v32  ;;  %v11848_v58 = vunpack.i.l.bf16 %v11847_v32 }
 0xb4a   : > { %v8443_v11 = vunpack.c.l.b16 %v6801_v63  ;;  %v8965_v43 = vsel %vm8964_vm14, %v8948_v35, %v11818_v62  ;;  %v8966_v37 = vsel %vm8964_vm14, %v8949_v55, %v11819_v28  ;;  %v8917_v26 = vsel %vm3474_vm10, %v19729_v23, %v11839_v2 }
 0xb4b   : > { %v8982_v8 = vsel %vm8981_vm15, %v8965_v43, %v11823_v38  ;;  %v8983_v45 = vsel %vm8981_vm15, %v8966_v37, %v11824_v34  ;;  %v11852_v29 = vpop.permute.xlu1 %11851 }
 0xb4c   : > { %v8444_v18 = vpack.c.b16 %v8443_v11, %v8442_v41  ;;  %v11854_v28 = vunpack.i.h.bf16 %v11852_v29  ;;  %v11853_v62 = vunpack.i.l.bf16 %v11852_v29 }
 0xb4e   : > { %v11827_v25 = vpop.permute.xlu2 %11826  ;;  %11280 = vmatmul.msk.bf16.vlgmr.msrb.gmra.mxu1 %vm3474_vm10, %v8444_v18 }
 0xb4f   : > { %v11829_v6 = vunpack.i.h.bf16 %v11827_v25  ;;  %v11828_v31 = vunpack.i.l.bf16 %v11827_v25 }
 0xb50   : > { %12011 = vrot.lane.b32.xlu0 %v12010_v16, %s13331_s1 }
 0xb51   : > { %v8999_v40 = vsel %vm8998_vm0, %v8982_v8, %v11828_v31  ;;  %v9000_v59 = vsel %vm8998_vm0, %v8983_v45, %v11829_v6  ;;  %v8385_v52 = vpop.f32.mrf.mxu2 }
 0xb52   : > { %v9016_v46 = vsel %vm9015_vm1, %v8999_v40, %v11833_v51  ;;  %v9017_v60 = vsel %vm9015_vm1, %v9000_v59, %v11834_v42  ;;  %v11970_v48 = vpack.i.bf16 %v8385_v52, %v8383_v12  ;;  %v11862_v12 = vpop.permute.xlu0 %11861  ;;  %v19731_v59 = vld [vmem:[#allocation126_spill] sm:$0xff]  ;;  %v19732_v52 = vld [vmem:[#allocation59_spill] sm:$0xff] }
 0xb53   : > { %v9032_v27 = vpack.c.bf16 %v9017_v60, %v9016_v46  ;;  %v11864_v38 = vunpack.i.h.bf16 %v11862_v12  ;;  %v11863_v25 = vunpack.i.l.bf16 %v11862_v12  ;;  %v12015_v46 = vpack.i.bf16 %v19732_v52, %v19731_v59  ;;  %v19733_v60 = vld [vmem:[#allocation175_spill] sm:$0xff] }
 0xb54   : > { %11971 = vrot.lane.b32.xlu1 %v11970_v48, %s13327_s14  ;;  %v19734_v48 = vld [vmem:[#allocation174_spill] sm:$0xff]  ;;  %v19740_v52 = vld [vmem:[#allocation67_spill] sm:$0xff] }
 0xb55   : > { %9116 = vmatmul.bf16.vlgmr.msrb.gmra.mxu0 %v9032_v27 }
 0xb56   : > { %v11842_v10 = vpop.permute.xlu2 %11841 }
 0xb57   : > { %v11844_v49 = vunpack.i.h.bf16 %v11842_v10  ;;  %v11843_v39 = vunpack.i.l.bf16 %v11842_v10 }
 0xb58   : > { %12026 = vrot.lane.b32.xlu0 %v12025_v47, %s13328_s27 }
 0xb59   : > { %v8934_v15 = vsel %vm8930_vm12, %v8917_v26, %v11844_v49  ;;  %v8933_v63 = vsel %vm8930_vm12, %v8916_v9, %v11843_v39  ;;  %v12030_v26 = vpack.i.bf16 %v18095_v1, %v18085_v50 }
 0xb5a   : > { %v8950_v3 = vsel %vm8947_vm13, %v8933_v63, %v11848_v58  ;;  %v8951_v11 = vsel %vm8947_vm13, %v8934_v15, %v11849_v7  ;;  %v11877_v4 = vpop.permute.xlu0 %11876 }
 0xb5b   : > { %v8967_v18 = vsel %vm8964_vm14, %v8950_v3, %v11853_v62  ;;  %v8968_v43 = vsel %vm8964_vm14, %v8951_v11, %v11854_v28  ;;  %v11879_v17 = vunpack.i.h.bf16 %v11877_v4  ;;  %v11878_v61 = vunpack.i.l.bf16 %v11877_v4 }
 0xb5c   : > { %11986 = vrot.lane.b32.xlu1 %v11985_v36, %s13329_s9  ;;  %v12035_v4 = vpack.i.bf16 %v18134_v56, %v18122_v20 }
 0xb5e   : > { %v11857_v41 = vpop.permute.xlu2 %11856 }
 0xb5f   : > { %v11859_v35 = vunpack.i.h.bf16 %v11857_v41  ;;  %v11858_v55 = vunpack.i.l.bf16 %v11857_v41 }
 0xb61   : > { %v8984_v37 = vsel %vm8981_vm15, %v8967_v18, %v11858_v55  ;;  %v8985_v34 = vsel %vm8981_vm15, %v8968_v43, %v11859_v35  ;;  %v19735_v43 = vld [vmem:[#allocation83_spill] sm:$0xff] }
 0xb62   : > { %v9001_v31 = vsel %vm8998_vm0, %v8984_v37, %v11863_v25  ;;  %v9002_v19 = vsel %vm8998_vm0, %v8985_v34, %v11864_v38  ;;  %v11892_v14 = vpop.permute.xlu0 %11891  ;;  %v19736_v37 = vld [vmem:[#allocation125_spill] sm:$0xff]  ;;  %v19737_v25 = vld [vmem:[#allocation87_spill] sm:$0xff] }
 0xb63   : > { %v11894_v15 = vunpack.i.h.bf16 %v11892_v14  ;;  %v11893_v63 = vunpack.i.l.bf16 %v11892_v14  ;;  %v12045_v34 = vpack.i.bf16 %v19736_v37, %v19735_v43 }
 0xb64   : > { %12001 = vrot.lane.b32.xlu1 %v12000_v5, %s13326_s8 }
 0xb65   : > { %v11867_v57 = vpop.permute.xlu1 %11866 }
 0xb66   : > { %v11872_v24 = vpop.permute.xlu2 %11871  ;;  %v11869_v16 = vunpack.i.h.bf16 %v11867_v57  ;;  %v11868_v6 = vunpack.i.l.bf16 %v11867_v57  ;;  %v19738_v57 = vld [vmem:[#allocation74_spill] sm:$0xff] }
 0xb67   : > { %v11874_v8 = vunpack.i.h.bf16 %v11872_v24  ;;  %v11873_v45 = vunpack.i.l.bf16 %v11872_v24  ;;  %v12020_v24 = vpack.i.bf16 %v19738_v57, %v19737_v25 }
 0xb68   : > { %v9018_v42 = vsel %vm9015_vm1, %v9001_v31, %v11868_v6  ;;  %v9019_v51 = vsel %vm9015_vm1, %v9002_v19, %v11869_v16  ;;  %v19739_v16 = vld [vmem:[#allocation115_spill] sm:$0xff] }
 0xb69   : > { %v9033_v40 = vpack.c.bf16 %v9019_v51, %v9018_v42  ;;  %v8919_v27 = vsel %vm3474_vm10, %v19733_v60, %v11874_v8  ;;  %v8918_v13 = vsel %vm3474_vm10, %v19734_v48, %v11873_v45  ;;  %v12060_v6 = vpack.i.bf16 %v18075_v54, %v19739_v16  ;;  %v19742_v60 = vld [vmem:[#allocation91_spill] sm:$0xff]  ;;  %v19743_v48 = vld [vmem:[#allocation173_spill] sm:$0xff] }
 0xb6a   : > { %v8935_v0 = vsel %vm8930_vm12, %v8918_v13, %v11878_v61  ;;  %v8936_v49 = vsel %vm8930_vm12, %v8919_v27, %v11879_v17  ;;  %v11907_v31 = vpop.permute.xlu0 %11906 }
 0xb6b   : > { %9121 = vmatmul.bf16.gmra.mxu0 %v9033_v40  ;;  %v11909_v8 = vunpack.i.h.bf16 %v11907_v31  ;;  %v11908_v45 = vunpack.i.l.bf16 %v11907_v31 }
 0xb6c   : > { %12016 = vrot.lane.b32.xlu1 %v12015_v46, %s13332_s30  ;;  %v19741_v46 = vld [vmem:[#allocation110_spill] sm:$0xff] }
 0xb6d   : > { %v11882_v32 = vpop.permute.xlu1 %11881  ;;  %v12050_v54 = vpack.i.bf16 %v19741_v46, %v19740_v52  ;;  %v8921_v27 = vsel %vm3474_vm10, %v19742_v60, %v11909_v8  ;;  %v8920_v13 = vsel %vm3474_vm10, %v19743_v48, %v11908_v45 }
 0xb6e   : > { %v11887_v10 = vpop.permute.xlu2 %11886  ;;  %v11884_v47 = vunpack.i.h.bf16 %v11882_v32  ;;  %v11883_v2 = vunpack.i.l.bf16 %v11882_v32 }
 0xb6f   : > { %v11889_v39 = vunpack.i.h.bf16 %v11887_v10  ;;  %v11888_v33 = vunpack.i.l.bf16 %v11887_v10 }
 0xb70   : > { %v8409_v21 = vpop.f32.mrf.mxu3  ;;  %v8952_v36 = vsel %vm8947_vm13, %v8935_v0, %v11883_v2  ;;  %v8953_v23 = vsel %vm8947_vm13, %v8936_v49, %v11884_v47 }
 0xb71   : > { %v8969_v9 = vsel %vm8964_vm14, %v8952_v36, %v11888_v33  ;;  %v8970_v29 = vsel %vm8964_vm14, %v8953_v23, %v11889_v39 }
 0xb72   : > { %v8986_v35 = vsel %vm8981_vm15, %v8969_v9, %v11893_v63  ;;  %v8987_v55 = vsel %vm8981_vm15, %v8970_v29, %v11894_v15  ;;  %v11922_v32 = vpop.permute.xlu0 %11921  ;;  %v19744_v15 = vld [vmem:[#allocation71_spill] sm:$0xff] }
 0xb73   : > { %v11924_v36 = vunpack.i.h.bf16 %v11922_v32  ;;  %v11923_v23 = vunpack.i.l.bf16 %v11922_v32  ;;  %v12065_v63 = vpack.i.bf16 %v19744_v15, %v18097_v53 }
 0xb74   : > { %12031 = vrot.lane.b32.xlu1 %v12030_v26, %s13330_s7 }
 0xb75   : > { %v11897_v41 = vpop.permute.xlu1 %11896 }
 0xb76   : > { %v11902_v7 = vpop.permute.xlu2 %11901  ;;  %v11899_v58 = vunpack.i.h.bf16 %v11897_v41  ;;  %v11898_v12 = vunpack.i.l.bf16 %v11897_v41 }
 0xb77   : > { %v11904_v3 = vunpack.i.h.bf16 %v11902_v7  ;;  %v11903_v11 = vunpack.i.l.bf16 %v11902_v7 }
 0xb78   : > { %v9003_v50 = vsel %vm8998_vm0, %v8986_v35, %v11898_v12  ;;  %v9004_v1 = vsel %vm8998_vm0, %v8987_v55, %v11899_v58  ;;  %v8411_v28 = vpop.f32.mrf.mxu3  ;;  %v19745_v12 = vld [vmem:[#allocation98_spill] sm:$0xff] }
 0xb79   : > { %v9020_v62 = vsel %vm9015_vm1, %v9003_v50, %v11903_v11  ;;  %v9021_v5 = vsel %vm9015_vm1, %v9004_v1, %v11904_v3  ;;  %v12005_v18 = vpack.i.bf16 %v8411_v28, %v8409_v21  ;;  %v19746_v3 = vld [vmem:[#allocation144_spill] sm:$0xff] }
 0xb7a   : > { %v9034_v38 = vpack.c.bf16 %v9021_v5, %v9020_v62  ;;  %v12055_v11 = vpack.i.bf16 %v19746_v3, %v19745_v12 }
 0xb7b   : > { %12006 = vrot.lane.b32.xlu2 %v12005_v18, %s13327_s14 }
 0xb7c   : > { %12046 = vrot.lane.b32.xlu1 %v12045_v34, %s13331_s1  ;;  %9126 = vmatmul.bf16.vlgmr.msra.gmra.mxu2 %v9034_v38 }
 0xb7d   : > { %v11912_v19 = vpop.permute.xlu1 %11911 }
 0xb7e   : > { %v11917_v51 = vpop.permute.xlu2 %11916  ;;  %v11914_v40 = vunpack.i.h.bf16 %v11912_v19  ;;  %v11913_v59 = vunpack.i.l.bf16 %v11912_v19 }
 0xb7f   : > { %v11919_v10 = vunpack.i.h.bf16 %v11917_v51  ;;  %v11918_v20 = vunpack.i.l.bf16 %v11917_v51 }
 0xb80   : > { %v8937_v56 = vsel %vm8930_vm12, %v8920_v13, %v11913_v59  ;;  %v8938_v17 = vsel %vm8930_vm12, %v8921_v27, %v11914_v40 }
 0xb81   : > { %v8954_v0 = vsel %vm8947_vm13, %v8937_v56, %v11918_v20  ;;  %v8955_v49 = vsel %vm8947_vm13, %v8938_v17, %v11919_v10 }
 0xb82   : > { %v8971_v26 = vsel %vm8964_vm14, %v8954_v0, %v11923_v23  ;;  %v8972_v14 = vsel %vm8964_vm14, %v8955_v49, %v11924_v36 }
 0xb83   : > { %12021 = vrot.lane.b32.xlu2 %v12020_v24, %s13329_s9  ;;  %v19747_v24 = vld [vmem:[#allocation121_spill] sm:$0xff] }
 0xb84   : > { %12061 = vrot.lane.b32.xlu1 %v12060_v6, %s13328_s27  ;;  %v19748_v6 = vld [vmem:[#allocation172_spill] sm:$0xff] }
 0xb85   : > { %v11927_v61 = vpop.permute.xlu1 %11926 }
 0xb86   : > { %v11929_v39 = vunpack.i.h.bf16 %v11927_v61  ;;  %v11928_v33 = vunpack.i.l.bf16 %v11927_v61  ;;  %v11932_v21 = vpop.permute.xlu2 %11931 }
 0xb87   : > { %v11934_v9 = vunpack.i.h.bf16 %v11932_v21  ;;  %v11933_v29 = vunpack.i.l.bf16 %v11932_v21 }
 0xb88   : > { %v8988_v41 = vsel %vm8981_vm15, %v8971_v26, %v11928_v33  ;;  %v8989_v7 = vsel %vm8981_vm15, %v8972_v14, %v11929_v39 }
 0xb89   : > { %v9005_v50 = vsel %vm8998_vm0, %v8988_v41, %v11933_v29  ;;  %v9006_v1 = vsel %vm8998_vm0, %v8989_v7, %v11934_v9  ;;  %v18338_v9 = vld [vmem:[%s19749_s25] ss:$0 sm:$0xff]  ;;  %v19751_v7 = vld [vmem:[#allocation56_spill] sm:$0xff] }
 0xb8a   : > { %v8435_v42 = vpop.f32.mrf.mxu0 }
 0xb8b   : > { %12036 = vrot.lane.b32.xlu2 %v12035_v4, %s13326_s8 }
 0xb8d   : > { %v11942_v18 = vpop.permute.xlu1 %11941 }
 0xb8e   : > { %v11947_v5 = vpop.permute.xlu2 %11946  ;;  %v11944_v37 = vunpack.i.h.bf16 %v11942_v18  ;;  %v11943_v34 = vunpack.i.l.bf16 %v11942_v18  ;;  %v12728_v18 = vld [vmem:[#allocation2 + $0x30] sm:$0xff] }
 0xb8f   : > { %v11949_v25 = vunpack.i.h.bf16 %v11947_v5  ;;  %v11948_v57 = vunpack.i.l.bf16 %v11947_v5 }
 0xb90   : > { %v8923_v16 = vsel %vm3474_vm10, %v19747_v24, %v11944_v37  ;;  %v8922_v31 = vsel %vm3474_vm10, %v19748_v6, %v11943_v34 }
 0xb91   : > { %v8940_v44 = vsel %vm8930_vm12, %v8923_v16, %v11949_v25  ;;  %v8939_v30 = vsel %vm8930_vm12, %v8922_v31, %v11948_v57 }
 0xb92   : > { %v8437_v47 = vpop.f32.mrf.mxu0 }
 0xb93   : > { %v12040_v2 = vpack.i.bf16 %v8437_v47, %v8435_v42  ;;  %12051 = vrot.lane.b32.xlu2 %v12050_v54, %s13332_s30 }
 0xb95   : > { %12041 = vrot.lane.b32.xlu0 %v12040_v2, %s13327_s14  ;;  %v11957_v42 = vpop.permute.xlu1 %11956 }
 0xb96   : > { %v11962_v38 = vpop.permute.xlu2 %11961  ;;  %v11959_v45 = vunpack.i.h.bf16 %v11957_v42  ;;  %v11958_v40 = vunpack.i.l.bf16 %v11957_v42 }
 0xb97   : > { %v11964_v27 = vunpack.i.h.bf16 %v11962_v38  ;;  %v11963_v48 = vunpack.i.l.bf16 %v11962_v38 }
 0xb9a   : > { %v11937_v58 = vpop.permute.xlu0 %11936 }
 0xb9b   : > { %v11939_v35 = vunpack.i.h.bf16 %v11937_v58  ;;  %v11938_v55 = vunpack.i.l.bf16 %v11937_v58  ;;  %12066 = vrot.lane.b32.xlu2 %v12065_v63, %s13330_s7  ;;  %v19750_v63 = vld [vmem:[#allocation58_spill] sm:$0xff] }
 0xb9d   : > { %12056 = vrot.lane.b32.xlu0 %v12055_v11, %s13329_s9  ;;  %v9022_v53 = vsel %vm9015_vm1, %v9005_v50, %v11938_v55  ;;  %v9023_v28 = vsel %vm9015_vm1, %v9006_v1, %v11939_v35 }
 0xb9e   : > { %v9035_v62 = vpack.c.bf16 %v9023_v28, %v9022_v53  ;;  %v11977_v59 = vpop.permute.xlu2 %11976 }
 0xb9f   : > { %v11979_v33 = vunpack.i.h.bf16 %v11977_v59  ;;  %v11978_v21 = vunpack.i.l.bf16 %v11977_v59  ;;  %v12729_v59 = vld [vmem:[#allocation2] sm:$0xff] }
 0xba0   : > { %9131 = vmatmul.bf16.gmra.mxu2 %v9035_v62 }
 0xba1   : > { %v8925_v41 = vsel %vm3474_vm10, %v19750_v63, %v11979_v33  ;;  %v8924_v58 = vsel %vm3474_vm10, %v19751_v7, %v11978_v21  ;;  %v19753_v21 = vld [vmem:[#allocation73_spill] sm:$0xff] }
 0xba2   : > { %v11952_v43 = vpop.permute.xlu0 %11951 }
 0xba3   : > { %v11954_v19 = vunpack.i.h.bf16 %v11952_v43  ;;  %v11953_v4 = vunpack.i.l.bf16 %v11952_v43 }
 0xba5   : > { %12071 = vrot.lane.b32.xlu0 %v12070_v22, %s13326_s8  ;;  %v8957_v22 = vsel %vm8947_vm13, %v8940_v44, %v11954_v19  ;;  %v8956_v8 = vsel %vm8947_vm13, %v8939_v30, %v11953_v4 }
 0xba6   : > { %v8974_v52 = vsel %vm8964_vm14, %v8957_v22, %v11959_v45  ;;  %v8973_v46 = vsel %vm8964_vm14, %v8956_v8, %v11958_v40  ;;  %v11992_v36 = vpop.permute.xlu2 %11991 }
 0xba7   : > { %v8990_v32 = vsel %vm8981_vm15, %v8973_v46, %v11963_v48  ;;  %v8991_v10 = vsel %vm8981_vm15, %v8974_v52, %v11964_v27  ;;  %v11994_v53 = vunpack.i.h.bf16 %v11992_v36  ;;  %v11993_v28 = vunpack.i.l.bf16 %v11992_v36  ;;  %v12730_v27 = vld [vmem:[#allocation2 + $0x18] sm:$0xff] }
 0xbaa   : > { %v11967_v51 = vpop.permute.xlu0 %11966 }
 0xbab   : > { %v11969_v54 = vunpack.i.h.bf16 %v11967_v51  ;;  %v11968_v60 = vunpack.i.l.bf16 %v11967_v51 }
 0xbad   : > { %v9007_v17 = vsel %vm8998_vm0, %v8990_v32, %v11968_v60  ;;  %v9008_v61 = vsel %vm8998_vm0, %v8991_v10, %v11969_v54 }
 0xbb2   : > { %v11982_v47 = vpop.permute.xlu0 %11981 }
 0xbb3   : > { %v11984_v23 = vunpack.i.h.bf16 %v11982_v47  ;;  %v11983_v26 = vunpack.i.l.bf16 %v11982_v47 }
 0xbb5   : > { %v8942_v12 = vsel %vm8930_vm12, %v8925_v41, %v11984_v23  ;;  %v8941_v3 = vsel %vm8930_vm12, %v8924_v58, %v11983_v26 }
 0xbba   : > { %v11997_v62 = vpop.permute.xlu0 %11996 }
 0xbbb   : > { %v11999_v25 = vunpack.i.h.bf16 %v11997_v62  ;;  %v11998_v57 = vunpack.i.l.bf16 %v11997_v62 }
 0xbc6   : > { %v11972_v13 = vpop.permute.xlu1 %11971 }
 0xbc7   : > { %v11974_v20 = vunpack.i.h.bf16 %v11972_v13  ;;  %v11973_v56 = vunpack.i.l.bf16 %v11972_v13  ;;  %v12012_v13 = vpop.permute.xlu0 %12011 }
 0xbc9   : > { %v9024_v2 = vsel %vm9015_vm1, %v9007_v17, %v11973_v56  ;;  %v9025_v0 = vsel %vm9015_vm1, %v9008_v61, %v11974_v20  ;;  %v12013_v20 = vunpack.i.l.bf16 %v12012_v13  ;;  %v12014_v17 = vunpack.i.h.bf16 %v12012_v13  ;;  %v19754_v13 = vld [vmem:[#allocation117_spill] sm:$0xff] }
 0xbca   : > { %v9036_v39 = vpack.c.bf16 %v9025_v0, %v9024_v2  ;;  %v19752_v2 = vld [vmem:[#allocation104_spill] sm:$0xff] }
 0xbcb   : > { %v8461_v49 = vpop.f32.mrf.mxu1  ;;  %v8926_v0 = vsel %vm3474_vm10, %v19752_v2, %v12013_v20  ;;  %v8927_v36 = vsel %vm3474_vm10, %v19753_v21, %v12014_v17 }
 0xbcc   : > { %9136 = vmatmul.bf16.gmra.mxu2 %v9036_v39  ;;  %v12731_v39 = vld [vmem:[#allocation2 + $0x58] sm:$0xff] }
 0xbce   : > { %v11987_v14 = vpop.permute.xlu1 %11986 }
 0xbcf   : > { %v11989_v29 = vunpack.i.h.bf16 %v11987_v14  ;;  %v11988_v15 = vunpack.i.l.bf16 %v11987_v14  ;;  %v12027_v23 = vpop.permute.xlu0 %12026 }
 0xbd1   : > { %v8958_v35 = vsel %vm8947_vm13, %v8941_v3, %v11988_v15  ;;  %v8959_v55 = vsel %vm8947_vm13, %v8942_v12, %v11989_v29 }
 0xbd2   : > { %v9117_v11 = vpop.f32.mrf.mxu0  ;;  %v8975_v37 = vsel %vm8964_vm14, %v8958_v35, %v11993_v28  ;;  %v8976_v34 = vsel %vm8964_vm14, %v8959_v55, %v11994_v53  ;;  %v12732_v35 = vld [vmem:[#allocation2 + $0x50] sm:$0xff] }
 0xbd3   : > { %v9118_v50 = vadd.f32 %v18338_v9, %v9117_v11  ;;  %v8463_v1 = vpop.f32.mrf.mxu1  ;;  %v8992_v4 = vsel %vm8981_vm15, %v8975_v37, %v11998_v57  ;;  %v8993_v42 = vsel %vm8981_vm15, %v8976_v34, %v11999_v25 }
 0xbd4   : > { %v12075_v5 = vpack.i.bf16 %v8463_v1, %v8461_v49  ;;  %v12028_v1 = vunpack.i.l.bf16 %v12027_v23 }
 0xbd5   : > { %v18349_v43 = vadd.f32 %v12728_v18, %v9118_v50  ;;  %v12007_v38 = vpop.permute.xlu2 %12006  ;;  %v12029_v50 = vunpack.i.h.bf16 %v12027_v23 }
 0xbd6   : > { %12076 = vrot.lane.b32.xlu1 %v12075_v5, %s13327_s14  ;;  %v12002_v24 = vpop.permute.xlu1 %12001  ;;  %v12009_v16 = vunpack.i.h.bf16 %v12007_v38  ;;  %v12008_v6 = vunpack.i.l.bf16 %v12007_v38 }
 0xbd7   : > { %9175 = vadd.xlane.f32.xlu2 %v18349_v43  ;;  %v12004_v31 = vunpack.i.h.bf16 %v12002_v24  ;;  %v12003_v19 = vunpack.i.l.bf16 %v12002_v24 }
 0xbd9   : > { %v9009_v51 = vsel %vm8998_vm0, %v8992_v4, %v12003_v19  ;;  %v9010_v44 = vsel %vm8998_vm0, %v8993_v42, %v12004_v31  ;;  %v12733_v31 = vld [vmem:[#allocation2 + $0x68] sm:$0xff] }
 0xbda   : > { %v9119_v30 = vpop.f32.mrf.mxu0  ;;  %v9026_v22 = vsel %vm9015_vm1, %v9009_v51, %v12008_v6  ;;  %v9027_v8 = vsel %vm9015_vm1, %v9010_v44, %v12009_v16 }
 0xbdb   : > { %v9120_v45 = vadd.f32 %v18338_v9, %v9119_v30  ;;  %v9037_v40 = vpack.c.bf16 %v9027_v8, %v9026_v22  ;;  %v12734_v22 = vld [vmem:[#allocation2 + $0x8] sm:$0xff] }
 0xbdd   : > { %v18362_v52 = vadd.f32 %v12729_v59, %v9120_v45  ;;  %9141 = vmatmul.bf16.vlgmr.msra.gmra.mxu3 %v9037_v40  ;;  %v12022_v10 = vpop.permute.xlu2 %12021 }
 0xbde   : > { %v12017_v32 = vpop.permute.xlu1 %12016  ;;  %v12023_v49 = vunpack.i.l.bf16 %v12022_v10  ;;  %v12024_v14 = vunpack.i.h.bf16 %v12022_v10  ;;  %v19755_v10 = vld [vmem:[#allocation131_spill] sm:$0xff] }
 0xbdf   : > { %9177 = vadd.xlane.f32.xlu0 %v18362_v52  ;;  %v12018_v61 = vunpack.i.l.bf16 %v12017_v32  ;;  %v12019_v47 = vunpack.i.h.bf16 %v12017_v32 }
 0xbe1   : > { %v8943_v26 = vsel %vm8930_vm12, %v8926_v0, %v12018_v61  ;;  %v8944_v29 = vsel %vm8930_vm12, %v8927_v36, %v12019_v47 }
 0xbe2   : > { %v8960_v7 = vsel %vm8947_vm13, %v8943_v26, %v12023_v49  ;;  %v8961_v58 = vsel %vm8947_vm13, %v8944_v29, %v12024_v14 }
 0xbe3   : > { %v8977_v53 = vsel %vm8964_vm14, %v8960_v7, %v12028_v1  ;;  %v8978_v28 = vsel %vm8964_vm14, %v8961_v58, %v12029_v50 }
 0xbe5   : > { %v12037_v11 = vpop.permute.xlu2 %12036 }
 0xbe6   : > { %v12032_v15 = vpop.permute.xlu1 %12031  ;;  %v12039_v62 = vunpack.i.h.bf16 %v12037_v11  ;;  %v12038_v5 = vunpack.i.l.bf16 %v12037_v11 }
 0xbe7   : > { %v12034_v12 = vunpack.i.h.bf16 %v12032_v15  ;;  %v12033_v3 = vunpack.i.l.bf16 %v12032_v15 }
 0xbe8   : > { %v9122_v46 = vpop.f32.mrf.mxu0 }
 0xbe9   : > { %v9123_v56 = vadd.f32 %v18338_v9, %v9122_v46  ;;  %v8994_v18 = vsel %vm8981_vm15, %v8977_v53, %v12033_v3  ;;  %v8995_v37 = vsel %vm8981_vm15, %v8978_v28, %v12034_v12  ;;  %v19756_v53 = vld [vmem:[#allocation52_spill] sm:$0xff] }
 0xbea   : > { %v9011_v16 = vsel %vm8998_vm0, %v8994_v18, %v12038_v5  ;;  %v9012_v6 = vsel %vm8998_vm0, %v8995_v37, %v12039_v62 }
 0xbeb   : > { %v18372_v33 = vadd.f32 %v12731_v39, %v9123_v56 }
 0xbed   : > { %v12052_v40 = vpop.permute.xlu2 %12051 }
 0xbee   : > { %v12047_v45 = vpop.permute.xlu1 %12046 }
 0xbef   : > { %v12049_v46 = vunpack.i.h.bf16 %v12047_v45 }
 0xbf0   : > { %v9124_v54 = vpop.f32.mrf.mxu0 }
 0xbf1   : > { %v9125_v60 = vadd.f32 %v18338_v9, %v9124_v54  ;;  %v12048_v54 = vunpack.i.l.bf16 %v12047_v45  ;;  %v8929_v32 = vsel %vm3474_vm10, %v19754_v13, %v12049_v46 }
 0xbf3   : > { %v18366_v48 = vadd.f32 %v12730_v27, %v9125_v60  ;;  %v12054_v60 = vunpack.i.h.bf16 %v12052_v40  ;;  %v12053_v27 = vunpack.i.l.bf16 %v12052_v40  ;;  %v8928_v20 = vsel %vm3474_vm10, %v19755_v10, %v12048_v54 }
 0xbf5   : > { %9181 = vadd.xlane.f32.xlu2 %v18366_v48  ;;  %v8946_v47 = vsel %vm8930_vm12, %v8929_v32, %v12054_v60  ;;  %v8945_v2 = vsel %vm8930_vm12, %v8928_v20, %v12053_v27  ;;  %v12067_v0 = vpop.permute.xlu2 %12066 }
 0xbf6   : > { %v12062_v61 = vpop.permute.xlu1 %12061 }
 0xbf7   : > { %v12064_v36 = vunpack.i.h.bf16 %v12062_v61  ;;  %v12063_v23 = vunpack.i.l.bf16 %v12062_v61 }
 0xbff   : > { %v9127_v63 = vpop.f32.mrf.mxu2 }
 0xc00   : > { %9179 = vadd.xlane.f32.xlu1 %v18372_v33  ;;  %v9128_v41 = vadd.f32 %v18338_v9, %v9127_v63  ;;  %v12069_v63 = vunpack.i.h.bf16 %v12067_v0 }
 0xc02   : > { %v18382_v55 = vadd.f32 %v12732_v35, %v9128_v41  ;;  %v12068_v41 = vunpack.i.l.bf16 %v12067_v0 }
 0xc04   : > { %9183 = vadd.xlane.f32.xlu0 %v18382_v55 }
 0xc07   : > { %v12042_v34 = vpop.permute.xlu0 %12041  ;;  %v9129_v38 = vpop.f32.mrf.mxu2 }
 0xc08   : > { %v12044_v25 = vunpack.i.h.bf16 %v12042_v34  ;;  %v12043_v57 = vunpack.i.l.bf16 %v12042_v34  ;;  %v9130_v24 = vadd.f32 %v18338_v9, %v9129_v38 }
 0xc0a   : > { %v18392_v19 = vadd.f32 %v12733_v31, %v9130_v24  ;;  %v9028_v4 = vsel %vm9015_vm1, %v9011_v16, %v12043_v57  ;;  %v9029_v42 = vsel %vm9015_vm1, %v9012_v6, %v12044_v25  ;;  %v12735_v6 = vld [vmem:[#allocation2 + $0x48] sm:$0xff] }
 0xc0b   : > { %v9038_v51 = vpack.c.bf16 %v9029_v42, %v9028_v4 }
 0xc0c   : > { %9185 = vadd.xlane.f32.xlu1 %v18392_v19 }
 0xc0d   : > { %9146 = vmatmul.bf16.gmra.mxu3 %v9038_v51 }
 0xc0f   : > { %v12057_v59 = vpop.permute.xlu0 %12056 }
 0xc10   : > { %v12059_v56 = vunpack.i.h.bf16 %v12057_v59  ;;  %v12058_v17 = vunpack.i.l.bf16 %v12057_v59 }
 0xc12   : > { %v8963_v49 = vsel %vm8947_vm13, %v8946_v47, %v12059_v56  ;;  %v8962_v39 = vsel %vm8947_vm13, %v8945_v2, %v12058_v17  ;;  %v12737_v2 = vld [vmem:[#allocation2 + $0x20] sm:$0xff] }
 0xc13   : > { %v8980_v26 = vsel %vm8964_vm14, %v8963_v49, %v12064_v36  ;;  %v8979_v14 = vsel %vm8964_vm14, %v8962_v39, %v12063_v23 }
 0xc14   : > { %v8996_v58 = vsel %vm8981_vm15, %v8979_v14, %v12068_v41  ;;  %v8997_v12 = vsel %vm8981_vm15, %v8980_v26, %v12069_v63  ;;  %v12738_v26 = vld [vmem:[#allocation2 + $0x38] sm:$0xff] }
 0xc17   : > { %v12072_v21 = vpop.permute.xlu0 %12071 }
 0xc18   : > { %v12074_v29 = vunpack.i.h.bf16 %v12072_v21  ;;  %v12073_v15 = vunpack.i.l.bf16 %v12072_v21 }
 0xc1a   : > { %v9013_v35 = vsel %vm8998_vm0, %v8996_v58, %v12073_v15  ;;  %v9014_v50 = vsel %vm8998_vm0, %v8997_v12, %v12074_v29  ;;  %v12739_v15 = vld [vmem:[#allocation2 + $0x10] sm:$0xff]  ;;  %v12740_v58 = vld [vmem:[#allocation2 + $0x60] sm:$0xff] }
 0xc23   : > { %v9132_v44 = vpop.f32.mrf.mxu2 }
 0xc24   : > { %v9133_v30 = vadd.f32 %v18338_v9, %v9132_v44  ;;  %v12736_v44 = vld [vmem:[#allocation2 + $0x40] sm:$0xff] }
 0xc26   : > { %v18398_v8 = vadd.f32 %v12734_v22, %v9133_v30 }
 0xc28   : > { %9187 = vadd.xlane.f32.xlu1 %v18398_v8 }
 0xc2b   : > { %v9134_v38 = vpop.f32.mrf.mxu2 }
 0xc2c   : > { %v9135_v57 = vadd.f32 %v18338_v9, %v9134_v38  ;;  %v11564_v38 = vld [vmem:[%s13793_s4 + $0x74] sm:$0xf] }
 0xc2e   : > { %v18428_v31 = vadd.f32 %v12735_v6, %v9135_v57  ;;  %v11373_v57 = vld [vmem:[%s13793_s4 + $0x78] sm:$0xf0]  ;;  %v11363_v6 = vld [vmem:[%s13793_s4 + $0x60] sm:$0xf] }
 0xc48   : > { %v12077_v7 = vpop.permute.xlu1 %12076 }
 0xc49   : > { %v12079_v3 = vunpack.i.h.bf16 %v12077_v7  ;;  %v12078_v11 = vunpack.i.l.bf16 %v12077_v7 }
 0xc4a   : > { %v9176_v1 = vpop.xlane.xlu2 %9175 }
 0xc4b   : > { %v9207_v28 = vmul.f32 %v9176_v1, %v19756_v53  ;;  %v9030_v62 = vsel %vm9015_vm1, %v9013_v35, %v12078_v11  ;;  %v9031_v5 = vsel %vm9015_vm1, %v9014_v50, %v12079_v3 }
 0xc4c   : > { %v9039_v18 = vpack.c.bf16 %v9031_v5, %v9030_v62  ;;  %v12741_v62 = vld [vmem:[#allocation2 + $0x70] sm:$0xff] }
 0xc4d   : > { %v18419_v37 = vsub.f32 %v18349_v43, %v9207_v28 }
 0xc4e   : > { %9151 = vmatmul.bf16.gmra.mxu3 %v9039_v18  ;;  %v11371_v18 = vld [vmem:[%s13793_s4 + $0x70] sm:$0xf] }
 0xc4f   : > { %v9239_v34 = vmul.f32 %v18419_v37, %v18419_v37  ;;  %v9137_v42 = vpop.f32.mrf.mxu2 }
 0xc50   : > { %v9138_v51 = vadd.f32 %v18338_v9, %v9137_v42  ;;  %v11562_v42 = vld [vmem:[%s13793_s4 + $0x64] sm:$0xf] }
 0xc51   : > { %9255 = vadd.xlane.f32.xlu2 %v9239_v34  ;;  %v11565_v34 = vld [vmem:[%s13793_s4 + $0x74] sm:$0xf0] }
 0xc52   : > { %v9178_v25 = vpop.xlane.xlu0 %9177  ;;  %v18434_v30 = vadd.f32 %v12736_v44, %v9138_v51  ;;  %v11365_v44 = vld [vmem:[%s13793_s4 + $0x68] sm:$0xf0] }
 0xc53   : > { %v9208_v24 = vmul.f32 %v9178_v25, %v19756_v53  ;;  %v11372_v25 = vor.u32 %v11565_v34, %v11371_v18 }
 0xc55   : > { %v18426_v16 = vsub.f32 %v18362_v52, %v9208_v24  ;;  %v11376_v24 = vor.u32 %v11564_v38, %v11373_v57  ;;  %9643 = vmatpush.bf16.msrb.mxu3 %v11372_v25 }
 0xc57   : > { %v9240_v4 = vmul.f32 %v18426_v16, %v18426_v16  ;;  %v9139_v10 = vpop.f32.mrf.mxu2  ;;  %9692 = vmatpush.bf16.msra.mxu0 %v11376_v24 }
 0xc58   : > { %v9140_v17 = vadd.f32 %v18338_v9, %v9139_v10 }
 0xc59   : > { %9257 = vadd.xlane.f32.xlu0 %v9240_v4  ;;  %9189 = vadd.xlane.f32.xlu2 %v18428_v31  ;;  %v11563_v4 = vld [vmem:[%s13793_s4 + $0x64] sm:$0xf0] }
 0xc5a   : > { %v18456_v0 = vadd.f32 %v12737_v2, %v9140_v17  ;;  %v11364_v51 = vor.u32 %v11563_v4, %v11363_v6  ;;  %v11559_v17 = vld [vmem:[%s13793_s4 + $0x44] sm:$0xf0]  ;;  %v11349_v2 = vld [vmem:[%s13793_s4 + $0x48] sm:$0xf0] }
 0xc5c   : > { %9644 = vmatpush.bf16.msrb.mxu3 %v11364_v51  ;;  %v11553_v51 = vld [vmem:[%s13793_s4 + $0x14] sm:$0xf0] }
 0xc60   : > { %v9142_v54 = vpop.f32.mrf.mxu3 }
 0xc61   : > { %9191 = vadd.xlane.f32.xlu2 %v18434_v30  ;;  %v9143_v23 = vadd.f32 %v18338_v9, %v9142_v54 }
 0xc63   : > { %v18470_v63 = vadd.f32 %v12739_v15, %v9143_v23  ;;  %v11557_v23 = vld [vmem:[%s13793_s4 + $0x34] sm:$0xf0]  ;;  %v11341_v15 = vld [vmem:[%s13793_s4 + $0x38] sm:$0xf0] }
 0xc68   : > { %v9182_v22 = vpop.xlane.xlu2 %9181  ;;  %v9144_v47 = vpop.f32.mrf.mxu3 }
 0xc69   : > { %v9210_v45 = vmul.f32 %v9182_v22, %v19756_v53  ;;  %v9145_v39 = vadd.f32 %v18338_v9, %v9144_v47  ;;  %v11368_v22 = vor.u32 %v11562_v42, %v11365_v44  ;;  %v11323_v42 = vld [vmem:[%s13793_s4 + $0x10] sm:$0xf] }
 0xc6b   : > { %v18439_v40 = vsub.f32 %v18366_v48, %v9210_v45  ;;  %v18465_v14 = vadd.f32 %v12738_v26, %v9145_v39  ;;  %9693 = vmatpush.bf16.msra.mxu0 %v11368_v22  ;;  %v11355_v45 = vld [vmem:[%s13793_s4 + $0x50] sm:$0xf] }
 0xc6d   : > { %v9242_v59 = vmul.f32 %v18439_v40, %v18439_v40 }
 0xc6f   : > { %9261 = vadd.xlane.f32.xlu1 %v9242_v59  ;;  %v11561_v59 = vld [vmem:[%s13793_s4 + $0x54] sm:$0xf0] }
 0xc70   : > { %v11356_v54 = vor.u32 %v11561_v59, %v11355_v45  ;;  %v11324_v45 = vor.u32 %v11553_v51, %v11323_v42  ;;  %v11552_v59 = vld [vmem:[%s13793_s4 + $0x14] sm:$0xf] }
 0xc72   : > { %9645 = vmatpush.bf16.msrb.mxu3 %v11356_v54 }
 0xc73   : > { %v9180_v46 = vpop.xlane.xlu1 %9179 }
 0xc74   : > { %v9209_v60 = vmul.f32 %v9180_v46, %v19756_v53  ;;  %v11560_v46 = vld [vmem:[%s13793_s4 + $0x54] sm:$0xf] }
 0xc76   : > { %v18445_v27 = vsub.f32 %v18372_v33, %v9209_v60  ;;  %v11357_v60 = vld [vmem:[%s13793_s4 + $0x58] sm:$0xf0] }
 0xc77   : > { %v9184_v13 = vpop.xlane.xlu0 %9183 }
 0xc78   : > { %v9241_v32 = vmul.f32 %v18445_v27, %v18445_v27  ;;  %v9211_v20 = vmul.f32 %v9184_v13, %v19756_v53  ;;  %v11360_v13 = vor.u32 %v11560_v46, %v11357_v60  ;;  %v11325_v46 = vld [vmem:[%s13793_s4 + $0x18] sm:$0xf0] }
 0xc79   : > { %v11328_v54 = vor.u32 %v11552_v59, %v11325_v46 }
 0xc7a   : > { %9259 = vadd.xlane.f32.xlu0 %v9241_v32  ;;  %v18451_v56 = vsub.f32 %v18382_v55, %v9211_v20  ;;  %9694 = vmatpush.bf16.msra.mxu0 %v11360_v13  ;;  %v11347_v20 = vld [vmem:[%s13793_s4 + $0x40] sm:$0xf] }
 0xc7b   : > { %v11348_v47 = vor.u32 %v11559_v17, %v11347_v20  ;;  %v12742_v13 = vld [vmem:[#allocation2 + $0x78] sm:$0xff] }
 0xc7c   : > { %v9243_v61 = vmul.f32 %v18451_v56, %v18451_v56  ;;  %v11315_v17 = vld [vmem:[%s13793_s4] sm:$0xf] }
 0xc7d   : > { %9646 = vmatpush.bf16.msrb.mxu3 %v11348_v47  ;;  %v11550_v47 = vld [vmem:[%s13793_s4 + $0x4] sm:$0xf] }
 0xc7e   : > { %9263 = vadd.xlane.f32.xlu1 %v9243_v61  ;;  %v11558_v61 = vld [vmem:[%s13793_s4 + $0x44] sm:$0xf] }
 0xc7f   : > { %v9186_v49 = vpop.xlane.xlu1 %9185  ;;  %v11352_v39 = vor.u32 %v11558_v61, %v11349_v2  ;;  %v11551_v61 = vld [vmem:[%s13793_s4 + $0x4] sm:$0xf0] }
 0xc80   : > { %v9212_v21 = vmul.f32 %v9186_v49, %v19756_v53 }
 0xc81   : > { %9695 = vmatpush.bf16.msra.mxu0 %v11352_v39  ;;  %v11316_v39 = vor.u32 %v11551_v61, %v11315_v17 }
 0xc82   : > { %9193 = vadd.xlane.f32.xlu0 %v18456_v0  ;;  %v18462_v36 = vsub.f32 %v18392_v19, %v9212_v21  ;;  %v11339_v21 = vld [vmem:[%s13793_s4 + $0x30] sm:$0xf] }
 0xc83   : > { %v11340_v26 = vor.u32 %v11557_v23, %v11339_v21  ;;  %v11317_v21 = vld [vmem:[%s13793_s4 + $0x8] sm:$0xf0] }
 0xc84   : > { %v9244_v29 = vmul.f32 %v18462_v36, %v18462_v36 }
 0xc85   : > { %9647 = vmatpush.bf16.msrb.mxu3 %v11340_v26 }
 0xc86   : > { %9265 = vadd.xlane.f32.xlu2 %v9244_v29  ;;  %9197 = vadd.xlane.f32.xlu1 %v18465_v14  ;;  %v11556_v29 = vld [vmem:[%s13793_s4 + $0x34] sm:$0xf] }
 0xc8a   : > { %9195 = vadd.xlane.f32.xlu0 %v18470_v63 }
 0xc90   : > { %v9147_v41 = vpop.f32.mrf.mxu3 }
 0xc91   : > { %v9148_v7 = vadd.f32 %v18338_v9, %v9147_v41  ;;  %v11344_v41 = vor.u32 %v11556_v29, %v11341_v15  ;;  %v11320_v29 = vor.u32 %v11550_v47, %v11317_v21 }
 0xc93   : > { %v18474_v12 = vadd.f32 %v12740_v58, %v9148_v7  ;;  %v11331_v7 = vld [vmem:[%s13793_s4 + $0x20] sm:$0xf]  ;;  %v11555_v58 = vld [vmem:[%s13793_s4 + $0x24] sm:$0xf0]  ;;  %9696 = vmatpush.bf16.msra.mxu0 %v11344_v41 }
 0xc95   : > { %9199 = vadd.xlane.f32.xlu1 %v18474_v12 }
 0xc98   : > { %v9149_v1 = vpop.f32.mrf.mxu3 }
 0xc99   : > { %v9150_v28 = vadd.f32 %v18338_v9, %v9149_v1 }
 0xc9b   : > { %v9188_v3 = vpop.xlane.xlu1 %9187  ;;  %v18484_v5 = vadd.f32 %v12741_v62, %v9150_v28  ;;  %v11332_v28 = vor.u32 %v11555_v58, %v11331_v7 }
 0xc9c   : > { %v9213_v11 = vmul.f32 %v9188_v3, %v19756_v53  ;;  %v11554_v3 = vld [vmem:[%s13793_s4 + $0x24] sm:$0xf] }
 0xc9d   : > { %9648 = vmatpush.bf16.msrb.mxu3 %v11332_v28 }
 0xc9e   : > { %v18479_v35 = vsub.f32 %v18398_v8, %v9213_v11  ;;  %v11333_v11 = vld [vmem:[%s13793_s4 + $0x28] sm:$0xf0] }
 0xc9f   : > { %v11336_v34 = vor.u32 %v11554_v3, %v11333_v11 }
 0xca0   : > { %v9245_v50 = vmul.f32 %v18479_v35, %v18479_v35 }
 0xca1   : > { %9697 = vmatpush.bf16.msra.mxu0 %v11336_v34  ;;  %9649 = vmatpush.bf16.msrb.mxu3 %v11324_v45 }
 0xca2   : > { %9267 = vadd.xlane.f32.xlu2 %v9245_v50 }
 0xca5   : > { %9698 = vmatpush.bf16.msra.mxu0 %v11328_v54  ;;  %9650 = vmatpush.bf16.msrb.mxu3 %v11316_v39 }
 0xca9   : > { %9699 = vmatpush.bf16.msra.mxu0 %v11320_v29 }
 0xcaa   : > { %9201 = vadd.xlane.f32.xlu2 %v18484_v5 }
 0xcc4   : > { %v9256_v32 = vpop.xlane.xlu2 %9255 }
 0xcc5   : > { %v9287_v10 = vmul.f32 %v9256_v32, %v19756_v53 }
 0xcc7   : > { %v18504_v49 = vadd.f32 1e-05, %v9287_v10 }
 0xcc9   : > { %12632 = vrsqrt.f32 %v18504_v49  ;;  %vm9325_vm3 = vweird.f32 %v18504_v49 }
 0xccc   : > { %v9258_v50 = vpop.xlane.xlu0 %9257  ;;  %v9190_v1 = vpop.xlane.xlu2 %9189 }
 0xccd   : > { %v9288_v62 = vmul.f32 %v9258_v50, %v19756_v53  ;;  %v9214_v18 = vmul.f32 %v9190_v1, %v19756_v53 }
 0xccf   : > { %v12633_v38 = vpop.eup %12632  ;;  %v9304_v25 = vadd.f32 1e-05, %v9288_v62  ;;  %v18518_v57 = vsub.f32 %v18428_v31, %v9214_v18  ;;  %v18545_v62 = vld [vmem:[%s19757_s0] ss:$0 sm:$0xff] }
 0xcd0   : > { %v9320_v24 = vmul.f32 %v12633_v38, %v18504_v49  ;;  %vm9326_vm2 = vweird.f32 %v12633_v38  ;;  %v12743_v49 = vld [vmem:[#allocation2 + $0x28] sm:$0xff] }
 0xcd1   : > { %12634 = vrsqrt.f32 %v9304_v25  ;;  %v9152_v6 = vpop.f32.mrf.mxu3  ;;  %v9246_v4 = vmul.f32 %v18518_v57, %v18518_v57  ;;  %vm9327_vm6 = vmor %vm9325_vm3, %vm9326_vm2  ;;  %vm9335_vm5 = vweird.f32 %v9304_v25 }
 0xcd2   : > { %v9321_v44 = vmul.f32 %v12633_v38, %v9320_v24  ;;  %v9153_v22 = vadd.f32 %v18338_v9, %v9152_v6 }
 0xcd3   : > { %9269 = vadd.xlane.f32.xlu0 %v9246_v4  ;;  %v18552_v4 = vld [vmem:[%s19758_s3] ss:$0 sm:$0xff] }
 0xcd4   : > { %v9322_v60 = vmul.f32 0.5, %v9321_v44  ;;  %v18528_v32 = vadd.f32 %v12742_v13, %v9153_v22  ;;  %v9192_v10 = vpop.xlane.xlu2 %9191 }
 0xcd5   : > { %v9215_v20 = vmul.f32 %v9192_v10, %v19756_v53 }
 0xcd6   : > { %v9323_v2 = vsub.f32 1.5, %v9322_v60  ;;  %9203 = vadd.xlane.f32.xlu2 %v18528_v32 }
 0xcd7   : > { %v12635_v23 = vpop.eup %12634  ;;  %v18537_v26 = vsub.f32 %v18434_v30, %v9215_v20 }
 0xcd8   : > { %v9324_v15 = vmul.f32 %v12633_v38, %v9323_v2  ;;  %v9330_v41 = vmul.f32 %v12635_v23, %v9304_v25  ;;  %vm9336_vm4 = vweird.f32 %v12635_v23 }
 0xcd9   : > { %v9247_v7 = vmul.f32 %v18537_v26, %v18537_v26  ;;  %v9154_v3 = vpop.f32.mrf.mxu3  ;;  %vm9337_vm7 = vmor %vm9335_vm5, %vm9336_vm4 }
 0xcda   : > { %v9331_v58 = vmul.f32 %v12635_v23, %v9330_v41  ;;  %v9328_v11 = vsel %vm9327_vm6, %v12633_v38, %v9324_v15  ;;  %v9155_v1 = vadd.f32 %v18338_v9, %v9154_v3 }
 0xcdb   : > { %9271 = vadd.xlane.f32.xlu0 %v9247_v7  ;;  %v9479_v18 = vmul.f32 %v9328_v11, %v18419_v37 }
 0xcdc   : > { %v9332_v50 = vmul.f32 0.5, %v9331_v58  ;;  %v18548_v24 = vadd.f32 %v12743_v49, %v9155_v1 }
 0xcdd   : > { %v9498_v38 = vmul.f32 %v18545_v62, %v9479_v18 }
 0xcde   : > { %v9333_v28 = vsub.f32 1.5, %v9332_v50 }
 0xcdf   : > { %v9517_v44 = vadd.f32 %v18552_v4, %v9498_v38 }
 0xce0   : > { %v9334_v34 = vmul.f32 %v12635_v23, %v9333_v28 }
 0xce2   : > { %v9338_v6 = vsel %vm9337_vm7, %v12635_v23, %v9334_v34  ;;  %v9262_v42 = vpop.xlane.xlu1 %9261 }
 0xce3   : > { %v9480_v9 = vmul.f32 %v9338_v6, %v18426_v16  ;;  %9205 = vadd.xlane.f32.xlu0 %v18548_v24  ;;  %v9290_v51 = vmul.f32 %v9262_v42, %v19756_v53 }
 0xce5   : > { %v9499_v37 = vmul.f32 %v18545_v62, %v9480_v9  ;;  %v9306_v25 = vadd.f32 1e-05, %v9290_v51 }
 0xce7   : > { %v9518_v22 = vadd.f32 %v18552_v4, %v9499_v37  ;;  %12636 = vrsqrt.f32 %v9306_v25  ;;  %vm9355_vm9 = vweird.f32 %v9306_v25 }
 0xce9   : > { %v9533_v45 = vpack.c.bf16 %v9518_v22, %v9517_v44 }
 0xceb   : > { %9651 = vmatmul.bf16.vlgmr.msrb.gmra.mxu3 %v9533_v45  ;;  %9700 = vmatmul.bf16.vlgmr.msra.gmra.mxu0 %v9533_v45 }
 0xced   : > { %v9260_v59 = vpop.xlane.xlu0 %9259  ;;  %v12637_v46 = vpop.eup %12636 }
 0xcee   : > { %v9289_v16 = vmul.f32 %v9260_v59, %v19756_v53  ;;  %v9350_v54 = vmul.f32 %v12637_v46, %v9306_v25  ;;  %vm9356_vm8 = vweird.f32 %v12637_v46 }
 0xcef   : > { %vm9357_vm10 = vmor %vm9355_vm9, %vm9356_vm8 }
 0xcf0   : > { %v9305_v60 = vadd.f32 1e-05, %v9289_v16  ;;  %v9351_v13 = vmul.f32 %v12637_v46, %v9350_v54 }
 0xcf1   : > { %v9264_v10 = vpop.xlane.xlu1 %9263 }
 0xcf2   : > { %12638 = vrsqrt.f32 %v9305_v60  ;;  %v9352_v20 = vmul.f32 0.5, %v9351_v13  ;;  %v9291_v17 = vmul.f32 %v9264_v10, %v19756_v53  ;;  %vm9345_vm12 = vweird.f32 %v9305_v60 }
 0xcf4   : > { %v9353_v61 = vsub.f32 1.5, %v9352_v20  ;;  %v9307_v47 = vadd.f32 1e-05, %v9291_v17 }
 0xcf5   : > { %v9194_v2 = vpop.xlane.xlu0 %9193 }
 0xcf6   : > { %v9216_v39 = vmul.f32 %v9194_v2, %v19756_v53  ;;  %12640 = vrsqrt.f32 %v9307_v47  ;;  %v9354_v29 = vmul.f32 %v12637_v46, %v9353_v61  ;;  %vm9365_vm15 = vweird.f32 %v9307_v47 }
 0xcf8   : > { %v12639_v21 = vpop.eup %12638  ;;  %v18565_v23 = vsub.f32 %v18456_v0, %v9216_v39  ;;  %v9358_v28 = vsel %vm9357_vm10, %v12637_v46, %v9354_v29 }
 0xcf9   : > { %v9340_v15 = vmul.f32 %v12639_v21, %v9305_v60  ;;  %v9198_v41 = vpop.xlane.xlu1 %9197  ;;  %v9266_v7 = vpop.xlane.xlu2 %9265  ;;  %vm9346_vm11 = vweird.f32 %v12639_v21  ;;  %v9482_v37 = vmul.f32 %v9358_v28, %v18439_v40 }
 0xcfa   : > { %v9248_v58 = vmul.f32 %v18565_v23, %v18565_v23  ;;  %v9218_v11 = vmul.f32 %v9198_v41, %v19756_v53  ;;  %v9292_v50 = vmul.f32 %v9266_v7, %v19756_v53  ;;  %vm9347_vm13 = vmor %vm9345_vm12, %vm9346_vm11 }
 0xcfb   : > { %v9341_v3 = vmul.f32 %v12639_v21, %v9340_v15  ;;  %v9501_v54 = vmul.f32 %v18545_v62, %v9482_v37 }
 0xcfc   : > { %9273 = vadd.xlane.f32.xlu1 %v9248_v58  ;;  %v12641_v1 = vpop.eup %12640  ;;  %v18572_v34 = vsub.f32 %v18465_v14, %v9218_v11  ;;  %v9308_v49 = vadd.f32 1e-05, %v9292_v50 }
 0xcfd   : > { %v9342_v18 = vmul.f32 0.5, %v9341_v3  ;;  %v9196_v6 = vpop.xlane.xlu0 %9195  ;;  %v9360_v38 = vmul.f32 %v12641_v1, %v9307_v47  ;;  %v9520_v61 = vadd.f32 %v18552_v4, %v9501_v54  ;;  %vm9366_vm14 = vweird.f32 %v12641_v1 }
 0xcfe   : > { %v9217_v9 = vmul.f32 %v9196_v6, %v19756_v53  ;;  %12642 = vrsqrt.f32 %v9308_v49  ;;  %v9250_v51 = vmul.f32 %v18572_v34, %v18572_v34  ;;  %vm9367_vm0 = vmor %vm9365_vm15, %vm9366_vm14  ;;  %vm9375_vm2 = vweird.f32 %v9308_v49 }
 0xcff   : > { %v9343_v42 = vsub.f32 1.5, %v9342_v18  ;;  %v9361_v25 = vmul.f32 %v12641_v1, %v9360_v38 }
 0xd00   : > { %v18579_v44 = vsub.f32 %v18470_v63, %v9217_v9  ;;  %9277 = vadd.xlane.f32.xlu2 %v9250_v51 }
 0xd01   : > { %v9344_v22 = vmul.f32 %v12639_v21, %v9343_v42  ;;  %v9362_v45 = vmul.f32 0.5, %v9361_v25 }
 0xd02   : > { %v9249_v59 = vmul.f32 %v18579_v44, %v18579_v44 }
 0xd03   : > { %v9348_v46 = vsel %vm9347_vm13, %v12639_v21, %v9344_v22  ;;  %v9363_v40 = vsub.f32 1.5, %v9362_v45 }
 0xd04   : > { %v9481_v16 = vmul.f32 %v9348_v46, %v18445_v27  ;;  %9275 = vadd.xlane.f32.xlu1 %v9249_v59  ;;  %v12643_v13 = vpop.eup %12642 }
 0xd05   : > { %v9370_v10 = vmul.f32 %v12643_v13, %v9308_v49  ;;  %v9364_v2 = vmul.f32 %v12641_v1, %v9363_v40  ;;  %vm9376_vm1 = vweird.f32 %v12643_v13 }
 0xd06   : > { %v9500_v20 = vmul.f32 %v18545_v62, %v9481_v16  ;;  %vm9377_vm3 = vmor %vm9375_vm2, %vm9376_vm1 }
 0xd07   : > { %v9371_v17 = vmul.f32 %v12643_v13, %v9370_v10  ;;  %v9368_v7 = vsel %vm9367_vm0, %v12641_v1, %v9364_v2 }
 0xd08   : > { %v9519_v60 = vadd.f32 %v18552_v4, %v9500_v20  ;;  %v9200_v39 = vpop.xlane.xlu1 %9199  ;;  %v9483_v11 = vmul.f32 %v9368_v7, %v18451_v56 }
 0xd09   : > { %v9372_v29 = vmul.f32 0.5, %v9371_v17  ;;  %v9219_v21 = vmul.f32 %v9200_v39, %v19756_v53 }
 0xd0a   : > { %v9534_v27 = vpack.c.bf16 %v9520_v61, %v9519_v60  ;;  %v9502_v18 = vmul.f32 %v18545_v62, %v9483_v11 }
 0xd0b   : > { %v9373_v15 = vsub.f32 1.5, %v9372_v29  ;;  %v18590_v41 = vsub.f32 %v18474_v12, %v9219_v21 }
 0xd0c   : > { %9656 = vmatmul.bf16.gmra.mxu3 %v9534_v27  ;;  %9705 = vmatmul.bf16.gmra.mxu0 %v9534_v27  ;;  %v9521_v1 = vadd.f32 %v18552_v4, %v9502_v18 }
 0xd0d   : > { %v9374_v58 = vmul.f32 %v12643_v13, %v9373_v15  ;;  %v9251_v3 = vmul.f32 %v18590_v41, %v18590_v41 }
 0xd0f   : > { %v9378_v50 = vsel %vm9377_vm3, %v12643_v13, %v9374_v58  ;;  %9279 = vadd.xlane.f32.xlu0 %v9251_v3 }
 0xd10   : > { %v9484_v47 = vmul.f32 %v9378_v50, %v18462_v36 }
 0xd12   : > { %v9503_v28 = vmul.f32 %v18545_v62, %v9484_v47  ;;  %v11581_v47 = vld [vmem:[%s13801_s26 + $0x78] sm:$0xff] }
 0xd13   : > { %10226 = vmatpush.bf16.msrb.mxu2 %v11581_v47 }
 0xd14   : > { %v9522_v38 = vadd.f32 %v18552_v4, %v9503_v28 }
 0xd15   : > { %v9268_v6 = vpop.xlane.xlu2 %9267 }
 0xd16   : > { %v9535_v49 = vpack.c.bf16 %v9522_v38, %v9521_v1  ;;  %v9293_v51 = vmul.f32 %v9268_v6, %v19756_v53 }
 0xd18   : > { %v9309_v37 = vadd.f32 1e-05, %v9293_v51 }
 0xd1a   : > { %12644 = vrsqrt.f32 %v9309_v37  ;;  %vm9385_vm4 = vweird.f32 %v9309_v37 }
 0xd1c   : > { %9661 = vmatmul.bf16.gmra.mxu3 %v9535_v49  ;;  %9710 = vmatmul.bf16.gmra.mxu0 %v9535_v49  ;;  %v11580_v49 = vld [vmem:[%s13801_s26 + $0x70] sm:$0xff] }
 0xd1d   : > { %v9202_v9 = vpop.xlane.xlu2 %9201  ;;  %10227 = vmatpush.bf16.msrb.mxu2 %v11580_v49 }
 0xd1e   : > { %v9220_v42 = vmul.f32 %v9202_v9, %v19756_v53 }
 0xd20   : > { %v18602_v56 = vsub.f32 %v18484_v5, %v9220_v42  ;;  %v12645_v25 = vpop.eup %12644  ;;  %v11573_v42 = vld [vmem:[%s13801_s26 + $0x38] sm:$0xff] }
 0xd21   : > { %v9380_v22 = vmul.f32 %v12645_v25, %v9309_v37  ;;  %vm9386_vm6 = vweird.f32 %v12645_v25  ;;  %10177 = vmatpush.bf16.msra.mxu1 %v11573_v42  ;;  %v9557_v37 = vld [vmem:[%s13823_s19] sm:$0x3]  ;;  %v11568_v42 = vld [vmem:[%s13801_s26 + $0x10] sm:$0xff] }
 0xd22   : > { %v9252_v36 = vmul.f32 %v18602_v56, %v18602_v56  ;;  %vm9387_vm5 = vmor %vm9385_vm4, %vm9386_vm6 }
 0xd23   : > { %v9381_v45 = vmul.f32 %v12645_v25, %v9380_v22  ;;  %v11572_v22 = vld [vmem:[%s13801_s26 + $0x30] sm:$0xff] }
 0xd24   : > { %9281 = vadd.xlane.f32.xlu1 %v9252_v36 }
 0xd25   : > { %v9382_v13 = vmul.f32 0.5, %v9381_v45  ;;  %v18636_v45 = vperm.slane %v9557_v37, 1  ;;  %10178 = vmatpush.bf16.msra.mxu1 %v11572_v22  ;;  %v11574_v22 = vld [vmem:[%s13801_s26 + $0x40] sm:$0xff] }
 0xd27   : > { %v9383_v20 = vsub.f32 1.5, %v9382_v13 }
 0xd29   : > { %v9384_v2 = vmul.f32 %v12645_v25, %v9383_v20 }
 0xd2b   : > { %v9388_v21 = vsel %vm9387_vm5, %v12645_v25, %v9384_v2 }
 0xd2c   : > { %v9485_v3 = vmul.f32 %v9388_v21, %v18479_v35 }
 0xd2e   : > { %v9504_v1 = vmul.f32 %v18545_v62, %v9485_v3  ;;  %v11575_v3 = vld [vmem:[%s13801_s26 + $0x48] sm:$0xff] }
 0xd30   : > { %v9523_v36 = vadd.f32 %v18552_v4, %v9504_v1 }
 0xd46   : > { %v9270_v59 = vpop.xlane.xlu0 %9269 }
 0xd47   : > { %v9294_v46 = vmul.f32 %v9270_v59, %v19756_v53  ;;  %v11578_v59 = vld [vmem:[%s13801_s26 + $0x60] sm:$0xff] }
 0xd49   : > { %v9310_v16 = vadd.f32 1e-05, %v9294_v46  ;;  %v9204_v54 = vpop.xlane.xlu2 %9203 }
 0xd4a   : > { %v9221_v40 = vmul.f32 %v9204_v54, %v19756_v53 }
 0xd4b   : > { %12646 = vrsqrt.f32 %v9310_v16  ;;  %vm9395_vm8 = vweird.f32 %v9310_v16 }
 0xd4c   : > { %v18610_v10 = vsub.f32 %v18528_v32, %v9221_v40  ;;  %v11577_v40 = vld [vmem:[%s13801_s26 + $0x58] sm:$0xff] }
 0xd4e   : > { %v9272_v17 = vpop.xlane.xlu0 %9271  ;;  %v9253_v60 = vmul.f32 %v18610_v10, %v18610_v10 }
 0xd4f   : > { %v9295_v11 = vmul.f32 %v9272_v17, %v19756_v53 }
 0xd50   : > { %9283 = vadd.xlane.f32.xlu2 %v9253_v60  ;;  %v18649_v60 = vperm.slane %v9557_v37, 0 }
 0xd51   : > { %v12647_v61 = vpop.eup %12646  ;;  %v18624_v35 = vadd.f32 1e-05, %v9295_v11 }
 0xd52   : > { %v9390_v39 = vmul.f32 %v12647_v61, %v9310_v16  ;;  %vm9396_vm7 = vweird.f32 %v12647_v61  ;;  %v11571_v16 = vld [vmem:[%s13801_s26 + $0x28] sm:$0xff] }
 0xd53   : > { %vm9397_vm9 = vmor %vm9395_vm8, %vm9396_vm7  ;;  %12648 = vrsqrt.f32 %v18624_v35  ;;  %10179 = vmatpush.bf16.msra.mxu1 %v11571_v16  ;;  %vm9405_vm11 = vweird.f32 %v18624_v35 }
 0xd54   : > { %v9391_v29 = vmul.f32 %v12647_v61, %v9390_v39  ;;  %v11576_v39 = vld [vmem:[%s13801_s26 + $0x50] sm:$0xff] }
 0xd56   : > { %v9392_v27 = vmul.f32 0.5, %v9391_v29  ;;  %v9206_v15 = vpop.xlane.xlu0 %9205 }
 0xd57   : > { %v9222_v7 = vmul.f32 %v9206_v15, %v19756_v53 }
 0xd58   : > { %v9393_v58 = vsub.f32 1.5, %v9392_v27  ;;  %v11569_v27 = vld [vmem:[%s13801_s26 + $0x18] sm:$0xff] }
 0xd59   : > { %v18618_v50 = vsub.f32 %v18548_v24, %v9222_v7  ;;  %v18639_v46 = vpop.eup %12648 }
 0xd5a   : > { %v9394_v28 = vmul.f32 %v12647_v61, %v9393_v58  ;;  %v9400_v20 = vmul.f32 %v18639_v46, %v18624_v35  ;;  %vm9406_vm10 = vweird.f32 %v18639_v46 }
 0xd5b   : > { %v9254_v18 = vmul.f32 %v18618_v50, %v18618_v50  ;;  %vm9407_vm12 = vmor %vm9405_vm11, %vm9406_vm10 }
 0xd5c   : > { %v9398_v6 = vsel %vm9397_vm9, %v12647_v61, %v9394_v28  ;;  %v11570_v61 = vld [vmem:[%s13801_s26 + $0x20] sm:$0xff]  ;;  %v9401_v29 = vmul.f32 %v18639_v46, %v9400_v20 }
 0xd5d   : > { %v9486_v38 = vmul.f32 %v9398_v6, %v18518_v57  ;;  %9285 = vadd.xlane.f32.xlu0 %v9254_v18  ;;  %v11579_v57 = vld [vmem:[%s13801_s26 + $0x68] sm:$0xff]  ;;  %10180 = vmatpush.bf16.msra.mxu1 %v11570_v61 }
 0xd5e   : > { %10228 = vmatpush.bf16.msrb.mxu2 %v11579_v57  ;;  %v11567_v61 = vld [vmem:[%s13801_s26 + $0x8] sm:$0xff] }
 0xd5f   : > { %v9505_v9 = vmul.f32 %v18545_v62, %v9486_v38  ;;  %v9402_v38 = vmul.f32 0.5, %v9401_v29 }
 0xd61   : > { %v9524_v51 = vadd.f32 %v18552_v4, %v9505_v9  ;;  %10181 = vmatpush.bf16.msra.mxu1 %v11569_v27 }
 0xd62   : > { %10229 = vmatpush.bf16.msrb.mxu2 %v11578_v59  ;;  %v9403_v59 = vsub.f32 1.5, %v9402_v38 }
 0xd63   : > { %v9536_v25 = vpack.c.bf16 %v9524_v51, %v9523_v36 }
 0xd64   : > { %v9404_v27 = vmul.f32 %v18639_v46, %v9403_v59 }
 0xd65   : > { %9666 = vmatmul.bf16.gmra.mxu3 %v9536_v25  ;;  %9715 = vmatmul.bf16.gmra.mxu0 %v9536_v25 }
 0xd66   : > { %10230 = vmatpush.bf16.msrb.mxu2 %v11577_v40  ;;  %10182 = vmatpush.bf16.msra.mxu1 %v11568_v42 }
 0xd68   : > { %v9701_v54 = vpop.f32.mrf.mxu0 }
 0xd69   : > { %v18643_v13 = vadd.f32 %v9701_v54, %v18636_v45 }
 0xd6a   : > { %10231 = vmatpush.bf16.msrb.mxu2 %v11576_v39  ;;  %10183 = vmatpush.bf16.msra.mxu1 %v11567_v61 }
 0xd6b   : > { %v9774_v17 = vmul.f32 0.044715, %v18643_v13 }
 0xd6d   : > { %v9806_v2 = vmul.f32 %v9774_v17, %v18643_v13 }
 0xd6e   : > { %v9652_v21 = vpop.f32.mrf.mxu3  ;;  %10232 = vmatpush.bf16.msrb.mxu2 %v11575_v3  ;;  %v11566_v3 = vld [vmem:[%s13801_s26] sm:$0xff] }
 0xd6f   : > { %v9838_v15 = vmul.f32 %v9806_v2, %v18643_v13  ;;  %v18658_v7 = vadd.f32 %v9652_v21, %v18649_v60  ;;  %v9274_v58 = vpop.xlane.xlu1 %9273  ;;  %10184 = vmatpush.bf16.msra.mxu1 %v11566_v3 }
 0xd70   : > { %v9296_v11 = vmul.f32 %v9274_v58, %v19756_v53  ;;  %v9703_v47 = vpop.f32.mrf.mxu0 }
 0xd71   : > { %v9870_v28 = vadd.f32 %v9838_v15, %v18643_v13  ;;  %v9773_v18 = vmul.f32 0.044715, %v18658_v7  ;;  %v18665_v6 = vadd.f32 %v9703_v47, %v18636_v45 }
 0xd72   : > { %v18667_v1 = vadd.f32 1e-05, %v9296_v11  ;;  %10233 = vmatpush.bf16.msrb.mxu2 %v11574_v22 }
 0xd73   : > { %v9805_v49 = vmul.f32 %v9773_v18, %v18658_v7  ;;  %v9776_v9 = vmul.f32 0.044715, %v18665_v6  ;;  %v9902_v36 = vmul.f32 0.7978846, %v9870_v28  ;;  %v9278_v51 = vpop.xlane.xlu2 %9277 }
 0xd74   : > { %12650 = vrsqrt.f32 %v18667_v1  ;;  %v9298_v25 = vmul.f32 %v9278_v51, %v19756_v53  ;;  %vm9415_vm14 = vweird.f32 %v18667_v1 }
 0xd75   : > { %v9837_v57 = vmul.f32 %v9805_v49, %v18658_v7  ;;  %v9808_v37 = vmul.f32 %v9776_v9, %v18665_v6  ;;  %12652 = vtanh.f32 %v9902_v36  ;;  %v9408_v9 = vsel %vm9407_vm12, %v18639_v46, %v9404_v27 }
 0xd76   : > { %v9654_v16 = vpop.f32.mrf.mxu3  ;;  %v18678_v40 = vadd.f32 1e-05, %v9298_v25  ;;  %v9742_v46 = vmul.f32 0.5, %v18643_v13 }
 0xd77   : > { %v9840_v54 = vmul.f32 %v9808_v37, %v18665_v6  ;;  %v18681_v20 = vadd.f32 %v9654_v16, %v18649_v60  ;;  %v9276_v17 = vpop.xlane.xlu1 %9275  ;;  %v9869_v2 = vadd.f32 %v9837_v57, %v18658_v7  ;;  %v9487_v37 = vmul.f32 %v9408_v9, %v18537_v26 }
 0xd78   : > { %v9297_v39 = vmul.f32 %v9276_v17, %v19756_v53  ;;  %12654 = vrsqrt.f32 %v18678_v40  ;;  %vm9435_vm6 = vweird.f32 %v18678_v40 }
 0xd79   : > { %v9872_v29 = vadd.f32 %v9840_v54, %v18665_v6  ;;  %v9775_v15 = vmul.f32 0.044715, %v18681_v20  ;;  %v9901_v28 = vmul.f32 0.7978846, %v9869_v2  ;;  %v9744_v2 = vmul.f32 0.5, %v18665_v6 }
 0xd7a   : > { %v12651_v21 = vpop.eup %12650  ;;  %v18691_v58 = vadd.f32 1e-05, %v9297_v39 }
 0xd7b   : > { %v9410_v11 = vmul.f32 %v12651_v21, %v18667_v1  ;;  %v9904_v47 = vmul.f32 0.7978846, %v9872_v29  ;;  %v9807_v18 = vmul.f32 %v9775_v15, %v18681_v20  ;;  %v12653_v49 = vpop.eup %12652  ;;  %vm9416_vm13 = vweird.f32 %v12651_v21 }
 0xd7c   : > { %12656 = vrsqrt.f32 %v18691_v58  ;;  %v9966_v59 = vadd.f32 1.0, %v12653_v49  ;;  %vm9417_vm15 = vmor %vm9415_vm14, %vm9416_vm13  ;;  %vm9425_vm2 = vweird.f32 %v18691_v58 }
 0xd7d   : > { %v9411_v38 = vmul.f32 %v12651_v21, %v9410_v11  ;;  %12658 = vtanh.f32 %v9904_v47  ;;  %v9839_v42 = vmul.f32 %v9807_v18, %v18681_v20  ;;  %v9506_v11 = vmul.f32 %v18545_v62, %v9487_v37 }
 0xd7e   : > { %v18700_v36 = vpop.eup %12654  ;;  %12660 = vtanh.f32 %v9901_v28  ;;  %v9998_v6 = vmul.f32 %v9966_v59, %v9742_v46  ;;  %v9741_v37 = vmul.f32 0.5, %v18658_v7  ;;  %v9743_v46 = vmul.f32 0.5, %v18681_v20 }
 0xd7f   : > { %v9412_v51 = vmul.f32 0.5, %v9411_v38  ;;  %v9430_v35 = vmul.f32 %v18700_v36, %v18678_v40  ;;  %v9871_v57 = vadd.f32 %v9839_v42, %v18681_v20  ;;  %vm9436_vm1 = vweird.f32 %v18700_v36 }
 0xd80   : > { %vm9437_vm4 = vmor %vm9435_vm6, %vm9436_vm1 }
 0xd81   : > { %v9413_v25 = vsub.f32 1.5, %v9412_v51  ;;  %v9431_v16 = vmul.f32 %v18700_v36, %v9430_v35  ;;  %v9903_v54 = vmul.f32 0.7978846, %v9871_v57 }
 0xd82   : > { %v18706_v22 = vpop.eup %12656  ;;  %v9280_v26 = vpop.xlane.xlu0 %9279 }
 0xd83   : > { %v12659_v17 = vpop.eup %12658  ;;  %v9414_v61 = vmul.f32 %v12651_v21, %v9413_v25  ;;  %v9420_v39 = vmul.f32 %v18706_v22, %v18691_v58  ;;  %v9432_v27 = vmul.f32 0.5, %v9431_v16  ;;  %12662 = vtanh.f32 %v9903_v54 }
 0xd84   : > { %v9968_v29 = vadd.f32 1.0, %v12659_v17  ;;  %v9299_v13 = vmul.f32 %v9280_v26, %v19756_v53  ;;  %v12661_v47 = vpop.eup %12660  ;;  %vm9426_vm0 = vweird.f32 %v18706_v22 }
 0xd85   : > { %v9418_v15 = vsel %vm9417_vm15, %v12651_v21, %v9414_v61  ;;  %v9421_v3 = vmul.f32 %v18706_v22, %v9420_v39  ;;  %v9433_v49 = vsub.f32 1.5, %v9432_v27  ;;  %v9965_v42 = vadd.f32 1.0, %v12661_v47  ;;  %vm18735_vm3 = vmor %vm9425_vm2, %vm9426_vm0 }
 0xd86   : > { %v9488_v1 = vmul.f32 %v9418_v15, %v18565_v23  ;;  %v18718_v28 = vadd.f32 1e-05, %v9299_v13  ;;  %v10000_v18 = vmul.f32 %v9968_v29, %v9744_v2  ;;  %v9525_v21 = vadd.f32 %v18552_v4, %v9506_v11 }
 0xd87   : > { %v9422_v38 = vmul.f32 0.5, %v9421_v3  ;;  %v9434_v17 = vmul.f32 %v18700_v36, %v9433_v49  ;;  %v9997_v39 = vmul.f32 %v9965_v42, %v9741_v37 }
 0xd88   : > { %v10030_v9 = vpack.c.bf16 %v10000_v18, %v9998_v6  ;;  %v9507_v57 = vmul.f32 %v18545_v62, %v9488_v1  ;;  %12664 = vrsqrt.f32 %v18718_v28  ;;  %vm9445_vm5 = vweird.f32 %v18718_v28 }
 0xd89   : > { %v9423_v51 = vsub.f32 1.5, %v9422_v38  ;;  %v9706_v35 = vpop.f32.mrf.mxu0  ;;  %v12663_v25 = vpop.eup %12662  ;;  %v9438_v15 = vsel %vm9437_vm4, %v18700_v36, %v9434_v17 }
 0xd8a   : > { %v18726_v23 = vadd.f32 %v9706_v35, %v18636_v45  ;;  %10234 = vmatmul.bf16.vlgmr.msrb.gmra.mxu2 %v10030_v9  ;;  %v9967_v59 = vadd.f32 1.0, %v12663_v25  ;;  %v9526_v54 = vadd.f32 %v18552_v4, %v9507_v57  ;;  %v9490_v18 = vmul.f32 %v9438_v15, %v18572_v34 }
 0xd8b   : > { %v9424_v16 = vmul.f32 %v18706_v22, %v9423_v51 }
 0xd8c   : > { %v9778_v7 = vmul.f32 0.044715, %v18726_v23  ;;  %v9537_v2 = vpack.c.bf16 %v9526_v54, %v9525_v21  ;;  %v9999_v20 = vmul.f32 %v9967_v59, %v9743_v46  ;;  %v9509_v21 = vmul.f32 %v18545_v62, %v9490_v18 }
 0xd8d   : > { %v9428_v26 = vsel %vm18735_vm3, %v18706_v22, %v9424_v16 }
 0xd8e   : > { %v9810_v29 = vmul.f32 %v9778_v7, %v18726_v23  ;;  %9671 = vmatmul.bf16.gmra.mxu3 %v9537_v2  ;;  %9720 = vmatmul.bf16.gmra.mxu0 %v9537_v2  ;;  %v10029_v27 = vpack.c.bf16 %v9999_v20, %v9997_v39  ;;  %v18744_v13 = vpop.eup %12664  ;;  %v9489_v11 = vmul.f32 %v9428_v26, %v18579_v44 }
 0xd8f   : > { %v9657_v58 = vpop.f32.mrf.mxu3  ;;  %v9440_v36 = vmul.f32 %v18744_v13, %v18718_v28  ;;  %v9528_v20 = vadd.f32 %v18552_v4, %v9509_v21  ;;  %vm9446_vm7 = vweird.f32 %v18744_v13 }
 0xd90   : > { %v18748_v3 = vadd.f32 %v9657_v58, %v18649_v60  ;;  %v9842_v40 = vmul.f32 %v9810_v29, %v18726_v23  ;;  %10185 = vmatmul.bf16.vlgmr.msra.gmra.mxu1 %v10029_v27  ;;  %v9508_v9 = vmul.f32 %v18545_v62, %v9489_v11  ;;  %vm18804_vm8 = vmor %vm9445_vm5, %vm9446_vm7 }
 0xd91   : > { %v9708_v22 = vpop.f32.mrf.mxu0  ;;  %v9441_v35 = vmul.f32 %v18744_v13, %v9440_v36 }
 0xd92   : > { %v9777_v47 = vmul.f32 0.044715, %v18748_v3  ;;  %v9709_v1 = vadd.f32 %v9708_v22, %v18636_v45  ;;  %v9874_v6 = vadd.f32 %v9842_v40, %v18726_v23  ;;  %v9527_v54 = vadd.f32 %v18552_v4, %v9508_v9 }
 0xd93   : > { %v9442_v2 = vmul.f32 0.5, %v9441_v35 }
 0xd94   : > { %v9809_v38 = vmul.f32 %v9777_v47, %v18748_v3  ;;  %v9780_v49 = vmul.f32 0.044715, %v9709_v1  ;;  %v9906_v44 = vmul.f32 0.7978846, %v9874_v6  ;;  %v9538_v15 = vpack.c.bf16 %v9528_v20, %v9527_v54 }
 0xd95   : > { %v9443_v22 = vsub.f32 1.5, %v9442_v2  ;;  %v9748_v54 = vmul.f32 0.5, %v9709_v1 }
 0xd96   : > { %v9812_v42 = vmul.f32 %v9780_v49, %v9709_v1  ;;  %v9841_v51 = vmul.f32 %v9809_v38, %v18748_v3  ;;  %12666 = vtanh.f32 %v9906_v44 }
 0xd97   : > { %v9659_v57 = vpop.f32.mrf.mxu3  ;;  %v9282_v25 = vpop.xlane.xlu1 %9281 }
 0xd98   : > { %v18764_v34 = vadd.f32 %v9659_v57, %v18649_v60  ;;  %v9844_v37 = vmul.f32 %v9812_v42, %v9709_v1  ;;  %v9873_v46 = vadd.f32 %v9841_v51, %v18748_v3  ;;  %v9300_v59 = vmul.f32 %v9282_v25, %v19756_v53 }
 0xd99   : > { %v9711_v16 = vpop.f32.mrf.mxu0  ;;  %v9444_v25 = vmul.f32 %v18744_v13, %v9443_v22 }
 0xd9a   : > { %v9779_v17 = vmul.f32 0.044715, %v18764_v34  ;;  %v18771_v7 = vadd.f32 %v9711_v16, %v18636_v45  ;;  %v9876_v61 = vadd.f32 %v9844_v37, %v9709_v1  ;;  %v18773_v39 = vadd.f32 1e-05, %v9300_v59 }
 0xd9b   : > { %v9905_v27 = vmul.f32 0.7978846, %v9873_v46  ;;  %v9746_v16 = vmul.f32 0.5, %v18726_v23 }
 0xd9c   : > { %v9811_v26 = vmul.f32 %v9779_v17, %v18764_v34  ;;  %v9782_v29 = vmul.f32 0.044715, %v18771_v7  ;;  %v9908_v58 = vmul.f32 0.7978846, %v9876_v61  ;;  %12668 = vrsqrt.f32 %v18773_v39  ;;  %v12667_v6 = vpop.eup %12666 }
 0xd9d   : > { %v9970_v57 = vadd.f32 1.0, %v12667_v6  ;;  %vm9455_vm10 = vweird.f32 %v18773_v39 }
 0xd9e   : > { %v9814_v40 = vmul.f32 %v9782_v29, %v18771_v7  ;;  %12670 = vtanh.f32 %v9908_v58  ;;  %v9843_v11 = vmul.f32 %v9811_v26, %v18764_v34  ;;  %9676 = vmatmul.bf16.gmra.mxu3 %v9538_v15  ;;  %9725 = vmatmul.bf16.gmra.mxu0 %v9538_v15  ;;  %v9448_v15 = vsel %vm18804_vm8, %v18744_v13, %v9444_v25 }
 0xd9f   : > { %v9662_v47 = vpop.f32.mrf.mxu3  ;;  %12672 = vtanh.f32 %v9905_v27  ;;  %v10002_v23 = vmul.f32 %v9970_v57, %v9746_v16  ;;  %v9745_v13 = vmul.f32 0.5, %v18748_v3 }
 0xda0   : > { %v18782_v18 = vadd.f32 %v9662_v47, %v18649_v60  ;;  %v9875_v36 = vadd.f32 %v9843_v11, %v18764_v34  ;;  %v9846_v38 = vmul.f32 %v9814_v40, %v18771_v7 }
 0xda1   : > { %v9713_v49 = vpop.f32.mrf.mxu0 }
 0xda2   : > { %v9781_v9 = vmul.f32 0.044715, %v18782_v18  ;;  %v18788_v42 = vadd.f32 %v9713_v49, %v18636_v45  ;;  %v9907_v44 = vmul.f32 0.7978846, %v9875_v36  ;;  %v9878_v51 = vadd.f32 %v9846_v38, %v18771_v7  ;;  %v12669_v35 = vpop.eup %12668 }
 0xda3   : > { %v9450_v37 = vmul.f32 %v12669_v35, %v18773_v39  ;;  %vm9456_vm9 = vweird.f32 %v12669_v35 }
 0xda4   : > { %v12671_v21 = vpop.eup %12670  ;;  %v9813_v46 = vmul.f32 %v9781_v9, %v18782_v18  ;;  %v9784_v59 = vmul.f32 0.044715, %v18788_v42  ;;  %12674 = vtanh.f32 %v9907_v44  ;;  %v9910_v26 = vmul.f32 0.7978846, %v9878_v51  ;;  %vm9457_vm11 = vmor %vm9455_vm10, %vm9456_vm9 }
 0xda5   : > { %v9972_v17 = vadd.f32 1.0, %v12671_v21  ;;  %v12673_v61 = vpop.eup %12672  ;;  %v9451_v2 = vmul.f32 %v12669_v35, %v9450_v37  ;;  %v9491_v44 = vmul.f32 %v9448_v15, %v18590_v41  ;;  %v9747_v51 = vmul.f32 0.5, %v18764_v34 }
 0xda6   : > { %v9816_v20 = vmul.f32 %v9784_v59, %v18788_v42  ;;  %v9845_v29 = vmul.f32 %v9813_v46, %v18782_v18  ;;  %v9969_v6 = vadd.f32 1.0, %v12673_v61  ;;  %12676 = vtanh.f32 %v9910_v26 }
 0xda7   : > { %v9664_v27 = vpop.f32.mrf.mxu3  ;;  %v10004_v1 = vmul.f32 %v9972_v17, %v9748_v54  ;;  %v9452_v40 = vmul.f32 0.5, %v9451_v2  ;;  %v9510_v39 = vmul.f32 %v18545_v62, %v9491_v44 }
 0xda8   : > { %v9665_v11 = vadd.f32 %v9664_v27, %v18649_v60  ;;  %v9848_v22 = vmul.f32 %v9816_v20, %v18788_v42  ;;  %v9877_v28 = vadd.f32 %v9845_v29, %v18782_v18  ;;  %v10001_v16 = vmul.f32 %v9969_v6, %v9745_v13 }
 0xda9   : > { %v10032_v47 = vpack.c.bf16 %v10004_v1, %v10002_v23  ;;  %v9453_v36 = vsub.f32 1.5, %v9452_v40  ;;  %v9529_v20 = vadd.f32 %v18552_v4, %v9510_v39  ;;  %v9750_v27 = vmul.f32 0.5, %v18771_v7 }
 0xdaa   : > { %v9783_v38 = vmul.f32 0.044715, %v9665_v11  ;;  %v9880_v49 = vadd.f32 %v9848_v22, %v18788_v42  ;;  %v12675_v9 = vpop.eup %12674  ;;  %v9909_v46 = vmul.f32 0.7978846, %v9877_v28  ;;  %v9752_v23 = vmul.f32 0.5, %v18788_v42 }
 0xdab   : > { %10239 = vmatmul.bf16.gmra.mxu2 %v10032_v47  ;;  %v9454_v57 = vmul.f32 %v12669_v35, %v9453_v36  ;;  %v9971_v25 = vadd.f32 1.0, %v12675_v9  ;;  %v9749_v36 = vmul.f32 0.5, %v18782_v18 }
 0xdac   : > { %v9815_v21 = vmul.f32 %v9783_v38, %v9665_v11  ;;  %v9912_v37 = vmul.f32 0.7978846, %v9880_v49  ;;  %v12677_v61 = vpop.eup %12676  ;;  %v9751_v38 = vmul.f32 0.5, %v9665_v11 }
 0xdad   : > { %v9458_v59 = vsel %vm9457_vm11, %v12669_v35, %v9454_v57  ;;  %v10003_v54 = vmul.f32 %v9971_v25, %v9747_v51  ;;  %v9974_v35 = vadd.f32 1.0, %v12677_v61 }
 0xdae   : > { %12678 = vtanh.f32 %v9912_v37  ;;  %v9492_v41 = vmul.f32 %v9458_v59, %v18602_v56  ;;  %v9847_v17 = vmul.f32 %v9815_v21, %v9665_v11 }
 0xdaf   : > { %v10031_v3 = vpack.c.bf16 %v10003_v54, %v10001_v16  ;;  %12680 = vtanh.f32 %v9909_v46  ;;  %v10006_v40 = vmul.f32 %v9974_v35, %v9750_v27 }
 0xdb0   : > { %v9511_v34 = vmul.f32 %v18545_v62, %v9492_v41  ;;  %v9879_v2 = vadd.f32 %v9847_v17, %v9665_v11 }
 0xdb1   : > { %10190 = vmatmul.bf16.gmra.mxu1 %v10031_v3 }
 0xdb2   : > { %v9530_v26 = vadd.f32 %v18552_v4, %v9511_v34  ;;  %v9911_v29 = vmul.f32 0.7978846, %v9879_v2 }
 0xdb4   : > { %v12679_v58 = vpop.eup %12678  ;;  %v9539_v56 = vpack.c.bf16 %v9530_v26, %v9529_v20  ;;  %12682 = vtanh.f32 %v9911_v29 }
 0xdb5   : > { %v9976_v1 = vadd.f32 1.0, %v12679_v58  ;;  %v12681_v15 = vpop.eup %12680 }
 0xdb6   : > { %9681 = vmatmul.bf16.gmra.mxu3 %v9539_v56  ;;  %9730 = vmatmul.bf16.gmra.mxu0 %v9539_v56  ;;  %v9973_v6 = vadd.f32 1.0, %v12681_v15 }
 0xdb7   : > { %v10008_v22 = vmul.f32 %v9976_v1, %v9752_v23 }
 0xdb8   : > { %v10005_v9 = vmul.f32 %v9973_v6, %v9749_v36 }
 0xdb9   : > { %v10034_v47 = vpack.c.bf16 %v10008_v22, %v10006_v40 }
 0xdba   : > { %v12683_v28 = vpop.eup %12682 }
 0xdbb   : > { %10244 = vmatmul.bf16.gmra.mxu2 %v10034_v47  ;;  %v9975_v49 = vadd.f32 1.0, %v12683_v28 }
 0xdbd   : > { %v10007_v7 = vmul.f32 %v9975_v49, %v9751_v38 }
 0xdbf   : > { %v10033_v44 = vpack.c.bf16 %v10007_v7, %v10005_v9 }
 0xdc1   : > { %10195 = vmatmul.bf16.gmra.mxu1 %v10033_v44 }
 0xdc3   : > { %v9284_v42 = vpop.xlane.xlu2 %9283 }
 0xdc4   : > { %v9301_v13 = vmul.f32 %v9284_v42, %v19756_v53 }
 0xdc6   : > { %v9317_v51 = vadd.f32 1e-05, %v9301_v13 }
 0xdc8   : > { %12684 = vrsqrt.f32 %v9317_v51  ;;  %vm9465_vm13 = vweird.f32 %v9317_v51 }
 0xdce   : > { %v12685_v57 = vpop.eup %12684 }
 0xdcf   : > { %v9460_v21 = vmul.f32 %v12685_v57, %v9317_v51  ;;  %vm9466_vm12 = vweird.f32 %v12685_v57 }
 0xdd0   : > { %v9286_v25 = vpop.xlane.xlu0 %9285  ;;  %vm9467_vm14 = vmor %vm9465_vm13, %vm9466_vm12 }
 0xdd1   : > { %v9461_v37 = vmul.f32 %v12685_v57, %v9460_v21  ;;  %v9302_v46 = vmul.f32 %v9286_v25, %v19756_v53 }
 0xdd3   : > { %v9462_v59 = vmul.f32 0.5, %v9461_v37  ;;  %v9318_v16 = vadd.f32 1e-05, %v9302_v46 }
 0xdd5   : > { %12686 = vrsqrt.f32 %v9318_v16  ;;  %v9463_v18 = vsub.f32 1.5, %v9462_v59  ;;  %vm9475_vm0 = vweird.f32 %v9318_v16 }
 0xdd7   : > { %v9464_v54 = vmul.f32 %v12685_v57, %v9463_v18 }
 0xdd9   : > { %v9468_v17 = vsel %vm9467_vm14, %v12685_v57, %v9464_v54 }
 0xdda   : > { %v9493_v3 = vmul.f32 %v9468_v17, %v18610_v10 }
 0xddb   : > { %v12687_v11 = vpop.eup %12686 }
 0xddc   : > { %v9470_v41 = vmul.f32 %v12687_v11, %v9318_v16  ;;  %vm9476_vm15 = vweird.f32 %v12687_v11  ;;  %v9512_v29 = vmul.f32 %v18545_v62, %v9493_v3 }
 0xddd   : > { %vm9477_vm1 = vmor %vm9475_vm0, %vm9476_vm15 }
 0xdde   : > { %v9471_v39 = vmul.f32 %v12687_v11, %v9470_v41  ;;  %v9531_v40 = vadd.f32 %v18552_v4, %v9512_v29 }
 0xde0   : > { %v9472_v61 = vmul.f32 0.5, %v9471_v39 }
 0xde2   : > { %v9473_v34 = vsub.f32 1.5, %v9472_v61  ;;  %v9716_v2 = vpop.f32.mrf.mxu0 }
 0xde3   : > { %v9717_v53 = vadd.f32 %v9716_v2, %v18636_v45 }
 0xde4   : > { %v9474_v20 = vmul.f32 %v12687_v11, %v9473_v34 }
 0xde5   : > { %v9786_v26 = vmul.f32 0.044715, %v9717_v53  ;;  %v9754_v54 = vmul.f32 0.5, %v9717_v53 }
 0xde6   : > { %v9478_v35 = vsel %vm9477_vm1, %v12687_v11, %v9474_v20 }
 0xde7   : > { %v9494_v58 = vmul.f32 %v9478_v35, %v18618_v50  ;;  %v9818_v27 = vmul.f32 %v9786_v26, %v9717_v53 }
 0xde8   : > { %v9667_v56 = vpop.f32.mrf.mxu3 }
 0xde9   : > { %v9668_v23 = vadd.f32 %v9667_v56, %v18649_v60  ;;  %v9513_v10 = vmul.f32 %v18545_v62, %v9494_v58  ;;  %v9850_v1 = vmul.f32 %v9818_v27, %v9717_v53 }
 0xdea   : > { %v9718_v15 = vpop.f32.mrf.mxu0 }
 0xdeb   : > { %v9785_v22 = vmul.f32 0.044715, %v9668_v23  ;;  %v9719_v47 = vadd.f32 %v9718_v15, %v18636_v45  ;;  %v9532_v6 = vadd.f32 %v18552_v4, %v9513_v10  ;;  %v9882_v28 = vadd.f32 %v9850_v1, %v9717_v53  ;;  %v18845_v53 = vld [vmem:[%s1090_s15] ss:$0 sm:$0xff]  ;;  %s19764_s15 = sld [smem:[#allocation40_spill]] }
 0xdec   : > { %v9753_v26 = vmul.f32 0.5, %v9668_v23 }
 0xded   : > { %v9817_v36 = vmul.f32 %v9785_v22, %v9668_v23  ;;  %v9788_v38 = vmul.f32 0.044715, %v9719_v47  ;;  %v9540_v49 = vpack.c.bf16 %v9532_v6, %v9531_v40  ;;  %v9914_v9 = vmul.f32 0.7978846, %v9882_v28 }
 0xdee   : > { %v9756_v41 = vmul.f32 0.5, %v9719_v47 }
 0xdef   : > { %v9820_v50 = vmul.f32 %v9788_v38, %v9719_v47  ;;  %9686 = vmatmul.bf16.gmra.mxu3 %v9540_v49  ;;  %9735 = vmatmul.bf16.gmra.mxu0 %v9540_v49  ;;  %v9849_v7 = vmul.f32 %v9817_v36, %v9668_v23  ;;  %12688 = vtanh.f32 %v9914_v9 }
 0xdf0   : > { %v9669_v44 = vpop.f32.mrf.mxu3 }
 0xdf1   : > { %v9670_v62 = vadd.f32 %v9669_v44, %v18649_v60  ;;  %v9852_v42 = vmul.f32 %v9820_v50, %v9719_v47  ;;  %v9881_v13 = vadd.f32 %v9849_v7, %v9668_v23  ;;  %p11441_p13 = scmp.ne.s32.totalorder %s19764_s15, 1 }
 0xdf2   : > { %s19766_s17 = sld [smem:[#allocation192_spill]] (!%p11441_p13) }
 0xdf3   : > { %v9787_v51 = vmul.f32 0.044715, %v9670_v62  ;;  %v9884_v57 = vadd.f32 %v9852_v42, %v9719_v47  ;;  %v9913_v4 = vmul.f32 0.7978846, %v9881_v13  ;;  %v9755_v35 = vmul.f32 0.5, %v9670_v62 }
 0xdf5   : > { %v9819_v21 = vmul.f32 %v9787_v51, %v9670_v62  ;;  %v9916_v25 = vmul.f32 0.7978846, %v9884_v57  ;;  %v12689_v46 = vpop.eup %12688 }
 0xdf6   : > { %v9978_v18 = vadd.f32 1.0, %v12689_v46 }
 0xdf7   : > { %12690 = vtanh.f32 %v9916_v25  ;;  %v9851_v37 = vmul.f32 %v9819_v21, %v9670_v62 }
 0xdf8   : > { %12692 = vtanh.f32 %v9913_v4  ;;  %v10010_v61 = vmul.f32 %v9978_v18, %v9754_v54 }
 0xdf9   : > { %v9883_v59 = vadd.f32 %v9851_v37, %v9670_v62 }
 0xdfb   : > { %v9915_v16 = vmul.f32 0.7978846, %v9883_v59 }
 0xdfd   : > { %v12691_v11 = vpop.eup %12690  ;;  %12694 = vtanh.f32 %v9915_v16 }
 0xdfe   : > { %v9980_v39 = vadd.f32 1.0, %v12691_v11  ;;  %v12693_v17 = vpop.eup %12692 }
 0xdff   : > { %v9977_v2 = vadd.f32 1.0, %v12693_v17 }
 0xe00   : > { %v10012_v3 = vmul.f32 %v9980_v39, %v9756_v41 }
 0xe01   : > { %v10009_v58 = vmul.f32 %v9977_v2, %v9753_v26 }
 0xe02   : > { %v10036_v34 = vpack.c.bf16 %v10012_v3, %v10010_v61 }
 0xe03   : > { %v12695_v20 = vpop.eup %12694 }
 0xe04   : > { %10249 = vmatmul.bf16.gmra.mxu2 %v10036_v34  ;;  %v9979_v29 = vadd.f32 1.0, %v12695_v20 }
 0xe06   : > { %v10011_v27 = vmul.f32 %v9979_v29, %v9755_v35 }
 0xe08   : > { %v10035_v56 = vpack.c.bf16 %v10011_v27, %v10009_v58 }
 0xe0a   : > { %10200 = vmatmul.bf16.gmra.mxu1 %v10035_v56 }
 0xe0b   : > { %v9721_v10 = vpop.f32.mrf.mxu0 }
 0xe0c   : > { %v9722_v1 = vadd.f32 %v9721_v10, %v18636_v45 }
 0xe0d   : > { %v10186_v15 = vpop.f32.mrf.mxu1  ;;  %v10235_v40 = vpop.f32.mrf.mxu2 }
 0xe0e   : > { %v9790_v22 = vmul.f32 0.044715, %v9722_v1  ;;  %v10187_v23 = vadd.f32 %v18845_v53, %v10186_v15 }
 0xe10   : > { %v9822_v47 = vmul.f32 %v9790_v22, %v9722_v1  ;;  %v10236_v6 = vadd.f32 %v10235_v40, %v10187_v23 }
 0xe11   : > { %v9672_v28 = vpop.f32.mrf.mxu3 }
 0xe12   : > { %v18850_v36 = vadd.f32 %v10236_v6, %v18349_v43  ;;  %v18853_v38 = vadd.f32 %v9672_v28, %v18649_v60  ;;  %v9854_v49 = vmul.f32 %v9822_v47, %v9722_v1  ;;  %v9758_v28 = vmul.f32 0.5, %v9722_v1 }
 0xe13   : > { %v9723_v50 = vpop.f32.mrf.mxu0 }
 0xe14   : > { %10291 = vst [vmem:[#allocation2 + $0x30] sm:$0xff] %v18850_v36  ;;  %v9789_v9 = vmul.f32 0.044715, %v18853_v38  ;;  %v9724_v7 = vadd.f32 %v9723_v50, %v18636_v45  ;;  %v9886_v44 = vadd.f32 %v9854_v49, %v9722_v1 }
 0xe15   : > { %v10188_v62 = vpop.f32.mrf.mxu1  ;;  %v10237_v43 = vpop.f32.mrf.mxu2 }
 0xe16   : > { %v9821_v42 = vmul.f32 %v9789_v9, %v18853_v38  ;;  %v9792_v13 = vmul.f32 0.044715, %v9724_v7  ;;  %v10189_v51 = vadd.f32 %v18845_v53, %v10188_v62  ;;  %v9918_v25 = vmul.f32 0.7978846, %v9886_v44 }
 0xe17   : > { %v9760_v49 = vmul.f32 0.5, %v9724_v7 }
 0xe18   : > { %v9824_v57 = vmul.f32 %v9792_v13, %v9724_v7  ;;  %v10238_v21 = vadd.f32 %v10237_v43, %v10189_v51  ;;  %v9853_v4 = vmul.f32 %v9821_v42, %v18853_v38  ;;  %12696 = vtanh.f32 %v9918_v25 }
 0xe19   : > { %v9674_v37 = vpop.f32.mrf.mxu3 }
 0xe1a   : > { %v10276_v46 = vadd.f32 %v10238_v21, %v18362_v52  ;;  %v9675_v59 = vadd.f32 %v9674_v37, %v18649_v60  ;;  %v9856_v16 = vmul.f32 %v9824_v57, %v9724_v7  ;;  %v9885_v18 = vadd.f32 %v9853_v4, %v18853_v38 }
 0xe1b   : > { %v9726_v11 = vpop.f32.mrf.mxu0 }
 0xe1c   : > { %10292 = vst [vmem:[#allocation2] sm:$0xff] %v10276_v46  ;;  %v9791_v54 = vmul.f32 0.044715, %v9675_v59  ;;  %v18865_v41 = vadd.f32 %v9726_v11, %v18636_v45  ;;  %v9888_v39 = vadd.f32 %v9856_v16, %v9724_v7  ;;  %v9917_v34 = vmul.f32 0.7978846, %v9885_v18 }
 0xe1d   : > { %v9757_v18 = vmul.f32 0.5, %v18853_v38  ;;  %v9759_v11 = vmul.f32 0.5, %v9675_v59 }
 0xe1e   : > { %v9823_v17 = vmul.f32 %v9791_v54, %v9675_v59  ;;  %v9794_v61 = vmul.f32 0.044715, %v18865_v41  ;;  %v9920_v3 = vmul.f32 0.7978846, %v9888_v39  ;;  %v12697_v26 = vpop.eup %12696 }
 0xe1f   : > { %v9982_v22 = vadd.f32 1.0, %v12697_v26 }
 0xe20   : > { %v9826_v52 = vmul.f32 %v9794_v61, %v18865_v41  ;;  %12698 = vtanh.f32 %v9920_v3  ;;  %v9855_v2 = vmul.f32 %v9823_v17, %v9675_v59 }
 0xe21   : > { %v9677_v20 = vpop.f32.mrf.mxu3  ;;  %12700 = vtanh.f32 %v9917_v34  ;;  %v10014_v51 = vmul.f32 %v9982_v22, %v9758_v28 }
 0xe22   : > { %v18870_v35 = vadd.f32 %v9677_v20, %v18649_v60  ;;  %v9887_v29 = vadd.f32 %v9855_v2, %v9675_v59  ;;  %v9858_v58 = vmul.f32 %v9826_v52, %v18865_v41 }
 0xe23   : > { %v9728_v27 = vpop.f32.mrf.mxu0 }
 0xe24   : > { %v9793_v56 = vmul.f32 0.044715, %v18870_v35  ;;  %v9729_v10 = vadd.f32 %v9728_v27, %v18636_v45  ;;  %v9919_v15 = vmul.f32 0.7978846, %v9887_v29  ;;  %v9890_v40 = vadd.f32 %v9858_v58, %v18865_v41 }
 0xe26   : > { %v12699_v23 = vpop.eup %12698  ;;  %v9825_v47 = vmul.f32 %v9793_v56, %v18870_v35  ;;  %v9796_v6 = vmul.f32 0.044715, %v9729_v10  ;;  %12702 = vtanh.f32 %v9919_v15  ;;  %v9922_v62 = vmul.f32 0.7978846, %v9890_v40 }
 0xe27   : > { %v9984_v50 = vadd.f32 1.0, %v12699_v23  ;;  %v12701_v9 = vpop.eup %12700 }
 0xe28   : > { %v9828_v44 = vmul.f32 %v9796_v6, %v9729_v10  ;;  %v9857_v42 = vmul.f32 %v9825_v47, %v18870_v35  ;;  %v9981_v37 = vadd.f32 1.0, %v12701_v9  ;;  %12704 = vtanh.f32 %v9922_v62 }
 0xe29   : > { %v9679_v13 = vpop.f32.mrf.mxu3  ;;  %v10016_v43 = vmul.f32 %v9984_v50, %v9760_v49  ;;  %v9764_v49 = vmul.f32 0.5, %v9729_v10 }
 0xe2a   : > { %v9680_v57 = vadd.f32 %v9679_v13, %v18649_v60  ;;  %v9860_v21 = vmul.f32 %v9828_v44, %v9729_v10  ;;  %v9889_v25 = vadd.f32 %v9857_v42, %v18870_v35  ;;  %v10013_v52 = vmul.f32 %v9981_v37, %v9757_v18 }
 0xe2b   : > { %v10038_v4 = vpack.c.bf16 %v10016_v43, %v10014_v51 }
 0xe2c   : > { %v12703_v46 = vpop.eup %12702  ;;  %v9795_v16 = vmul.f32 0.044715, %v9680_v57  ;;  %v9892_v1 = vadd.f32 %v9860_v21, %v9729_v10  ;;  %v9921_v3 = vmul.f32 0.7978846, %v9889_v25  ;;  %v9763_v18 = vmul.f32 0.5, %v9680_v57 }
 0xe2d   : > { %10254 = vmatmul.bf16.gmra.mxu2 %v10038_v4  ;;  %v9983_v54 = vadd.f32 1.0, %v12703_v46 }
 0xe2e   : > { %v10240_v7 = vpop.f32.mrf.mxu2  ;;  %v9827_v39 = vmul.f32 %v9795_v16, %v9680_v57  ;;  %v10191_v17 = vpop.f32.mrf.mxu1  ;;  %v9924_v61 = vmul.f32 0.7978846, %v9892_v1 }
 0xe2f   : > { %v10192_v34 = vadd.f32 %v18845_v53, %v10191_v17  ;;  %v10015_v2 = vmul.f32 %v9983_v54, %v9759_v11  ;;  %v12705_v58 = vpop.eup %12704 }
 0xe30   : > { %12706 = vtanh.f32 %v9924_v61  ;;  %v9859_v20 = vmul.f32 %v9827_v39, %v9680_v57  ;;  %v9986_v22 = vadd.f32 1.0, %v12705_v58 }
 0xe31   : > { %v10241_v26 = vadd.f32 %v10240_v7, %v10192_v34  ;;  %v10037_v29 = vpack.c.bf16 %v10015_v2, %v10013_v52  ;;  %12708 = vtanh.f32 %v9921_v3  ;;  %v9761_v7 = vmul.f32 0.5, %v18870_v35 }
 0xe32   : > { %v9891_v27 = vadd.f32 %v9859_v20, %v9680_v57 }
 0xe33   : > { %v18883_v56 = vadd.f32 %v10241_v26, %v18372_v33  ;;  %v9731_v38 = vpop.f32.mrf.mxu0  ;;  %10205 = vmatmul.bf16.gmra.mxu1 %v10037_v29  ;;  %v9762_v33 = vmul.f32 0.5, %v18865_v41 }
 0xe34   : > { %v18886_v59 = vadd.f32 %v9731_v38, %v18636_v45  ;;  %v9923_v15 = vmul.f32 0.7978846, %v9891_v27 }
 0xe35   : > { %10293 = vst [vmem:[#allocation2 + $0x58] sm:$0xff] %v18883_v56  ;;  %v10018_v13 = vmul.f32 %v9986_v22, %v9762_v33 }
 0xe36   : > { %v10242_v40 = vpop.f32.mrf.mxu2  ;;  %v12707_v23 = vpop.eup %12706  ;;  %v9798_v47 = vmul.f32 0.044715, %v18886_v59  ;;  %12710 = vtanh.f32 %v9923_v15 }
 0xe37   : > { %v10193_v6 = vpop.f32.mrf.mxu1  ;;  %v9988_v50 = vadd.f32 1.0, %v12707_v23  ;;  %v12709_v9 = vpop.eup %12708 }
 0xe38   : > { %v10194_v28 = vadd.f32 %v18845_v53, %v10193_v6  ;;  %v9830_v44 = vmul.f32 %v9798_v47, %v18886_v59  ;;  %v9985_v46 = vadd.f32 1.0, %v12709_v9 }
 0xe39   : > { %v9682_v42 = vpop.f32.mrf.mxu3  ;;  %v10020_v51 = vmul.f32 %v9988_v50, %v9764_v49 }
 0xe3a   : > { %v10243_v62 = vadd.f32 %v10242_v40, %v10194_v28  ;;  %v18894_v43 = vadd.f32 %v9682_v42, %v18649_v60  ;;  %v9862_v21 = vmul.f32 %v9830_v44, %v18886_v59  ;;  %v10017_v3 = vmul.f32 %v9985_v46, %v9761_v7 }
 0xe3b   : > { %v9733_v4 = vpop.f32.mrf.mxu0  ;;  %v10040_v37 = vpack.c.bf16 %v10020_v51, %v10018_v13  ;;  %v9766_v51 = vmul.f32 0.5, %v18886_v59 }
 0xe3c   : > { %v10278_v25 = vadd.f32 %v10243_v62, %v18366_v48  ;;  %v12711_v41 = vpop.eup %12710  ;;  %v9797_v10 = vmul.f32 0.044715, %v18894_v43  ;;  %v9734_v16 = vadd.f32 %v9733_v4, %v18636_v45  ;;  %v9894_v1 = vadd.f32 %v9862_v21, %v18886_v59 }
 0xe3d   : > { %10259 = vmatmul.bf16.gmra.mxu2 %v10040_v37  ;;  %v9987_v11 = vadd.f32 1.0, %v12711_v41  ;;  %v9765_v7 = vmul.f32 0.5, %v18894_v43 }
 0xe3e   : > { %10294 = vst [vmem:[#allocation2 + $0x18] sm:$0xff] %v10278_v25  ;;  %v9829_v54 = vmul.f32 %v9797_v10, %v18894_v43  ;;  %v9800_v39 = vmul.f32 0.044715, %v9734_v16  ;;  %v10245_v17 = vpop.f32.mrf.mxu2  ;;  %v9926_v2 = vmul.f32 0.7978846, %v9894_v1  ;;  %v9768_v21 = vmul.f32 0.5, %v9734_v16 }
 0xe3f   : > { %v10196_v48 = vpop.f32.mrf.mxu1  ;;  %v10019_v34 = vmul.f32 %v9987_v11, %v9763_v18 }
 0xe40   : > { %v10197_v61 = vadd.f32 %v18845_v53, %v10196_v48  ;;  %v9832_v52 = vmul.f32 %v9800_v39, %v9734_v16  ;;  %v9861_v20 = vmul.f32 %v9829_v54, %v18894_v43  ;;  %12712 = vtanh.f32 %v9926_v2 }
 0xe41   : > { %v9684_v29 = vpop.f32.mrf.mxu3  ;;  %v10039_v58 = vpack.c.bf16 %v10019_v34, %v10017_v3 }
 0xe42   : > { %v10246_v26 = vadd.f32 %v10245_v17, %v10197_v61  ;;  %v9685_v35 = vadd.f32 %v9684_v29, %v18649_v60  ;;  %v9864_v57 = vmul.f32 %v9832_v52, %v9734_v16  ;;  %v9893_v27 = vadd.f32 %v9861_v20, %v18894_v43 }
 0xe43   : > { %10210 = vmatmul.bf16.gmra.mxu1 %v10039_v58 }
 0xe44   : > { %v18908_v38 = vadd.f32 %v10246_v26, %v18382_v55  ;;  %v9799_v15 = vmul.f32 0.044715, %v9685_v35  ;;  %v9896_v40 = vadd.f32 %v9864_v57, %v9734_v16  ;;  %v9925_v6 = vmul.f32 0.7978846, %v9893_v27 }
 0xe45   : > { %v9767_v18 = vmul.f32 0.5, %v9685_v35 }
 0xe46   : > { %10295 = vst [vmem:[#allocation2 + $0x50] sm:$0xff] %v18908_v38  ;;  %v9831_v22 = vmul.f32 %v9799_v15, %v9685_v35  ;;  %v9928_v47 = vmul.f32 0.7978846, %v9896_v40  ;;  %v10247_v33 = vpop.f32.mrf.mxu2  ;;  %v12713_v9 = vpop.eup %12712 }
 0xe47   : > { %v10198_v23 = vpop.f32.mrf.mxu1  ;;  %v9990_v42 = vadd.f32 1.0, %v12713_v9 }
 0xe48   : > { %v10199_v28 = vadd.f32 %v18845_v53, %v10198_v23  ;;  %12714 = vtanh.f32 %v9928_v47  ;;  %v9863_v49 = vmul.f32 %v9831_v22, %v9685_v35 }
 0xe49   : > { %12716 = vtanh.f32 %v9925_v6  ;;  %v10022_v37 = vmul.f32 %v9990_v42, %v9766_v51 }
 0xe4a   : > { %v10248_v50 = vadd.f32 %v10247_v33, %v10199_v28  ;;  %v9895_v44 = vadd.f32 %v9863_v49, %v9685_v35 }
 0xe4c   : > { %v10280_v55 = vadd.f32 %v10248_v50, %v18392_v19  ;;  %v9927_v62 = vmul.f32 0.7978846, %v9895_v44 }
 0xe4e   : > { %10296 = vst [vmem:[#allocation2 + $0x68] sm:$0xff] %v10280_v55  ;;  %v12715_v13 = vpop.eup %12714  ;;  %12718 = vtanh.f32 %v9927_v62 }
 0xe4f   : > { %v9992_v25 = vadd.f32 1.0, %v12715_v13  ;;  %v12717_v4 = vpop.eup %12716 }
 0xe50   : > { %v9989_v10 = vadd.f32 1.0, %v12717_v4 }
 0xe51   : > { %v10024_v46 = vmul.f32 %v9992_v25, %v9768_v21 }
 0xe52   : > { %v10021_v11 = vmul.f32 %v9989_v10, %v9765_v7 }
 0xe53   : > { %v10042_v41 = vpack.c.bf16 %v10024_v46, %v10022_v37 }
 0xe54   : > { %v12719_v1 = vpop.eup %12718 }
 0xe55   : > { %10264 = vmatmul.bf16.gmra.mxu2 %v10042_v41  ;;  %v9991_v19 = vadd.f32 1.0, %v12719_v1 }
 0xe57   : > { %v10023_v54 = vmul.f32 %v9991_v19, %v9767_v18 }
 0xe59   : > { %v10041_v39 = vpack.c.bf16 %v10023_v54, %v10021_v11 }
 0xe5b   : > { %10215 = vmatmul.bf16.gmra.mxu1 %v10041_v39 }
 0xe6c   : > { %v9736_v48 = vpop.f32.mrf.mxu0 }
 0xe6d   : > { %v9737_v59 = vadd.f32 %v9736_v48, %v18636_v45 }
 0xe6f   : > { %v9802_v16 = vmul.f32 0.044715, %v9737_v59  ;;  %v9770_v13 = vmul.f32 0.5, %v9737_v59 }
 0xe71   : > { %v9834_v17 = vmul.f32 %v9802_v16, %v9737_v59 }
 0xe72   : > { %v9687_v61 = vpop.f32.mrf.mxu3 }
 0xe73   : > { %v9688_v3 = vadd.f32 %v9687_v61, %v18649_v60  ;;  %v9866_v34 = vmul.f32 %v9834_v17, %v9737_v59 }
 0xe74   : > { %v9738_v52 = vpop.f32.mrf.mxu0 }
 0xe75   : > { %v9801_v2 = vmul.f32 0.044715, %v9688_v3  ;;  %v9739_v20 = vadd.f32 %v9738_v52, %v18636_v45  ;;  %v9898_v43 = vadd.f32 %v9866_v34, %v9737_v59  ;;  %v9769_v18 = vmul.f32 0.5, %v9688_v3 }
 0xe77   : > { %v9833_v26 = vmul.f32 %v9801_v2, %v9688_v3  ;;  %v9804_v29 = vmul.f32 0.044715, %v9739_v20  ;;  %v9930_v35 = vmul.f32 0.7978846, %v9898_v43  ;;  %v9772_v51 = vmul.f32 0.5, %v9739_v20 }
 0xe79   : > { %v9836_v58 = vmul.f32 %v9804_v29, %v9739_v20  ;;  %v9865_v57 = vmul.f32 %v9833_v26, %v9688_v3  ;;  %12720 = vtanh.f32 %v9930_v35 }
 0xe7a   : > { %v9689_v27 = vpop.f32.mrf.mxu3 }
 0xe7b   : > { %v9690_v15 = vadd.f32 %v9689_v27, %v18649_v60  ;;  %v9868_v40 = vmul.f32 %v9836_v58, %v9739_v20  ;;  %v9897_v22 = vadd.f32 %v9865_v57, %v9688_v3 }
 0xe7d   : > { %v9803_v23 = vmul.f32 0.044715, %v9690_v15  ;;  %v9900_v47 = vadd.f32 %v9868_v40, %v9739_v20  ;;  %v9929_v33 = vmul.f32 0.7978846, %v9897_v22  ;;  %v9771_v19 = vmul.f32 0.5, %v9690_v15 }
 0xe7f   : > { %v9835_v6 = vmul.f32 %v9803_v23, %v9690_v15  ;;  %v9932_v28 = vmul.f32 0.7978846, %v9900_v47  ;;  %v12721_v45 = vpop.eup %12720 }
 0xe80   : > { %v9994_v44 = vadd.f32 1.0, %v12721_v45 }
 0xe81   : > { %12722 = vtanh.f32 %v9932_v28  ;;  %v9867_v49 = vmul.f32 %v9835_v6, %v9690_v15 }
 0xe82   : > { %12724 = vtanh.f32 %v9929_v33  ;;  %v10026_v37 = vmul.f32 %v9994_v44, %v9770_v13 }
 0xe83   : > { %v9899_v50 = vadd.f32 %v9867_v49, %v9690_v15 }
 0xe85   : > { %v9931_v9 = vmul.f32 0.7978846, %v9899_v50 }
 0xe87   : > { %v12723_v55 = vpop.eup %12722  ;;  %v10201_v62 = vpop.f32.mrf.mxu1  ;;  %12726 = vtanh.f32 %v9931_v9 }
 0xe88   : > { %v10250_v42 = vpop.f32.mrf.mxu2  ;;  %v10202_v60 = vadd.f32 %v18845_v53, %v10201_v62  ;;  %v9996_v21 = vadd.f32 1.0, %v12723_v55  ;;  %v12725_v25 = vpop.eup %12724 }
 0xe89   : > { %v9993_v1 = vadd.f32 1.0, %v12725_v25 }
 0xe8a   : > { %v10251_v4 = vadd.f32 %v10250_v42, %v10202_v60  ;;  %v10028_v46 = vmul.f32 %v9996_v21, %v9772_v51 }
 0xe8b   : > { %v10025_v48 = vmul.f32 %v9993_v1, %v9769_v18 }
 0xe8c   : > { %v18921_v41 = vadd.f32 %v10251_v4, %v18398_v8  ;;  %v10044_v10 = vpack.c.bf16 %v10028_v46, %v10026_v37 }
 0xe8d   : > { %v12727_v7 = vpop.eup %12726 }
 0xe8e   : > { %10297 = vst [vmem:[#allocation2 + $0x8] sm:$0xff] %v18921_v41  ;;  %10269 = vmatmul.bf16.gmra.mxu2 %v10044_v10  ;;  %v9995_v11 = vadd.f32 1.0, %v12727_v7 }
 0xe8f   : > { %v10203_v54 = vpop.f32.mrf.mxu1 }
 0xe90   : > { %v10204_v39 = vadd.f32 %v18845_v53, %v10203_v54  ;;  %v10027_v59 = vmul.f32 %v9995_v11, %v9771_v19  ;;  %v10252_v16 = vpop.f32.mrf.mxu2 }
 0xe92   : > { %v10253_v17 = vadd.f32 %v10252_v16, %v10204_v39  ;;  %v10043_v61 = vpack.c.bf16 %v10027_v59, %v10025_v48 }
 0xe94   : > { %v10282_v8 = vadd.f32 %v10253_v17, %v18428_v31  ;;  %10220 = vmatmul.bf16.gmra.mxu1 %v10043_v61 }
 0xe96   : > { %10298 = vst [vmem:[#allocation2 + $0x48] sm:$0xff] %v10282_v8 }
 0xeb0   : > { %v10206_v34 = vpop.f32.mrf.mxu1  ;;  %v10255_v52 = vpop.f32.mrf.mxu2 }
 0xeb1   : > { %v10207_v2 = vadd.f32 %v18845_v53, %v10206_v34 }
 0xeb3   : > { %v10256_v20 = vadd.f32 %v10255_v52, %v10207_v2 }
 0xeb5   : > { %v10283_v3 = vadd.f32 %v10256_v20, %v18434_v30 }
 0xeb7   : > { %10299 = vst [vmem:[#allocation2 + $0x40] sm:$0xff] %v10283_v3 }
 0xeb8   : > { %v10208_v43 = vpop.f32.mrf.mxu1  ;;  %v10257_v26 = vpop.f32.mrf.mxu2 }
 0xeb9   : > { %v10209_v29 = vadd.f32 %v18845_v53, %v10208_v43 }
 0xebb   : > { %v10258_v58 = vadd.f32 %v10257_v26, %v10209_v29 }
 0xebd   : > { %v10284_v35 = vadd.f32 %v10258_v58, %v18456_v0 }
 0xebf   : > { %10300 = vst [vmem:[#allocation2 + $0x20] sm:$0xff] %v10284_v35 }
 0xec0   : > { %v10211_v57 = vpop.f32.mrf.mxu1  ;;  %v10260_v31 = vpop.f32.mrf.mxu2 }
 0xec1   : > { %v10212_v27 = vadd.f32 %v18845_v53, %v10211_v57 }
 0xec3   : > { %v10261_v15 = vadd.f32 %v10260_v31, %v10212_v27 }
 0xec5   : > { %v10285_v40 = vadd.f32 %v10261_v15, %v18470_v63 }
 0xec7   : > { %10301 = vst [vmem:[#allocation2 + $0x10] sm:$0xff] %v10285_v40 }
 0xec8   : > { %v10213_v22 = vpop.f32.mrf.mxu1  ;;  %v10262_v23 = vpop.f32.mrf.mxu2 }
 0xec9   : > { %v10214_v30 = vadd.f32 %v18845_v53, %v10213_v22 }
 0xecb   : > { %v10263_v47 = vadd.f32 %v10262_v23, %v10214_v30 }
 0xecd   : > { %v10286_v6 = vadd.f32 %v10263_v47, %v18465_v14 }
 0xecf   : > { %10302 = vst [vmem:[#allocation2 + $0x38] sm:$0xff] %v10286_v6 }
 0xed8   : > { %v10216_v28 = vpop.f32.mrf.mxu1  ;;  %v10265_v33 = vpop.f32.mrf.mxu2 }
 0xed9   : > { %v10217_v0 = vadd.f32 %v18845_v53, %v10216_v28 }
 0xedb   : > { %v10266_v49 = vadd.f32 %v10265_v33, %v10217_v0 }
 0xedd   : > { %v10287_v45 = vadd.f32 %v10266_v49, %v18474_v12 }
 0xedf   : > { %10303 = vst [vmem:[#allocation2 + $0x60] sm:$0xff] %v10287_v45 }
 0xee0   : > { %v10218_v50 = vpop.f32.mrf.mxu1  ;;  %v10267_v9 = vpop.f32.mrf.mxu2 }
 0xee1   : > { %v10219_v63 = vadd.f32 %v18845_v53, %v10218_v50 }
 0xee3   : > { %v10268_v44 = vadd.f32 %v10267_v9, %v10219_v63 }
 0xee5   : > { %v10288_v55 = vadd.f32 %v10268_v44, %v18484_v5 }
 0xee7   : > { %10304 = vst [vmem:[#allocation2 + $0x70] sm:$0xff] %v10288_v55 }
 0xf11   : > { %v10221_v62 = vpop.f32.mrf.mxu1  ;;  %v10270_v42 = vpop.f32.mrf.mxu2 }
 0xf12   : > { %v10222_v14 = vadd.f32 %v18845_v53, %v10221_v62 }
 0xf14   : > { %v10271_v60 = vadd.f32 %v10270_v42, %v10222_v14 }
 0xf16   : > { %v10289_v13 = vadd.f32 %v10271_v60, %v18528_v32 }
 0xf18   : > { %10305 = vst [vmem:[#allocation2 + $0x78] sm:$0xff] %v10289_v13 }
 0xf19   : > { %v10223_v51 = vpop.f32.mrf.mxu1  ;;  %v10272_v21 = vpop.f32.mrf.mxu2 }
 0xf1a   : > { %v10224_v12 = vadd.f32 %v18845_v53, %v10223_v51 }
 0xf1c   : > { %v10273_v25 = vadd.f32 %v10272_v21, %v10224_v12  ;;  %10310 = sbr.rel (%p11441_p13) target bundleno = 4039 (0xfc7), region = 156 }
 0xf1e   : > { %v10290_v4 = vadd.f32 %v10273_v25, %v18548_v24 }
 0xf20   : > { %10306 = vst [vmem:[#allocation2 + $0x28] sm:$0xff] %v10290_v4 }
 0xf21   : > { %v11589_v5 = vld [vmem:[#allocation20 + $0x38] sm:$0xff]  ;;  %v19765_v37 = vlaneseq  ;;  %v11588_v10 = vld [vmem:[#allocation20 + $0x30] sm:$0xff]  ;;  %v11587_v16 = vld [vmem:[#allocation20 + $0x28] sm:$0xff]  ;;  %vm10436_vm3 = vcmask 1041409   ;;  %vm10438_vm6 = vcmask 1042434   ;;  %vm10440_vm4 = vcmask 1043459  }
 0xf22   : > { %10500 = vmatpush.bf16.msra.mxu0 %v11589_v5  ;;  %v11586_v35 = vld [vmem:[#allocation20 + $0x20] sm:$0xff]  ;;  %v11585_v63 = vld [vmem:[#allocation20 + $0x18] sm:$0xff]  ;;  %vm10442_vm5 = vcmask 1044484   ;;  %vm10444_vm7 = vcmask 1045509   ;;  %vm10446_vm8 = vcmask 1046534   ;;  %vm10448_vm9 = vcmask 1047559  }
 0xf23   : > { %v10312_v46 = vshrl.u32 %v19765_v37, 7 }
 0xf25   : > { %vm10314_vm2 = vcmp.eq.s32.totalorder %v10312_v46, 0 }
 0xf26   : > { %v10320_v32 = vsel %vm10314_vm2, %v18850_v36, 0.0  ;;  %v10322_v1 = vsel %vm10314_vm2, %v18883_v56, 0.0  ;;  %v10324_v53 = vsel %vm10314_vm2, %v18908_v38, 0.0  ;;  %v10326_v7 = vsel %vm10314_vm2, %v18921_v41, 0.0  ;;  %10501 = vmatpush.bf16.msra.mxu0 %v11588_v10  ;;  %v11584_v10 = vld [vmem:[#allocation20 + $0x10] sm:$0xff] }
 0xf27   : > { %v10328_v18 = vsel %vm10314_vm2, %v10283_v3, 0.0  ;;  %v10330_v24 = vsel %vm10314_vm2, %v10285_v40, 0.0  ;;  %v10332_v19 = vsel %vm10314_vm2, %v10287_v45, 0.0  ;;  %v10334_v11 = vsel %vm10314_vm2, %v10289_v13, 0.0 }
 0xf28   : > { %v10337_v54 = vrot.slane %v10320_v32, 4  ;;  %v10344_v39 = vrot.slane %v10322_v1, 4  ;;  %v10351_v48 = vrot.slane %v10324_v53, 4  ;;  %v10358_v59 = vrot.slane %v10326_v7, 4 }
 0xf29   : > { %v10365_v17 = vrot.slane %v10328_v18, 4  ;;  %v10372_v61 = vrot.slane %v10330_v24, 4  ;;  %v10379_v8 = vrot.slane %v10332_v19, 4  ;;  %v10386_v36 = vrot.slane %v10334_v11, 4 }
 0xf2a   : > { %v10338_v34 = vadd.f32 %v10337_v54, %v10320_v32  ;;  %v10345_v56 = vadd.f32 %v10344_v39, %v10322_v1  ;;  %v10352_v52 = vadd.f32 %v10351_v48, %v10324_v53  ;;  %v10359_v38 = vadd.f32 %v10358_v59, %v10326_v7  ;;  %10502 = vmatpush.bf16.msra.mxu0 %v11587_v16  ;;  %v11583_v59 = vld [vmem:[#allocation20 + $0x8] sm:$0xff] }
 0xf2b   : > { %v10366_v2 = vadd.f32 %v10365_v17, %v10328_v18  ;;  %v10373_v41 = vadd.f32 %v10372_v61, %v10330_v24  ;;  %v10380_v20 = vadd.f32 %v10379_v8, %v10332_v19  ;;  %v10387_v3 = vadd.f32 %v10386_v36, %v10334_v11 }
 0xf2c   : > { %v10339_v43 = vrot.slane %v10338_v34, 2  ;;  %v10346_v26 = vrot.slane %v10345_v56, 2  ;;  %v10353_v29 = vrot.slane %v10352_v52, 2  ;;  %v10360_v58 = vrot.slane %v10359_v38, 2 }
 0xf2d   : > { %v10367_v57 = vrot.slane %v10366_v2, 2  ;;  %v10374_v31 = vrot.slane %v10373_v41, 2  ;;  %v10381_v27 = vrot.slane %v10380_v20, 2  ;;  %v10388_v15 = vrot.slane %v10387_v3, 2 }
 0xf2e   : > { %v10340_v40 = vadd.f32 %v10339_v43, %v10338_v34  ;;  %v10347_v22 = vadd.f32 %v10346_v26, %v10345_v56  ;;  %v10354_v30 = vadd.f32 %v10353_v29, %v10352_v52  ;;  %v10361_v23 = vadd.f32 %v10360_v58, %v10359_v38  ;;  %10503 = vmatpush.bf16.msra.mxu0 %v11586_v35  ;;  %v11582_v56 = vld [vmem:[#allocation20] sm:$0xff] }
 0xf2f   : > { %v10368_v47 = vadd.f32 %v10367_v57, %v10366_v2  ;;  %v10375_v6 = vadd.f32 %v10374_v31, %v10373_v41  ;;  %v10382_v28 = vadd.f32 %v10381_v27, %v10380_v20  ;;  %v10389_v33 = vadd.f32 %v10388_v15, %v10387_v3  ;;  %v12744_v41 = vld [vmem:[%s19766_s17] ss:$0 sm:$0xff] }
 0xf30   : > { %v10341_v0 = vrot.slane %v10340_v40, 1  ;;  %v10348_v49 = vrot.slane %v10347_v22, 1  ;;  %v10355_v45 = vrot.slane %v10354_v30, 1  ;;  %v10362_v50 = vrot.slane %v10361_v23, 1 }
 0xf31   : > { %v10369_v9 = vrot.slane %v10368_v47, 1  ;;  %v10376_v44 = vrot.slane %v10375_v6, 1  ;;  %v10383_v55 = vrot.slane %v10382_v28, 1  ;;  %v10390_v62 = vrot.slane %v10389_v33, 1 }
 0xf32   : > { %v10342_v42 = vadd.f32 %v10341_v0, %v10340_v40  ;;  %v10349_v14 = vadd.f32 %v10348_v49, %v10347_v22  ;;  %v10356_v60 = vadd.f32 %v10355_v45, %v10354_v30  ;;  %v10363_v13 = vadd.f32 %v10362_v50, %v10361_v23  ;;  %10504 = vmatpush.bf16.msra.mxu0 %v11585_v63 }
 0xf33   : > { %v10370_v51 = vadd.f32 %v10369_v9, %v10368_v47  ;;  %v10377_v12 = vadd.f32 %v10376_v44, %v10375_v6  ;;  %v10384_v21 = vadd.f32 %v10383_v55, %v10382_v28  ;;  %v10391_v25 = vadd.f32 %v10390_v62, %v10389_v33 }
 0xf34   : > { %v10392_v4 = vpack.c.bf16 %v10342_v42, %v10342_v42  ;;  %v10393_v5 = vpack.c.bf16 %v10349_v14, %v10349_v14  ;;  %v10394_v37 = vpack.c.bf16 %v10356_v60, %v10356_v60  ;;  %v10395_v46 = vpack.c.bf16 %v10363_v13, %v10363_v13 }
 0xf35   : > { %v10396_v32 = vpack.c.bf16 %v10370_v51, %v10370_v51  ;;  %v10397_v1 = vpack.c.bf16 %v10377_v12, %v10377_v12  ;;  %v10398_v53 = vpack.c.bf16 %v10384_v21, %v10384_v21  ;;  %v10399_v7 = vpack.c.bf16 %v10391_v25, %v10391_v25 }
 0xf36   : > { %v10428_v18 = vunpack.c.l.b16 %v10392_v4  ;;  %v10429_v24 = vunpack.c.l.b16 %v10393_v5  ;;  %v10430_v19 = vunpack.c.l.b16 %v10394_v37  ;;  %v10431_v11 = vunpack.c.l.b16 %v10395_v46  ;;  %10505 = vmatpush.bf16.msra.mxu0 %v11584_v10 }
 0xf37   : > { %v10432_v54 = vunpack.c.l.b16 %v10396_v32  ;;  %v10433_v39 = vunpack.c.l.b16 %v10397_v1  ;;  %v10434_v16 = vunpack.c.l.b16 %v10398_v53  ;;  %v10435_v61 = vunpack.c.l.b16 %v10399_v7 }
 0xf38   : > { %v10437_v48 = vsel %vm10436_vm3, %v10429_v24, %v10428_v18 }
 0xf39   : > { %v10439_v17 = vsel %vm10438_vm6, %v10430_v19, %v10437_v48 }
 0xf3a   : > { %v10441_v8 = vsel %vm10440_vm4, %v10431_v11, %v10439_v17  ;;  %10506 = vmatpush.bf16.msra.mxu0 %v11583_v59 }
 0xf3b   : > { %v10443_v36 = vsel %vm10442_vm5, %v10432_v54, %v10441_v8 }
 0xf3c   : > { %v10445_v34 = vsel %vm10444_vm7, %v10433_v39, %v10443_v36 }
 0xf3d   : > { %v10447_v52 = vsel %vm10446_vm8, %v10434_v16, %v10445_v34 }
 0xf3e   : > { %v10449_v38 = vsel %vm10448_vm9, %v10435_v61, %v10447_v52  ;;  %10507 = vmatpush.bf16.msra.mxu0 %v11582_v56 }
 0xf3f   : > { %v10450_v2 = vpack.c.b16 %v10449_v38, %v10449_v38 }
 0xf41   : > { %10508 = vmatmul.bf16.vlgmr.msra.gmra.mxu0 %v10450_v2 }
 0xfbe   : > { %v10509_v20 = vpop.f32.mrf.mxu0 }
 0xfbf   : > { %v10510_v3 = vadd.f32 %v12744_v41, %v10509_v20 }
 0xfc1   : > { %10513 = vst [vmem:[%s13834_s10] sm:$0xff] %v10510_v3 }
 0xfc6   : > { %v10511_v43 = vpop.f32.mrf.mxu0 }
 0xfc7 PF: > { %s19767_s12 = sld [smem:[#allocation41_spill]]  ;;  %s10527_s6 = sshll.u32 %s13834_s10, 4  ;;  %s10528_s6 = int_to_ptr.vmem [resolvable:$true] %s10527_s6 }
 0xfc8   : > { %s19769_s18 = sld [smem:[#allocation193_spill]]  ;;  %s10515_s14 = scalar_lea.sflag [#allocation5], %s13705_s28 }
 0xfcd   : > { %s11475_s16 = sshll.u32 %s19767_s12, 3 }
 0xfce   : > { %s10525_s5 = scalar_lea.hbm %s19769_s18, %s11475_s16  ;;  %s13161_s30 = scalar_lea.hbm %s19769_s18, 16 }
 0xfcf   : > { %s10529_s8 = sshll.u32 %s10525_s5, 4  ;;  %s10530_s8 = int_to_ptr.hbm [resolvable:$true] %s10529_s8 }
 0xfd0   : > { %s13155_s27 = sshra.s32 %s10530_s8, 4  ;;  %s13156_s27 = int_to_ptr.hbm [resolvable:$true] %s13155_s27 }
 0xfd1   : > { %s13157_s9 = scalar_lea.hbm %s13156_s27, 8  ;;  %p13162_p2 = scmp.lt.s32.totalorder %s13156_s27, %s19769_s18 }
 0xfd2   : > { %p13158_p0 = scmp.ne.s32.totalorder %s13156_s27, %s13157_s9  ;;  %p13163_p9 = scmp.lt.s32.totalorder %s13161_s30, %s13157_s9 }
 0xfd4   : > { %p13159_p5 = pnand %p13158_p0, %p13552_p8  ;;  %p13164_p7 = por %p13163_p9, %p13162_p2 }
 0xfd6   : > { %p13160_p10 = pneg %p13159_p5 }
 0xfd8   : > { %p13165_p1 = pnand %p13164_p7, %p13160_p10 }
 0xfda   : > { %13168 = shalt.err (!%p13165_p1)
}
 0xfdb   : > { %11642 = dma.vmem_to_hbm [thread:$0]  (%p13552_p8), %s10528_s6, 128, %s10530_s8, %s10515_s14  }
 0xfdc PF: > { %s19770_s10 = sld [smem:[#allocation42_spill]] }
 0xfdd   : > { %s19771_s28 = sld [smem:[#allocation37_spill]] }
 0xfe2   : > { %p11659_p4 = scmp.ge.s32.totalorder %s19770_s10, 2 }
 0xfe3   : > { %s10541_s2 = sand.u32 1, %s19771_s28  }
 0xfe4   : > { %p11652_p11 = pnand %p11659_p4, %p13559_p3  ;;  %s10542_s19 = scalar_lea.sflag [#allocation5], %s10541_s2 }
 0xfe6   : > { %p11653_p12 = pneg %p11652_p11 }
 0xfe8   : > { %13266 = dma.done.wait (%p11653_p12), %s10542_s19, 128  }
 0xfe9   : > { %13268 = vsyncadd (%p11653_p12), %s10542_s19, 4294967168  ;;  %s38_s2 = sadd.s32 1, %s19770_s10   ;;  %s19773_s27 = sld [smem:[#allocation36_spill]] }
 0xfea   : > { %p35_p6 = scmp.ge.s32.totalorder %s38_s2, 6   ;;  %s19774_s4 = sld [smem:[#allocation47_spill]] }
 0xfeb   : > { %s19775_s30 = sld [smem:[#allocation38_spill]]  ;;  %s19780_s28 = smov %s13279_s29 }
 0xfec   : > { %s19776_s0 = sld [smem:[#allocation39_spill]]  ;;  %s19782_s1 = smov %s13303_s21 }
 0xfed   : > { %s19777_s19 = sld [smem:[#allocation48_spill]]  ;;  %s19783_s20 = smov %s13307_s22 }
 0xfee   : > { %s19778_s15 = sld [smem:[#allocation44_spill]] }
 0xfef   : > { %s19779_s26 = sld [smem:[#allocation45_spill]] }
 0xff0   : > { %s19781_s29 = smov %s19774_s4 }
 0xff1   :  { %37 = sbr.rel (!%p35_p6) target bundleno = 31 (0x1f), region = 285 }
 0xff4   : > { %s19784_s21 = smov %s19778_s15 }
 0xff5   : > { %s19785_s22 = smov %s19779_s26 }
 0xff6   :  { %10548 = vsyncpa [#allocation4], 1 }
 0xff7   :  { %10550 = vsyncpa [#allocation4 + $0x1], 1 }
 0xff8   :  { %10551 = vsyncpa [#allocation7], 1 }
 0xff9   :  { %10553 = vsyncpa [#allocation7 + $0x1], 1 }
 0xffa   :  { %10554 = vsyncpa [#allocation10], 1 }
 0xffb   :  { %10555 = vsyncpa [#allocation5], 1 }
 0xffc   :  { %10557 = vsyncpa [#allocation5 + $0x1], 1 }

</bundles_post_ra>
